<compile_context>
chip_gen: v7x
topology: tpu7x:2x2x1
jax: 0.10.0
libtpu: 0.0.40
codegen_flags: <defaults>
</compile_context>

<pallas_src>
import functools

import jax
import jax.numpy as jnp
from jax.experimental import pallas as pl
from jax.experimental.pallas import tpu as pltpu

NEG_SLOPE = 0.2          # GATv2Conv default negative_slope
VMEM_LIMIT = 48 * 1024 * 1024   # fits v7x's 64 MiB physical VMEM with headroom


def _row_tile(n, pref=(512, 256, 128, 64, 32, 16, 8)):
    """Largest nice target-row tile that divides n; fall back to full n."""
    for t in pref:
        if n % t == 0:
            return t
    return n


# ---------------------------------------------------------------------------
# Kernels
# ---------------------------------------------------------------------------
def _proj_kernel(x_ref, w_ref, b_ref, o_ref):
    """Row-tiled fused projection: [Ti, F_in] @ [F_in, 2*H*C] + bias."""
    o_ref[...] = (
        jnp.dot(x_ref[...].astype(jnp.bfloat16),
                w_ref[...].astype(jnp.bfloat16),
                preferred_element_type=jnp.float32)
        + b_ref[...])


def _gatv2_attn_kernel(att_ref, xr_ref, xl_ref, xlt_ref, mask_ref, bias_ref,
                       out_ref, *, heads, ch, epilogue):
    """GATv2 attention for one tile of target nodes, all heads.

    att_ref  : SMEM [H, C]      attention vectors (scalar reads)
    xr_ref   : VMEM [Ti, H*C]   target-side projections (lin_r) for this tile
    xl_ref   : VMEM [N,  H*C]   source-side projections (lin_l), all nodes
    xlt_ref  : VMEM [H*C, N]    xl transposed -> source nodes on the lane axis
    mask_ref : VMEM [Ti, N]     int8 adjacency (1 = edge j->i, incl. self loops)
    bias_ref : VMEM [1, H*C]
    out_ref  : VMEM [Ti, H*C]   lane-dense concatenated-head output
    """
    maskf = mask_ref[...].astype(jnp.float32)          # one i8->f32 cast per tile
    no_edge = maskf == 0.0                             # [Ti, N]
    ti, n_src = maskf.shape

    head_outs = []
    for h in range(heads):                             # static unroll (H small)
        base = h * ch
        xr_h = xr_ref[:, base:base + ch]               # [Ti, C]  (targets i)
        xlt_h = xlt_ref[base:base + ch, :]             # [C, N]   (sources j, lane-dense)

        # e[i, j] = sum_c att[c] * leaky_relu(xr[i, c] + xl[j, c])
        e = jnp.zeros((ti, n_src), jnp.float32)
        for c in range(ch):                            # C is 4..8 -> cheap unroll
            s = xr_h[:, c:c + 1] + xlt_h[c:c + 1, :]   # [Ti, N], N on lanes
            s = jnp.where(s > 0, s, NEG_SLOPE * s)     # leaky_relu
            e = e + att_ref[h, c] * s                  # SMEM scalar * vector

        e = jnp.where(no_edge, -1e30, e)
        m = jnp.max(e, axis=1, keepdims=True)          # softmax over sources j
        p = jnp.exp(e - m)
        p = jnp.where(no_edge, 0.0, p)
        inv = pl.reciprocal(jnp.sum(p, axis=1, keepdims=True), approx=True)
        alpha = p * inv                                # [Ti, N]

        xl_h = xl_ref[:, base:base + ch]               # [N, C]
        head_outs.append(
            jnp.dot(alpha.astype(jnp.bfloat16), xl_h.astype(jnp.bfloat16),
                    preferred_element_type=jnp.float32))   # [Ti, C]

    out = jnp.concatenate(head_outs, axis=1) + bias_ref[...]   # [Ti, H*C]

    if epilogue == "elu":                              # fused F.elu
        out = jnp.where(out > 0, out, jnp.exp(out) - 1.0)
    elif epilogue == "log_softmax":                    # fused F.log_softmax(dim=1)
        mm = jnp.max(out, axis=1, keepdims=True)
        lse = mm + jnp.log(jnp.sum(jnp.exp(out - mm), axis=1, keepdims=True))
        out = out - lse

    out_ref[...] = out


# ---------------------------------------------------------------------------
# Wrappers
# ---------------------------------------------------------------------------
def _project(x, w, b, *, row_tile):
    n, f_in = x.shape
    cols = w.shape[1]
    return pl.pallas_call(
        _proj_kernel,
        out_shape=jax.ShapeDtypeStruct((n, cols), jnp.float32),
        grid=(n // row_tile,),
        in_specs=[pl.BlockSpec((row_tile, f_in), lambda i: (i, 0)),
                  pl.BlockSpec((f_in, cols), lambda i: (0, 0)),
                  pl.BlockSpec((1, cols), lambda i: (0, 0))],
        out_specs=pl.BlockSpec((row_tile, cols), lambda i: (i, 0)),
        compiler_params=pltpu.CompilerParams(
            dimension_semantics=("parallel",),
            vmem_limit_bytes=VMEM_LIMIT),
    )(x, w, b)


def gatv2_layer(x, mask, params, *, epilogue):
    """Dense GATv2Conv layer with concatenated heads, fused epilogue."""
    wl, bl, wr, br, att, bias = params
    n, _ = x.shape
    heads, ch = att.shape
    hc = heads * ch
    ti = _row_tile(n)

    # Fused-head projections: one lane-dense matmul per layer (lin_l | lin_r).
    w_cat = jnp.concatenate([wl, wr], axis=1)       # [F_in, 2*H*C]
    b_cat = jnp.concatenate([bl, br], axis=1)       # [1, 2*H*C]
    proj = _project(x, w_cat, b_cat, row_tile=ti)   # [N, 2*H*C]
    xl = proj[:, :hc]                               # source-side (lin_l)
    xr = proj[:, hc:]                               # target-side (lin_r)
    xlt = jnp.transpose(xl)                         # [H*C, N]: sources on lanes

    kernel = functools.partial(_gatv2_attn_kernel, heads=heads, ch=ch,
                               epilogue=epilogue)
    return pl.pallas_call(
        kernel,
        out_shape=jax.ShapeDtypeStruct((n, hc), jnp.float32),
        grid=(n // ti,),
        in_specs=[
            pl.BlockSpec(memory_space=pltpu.MemorySpace.SMEM),   # att [H, C]
            pl.BlockSpec((ti, hc), lambda i: (i, 0)),            # xr (row tile)
            pl.BlockSpec((n, hc), lambda i: (0, 0)),             # xl (all sources)
            pl.BlockSpec((hc, n), lambda i: (0, 0)),             # xl^T
            pl.BlockSpec((ti, n), lambda i: (i, 0)),             # int8 mask tile
            pl.BlockSpec((1, hc), lambda i: (0, 0)),             # bias
        ],
        out_specs=pl.BlockSpec((ti, hc), lambda i: (i, 0)),
        compiler_params=pltpu.CompilerParams(
            dimension_semantics=("parallel",),
            vmem_limit_bytes=VMEM_LIMIT),
    )(att, xr, xl, xlt, mask, bias)


def gatv2_forward(x, edge_index, params1, params2):
    n = x.shape[0]
    src, dst = edge_index[0], edge_index[1]
    # int8 dense mask: mask[target, source] = 1, plus self loops.
    mask = jnp.zeros((n, n), jnp.int8).at[dst, src].set(1)
    mask = mask.at[jnp.arange(n), jnp.arange(n)].set(1)

    # F.dropout(..., training=False) is the identity in eval mode.
    h = gatv2_layer(x, mask, params1, epilogue="elu")            # gat1 + elu
    return gatv2_layer(h, mask, params2, epilogue="log_softmax")  # gat2 + log_softmax


# ---------------------------------------------------------------------------
# Deterministic parameter init (synthetic glorot; shapes follow GATv2Conv)
# ---------------------------------------------------------------------------
def _glorot(key, shape):
    fan_in, fan_out = shape[-2], shape[-1]
    limit = (6.0 / (fan_in + fan_out)) ** 0.5
    return jax.random.uniform(key, shape, jnp.float32, -limit, limit)


def init_gatv2_params(key, f_in, c, heads):
    k0, k1, k2 = jax.random.split(key, 3)
    hc = heads * c
    wl = _glorot(k0, (f_in, hc))                  # lin_l weight, heads concat on cols
    wr = _glorot(k1, (f_in, hc))                  # lin_r weight
    bl = jnp.zeros((1, hc), jnp.float32)
    br = jnp.zeros((1, hc), jnp.float32)
    att = _glorot(k2, (heads, c))                 # attention vector a, per head
    bias = jnp.zeros((1, hc), jnp.float32)
    return wl, bl, wr, br, att, bias


# ---------------------------------------------------------------------------
if __name__ == "__main__":
    key = jax.random.PRNGKey(0)
    n_nodes, dim_in, dim_h, dim_out, heads = 12, 16, 8, 4, 8

    kx, k1, k2 = jax.random.split(key, 3)
    x = jax.random.normal(kx, (n_nodes, dim_in), jnp.float32)

    # Simple ring graph in both directions: [2, E] edge list.
    idx = jnp.arange(n_nodes)
    src = jnp.concatenate([idx, (idx + 1) % n_nodes])
    dst = jnp.concatenate([(idx + 1) % n_nodes, idx])
    edge_index = jnp.stack([src, dst]).astype(jnp.int32)

    params1 = init_gatv2_params(k1, dim_in, dim_h, heads)            # gat1
    params2 = init_gatv2_params(k2, dim_h * heads, dim_out, heads)   # gat2

    out = jax.jit(gatv2_forward)(x, edge_index, params1, params2)
    out = jax.block_until_ready(out)

    assert out.shape == (n_nodes, dim_out * heads)
    assert bool(jnp.all(jnp.isfinite(out)))
    # log_softmax rows should sum to ~1 after exp.
    assert bool(jnp.allclose(jnp.sum(jnp.exp(out), axis=1), 1.0, atol=1e-4))
    print("KERNEL_OK")
</pallas_src>

<mosaic_0001>
module attributes {stable_mosaic.version = 11 : i64} {
  func.func @_proj_kernel(%arg0: i32, %arg1: memref<12x16xf32, #tpu.memory_space<vmem>>, %arg2: memref<16x128xf32, #tpu.memory_space<vmem>>, %arg3: memref<1x128xf32, #tpu.memory_space<vmem>>, %arg4: memref<12x128xf32, #tpu.memory_space<vmem>>) attributes {dimension_semantics = [#tpu.dimension_semantics<parallel>], iteration_bounds = array<i64: 1>, scalar_prefetch = 0 : i64, scratch_operands = 0 : i64, tpu.core_type = #tpu.core_type<tc>, window_params = [{transform_indices = @transform_0, window_bounds = array<i64: 12, 16>}, {pipeline_mode = #tpu.pipeline_mode<synchronous>, transform_indices = @transform_1, window_bounds = array<i64: 16, 128>}, {pipeline_mode = #tpu.pipeline_mode<synchronous>, transform_indices = @transform_2, window_bounds = array<i64: 1, 128>}, {transform_indices = @transform_3, window_bounds = array<i64: 12, 128>}]} {
    %c0 = arith.constant 0 : index
    %c0_0 = arith.constant 0 : index
    %0 = vector.load %arg1[%c0, %c0_0] : memref<12x16xf32, #tpu.memory_space<vmem>>, vector<12x16xf32>
    %1 = arith.truncf %0 : vector<12x16xf32> to vector<12x16xbf16>
    %c0_1 = arith.constant 0 : index
    %c0_2 = arith.constant 0 : index
    %2 = vector.load %arg2[%c0_1, %c0_2] : memref<16x128xf32, #tpu.memory_space<vmem>>, vector<16x128xf32>
    %3 = arith.truncf %2 : vector<16x128xf32> to vector<16x128xbf16>
    %cst = arith.constant dense<0.000000e+00> : vector<12x128xf32>
    %4 = tpu.matmul %1, %3, %cst {dimension_numbers = #tpu.dot_dimension_numbers<[1], [0], [0], [1], [0, 0, 1, 1], [], []>} : vector<12x16xbf16>, vector<16x128xbf16>, vector<12x128xf32> -> vector<12x128xf32>
    %c0_3 = arith.constant 0 : index
    %c0_4 = arith.constant 0 : index
    %5 = vector.load %arg3[%c0_3, %c0_4] : memref<1x128xf32, #tpu.memory_space<vmem>>, vector<1x128xf32>
    %6 = vector.broadcast %5 : vector<1x128xf32> to vector<12x128xf32>
    %7 = arith.addf %4, %6 : vector<12x128xf32>
    %c0_5 = arith.constant 0 : index
    %c0_6 = arith.constant 0 : index
    %8 = vector.load %arg4[%c0_5, %c0_6] : memref<12x128xf32, #tpu.memory_space<vmem>>, vector<12x128xf32>
    tpu.vector_store %arg4[%c0_5, %c0_6], %7 {strides = array<i32>} : memref<12x128xf32, #tpu.memory_space<vmem>>, vector<12x128xf32>,
    return
  }
  func.func @transform_0(%arg0: i32) -> (i32, i32) {
    %c0_i32 = arith.constant 0 : i32
    %c0_i32_0 = arith.constant 0 : i32
    return %arg0, %c0_i32 : i32, i32
  }
  func.func @transform_1(%arg0: i32) -> (i32, i32) {
    %c0_i32 = arith.constant 0 : i32
    %c0_i32_0 = arith.constant 0 : i32
    %c0_i32_1 = arith.constant 0 : i32
    return %c0_i32, %c0_i32_0 : i32, i32
  }
  func.func @transform_2(%arg0: i32) -> (i32, i32) {
    %c0_i32 = arith.constant 0 : i32
    %c0_i32_0 = arith.constant 0 : i32
    %c0_i32_1 = arith.constant 0 : i32
    return %c0_i32, %c0_i32_0 : i32, i32
  }
  func.func @transform_3(%arg0: i32) -> (i32, i32) {
    %c0_i32 = arith.constant 0 : i32
    %c0_i32_0 = arith.constant 0 : i32
    return %arg0, %c0_i32 : i32, i32
  }
}

module attributes {stable_mosaic.version = 11 : i64} {
  func.func @_gatv2_attn_kernel(%arg0: i32, %arg1: memref<8x8xf32, #tpu.memory_space<smem>>, %arg2: memref<12x64xf32, #tpu.memory_space<vmem>>, %arg3: memref<12x64xf32, #tpu.memory_space<vmem>>, %arg4: memref<64x12xf32, #tpu.memory_space<vmem>>, %arg5: memref<12x12xi8, #tpu.memory_space<vmem>>, %arg6: memref<1x64xf32, #tpu.memory_space<vmem>>, %arg7: memref<12x64xf32, #tpu.memory_space<vmem>>) attributes {dimension_semantics = [#tpu.dimension_semantics<parallel>], iteration_bounds = array<i64: 1>, scalar_prefetch = 0 : i64, scratch_operands = 0 : i64, tpu.core_type = #tpu.core_type<tc>, window_params = [{transform_indices = @transform_0, window_bounds = array<i64: 8, 8>}, {transform_indices = @transform_1, window_bounds = array<i64: 12, 64>}, {pipeline_mode = #tpu.pipeline_mode<synchronous>, transform_indices = @transform_2, window_bounds = array<i64: 12, 64>}, {pipeline_mode = #tpu.pipeline_mode<synchronous>, transform_indices = @transform_3, window_bounds = array<i64: 64, 12>}, {transform_indices = @transform_4, window_bounds = array<i64: 12, 12>}, {pipeline_mode = #tpu.pipeline_mode<synchronous>, transform_indices = @transform_5, window_bounds = array<i64: 1, 64>}, {transform_indices = @transform_6, window_bounds = array<i64: 12, 64>}]} {
    %c0 = arith.constant 0 : index
    %c0_0 = arith.constant 0 : index
    %0 = vector.load %arg5[%c0, %c0_0] : memref<12x12xi8, #tpu.memory_space<vmem>>, vector<12x12xi8>
    %1 = arith.sitofp %0 : vector<12x12xi8> to vector<12x12xf32>
    %cst = arith.constant 0.000000e+00 : f32
    %2 = vector.broadcast %cst : f32 to vector<12x12xf32>
    %3 = arith.cmpf oeq, %1, %2 : vector<12x12xf32>
    %c0_1 = arith.constant 0 : index
    %c0_2 = arith.constant 0 : index
    %4 = vector.load %arg2[%c0_1, %c0_2] : memref<12x64xf32, #tpu.memory_space<vmem>>, vector<12x8xf32>
    %c0_3 = arith.constant 0 : index
    %c0_4 = arith.constant 0 : index
    %5 = vector.load %arg4[%c0_3, %c0_4] : memref<64x12xf32, #tpu.memory_space<vmem>>, vector<8x12xf32>
    %cst_5 = arith.constant 0.000000e+00 : f32
    %6 = vector.broadcast %cst_5 : f32 to vector<12x12xf32>
    %7 = vector.extract_strided_slice %4 {offsets = [0, 0], sizes = [12, 1], strides = [1, 1]} : vector<12x8xf32> to vector<12x1xf32>
    %8 = vector.extract_strided_slice %5 {offsets = [0, 0], sizes = [1, 12], strides = [1, 1]} : vector<8x12xf32> to vector<1x12xf32>
    %9 = vector.broadcast %7 : vector<12x1xf32> to vector<12x12xf32>
    %10 = vector.broadcast %8 : vector<1x12xf32> to vector<12x12xf32>
    %11 = arith.addf %9, %10 : vector<12x12xf32>
    %cst_6 = arith.constant 0.000000e+00 : f32
    %12 = vector.broadcast %cst_6 : f32 to vector<12x12xf32>
    %13 = arith.cmpf ogt, %11, %12 : vector<12x12xf32>
    %cst_7 = arith.constant 2.000000e-01 : f32
    %14 = vector.broadcast %cst_7 : f32 to vector<12x12xf32>
    %15 = arith.mulf %14, %11 : vector<12x12xf32>
    %16 = arith.select %13, %11, %15 : vector<12x12xi1>, vector<12x12xf32>
    %c0_8 = arith.constant 0 : index
    %c0_9 = arith.constant 0 : index
    %17 = memref.load %arg1[%c0_8, %c0_9] : memref<8x8xf32, #tpu.memory_space<smem>>
    %18 = vector.broadcast %17 : f32 to vector<12x12xf32>
    %19 = arith.mulf %18, %16 : vector<12x12xf32>
    %20 = arith.addf %6, %19 : vector<12x12xf32>
    %21 = vector.extract_strided_slice %4 {offsets = [0, 1], sizes = [12, 1], strides = [1, 1]} : vector<12x8xf32> to vector<12x1xf32>
    %22 = vector.extract_strided_slice %5 {offsets = [1, 0], sizes = [1, 12], strides = [1, 1]} : vector<8x12xf32> to vector<1x12xf32>
    %23 = vector.broadcast %21 : vector<12x1xf32> to vector<12x12xf32>
    %24 = vector.broadcast %22 : vector<1x12xf32> to vector<12x12xf32>
    %25 = arith.addf %23, %24 : vector<12x12xf32>
    %cst_10 = arith.constant 0.000000e+00 : f32
    %26 = vector.broadcast %cst_10 : f32 to vector<12x12xf32>
    %27 = arith.cmpf ogt, %25, %26 : vector<12x12xf32>
    %cst_11 = arith.constant 2.000000e-01 : f32
    %28 = vector.broadcast %cst_11 : f32 to vector<12x12xf32>
    %29 = arith.mulf %28, %25 : vector<12x12xf32>
    %30 = arith.select %27, %25, %29 : vector<12x12xi1>, vector<12x12xf32>
    %c0_12 = arith.constant 0 : index
    %c1 = arith.constant 1 : index
    %31 = memref.load %arg1[%c0_12, %c1] : memref<8x8xf32, #tpu.memory_space<smem>>
    %32 = vector.broadcast %31 : f32 to vector<12x12xf32>
    %33 = arith.mulf %32, %30 : vector<12x12xf32>
    %34 = arith.addf %20, %33 : vector<12x12xf32>
    %35 = vector.extract_strided_slice %4 {offsets = [0, 2], sizes = [12, 1], strides = [1, 1]} : vector<12x8xf32> to vector<12x1xf32>
    %36 = vector.extract_strided_slice %5 {offsets = [2, 0], sizes = [1, 12], strides = [1, 1]} : vector<8x12xf32> to vector<1x12xf32>
    %37 = vector.broadcast %35 : vector<12x1xf32> to vector<12x12xf32>
    %38 = vector.broadcast %36 : vector<1x12xf32> to vector<12x12xf32>
    %39 = arith.addf %37, %38 : vector<12x12xf32>
    %cst_13 = arith.constant 0.000000e+00 : f32
    %40 = vector.broadcast %cst_13 : f32 to vector<12x12xf32>
    %41 = arith.cmpf ogt, %39, %40 : vector<12x12xf32>
    %cst_14 = arith.constant 2.000000e-01 : f32
    %42 = vector.broadcast %cst_14 : f32 to vector<12x12xf32>
    %43 = arith.mulf %42, %39 : vector<12x12xf32>
    %44 = arith.select %41, %39, %43 : vector<12x12xi1>, vector<12x12xf32>
    %c0_15 = arith.constant 0 : index
    %c2 = arith.constant 2 : index
    %45 = memref.load %arg1[%c0_15, %c2] : memref<8x8xf32, #tpu.memory_space<smem>>
    %46 = vector.broadcast %45 : f32 to vector<12x12xf32>
    %47 = arith.mulf %46, %44 : vector<12x12xf32>
    %48 = arith.addf %34, %47 : vector<12x12xf32>
    %49 = vector.extract_strided_slice %4 {offsets = [0, 3], sizes = [12, 1], strides = [1, 1]} : vector<12x8xf32> to vector<12x1xf32>
    %50 = vector.extract_strided_slice %5 {offsets = [3, 0], sizes = [1, 12], strides = [1, 1]} : vector<8x12xf32> to vector<1x12xf32>
    %51 = vector.broadcast %49 : vector<12x1xf32> to vector<12x12xf32>
    %52 = vector.broadcast %50 : vector<1x12xf32> to vector<12x12xf32>
    %53 = arith.addf %51, %52 : vector<12x12xf32>
    %cst_16 = arith.constant 0.000000e+00 : f32
    %54 = vector.broadcast %cst_16 : f32 to vector<12x12xf32>
    %55 = arith.cmpf ogt, %53, %54 : vector<12x12xf32>
    %cst_17 = arith.constant 2.000000e-01 : f32
    %56 = vector.broadcast %cst_17 : f32 to vector<12x12xf32>
    %57 = arith.mulf %56, %53 : vector<12x12xf32>
    %58 = arith.select %55, %53, %57 : vector<12x12xi1>, vector<12x12xf32>
    %c0_18 = arith.constant 0 : index
    %c3 = arith.constant 3 : index
    %59 = memref.load %arg1[%c0_18, %c3] : memref<8x8xf32, #tpu.memory_space<smem>>
    %60 = vector.broadcast %59 : f32 to vector<12x12xf32>
    %61 = arith.mulf %60, %58 : vector<12x12xf32>
    %62 = arith.addf %48, %61 : vector<12x12xf32>
    %63 = vector.extract_strided_slice %4 {offsets = [0, 4], sizes = [12, 1], strides = [1, 1]} : vector<12x8xf32> to vector<12x1xf32>
    %64 = vector.extract_strided_slice %5 {offsets = [4, 0], sizes = [1, 12], strides = [1, 1]} : vector<8x12xf32> to vector<1x12xf32>
    %65 = vector.broadcast %63 : vector<12x1xf32> to vector<12x12xf32>
    %66 = vector.broadcast %64 : vector<1x12xf32> to vector<12x12xf32>
    %67 = arith.addf %65, %66 : vector<12x12xf32>
    %cst_19 = arith.constant 0.000000e+00 : f32
    %68 = vector.broadcast %cst_19 : f32 to vector<12x12xf32>
    %69 = arith.cmpf ogt, %67, %68 : vector<12x12xf32>
    %cst_20 = arith.constant 2.000000e-01 : f32
    %70 = vector.broadcast %cst_20 : f32 to vector<12x12xf32>
    %71 = arith.mulf %70, %67 : vector<12x12xf32>
    %72 = arith.select %69, %67, %71 : vector<12x12xi1>, vector<12x12xf32>
    %c0_21 = arith.constant 0 : index
    %c4 = arith.constant 4 : index
    %73 = memref.load %arg1[%c0_21, %c4] : memref<8x8xf32, #tpu.memory_space<smem>>
    %74 = vector.broadcast %73 : f32 to vector<12x12xf32>
    %75 = arith.mulf %74, %72 : vector<12x12xf32>
    %76 = arith.addf %62, %75 : vector<12x12xf32>
    %77 = vector.extract_strided_slice %4 {offsets = [0, 5], sizes = [12, 1], strides = [1, 1]} : vector<12x8xf32> to vector<12x1xf32>
    %78 = vector.extract_strided_slice %5 {offsets = [5, 0], sizes = [1, 12], strides = [1, 1]} : vector<8x12xf32> to vector<1x12xf32>
    %79 = vector.broadcast %77 : vector<12x1xf32> to vector<12x12xf32>
    %80 = vector.broadcast %78 : vector<1x12xf32> to vector<12x12xf32>
    %81 = arith.addf %79, %80 : vector<12x12xf32>
    %cst_22 = arith.constant 0.000000e+00 : f32
    %82 = vector.broadcast %cst_22 : f32 to vector<12x12xf32>
    %83 = arith.cmpf ogt, %81, %82 : vector<12x12xf32>
    %cst_23 = arith.constant 2.000000e-01 : f32
    %84 = vector.broadcast %cst_23 : f32 to vector<12x12xf32>
    %85 = arith.mulf %84, %81 : vector<12x12xf32>
    %86 = arith.select %83, %81, %85 : vector<12x12xi1>, vector<12x12xf32>
    %c0_24 = arith.constant 0 : index
    %c5 = arith.constant 5 : index
    %87 = memref.load %arg1[%c0_24, %c5] : memref<8x8xf32, #tpu.memory_space<smem>>
    %88 = vector.broadcast %87 : f32 to vector<12x12xf32>
    %89 = arith.mulf %88, %86 : vector<12x12xf32>
    %90 = arith.addf %76, %89 : vector<12x12xf32>
    %91 = vector.extract_strided_slice %4 {offsets = [0, 6], sizes = [12, 1], strides = [1, 1]} : vector<12x8xf32> to vector<12x1xf32>
    %92 = vector.extract_strided_slice %5 {offsets = [6, 0], sizes = [1, 12], strides = [1, 1]} : vector<8x12xf32> to vector<1x12xf32>
    %93 = vector.broadcast %91 : vector<12x1xf32> to vector<12x12xf32>
    %94 = vector.broadcast %92 : vector<1x12xf32> to vector<12x12xf32>
    %95 = arith.addf %93, %94 : vector<12x12xf32>
    %cst_25 = arith.constant 0.000000e+00 : f32
    %96 = vector.broadcast %cst_25 : f32 to vector<12x12xf32>
    %97 = arith.cmpf ogt, %95, %96 : vector<12x12xf32>
    %cst_26 = arith.constant 2.000000e-01 : f32
    %98 = vector.broadcast %cst_26 : f32 to vector<12x12xf32>
    %99 = arith.mulf %98, %95 : vector<12x12xf32>
    %100 = arith.select %97, %95, %99 : vector<12x12xi1>, vector<12x12xf32>
    %c0_27 = arith.constant 0 : index
    %c6 = arith.constant 6 : index
    %101 = memref.load %arg1[%c0_27, %c6] : memref<8x8xf32, #tpu.memory_space<smem>>
    %102 = vector.broadcast %101 : f32 to vector<12x12xf32>
    %103 = arith.mulf %102, %100 : vector<12x12xf32>
    %104 = arith.addf %90, %103 : vector<12x12xf32>
    %105 = vector.extract_strided_slice %4 {offsets = [0, 7], sizes = [12, 1], strides = [1, 1]} : vector<12x8xf32> to vector<12x1xf32>
    %106 = vector.extract_strided_slice %5 {offsets = [7, 0], sizes = [1, 12], strides = [1, 1]} : vector<8x12xf32> to vector<1x12xf32>
    %107 = vector.broadcast %105 : vector<12x1xf32> to vector<12x12xf32>
    %108 = vector.broadcast %106 : vector<1x12xf32> to vector<12x12xf32>
    %109 = arith.addf %107, %108 : vector<12x12xf32>
    %cst_28 = arith.constant 0.000000e+00 : f32
    %110 = vector.broadcast %cst_28 : f32 to vector<12x12xf32>
    %111 = arith.cmpf ogt, %109, %110 : vector<12x12xf32>
    %cst_29 = arith.constant 2.000000e-01 : f32
    %112 = vector.broadcast %cst_29 : f32 to vector<12x12xf32>
    %113 = arith.mulf %112, %109 : vector<12x12xf32>
    %114 = arith.select %111, %109, %113 : vector<12x12xi1>, vector<12x12xf32>
    %c0_30 = arith.constant 0 : index
    %c7 = arith.constant 7 : index
    %115 = memref.load %arg1[%c0_30, %c7] : memref<8x8xf32, #tpu.memory_space<smem>>
    %116 = vector.broadcast %115 : f32 to vector<12x12xf32>
    %117 = arith.mulf %116, %114 : vector<12x12xf32>
    %118 = arith.addf %104, %117 : vector<12x12xf32>
    %cst_31 = arith.constant -1.000000e+30 : f32
    %119 = vector.broadcast %cst_31 : f32 to vector<12x12xf32>
    %120 = arith.select %3, %119, %118 : vector<12x12xi1>, vector<12x12xf32>
    %cst_32 = arith.constant dense<0xFF800000> : vector<12xf32>
    %121 = vector.multi_reduction <maximumf>, %120, %cst_32 [1] : vector<12x12xf32> to vector<12xf32>
    %122 = vector.shape_cast %121 : vector<12xf32> to vector<12x1xf32>
    %123 = vector.broadcast %122 : vector<12x1xf32> to vector<12x12xf32>
    %124 = arith.subf %120, %123 : vector<12x12xf32>
    %125 = math.exp %124 : vector<12x12xf32>
    %cst_33 = arith.constant 0.000000e+00 : f32
    %126 = vector.broadcast %cst_33 : f32 to vector<12x12xf32>
    %127 = arith.select %3, %126, %125 : vector<12x12xi1>, vector<12x12xf32>
    %cst_34 = arith.constant dense<0.000000e+00> : vector<12xf32>
    %128 = vector.multi_reduction <add>, %127, %cst_34 [1] : vector<12x12xf32> to vector<12xf32>
    %129 = vector.shape_cast %128 : vector<12xf32> to vector<12x1xf32>
    %130 = tpu.reciprocal %129 {approx = true} : vector<12x1xf32> -> vector<12x1xf32>
    %131 = vector.broadcast %130 : vector<12x1xf32> to vector<12x12xf32>
    %132 = arith.mulf %127, %131 : vector<12x12xf32>
    %c0_35 = arith.constant 0 : index
    %c0_36 = arith.constant 0 : index
    %133 = vector.load %arg3[%c0_35, %c0_36] : memref<12x64xf32, #tpu.memory_space<vmem>>, vector<12x8xf32>
    %134 = arith.truncf %132 : vector<12x12xf32> to vector<12x12xbf16>
    %135 = arith.truncf %133 : vector<12x8xf32> to vector<12x8xbf16>
    %cst_37 = arith.constant dense<0.000000e+00> : vector<12x8xf32>
    %136 = tpu.matmul %134, %135, %cst_37 {dimension_numbers = #tpu.dot_dimension_numbers<[1], [0], [0], [1], [0, 0, 1, 1], [], []>} : vector<12x12xbf16>, vector<12x8xbf16>, vector<12x8xf32> -> vector<12x8xf32>
    %c0_38 = arith.constant 0 : index
    %c8 = arith.constant 8 : index
    %137 = vector.load %arg2[%c0_38, %c8] : memref<12x64xf32, #tpu.memory_space<vmem>>, vector<12x8xf32>
    %c8_39 = arith.constant 8 : index
    %c0_40 = arith.constant 0 : index
    %138 = vector.load %arg4[%c8_39, %c0_40] : memref<64x12xf32, #tpu.memory_space<vmem>>, vector<8x12xf32>
    %cst_41 = arith.constant 0.000000e+00 : f32
    %139 = vector.broadcast %cst_41 : f32 to vector<12x12xf32>
    %140 = vector.extract_strided_slice %137 {offsets = [0, 0], sizes = [12, 1], strides = [1, 1]} : vector<12x8xf32> to vector<12x1xf32>
    %141 = vector.extract_strided_slice %138 {offsets = [0, 0], sizes = [1, 12], strides = [1, 1]} : vector<8x12xf32> to vector<1x12xf32>
    %142 = vector.broadcast %140 : vector<12x1xf32> to vector<12x12xf32>
    %143 = vector.broadcast %141 : vector<1x12xf32> to vector<12x12xf32>
    %144 = arith.addf %142, %143 : vector<12x12xf32>
    %cst_42 = arith.constant 0.000000e+00 : f32
    %145 = vector.broadcast %cst_42 : f32 to vector<12x12xf32>
    %146 = arith.cmpf ogt, %144, %145 : vector<12x12xf32>
    %cst_43 = arith.constant 2.000000e-01 : f32
    %147 = vector.broadcast %cst_43 : f32 to vector<12x12xf32>
    %148 = arith.mulf %147, %144 : vector<12x12xf32>
    %149 = arith.select %146, %144, %148 : vector<12x12xi1>, vector<12x12xf32>
    %c1_44 = arith.constant 1 : index
    %c0_45 = arith.constant 0 : index
    %150 = memref.load %arg1[%c1_44, %c0_45] : memref<8x8xf32, #tpu.memory_space<smem>>
    %151 = vector.broadcast %150 : f32 to vector<12x12xf32>
    %152 = arith.mulf %151, %149 : vector<12x12xf32>
    %153 = arith.addf %139, %152 : vector<12x12xf32>
    %154 = vector.extract_strided_slice %137 {offsets = [0, 1], sizes = [12, 1], strides = [1, 1]} : vector<12x8xf32> to vector<12x1xf32>
    %155 = vector.extract_strided_slice %138 {offsets = [1, 0], sizes = [1, 12], strides = [1, 1]} : vector<8x12xf32> to vector<1x12xf32>
    %156 = vector.broadcast %154 : vector<12x1xf32> to vector<12x12xf32>
    %157 = vector.broadcast %155 : vector<1x12xf32> to vector<12x12xf32>
    %158 = arith.addf %156, %157 : vector<12x12xf32>
    %cst_46 = arith.constant 0.000000e+00 : f32
    %159 = vector.broadcast %cst_46 : f32 to vector<12x12xf32>
    %160 = arith.cmpf ogt, %158, %159 : vector<12x12xf32>
    %cst_47 = arith.constant 2.000000e-01 : f32
    %161 = vector.broadcast %cst_47 : f32 to vector<12x12xf32>
    %162 = arith.mulf %161, %158 : vector<12x12xf32>
    %163 = arith.select %160, %158, %162 : vector<12x12xi1>, vector<12x12xf32>
    %c1_48 = arith.constant 1 : index
    %c1_49 = arith.constant 1 : index
    %164 = memref.load %arg1[%c1_48, %c1_49] : memref<8x8xf32, #tpu.memory_space<smem>>
    %165 = vector.broadcast %164 : f32 to vector<12x12xf32>
    %166 = arith.mulf %165, %163 : vector<12x12xf32>
    %167 = arith.addf %153, %166 : vector<12x12xf32>
    %168 = vector.extract_strided_slice %137 {offsets = [0, 2], sizes = [12, 1], strides = [1, 1]} : vector<12x8xf32> to vector<12x1xf32>
    %169 = vector.extract_strided_slice %138 {offsets = [2, 0], sizes = [1, 12], strides = [1, 1]} : vector<8x12xf32> to vector<1x12xf32>
    %170 = vector.broadcast %168 : vector<12x1xf32> to vector<12x12xf32>
    %171 = vector.broadcast %169 : vector<1x12xf32> to vector<12x12xf32>
    %172 = arith.addf %170, %171 : vector<12x12xf32>
    %cst_50 = arith.constant 0.000000e+00 : f32
    %173 = vector.broadcast %cst_50 : f32 to vector<12x12xf32>
    %174 = arith.cmpf ogt, %172, %173 : vector<12x12xf32>
    %cst_51 = arith.constant 2.000000e-01 : f32
    %175 = vector.broadcast %cst_51 : f32 to vector<12x12xf32>
    %176 = arith.mulf %175, %172 : vector<12x12xf32>
    %177 = arith.select %174, %172, %176 : vector<12x12xi1>, vector<12x12xf32>
    %c1_52 = arith.constant 1 : index
    %c2_53 = arith.constant 2 : index
    %178 = memref.load %arg1[%c1_52, %c2_53] : memref<8x8xf32, #tpu.memory_space<smem>>
    %179 = vector.broadcast %178 : f32 to vector<12x12xf32>
    %180 = arith.mulf %179, %177 : vector<12x12xf32>
    %181 = arith.addf %167, %180 : vector<12x12xf32>
    %182 = vector.extract_strided_slice %137 {offsets = [0, 3], sizes = [12, 1], strides = [1, 1]} : vector<12x8xf32> to vector<12x1xf32>
    %183 = vector.extract_strided_slice %138 {offsets = [3, 0], sizes = [1, 12], strides = [1, 1]} : vector<8x12xf32> to vector<1x12xf32>
    %184 = vector.broadcast %182 : vector<12x1xf32> to vector<12x12xf32>
    %185 = vector.broadcast %183 : vector<1x12xf32> to vector<12x12xf32>
    %186 = arith.addf %184, %185 : vector<12x12xf32>
    %cst_54 = arith.constant 0.000000e+00 : f32
    %187 = vector.broadcast %cst_54 : f32 to vector<12x12xf32>
    %188 = arith.cmpf ogt, %186, %187 : vector<12x12xf32>
    %cst_55 = arith.constant 2.000000e-01 : f32
    %189 = vector.broadcast %cst_55 : f32 to vector<12x12xf32>
    %190 = arith.mulf %189, %186 : vector<12x12xf32>
    %191 = arith.select %188, %186, %190 : vector<12x12xi1>, vector<12x12xf32>
    %c1_56 = arith.constant 1 : index
    %c3_57 = arith.constant 3 : index
    %192 = memref.load %arg1[%c1_56, %c3_57] : memref<8x8xf32, #tpu.memory_space<smem>>
    %193 = vector.broadcast %192 : f32 to vector<12x12xf32>
    %194 = arith.mulf %193, %191 : vector<12x12xf32>
    %195 = arith.addf %181, %194 : vector<12x12xf32>
    %196 = vector.extract_strided_slice %137 {offsets = [0, 4], sizes = [12, 1], strides = [1, 1]} : vector<12x8xf32> to vector<12x1xf32>
    %197 = vector.extract_strided_slice %138 {offsets = [4, 0], sizes = [1, 12], strides = [1, 1]} : vector<8x12xf32> to vector<1x12xf32>
    %198 = vector.broadcast %196 : vector<12x1xf32> to vector<12x12xf32>
    %199 = vector.broadcast %197 : vector<1x12xf32> to vector<12x12xf32>
    %200 = arith.addf %198, %199 : vector<12x12xf32>
    %cst_58 = arith.constant 0.000000e+00 : f32
    %201 = vector.broadcast %cst_58 : f32 to vector<12x12xf32>
    %202 = arith.cmpf ogt, %200, %201 : vector<12x12xf32>
    %cst_59 = arith.constant 2.000000e-01 : f32
    %203 = vector.broadcast %cst_59 : f32 to vector<12x12xf32>
    %204 = arith.mulf %203, %200 : vector<12x12xf32>
    %205 = arith.select %202, %200, %204 : vector<12x12xi1>, vector<12x12xf32>
    %c1_60 = arith.constant 1 : index
    %c4_61 = arith.constant 4 : index
    %206 = memref.load %arg1[%c1_60, %c4_61] : memref<8x8xf32, #tpu.memory_space<smem>>
    %207 = vector.broadcast %206 : f32 to vector<12x12xf32>
    %208 = arith.mulf %207, %205 : vector<12x12xf32>
    %209 = arith.addf %195, %208 : vector<12x12xf32>
    %210 = vector.extract_strided_slice %137 {offsets = [0, 5], sizes = [12, 1], strides = [1, 1]} : vector<12x8xf32> to vector<12x1xf32>
    %211 = vector.extract_strided_slice %138 {offsets = [5, 0], sizes = [1, 12], strides = [1, 1]} : vector<8x12xf32> to vector<1x12xf32>
    %212 = vector.broadcast %210 : vector<12x1xf32> to vector<12x12xf32>
    %213 = vector.broadcast %211 : vector<1x12xf32> to vector<12x12xf32>
    %214 = arith.addf %212, %213 : vector<12x12xf32>
    %cst_62 = arith.constant 0.000000e+00 : f32
    %215 = vector.broadcast %cst_62 : f32 to vector<12x12xf32>
    %216 = arith.cmpf ogt, %214, %215 : vector<12x12xf32>
    %cst_63 = arith.constant 2.000000e-01 : f32
    %217 = vector.broadcast %cst_63 : f32 to vector<12x12xf32>
    %218 = arith.mulf %217, %214 : vector<12x12xf32>
    %219 = arith.select %216, %214, %218 : vector<12x12xi1>, vector<12x12xf32>
    %c1_64 = arith.constant 1 : index
    %c5_65 = arith.constant 5 : index
    %220 = memref.load %arg1[%c1_64, %c5_65] : memref<8x8xf32, #tpu.memory_space<smem>>
    %221 = vector.broadcast %220 : f32 to vector<12x12xf32>
    %222 = arith.mulf %221, %219 : vector<12x12xf32>
    %223 = arith.addf %209, %222 : vector<12x12xf32>
    %224 = vector.extract_strided_slice %137 {offsets = [0, 6], sizes = [12, 1], strides = [1, 1]} : vector<12x8xf32> to vector<12x1xf32>
    %225 = vector.extract_strided_slice %138 {offsets = [6, 0], sizes = [1, 12], strides = [1, 1]} : vector<8x12xf32> to vector<1x12xf32>
    %226 = vector.broadcast %224 : vector<12x1xf32> to vector<12x12xf32>
    %227 = vector.broadcast %225 : vector<1x12xf32> to vector<12x12xf32>
    %228 = arith.addf %226, %227 : vector<12x12xf32>
    %cst_66 = arith.constant 0.000000e+00 : f32
    %229 = vector.broadcast %cst_66 : f32 to vector<12x12xf32>
    %230 = arith.cmpf ogt, %228, %229 : vector<12x12xf32>
    %cst_67 = arith.constant 2.000000e-01 : f32
    %231 = vector.broadcast %cst_67 : f32 to vector<12x12xf32>
    %232 = arith.mulf %231, %228 : vector<12x12xf32>
    %233 = arith.select %230, %228, %232 : vector<12x12xi1>, vector<12x12xf32>
    %c1_68 = arith.constant 1 : index
    %c6_69 = arith.constant 6 : index
    %234 = memref.load %arg1[%c1_68, %c6_69] : memref<8x8xf32, #tpu.memory_space<smem>>
    %235 = vector.broadcast %234 : f32 to vector<12x12xf32>
    %236 = arith.mulf %235, %233 : vector<12x12xf32>
    %237 = arith.addf %223, %236 : vector<12x12xf32>
    %238 = vector.extract_strided_slice %137 {offsets = [0, 7], sizes = [12, 1], strides = [1, 1]} : vector<12x8xf32> to vector<12x1xf32>
    %239 = vector.extract_strided_slice %138 {offsets = [7, 0], sizes = [1, 12], strides = [1, 1]} : vector<8x12xf32> to vector<1x12xf32>
    %240 = vector.broadcast %238 : vector<12x1xf32> to vector<12x12xf32>
    %241 = vector.broadcast %239 : vector<1x12xf32> to vector<12x12xf32>
    %242 = arith.addf %240, %241 : vector<12x12xf32>
    %cst_70 = arith.constant 0.000000e+00 : f32
    %243 = vector.broadcast %cst_70 : f32 to vector<12x12xf32>
    %244 = arith.cmpf ogt, %242, %243 : vector<12x12xf32>
    %cst_71 = arith.constant 2.000000e-01 : f32
    %245 = vector.broadcast %cst_71 : f32 to vector<12x12xf32>
    %246 = arith.mulf %245, %242 : vector<12x12xf32>
    %247 = arith.select %244, %242, %246 : vector<12x12xi1>, vector<12x12xf32>
    %c1_72 = arith.constant 1 : index
    %c7_73 = arith.constant 7 : index
    %248 = memref.load %arg1[%c1_72, %c7_73] : memref<8x8xf32, #tpu.memory_space<smem>>
    %249 = vector.broadcast %248 : f32 to vector<12x12xf32>
    %250 = arith.mulf %249, %247 : vector<12x12xf32>
    %251 = arith.addf %237, %250 : vector<12x12xf32>
    %cst_74 = arith.constant -1.000000e+30 : f32
    %252 = vector.broadcast %cst_74 : f32 to vector<12x12xf32>
    %253 = arith.select %3, %252, %251 : vector<12x12xi1>, vector<12x12xf32>
    %cst_75 = arith.constant dense<0xFF800000> : vector<12xf32>
    %254 = vector.multi_reduction <maximumf>, %253, %cst_75 [1] : vector<12x12xf32> to vector<12xf32>
    %255 = vector.shape_cast %254 : vector<12xf32> to vector<12x1xf32>
    %256 = vector.broadcast %255 : vector<12x1xf32> to vector<12x12xf32>
    %257 = arith.subf %253, %256 : vector<12x12xf32>
    %258 = math.exp %257 : vector<12x12xf32>
    %cst_76 = arith.constant 0.000000e+00 : f32
    %259 = vector.broadcast %cst_76 : f32 to vector<12x12xf32>
    %260 = arith.select %3, %259, %258 : vector<12x12xi1>, vector<12x12xf32>
    %cst_77 = arith.constant dense<0.000000e+00> : vector<12xf32>
    %261 = vector.multi_reduction <add>, %260, %cst_77 [1] : vector<12x12xf32> to vector<12xf32>
    %262 = vector.shape_cast %261 : vector<12xf32> to vector<12x1xf32>
    %263 = tpu.reciprocal %262 {approx = true} : vector<12x1xf32> -> vector<12x1xf32>
    %264 = vector.broadcast %263 : vector<12x1xf32> to vector<12x12xf32>
    %265 = arith.mulf %260, %264 : vector<12x12xf32>
    %c0_78 = arith.constant 0 : index
    %c8_79 = arith.constant 8 : index
    %266 = vector.load %arg3[%c0_78, %c8_79] : memref<12x64xf32, #tpu.memory_space<vmem>>, vector<12x8xf32>
    %267 = arith.truncf %265 : vector<12x12xf32> to vector<12x12xbf16>
    %268 = arith.truncf %266 : vector<12x8xf32> to vector<12x8xbf16>
    %cst_80 = arith.constant dense<0.000000e+00> : vector<12x8xf32>
    %269 = tpu.matmul %267, %268, %cst_80 {dimension_numbers = #tpu.dot_dimension_numbers<[1], [0], [0], [1], [0, 0, 1, 1], [], []>} : vector<12x12xbf16>, vector<12x8xbf16>, vector<12x8xf32> -> vector<12x8xf32>
    %c0_81 = arith.constant 0 : index
    %c16 = arith.constant 16 : index
    %270 = vector.load %arg2[%c0_81, %c16] : memref<12x64xf32, #tpu.memory_space<vmem>>, vector<12x8xf32>
    %c16_82 = arith.constant 16 : index
    %c0_83 = arith.constant 0 : index
    %271 = vector.load %arg4[%c16_82, %c0_83] : memref<64x12xf32, #tpu.memory_space<vmem>>, vector<8x12xf32>
    %cst_84 = arith.constant 0.000000e+00 : f32
    %272 = vector.broadcast %cst_84 : f32 to vector<12x12xf32>
    %273 = vector.extract_strided_slice %270 {offsets = [0, 0], sizes = [12, 1], strides = [1, 1]} : vector<12x8xf32> to vector<12x1xf32>
    %274 = vector.extract_strided_slice %271 {offsets = [0, 0], sizes = [1, 12], strides = [1, 1]} : vector<8x12xf32> to vector<1x12xf32>
    %275 = vector.broadcast %273 : vector<12x1xf32> to vector<12x12xf32>
    %276 = vector.broadcast %274 : vector<1x12xf32> to vector<12x12xf32>
    %277 = arith.addf %275, %276 : vector<12x12xf32>
    %cst_85 = arith.constant 0.000000e+00 : f32
    %278 = vector.broadcast %cst_85 : f32 to vector<12x12xf32>
    %279 = arith.cmpf ogt, %277, %278 : vector<12x12xf32>
    %cst_86 = arith.constant 2.000000e-01 : f32
    %280 = vector.broadcast %cst_86 : f32 to vector<12x12xf32>
    %281 = arith.mulf %280, %277 : vector<12x12xf32>
    %282 = arith.select %279, %277, %281 : vector<12x12xi1>, vector<12x12xf32>
    %c2_87 = arith.constant 2 : index
    %c0_88 = arith.constant 0 : index
    %283 = memref.load %arg1[%c2_87, %c0_88] : memref<8x8xf32, #tpu.memory_space<smem>>
    %284 = vector.broadcast %283 : f32 to vector<12x12xf32>
    %285 = arith.mulf %284, %282 : vector<12x12xf32>
    %286 = arith.addf %272, %285 : vector<12x12xf32>
    %287 = vector.extract_strided_slice %270 {offsets = [0, 1], sizes = [12, 1], strides = [1, 1]} : vector<12x8xf32> to vector<12x1xf32>
    %288 = vector.extract_strided_slice %271 {offsets = [1, 0], sizes = [1, 12], strides = [1, 1]} : vector<8x12xf32> to vector<1x12xf32>
    %289 = vector.broadcast %287 : vector<12x1xf32> to vector<12x12xf32>
    %290 = vector.broadcast %288 : vector<1x12xf32> to vector<12x12xf32>
    %291 = arith.addf %289, %290 : vector<12x12xf32>
    %cst_89 = arith.constant 0.000000e+00 : f32
    %292 = vector.broadcast %cst_89 : f32 to vector<12x12xf32>
    %293 = arith.cmpf ogt, %291, %292 : vector<12x12xf32>
    %cst_90 = arith.constant 2.000000e-01 : f32
    %294 = vector.broadcast %cst_90 : f32 to vector<12x12xf32>
    %295 = arith.mulf %294, %291 : vector<12x12xf32>
    %296 = arith.select %293, %291, %295 : vector<12x12xi1>, vector<12x12xf32>
    %c2_91 = arith.constant 2 : index
    %c1_92 = arith.constant 1 : index
    %297 = memref.load %arg1[%c2_91, %c1_92] : memref<8x8xf32, #tpu.memory_space<smem>>
    %298 = vector.broadcast %297 : f32 to vector<12x12xf32>
    %299 = arith.mulf %298, %296 : vector<12x12xf32>
    %300 = arith.addf %286, %299 : vector<12x12xf32>
    %301 = vector.extract_strided_slice %270 {offsets = [0, 2], sizes = [12, 1], strides = [1, 1]} : vector<12x8xf32> to vector<12x1xf32>
    %302 = vector.extract_strided_slice %271 {offsets = [2, 0], sizes = [1, 12], strides = [1, 1]} : vector<8x12xf32> to vector<1x12xf32>
    %303 = vector.broadcast %301 : vector<12x1xf32> to vector<12x12xf32>
    %304 = vector.broadcast %302 : vector<1x12xf32> to vector<12x12xf32>
    %305 = arith.addf %303, %304 : vector<12x12xf32>
    %cst_93 = arith.constant 0.000000e+00 : f32
    %306 = vector.broadcast %cst_93 : f32 to vector<12x12xf32>
    %307 = arith.cmpf ogt, %305, %306 : vector<12x12xf32>
    %cst_94 = arith.constant 2.000000e-01 : f32
    %308 = vector.broadcast %cst_94 : f32 to vector<12x12xf32>
    %309 = arith.mulf %308, %305 : vector<12x12xf32>
    %310 = arith.select %307, %305, %309 : vector<12x12xi1>, vector<12x12xf32>
    %c2_95 = arith.constant 2 : index
    %c2_96 = arith.constant 2 : index
    %311 = memref.load %arg1[%c2_95, %c2_96] : memref<8x8xf32, #tpu.memory_space<smem>>
    %312 = vector.broadcast %311 : f32 to vector<12x12xf32>
    %313 = arith.mulf %312, %310 : vector<12x12xf32>
    %314 = arith.addf %300, %313 : vector<12x12xf32>
    %315 = vector.extract_strided_slice %270 {offsets = [0, 3], sizes = [12, 1], strides = [1, 1]} : vector<12x8xf32> to vector<12x1xf32>
    %316 = vector.extract_strided_slice %271 {offsets = [3, 0], sizes = [1, 12], strides = [1, 1]} : vector<8x12xf32> to vector<1x12xf32>
    %317 = vector.broadcast %315 : vector<12x1xf32> to vector<12x12xf32>
    %318 = vector.broadcast %316 : vector<1x12xf32> to vector<12x12xf32>
    %319 = arith.addf %317, %318 : vector<12x12xf32>
    %cst_97 = arith.constant 0.000000e+00 : f32
    %320 = vector.broadcast %cst_97 : f32 to vector<12x12xf32>
    %321 = arith.cmpf ogt, %319, %320 : vector<12x12xf32>
    %cst_98 = arith.constant 2.000000e-01 : f32
    %322 = vector.broadcast %cst_98 : f32 to vector<12x12xf32>
    %323 = arith.mulf %322, %319 : vector<12x12xf32>
    %324 = arith.select %321, %319, %323 : vector<12x12xi1>, vector<12x12xf32>
    %c2_99 = arith.constant 2 : index
    %c3_100 = arith.constant 3 : index
    %325 = memref.load %arg1[%c2_99, %c3_100] : memref<8x8xf32, #tpu.memory_space<smem>>
    %326 = vector.broadcast %325 : f32 to vector<12x12xf32>
    %327 = arith.mulf %326, %324 : vector<12x12xf32>
    %328 = arith.addf %314, %327 : vector<12x12xf32>
    %329 = vector.extract_strided_slice %270 {offsets = [0, 4], sizes = [12, 1], strides = [1, 1]} : vector<12x8xf32> to vector<12x1xf32>
    %330 = vector.extract_strided_slice %271 {offsets = [4, 0], sizes = [1, 12], strides = [1, 1]} : vector<8x12xf32> to vector<1x12xf32>
    %331 = vector.broadcast %329 : vector<12x1xf32> to vector<12x12xf32>
    %332 = vector.broadcast %330 : vector<1x12xf32> to vector<12x12xf32>
    %333 = arith.addf %331, %332 : vector<12x12xf32>
    %cst_101 = arith.constant 0.000000e+00 : f32
    %334 = vector.broadcast %cst_101 : f32 to vector<12x12xf32>
    %335 = arith.cmpf ogt, %333, %334 : vector<12x12xf32>
    %cst_102 = arith.constant 2.000000e-01 : f32
    %336 = vector.broadcast %cst_102 : f32 to vector<12x12xf32>
    %337 = arith.mulf %336, %333 : vector<12x12xf32>
    %338 = arith.select %335, %333, %337 : vector<12x12xi1>, vector<12x12xf32>
    %c2_103 = arith.constant 2 : index
    %c4_104 = arith.constant 4 : index
    %339 = memref.load %arg1[%c2_103, %c4_104] : memref<8x8xf32, #tpu.memory_space<smem>>
    %340 = vector.broadcast %339 : f32 to vector<12x12xf32>
    %341 = arith.mulf %340, %338 : vector<12x12xf32>
    %342 = arith.addf %328, %341 : vector<12x12xf32>
    %343 = vector.extract_strided_slice %270 {offsets = [0, 5], sizes = [12, 1], strides = [1, 1]} : vector<12x8xf32> to vector<12x1xf32>
    %344 = vector.extract_strided_slice %271 {offsets = [5, 0], sizes = [1, 12], strides = [1, 1]} : vector<8x12xf32> to vector<1x12xf32>
    %345 = vector.broadcast %343 : vector<12x1xf32> to vector<12x12xf32>
    %346 = vector.broadcast %344 : vector<1x12xf32> to vector<12x12xf32>
    %347 = arith.addf %345, %346 : vector<12x12xf32>
    %cst_105 = arith.constant 0.000000e+00 : f32
    %348 = vector.broadcast %cst_105 : f32 to vector<12x12xf32>
    %349 = arith.cmpf ogt, %347, %348 : vector<12x12xf32>
    %cst_106 = arith.constant 2.000000e-01 : f32
    %350 = vector.broadcast %cst_106 : f32 to vector<12x12xf32>
    %351 = arith.mulf %350, %347 : vector<12x12xf32>
    %352 = arith.select %349, %347, %351 : vector<12x12xi1>, vector<12x12xf32>
    %c2_107 = arith.constant 2 : index
    %c5_108 = arith.constant 5 : index
    %353 = memref.load %arg1[%c2_107, %c5_108] : memref<8x8xf32, #tpu.memory_space<smem>>
    %354 = vector.broadcast %353 : f32 to vector<12x12xf32>
    %355 = arith.mulf %354, %352 : vector<12x12xf32>
    %356 = arith.addf %342, %355 : vector<12x12xf32>
    %357 = vector.extract_strided_slice %270 {offsets = [0, 6], sizes = [12, 1], strides = [1, 1]} : vector<12x8xf32> to vector<12x1xf32>
    %358 = vector.extract_strided_slice %271 {offsets = [6, 0], sizes = [1, 12], strides = [1, 1]} : vector<8x12xf32> to vector<1x12xf32>
    %359 = vector.broadcast %357 : vector<12x1xf32> to vector<12x12xf32>
    %360 = vector.broadcast %358 : vector<1x12xf32> to vector<12x12xf32>
    %361 = arith.addf %359, %360 : vector<12x12xf32>
    %cst_109 = arith.constant 0.000000e+00 : f32
    %362 = vector.broadcast %cst_109 : f32 to vector<12x12xf32>
    %363 = arith.cmpf ogt, %361, %362 : vector<12x12xf32>
    %cst_110 = arith.constant 2.000000e-01 : f32
    %364 = vector.broadcast %cst_110 : f32 to vector<12x12xf32>
    %365 = arith.mulf %364, %361 : vector<12x12xf32>
    %366 = arith.select %363, %361, %365 : vector<12x12xi1>, vector<12x12xf32>
    %c2_111 = arith.constant 2 : index
    %c6_112 = arith.constant 6 : index
    %367 = memref.load %arg1[%c2_111, %c6_112] : memref<8x8xf32, #tpu.memory_space<smem>>
    %368 = vector.broadcast %367 : f32 to vector<12x12xf32>
    %369 = arith.mulf %368, %366 : vector<12x12xf32>
    %370 = arith.addf %356, %369 : vector<12x12xf32>
    %371 = vector.extract_strided_slice %270 {offsets = [0, 7], sizes = [12, 1], strides = [1, 1]} : vector<12x8xf32> to vector<12x1xf32>
    %372 = vector.extract_strided_slice %271 {offsets = [7, 0], sizes = [1, 12], strides = [1, 1]} : vector<8x12xf32> to vector<1x12xf32>
    %373 = vector.broadcast %371 : vector<12x1xf32> to vector<12x12xf32>
    %374 = vector.broadcast %372 : vector<1x12xf32> to vector<12x12xf32>
    %375 = arith.addf %373, %374 : vector<12x12xf32>
    %cst_113 = arith.constant 0.000000e+00 : f32
    %376 = vector.broadcast %cst_113 : f32 to vector<12x12xf32>
    %377 = arith.cmpf ogt, %375, %376 : vector<12x12xf32>
    %cst_114 = arith.constant 2.000000e-01 : f32
    %378 = vector.broadcast %cst_114 : f32 to vector<12x12xf32>
    %379 = arith.mulf %378, %375 : vector<12x12xf32>
    %380 = arith.select %377, %375, %379 : vector<12x12xi1>, vector<12x12xf32>
    %c2_115 = arith.constant 2 : index
    %c7_116 = arith.constant 7 : index
    %381 = memref.load %arg1[%c2_115, %c7_116] : memref<8x8xf32, #tpu.memory_space<smem>>
    %382 = vector.broadcast %381 : f32 to vector<12x12xf32>
    %383 = arith.mulf %382, %380 : vector<12x12xf32>
    %384 = arith.addf %370, %383 : vector<12x12xf32>
    %cst_117 = arith.constant -1.000000e+30 : f32
    %385 = vector.broadcast %cst_117 : f32 to vector<12x12xf32>
    %386 = arith.select %3, %385, %384 : vector<12x12xi1>, vector<12x12xf32>
    %cst_118 = arith.constant dense<0xFF800000> : vector<12xf32>
    %387 = vector.multi_reduction <maximumf>, %386, %cst_118 [1] : vector<12x12xf32> to vector<12xf32>
    %388 = vector.shape_cast %387 : vector<12xf32> to vector<12x1xf32>
    %389 = vector.broadcast %388 : vector<12x1xf32> to vector<12x12xf32>
    %390 = arith.subf %386, %389 : vector<12x12xf32>
    %391 = math.exp %390 : vector<12x12xf32>
    %cst_119 = arith.constant 0.000000e+00 : f32
    %392 = vector.broadcast %cst_119 : f32 to vector<12x12xf32>
    %393 = arith.select %3, %392, %391 : vector<12x12xi1>, vector<12x12xf32>
    %cst_120 = arith.constant dense<0.000000e+00> : vector<12xf32>
    %394 = vector.multi_reduction <add>, %393, %cst_120 [1] : vector<12x12xf32> to vector<12xf32>
    %395 = vector.shape_cast %394 : vector<12xf32> to vector<12x1xf32>
    %396 = tpu.reciprocal %395 {approx = true} : vector<12x1xf32> -> vector<12x1xf32>
    %397 = vector.broadcast %396 : vector<12x1xf32> to vector<12x12xf32>
    %398 = arith.mulf %393, %397 : vector<12x12xf32>
    %c0_121 = arith.constant 0 : index
    %c16_122 = arith.constant 16 : index
    %399 = vector.load %arg3[%c0_121, %c16_122] : memref<12x64xf32, #tpu.memory_space<vmem>>, vector<12x8xf32>
    %400 = arith.truncf %398 : vector<12x12xf32> to vector<12x12xbf16>
    %401 = arith.truncf %399 : vector<12x8xf32> to vector<12x8xbf16>
    %cst_123 = arith.constant dense<0.000000e+00> : vector<12x8xf32>
    %402 = tpu.matmul %400, %401, %cst_123 {dimension_numbers = #tpu.dot_dimension_numbers<[1], [0], [0], [1], [0, 0, 1, 1], [], []>} : vector<12x12xbf16>, vector<12x8xbf16>, vector<12x8xf32> -> vector<12x8xf32>
    %c0_124 = arith.constant 0 : index
    %c24 = arith.constant 24 : index
    %403 = vector.load %arg2[%c0_124, %c24] : memref<12x64xf32, #tpu.memory_space<vmem>>, vector<12x8xf32>
    %c24_125 = arith.constant 24 : index
    %c0_126 = arith.constant 0 : index
    %404 = vector.load %arg4[%c24_125, %c0_126] : memref<64x12xf32, #tpu.memory_space<vmem>>, vector<8x12xf32>
    %cst_127 = arith.constant 0.000000e+00 : f32
    %405 = vector.broadcast %cst_127 : f32 to vector<12x12xf32>
    %406 = vector.extract_strided_slice %403 {offsets = [0, 0], sizes = [12, 1], strides = [1, 1]} : vector<12x8xf32> to vector<12x1xf32>
    %407 = vector.extract_strided_slice %404 {offsets = [0, 0], sizes = [1, 12], strides = [1, 1]} : vector<8x12xf32> to vector<1x12xf32>
    %408 = vector.broadcast %406 : vector<12x1xf32> to vector<12x12xf32>
    %409 = vector.broadcast %407 : vector<1x12xf32> to vector<12x12xf32>
    %410 = arith.addf %408, %409 : vector<12x12xf32>
    %cst_128 = arith.constant 0.000000e+00 : f32
    %411 = vector.broadcast %cst_128 : f32 to vector<12x12xf32>
    %412 = arith.cmpf ogt, %410, %411 : vector<12x12xf32>
    %cst_129 = arith.constant 2.000000e-01 : f32
    %413 = vector.broadcast %cst_129 : f32 to vector<12x12xf32>
    %414 = arith.mulf %413, %410 : vector<12x12xf32>
    %415 = arith.select %412, %410, %414 : vector<12x12xi1>, vector<12x12xf32>
    %c3_130 = arith.constant 3 : index
    %c0_131 = arith.constant 0 : index
    %416 = memref.load %arg1[%c3_130, %c0_131] : memref<8x8xf32, #tpu.memory_space<smem>>
    %417 = vector.broadcast %416 : f32 to vector<12x12xf32>
    %418 = arith.mulf %417, %415 : vector<12x12xf32>
    %419 = arith.addf %405, %418 : vector<12x12xf32>
    %420 = vector.extract_strided_slice %403 {offsets = [0, 1], sizes = [12, 1], strides = [1, 1]} : vector<12x8xf32> to vector<12x1xf32>
    %421 = vector.extract_strided_slice %404 {offsets = [1, 0], sizes = [1, 12], strides = [1, 1]} : vector<8x12xf32> to vector<1x12xf32>
    %422 = vector.broadcast %420 : vector<12x1xf32> to vector<12x12xf32>
    %423 = vector.broadcast %421 : vector<1x12xf32> to vector<12x12xf32>
    %424 = arith.addf %422, %423 : vector<12x12xf32>
    %cst_132 = arith.constant 0.000000e+00 : f32
    %425 = vector.broadcast %cst_132 : f32 to vector<12x12xf32>
    %426 = arith.cmpf ogt, %424, %425 : vector<12x12xf32>
    %cst_133 = arith.constant 2.000000e-01 : f32
    %427 = vector.broadcast %cst_133 : f32 to vector<12x12xf32>
    %428 = arith.mulf %427, %424 : vector<12x12xf32>
    %429 = arith.select %426, %424, %428 : vector<12x12xi1>, vector<12x12xf32>
    %c3_134 = arith.constant 3 : index
    %c1_135 = arith.constant 1 : index
    %430 = memref.load %arg1[%c3_134, %c1_135] : memref<8x8xf32, #tpu.memory_space<smem>>
    %431 = vector.broadcast %430 : f32 to vector<12x12xf32>
    %432 = arith.mulf %431, %429 : vector<12x12xf32>
    %433 = arith.addf %419, %432 : vector<12x12xf32>
    %434 = vector.extract_strided_slice %403 {offsets = [0, 2], sizes = [12, 1], strides = [1, 1]} : vector<12x8xf32> to vector<12x1xf32>
    %435 = vector.extract_strided_slice %404 {offsets = [2, 0], sizes = [1, 12], strides = [1, 1]} : vector<8x12xf32> to vector<1x12xf32>
    %436 = vector.broadcast %434 : vector<12x1xf32> to vector<12x12xf32>
    %437 = vector.broadcast %435 : vector<1x12xf32> to vector<12x12xf32>
    %438 = arith.addf %436, %437 : vector<12x12xf32>
    %cst_136 = arith.constant 0.000000e+00 : f32
    %439 = vector.broadcast %cst_136 : f32 to vector<12x12xf32>
    %440 = arith.cmpf ogt, %438, %439 : vector<12x12xf32>
    %cst_137 = arith.constant 2.000000e-01 : f32
    %441 = vector.broadcast %cst_137 : f32 to vector<12x12xf32>
    %442 = arith.mulf %441, %438 : vector<12x12xf32>
    %443 = arith.select %440, %438, %442 : vector<12x12xi1>, vector<12x12xf32>
    %c3_138 = arith.constant 3 : index
    %c2_139 = arith.constant 2 : index
    %444 = memref.load %arg1[%c3_138, %c2_139] : memref<8x8xf32, #tpu.memory_space<smem>>
    %445 = vector.broadcast %444 : f32 to vector<12x12xf32>
    %446 = arith.mulf %445, %443 : vector<12x12xf32>
    %447 = arith.addf %433, %446 : vector<12x12xf32>
    %448 = vector.extract_strided_slice %403 {offsets = [0, 3], sizes = [12, 1], strides = [1, 1]} : vector<12x8xf32> to vector<12x1xf32>
    %449 = vector.extract_strided_slice %404 {offsets = [3, 0], sizes = [1, 12], strides = [1, 1]} : vector<8x12xf32> to vector<1x12xf32>
    %450 = vector.broadcast %448 : vector<12x1xf32> to vector<12x12xf32>
    %451 = vector.broadcast %449 : vector<1x12xf32> to vector<12x12xf32>
    %452 = arith.addf %450, %451 : vector<12x12xf32>
    %cst_140 = arith.constant 0.000000e+00 : f32
    %453 = vector.broadcast %cst_140 : f32 to vector<12x12xf32>
    %454 = arith.cmpf ogt, %452, %453 : vector<12x12xf32>
    %cst_141 = arith.constant 2.000000e-01 : f32
    %455 = vector.broadcast %cst_141 : f32 to vector<12x12xf32>
    %456 = arith.mulf %455, %452 : vector<12x12xf32>
    %457 = arith.select %454, %452, %456 : vector<12x12xi1>, vector<12x12xf32>
    %c3_142 = arith.constant 3 : index
    %c3_143 = arith.constant 3 : index
    %458 = memref.load %arg1[%c3_142, %c3_143] : memref<8x8xf32, #tpu.memory_space<smem>>
    %459 = vector.broadcast %458 : f32 to vector<12x12xf32>
    %460 = arith.mulf %459, %457 : vector<12x12xf32>
    %461 = arith.addf %447, %460 : vector<12x12xf32>
    %462 = vector.extract_strided_slice %403 {offsets = [0, 4], sizes = [12, 1], strides = [1, 1]} : vector<12x8xf32> to vector<12x1xf32>
    %463 = vector.extract_strided_slice %404 {offsets = [4, 0], sizes = [1, 12], strides = [1, 1]} : vector<8x12xf32> to vector<1x12xf32>
    %464 = vector.broadcast %462 : vector<12x1xf32> to vector<12x12xf32>
    %465 = vector.broadcast %463 : vector<1x12xf32> to vector<12x12xf32>
    %466 = arith.addf %464, %465 : vector<12x12xf32>
    %cst_144 = arith.constant 0.000000e+00 : f32
    %467 = vector.broadcast %cst_144 : f32 to vector<12x12xf32>
    %468 = arith.cmpf ogt, %466, %467 : vector<12x12xf32>
    %cst_145 = arith.constant 2.000000e-01 : f32
    %469 = vector.broadcast %cst_145 : f32 to vector<12x12xf32>
    %470 = arith.mulf %469, %466 : vector<12x12xf32>
    %471 = arith.select %468, %466, %470 : vector<12x12xi1>, vector<12x12xf32>
    %c3_146 = arith.constant 3 : index
    %c4_147 = arith.constant 4 : index
    %472 = memref.load %arg1[%c3_146, %c4_147] : memref<8x8xf32, #tpu.memory_space<smem>>
    %473 = vector.broadcast %472 : f32 to vector<12x12xf32>
    %474 = arith.mulf %473, %471 : vector<12x12xf32>
    %475 = arith.addf %461, %474 : vector<12x12xf32>
    %476 = vector.extract_strided_slice %403 {offsets = [0, 5], sizes = [12, 1], strides = [1, 1]} : vector<12x8xf32> to vector<12x1xf32>
    %477 = vector.extract_strided_slice %404 {offsets = [5, 0], sizes = [1, 12], strides = [1, 1]} : vector<8x12xf32> to vector<1x12xf32>
    %478 = vector.broadcast %476 : vector<12x1xf32> to vector<12x12xf32>
    %479 = vector.broadcast %477 : vector<1x12xf32> to vector<12x12xf32>
    %480 = arith.addf %478, %479 : vector<12x12xf32>
    %cst_148 = arith.constant 0.000000e+00 : f32
    %481 = vector.broadcast %cst_148 : f32 to vector<12x12xf32>
    %482 = arith.cmpf ogt, %480, %481 : vector<12x12xf32>
    %cst_149 = arith.constant 2.000000e-01 : f32
    %483 = vector.broadcast %cst_149 : f32 to vector<12x12xf32>
    %484 = arith.mulf %483, %480 : vector<12x12xf32>
    %485 = arith.select %482, %480, %484 : vector<12x12xi1>, vector<12x12xf32>
    %c3_150 = arith.constant 3 : index
    %c5_151 = arith.constant 5 : index
    %486 = memref.load %arg1[%c3_150, %c5_151] : memref<8x8xf32, #tpu.memory_space<smem>>
    %487 = vector.broadcast %486 : f32 to vector<12x12xf32>
    %488 = arith.mulf %487, %485 : vector<12x12xf32>
    %489 = arith.addf %475, %488 : vector<12x12xf32>
    %490 = vector.extract_strided_slice %403 {offsets = [0, 6], sizes = [12, 1], strides = [1, 1]} : vector<12x8xf32> to vector<12x1xf32>
    %491 = vector.extract_strided_slice %404 {offsets = [6, 0], sizes = [1, 12], strides = [1, 1]} : vector<8x12xf32> to vector<1x12xf32>
    %492 = vector.broadcast %490 : vector<12x1xf32> to vector<12x12xf32>
    %493 = vector.broadcast %491 : vector<1x12xf32> to vector<12x12xf32>
    %494 = arith.addf %492, %493 : vector<12x12xf32>
    %cst_152 = arith.constant 0.000000e+00 : f32
    %495 = vector.broadcast %cst_152 : f32 to vector<12x12xf32>
    %496 = arith.cmpf ogt, %494, %495 : vector<12x12xf32>
    %cst_153 = arith.constant 2.000000e-01 : f32
    %497 = vector.broadcast %cst_153 : f32 to vector<12x12xf32>
    %498 = arith.mulf %497, %494 : vector<12x12xf32>
    %499 = arith.select %496, %494, %498 : vector<12x12xi1>, vector<12x12xf32>
    %c3_154 = arith.constant 3 : index
    %c6_155 = arith.constant 6 : index
    %500 = memref.load %arg1[%c3_154, %c6_155] : memref<8x8xf32, #tpu.memory_space<smem>>
    %501 = vector.broadcast %500 : f32 to vector<12x12xf32>
    %502 = arith.mulf %501, %499 : vector<12x12xf32>
    %503 = arith.addf %489, %502 : vector<12x12xf32>
    %504 = vector.extract_strided_slice %403 {offsets = [0, 7], sizes = [12, 1], strides = [1, 1]} : vector<12x8xf32> to vector<12x1xf32>
    %505 = vector.extract_strided_slice %404 {offsets = [7, 0], sizes = [1, 12], strides = [1, 1]} : vector<8x12xf32> to vector<1x12xf32>
    %506 = vector.broadcast %504 : vector<12x1xf32> to vector<12x12xf32>
    %507 = vector.broadcast %505 : vector<1x12xf32> to vector<12x12xf32>
    %508 = arith.addf %506, %507 : vector<12x12xf32>
    %cst_156 = arith.constant 0.000000e+00 : f32
    %509 = vector.broadcast %cst_156 : f32 to vector<12x12xf32>
    %510 = arith.cmpf ogt, %508, %509 : vector<12x12xf32>
    %cst_157 = arith.constant 2.000000e-01 : f32
    %511 = vector.broadcast %cst_157 : f32 to vector<12x12xf32>
    %512 = arith.mulf %511, %508 : vector<12x12xf32>
    %513 = arith.select %510, %508, %512 : vector<12x12xi1>, vector<12x12xf32>
    %c3_158 = arith.constant 3 : index
    %c7_159 = arith.constant 7 : index
    %514 = memref.load %arg1[%c3_158, %c7_159] : memref<8x8xf32, #tpu.memory_space<smem>>
    %515 = vector.broadcast %514 : f32 to vector<12x12xf32>
    %516 = arith.mulf %515, %513 : vector<12x12xf32>
    %517 = arith.addf %503, %516 : vector<12x12xf32>
    %cst_160 = arith.constant -1.000000e+30 : f32
    %518 = vector.broadcast %cst_160 : f32 to vector<12x12xf32>
    %519 = arith.select %3, %518, %517 : vector<12x12xi1>, vector<12x12xf32>
    %cst_161 = arith.constant dense<0xFF800000> : vector<12xf32>
    %520 = vector.multi_reduction <maximumf>, %519, %cst_161 [1] : vector<12x12xf32> to vector<12xf32>
    %521 = vector.shape_cast %520 : vector<12xf32> to vector<12x1xf32>
    %522 = vector.broadcast %521 : vector<12x1xf32> to vector<12x12xf32>
    %523 = arith.subf %519, %522 : vector<12x12xf32>
    %524 = math.exp %523 : vector<12x12xf32>
    %cst_162 = arith.constant 0.000000e+00 : f32
    %525 = vector.broadcast %cst_162 : f32 to vector<12x12xf32>
    %526 = arith.select %3, %525, %524 : vector<12x12xi1>, vector<12x12xf32>
    %cst_163 = arith.constant dense<0.000000e+00> : vector<12xf32>
    %527 = vector.multi_reduction <add>, %526, %cst_163 [1] : vector<12x12xf32> to vector<12xf32>
    %528 = vector.shape_cast %527 : vector<12xf32> to vector<12x1xf32>
    %529 = tpu.reciprocal %528 {approx = true} : vector<12x1xf32> -> vector<12x1xf32>
    %530 = vector.broadcast %529 : vector<12x1xf32> to vector<12x12xf32>
    %531 = arith.mulf %526, %530 : vector<12x12xf32>
    %c0_164 = arith.constant 0 : index
    %c24_165 = arith.constant 24 : index
    %532 = vector.load %arg3[%c0_164, %c24_165] : memref<12x64xf32, #tpu.memory_space<vmem>>, vector<12x8xf32>
    %533 = arith.truncf %531 : vector<12x12xf32> to vector<12x12xbf16>
    %534 = arith.truncf %532 : vector<12x8xf32> to vector<12x8xbf16>
    %cst_166 = arith.constant dense<0.000000e+00> : vector<12x8xf32>
    %535 = tpu.matmul %533, %534, %cst_166 {dimension_numbers = #tpu.dot_dimension_numbers<[1], [0], [0], [1], [0, 0, 1, 1], [], []>} : vector<12x12xbf16>, vector<12x8xbf16>, vector<12x8xf32> -> vector<12x8xf32>
    %c0_167 = arith.constant 0 : index
    %c32 = arith.constant 32 : index
    %536 = vector.load %arg2[%c0_167, %c32] : memref<12x64xf32, #tpu.memory_space<vmem>>, vector<12x8xf32>
    %c32_168 = arith.constant 32 : index
    %c0_169 = arith.constant 0 : index
    %537 = vector.load %arg4[%c32_168, %c0_169] : memref<64x12xf32, #tpu.memory_space<vmem>>, vector<8x12xf32>
    %cst_170 = arith.constant 0.000000e+00 : f32
    %538 = vector.broadcast %cst_170 : f32 to vector<12x12xf32>
    %539 = vector.extract_strided_slice %536 {offsets = [0, 0], sizes = [12, 1], strides = [1, 1]} : vector<12x8xf32> to vector<12x1xf32>
    %540 = vector.extract_strided_slice %537 {offsets = [0, 0], sizes = [1, 12], strides = [1, 1]} : vector<8x12xf32> to vector<1x12xf32>
    %541 = vector.broadcast %539 : vector<12x1xf32> to vector<12x12xf32>
    %542 = vector.broadcast %540 : vector<1x12xf32> to vector<12x12xf32>
    %543 = arith.addf %541, %542 : vector<12x12xf32>
    %cst_171 = arith.constant 0.000000e+00 : f32
    %544 = vector.broadcast %cst_171 : f32 to vector<12x12xf32>
    %545 = arith.cmpf ogt, %543, %544 : vector<12x12xf32>
    %cst_172 = arith.constant 2.000000e-01 : f32
    %546 = vector.broadcast %cst_172 : f32 to vector<12x12xf32>
    %547 = arith.mulf %546, %543 : vector<12x12xf32>
    %548 = arith.select %545, %543, %547 : vector<12x12xi1>, vector<12x12xf32>
    %c4_173 = arith.constant 4 : index
    %c0_174 = arith.constant 0 : index
    %549 = memref.load %arg1[%c4_173, %c0_174] : memref<8x8xf32, #tpu.memory_space<smem>>
    %550 = vector.broadcast %549 : f32 to vector<12x12xf32>
    %551 = arith.mulf %550, %548 : vector<12x12xf32>
    %552 = arith.addf %538, %551 : vector<12x12xf32>
    %553 = vector.extract_strided_slice %536 {offsets = [0, 1], sizes = [12, 1], strides = [1, 1]} : vector<12x8xf32> to vector<12x1xf32>
    %554 = vector.extract_strided_slice %537 {offsets = [1, 0], sizes = [1, 12], strides = [1, 1]} : vector<8x12xf32> to vector<1x12xf32>
    %555 = vector.broadcast %553 : vector<12x1xf32> to vector<12x12xf32>
    %556 = vector.broadcast %554 : vector<1x12xf32> to vector<12x12xf32>
    %557 = arith.addf %555, %556 : vector<12x12xf32>
    %cst_175 = arith.constant 0.000000e+00 : f32
    %558 = vector.broadcast %cst_175 : f32 to vector<12x12xf32>
    %559 = arith.cmpf ogt, %557, %558 : vector<12x12xf32>
    %cst_176 = arith.constant 2.000000e-01 : f32
    %560 = vector.broadcast %cst_176 : f32 to vector<12x12xf32>
    %561 = arith.mulf %560, %557 : vector<12x12xf32>
    %562 = arith.select %559, %557, %561 : vector<12x12xi1>, vector<12x12xf32>
    %c4_177 = arith.constant 4 : index
    %c1_178 = arith.constant 1 : index
    %563 = memref.load %arg1[%c4_177, %c1_178] : memref<8x8xf32, #tpu.memory_space<smem>>
    %564 = vector.broadcast %563 : f32 to vector<12x12xf32>
    %565 = arith.mulf %564, %562 : vector<12x12xf32>
    %566 = arith.addf %552, %565 : vector<12x12xf32>
    %567 = vector.extract_strided_slice %536 {offsets = [0, 2], sizes = [12, 1], strides = [1, 1]} : vector<12x8xf32> to vector<12x1xf32>
    %568 = vector.extract_strided_slice %537 {offsets = [2, 0], sizes = [1, 12], strides = [1, 1]} : vector<8x12xf32> to vector<1x12xf32>
    %569 = vector.broadcast %567 : vector<12x1xf32> to vector<12x12xf32>
    %570 = vector.broadcast %568 : vector<1x12xf32> to vector<12x12xf32>
    %571 = arith.addf %569, %570 : vector<12x12xf32>
    %cst_179 = arith.constant 0.000000e+00 : f32
    %572 = vector.broadcast %cst_179 : f32 to vector<12x12xf32>
    %573 = arith.cmpf ogt, %571, %572 : vector<12x12xf32>
    %cst_180 = arith.constant 2.000000e-01 : f32
    %574 = vector.broadcast %cst_180 : f32 to vector<12x12xf32>
    %575 = arith.mulf %574, %571 : vector<12x12xf32>
    %576 = arith.select %573, %571, %575 : vector<12x12xi1>, vector<12x12xf32>
    %c4_181 = arith.constant 4 : index
    %c2_182 = arith.constant 2 : index
    %577 = memref.load %arg1[%c4_181, %c2_182] : memref<8x8xf32, #tpu.memory_space<smem>>
    %578 = vector.broadcast %577 : f32 to vector<12x12xf32>
    %579 = arith.mulf %578, %576 : vector<12x12xf32>
    %580 = arith.addf %566, %579 : vector<12x12xf32>
    %581 = vector.extract_strided_slice %536 {offsets = [0, 3], sizes = [12, 1], strides = [1, 1]} : vector<12x8xf32> to vector<12x1xf32>
    %582 = vector.extract_strided_slice %537 {offsets = [3, 0], sizes = [1, 12], strides = [1, 1]} : vector<8x12xf32> to vector<1x12xf32>
    %583 = vector.broadcast %581 : vector<12x1xf32> to vector<12x12xf32>
    %584 = vector.broadcast %582 : vector<1x12xf32> to vector<12x12xf32>
    %585 = arith.addf %583, %584 : vector<12x12xf32>
    %cst_183 = arith.constant 0.000000e+00 : f32
    %586 = vector.broadcast %cst_183 : f32 to vector<12x12xf32>
    %587 = arith.cmpf ogt, %585, %586 : vector<12x12xf32>
    %cst_184 = arith.constant 2.000000e-01 : f32
    %588 = vector.broadcast %cst_184 : f32 to vector<12x12xf32>
    %589 = arith.mulf %588, %585 : vector<12x12xf32>
    %590 = arith.select %587, %585, %589 : vector<12x12xi1>, vector<12x12xf32>
    %c4_185 = arith.constant 4 : index
    %c3_186 = arith.constant 3 : index
    %591 = memref.load %arg1[%c4_185, %c3_186] : memref<8x8xf32, #tpu.memory_space<smem>>
    %592 = vector.broadcast %591 : f32 to vector<12x12xf32>
    %593 = arith.mulf %592, %590 : vector<12x12xf32>
    %594 = arith.addf %580, %593 : vector<12x12xf32>
    %595 = vector.extract_strided_slice %536 {offsets = [0, 4], sizes = [12, 1], strides = [1, 1]} : vector<12x8xf32> to vector<12x1xf32>
    %596 = vector.extract_strided_slice %537 {offsets = [4, 0], sizes = [1, 12], strides = [1, 1]} : vector<8x12xf32> to vector<1x12xf32>
    %597 = vector.broadcast %595 : vector<12x1xf32> to vector<12x12xf32>
    %598 = vector.broadcast %596 : vector<1x12xf32> to vector<12x12xf32>
    %599 = arith.addf %597, %598 : vector<12x12xf32>
    %cst_187 = arith.constant 0.000000e+00 : f32
    %600 = vector.broadcast %cst_187 : f32 to vector<12x12xf32>
    %601 = arith.cmpf ogt, %599, %600 : vector<12x12xf32>
    %cst_188 = arith.constant 2.000000e-01 : f32
    %602 = vector.broadcast %cst_188 : f32 to vector<12x12xf32>
    %603 = arith.mulf %602, %599 : vector<12x12xf32>
    %604 = arith.select %601, %599, %603 : vector<12x12xi1>, vector<12x12xf32>
    %c4_189 = arith.constant 4 : index
    %c4_190 = arith.constant 4 : index
    %605 = memref.load %arg1[%c4_189, %c4_190] : memref<8x8xf32, #tpu.memory_space<smem>>
    %606 = vector.broadcast %605 : f32 to vector<12x12xf32>
    %607 = arith.mulf %606, %604 : vector<12x12xf32>
    %608 = arith.addf %594, %607 : vector<12x12xf32>
    %609 = vector.extract_strided_slice %536 {offsets = [0, 5], sizes = [12, 1], strides = [1, 1]} : vector<12x8xf32> to vector<12x1xf32>
    %610 = vector.extract_strided_slice %537 {offsets = [5, 0], sizes = [1, 12], strides = [1, 1]} : vector<8x12xf32> to vector<1x12xf32>
    %611 = vector.broadcast %609 : vector<12x1xf32> to vector<12x12xf32>
    %612 = vector.broadcast %610 : vector<1x12xf32> to vector<12x12xf32>
    %613 = arith.addf %611, %612 : vector<12x12xf32>
    %cst_191 = arith.constant 0.000000e+00 : f32
    %614 = vector.broadcast %cst_191 : f32 to vector<12x12xf32>
    %615 = arith.cmpf ogt, %613, %614 : vector<12x12xf32>
    %cst_192 = arith.constant 2.000000e-01 : f32
    %616 = vector.broadcast %cst_192 : f32 to vector<12x12xf32>
    %617 = arith.mulf %616, %613 : vector<12x12xf32>
    %618 = arith.select %615, %613, %617 : vector<12x12xi1>, vector<12x12xf32>
    %c4_193 = arith.constant 4 : index
    %c5_194 = arith.constant 5 : index
    %619 = memref.load %arg1[%c4_193, %c5_194] : memref<8x8xf32, #tpu.memory_space<smem>>
    %620 = vector.broadcast %619 : f32 to vector<12x12xf32>
    %621 = arith.mulf %620, %618 : vector<12x12xf32>
    %622 = arith.addf %608, %621 : vector<12x12xf32>
    %623 = vector.extract_strided_slice %536 {offsets = [0, 6], sizes = [12, 1], strides = [1, 1]} : vector<12x8xf32> to vector<12x1xf32>
    %624 = vector.extract_strided_slice %537 {offsets = [6, 0], sizes = [1, 12], strides = [1, 1]} : vector<8x12xf32> to vector<1x12xf32>
    %625 = vector.broadcast %623 : vector<12x1xf32> to vector<12x12xf32>
    %626 = vector.broadcast %624 : vector<1x12xf32> to vector<12x12xf32>
    %627 = arith.addf %625, %626 : vector<12x12xf32>
    %cst_195 = arith.constant 0.000000e+00 : f32
    %628 = vector.broadcast %cst_195 : f32 to vector<12x12xf32>
    %629 = arith.cmpf ogt, %627, %628 : vector<12x12xf32>
    %cst_196 = arith.constant 2.000000e-01 : f32
    %630 = vector.broadcast %cst_196 : f32 to vector<12x12xf32>
    %631 = arith.mulf %630, %627 : vector<12x12xf32>
    %632 = arith.select %629, %627, %631 : vector<12x12xi1>, vector<12x12xf32>
    %c4_197 = arith.constant 4 : index
    %c6_198 = arith.constant 6 : index
    %633 = memref.load %arg1[%c4_197, %c6_198] : memref<8x8xf32, #tpu.memory_space<smem>>
    %634 = vector.broadcast %633 : f32 to vector<12x12xf32>
    %635 = arith.mulf %634, %632 : vector<12x12xf32>
    %636 = arith.addf %622, %635 : vector<12x12xf32>
    %637 = vector.extract_strided_slice %536 {offsets = [0, 7], sizes = [12, 1], strides = [1, 1]} : vector<12x8xf32> to vector<12x1xf32>
    %638 = vector.extract_strided_slice %537 {offsets = [7, 0], sizes = [1, 12], strides = [1, 1]} : vector<8x12xf32> to vector<1x12xf32>
    %639 = vector.broadcast %637 : vector<12x1xf32> to vector<12x12xf32>
    %640 = vector.broadcast %638 : vector<1x12xf32> to vector<12x12xf32>
    %641 = arith.addf %639, %640 : vector<12x12xf32>
    %cst_199 = arith.constant 0.000000e+00 : f32
    %642 = vector.broadcast %cst_199 : f32 to vector<12x12xf32>
    %643 = arith.cmpf ogt, %641, %642 : vector<12x12xf32>
    %cst_200 = arith.constant 2.000000e-01 : f32
    %644 = vector.broadcast %cst_200 : f32 to vector<12x12xf32>
    %645 = arith.mulf %644, %641 : vector<12x12xf32>
    %646 = arith.select %643, %641, %645 : vector<12x12xi1>, vector<12x12xf32>
    %c4_201 = arith.constant 4 : index
    %c7_202 = arith.constant 7 : index
    %647 = memref.load %arg1[%c4_201, %c7_202] : memref<8x8xf32, #tpu.memory_space<smem>>
    %648 = vector.broadcast %647 : f32 to vector<12x12xf32>
    %649 = arith.mulf %648, %646 : vector<12x12xf32>
    %650 = arith.addf %636, %649 : vector<12x12xf32>
    %cst_203 = arith.constant -1.000000e+30 : f32
    %651 = vector.broadcast %cst_203 : f32 to vector<12x12xf32>
    %652 = arith.select %3, %651, %650 : vector<12x12xi1>, vector<12x12xf32>
    %cst_204 = arith.constant dense<0xFF800000> : vector<12xf32>
    %653 = vector.multi_reduction <maximumf>, %652, %cst_204 [1] : vector<12x12xf32> to vector<12xf32>
    %654 = vector.shape_cast %653 : vector<12xf32> to vector<12x1xf32>
    %655 = vector.broadcast %654 : vector<12x1xf32> to vector<12x12xf32>
    %656 = arith.subf %652, %655 : vector<12x12xf32>
    %657 = math.exp %656 : vector<12x12xf32>
    %cst_205 = arith.constant 0.000000e+00 : f32
    %658 = vector.broadcast %cst_205 : f32 to vector<12x12xf32>
    %659 = arith.select %3, %658, %657 : vector<12x12xi1>, vector<12x12xf32>
    %cst_206 = arith.constant dense<0.000000e+00> : vector<12xf32>
    %660 = vector.multi_reduction <add>, %659, %cst_206 [1] : vector<12x12xf32> to vector<12xf32>
    %661 = vector.shape_cast %660 : vector<12xf32> to vector<12x1xf32>
    %662 = tpu.reciprocal %661 {approx = true} : vector<12x1xf32> -> vector<12x1xf32>
    %663 = vector.broadcast %662 : vector<12x1xf32> to vector<12x12xf32>
    %664 = arith.mulf %659, %663 : vector<12x12xf32>
    %c0_207 = arith.constant 0 : index
    %c32_208 = arith.constant 32 : index
    %665 = vector.load %arg3[%c0_207, %c32_208] : memref<12x64xf32, #tpu.memory_space<vmem>>, vector<12x8xf32>
    %666 = arith.truncf %664 : vector<12x12xf32> to vector<12x12xbf16>
    %667 = arith.truncf %665 : vector<12x8xf32> to vector<12x8xbf16>
    %cst_209 = arith.constant dense<0.000000e+00> : vector<12x8xf32>
    %668 = tpu.matmul %666, %667, %cst_209 {dimension_numbers = #tpu.dot_dimension_numbers<[1], [0], [0], [1], [0, 0, 1, 1], [], []>} : vector<12x12xbf16>, vector<12x8xbf16>, vector<12x8xf32> -> vector<12x8xf32>
    %c0_210 = arith.constant 0 : index
    %c40 = arith.constant 40 : index
    %669 = vector.load %arg2[%c0_210, %c40] : memref<12x64xf32, #tpu.memory_space<vmem>>, vector<12x8xf32>
    %c40_211 = arith.constant 40 : index
    %c0_212 = arith.constant 0 : index
    %670 = vector.load %arg4[%c40_211, %c0_212] : memref<64x12xf32, #tpu.memory_space<vmem>>, vector<8x12xf32>
    %cst_213 = arith.constant 0.000000e+00 : f32
    %671 = vector.broadcast %cst_213 : f32 to vector<12x12xf32>
    %672 = vector.extract_strided_slice %669 {offsets = [0, 0], sizes = [12, 1], strides = [1, 1]} : vector<12x8xf32> to vector<12x1xf32>
    %673 = vector.extract_strided_slice %670 {offsets = [0, 0], sizes = [1, 12], strides = [1, 1]} : vector<8x12xf32> to vector<1x12xf32>
    %674 = vector.broadcast %672 : vector<12x1xf32> to vector<12x12xf32>
    %675 = vector.broadcast %673 : vector<1x12xf32> to vector<12x12xf32>
    %676 = arith.addf %674, %675 : vector<12x12xf32>
    %cst_214 = arith.constant 0.000000e+00 : f32
    %677 = vector.broadcast %cst_214 : f32 to vector<12x12xf32>
    %678 = arith.cmpf ogt, %676, %677 : vector<12x12xf32>
    %cst_215 = arith.constant 2.000000e-01 : f32
    %679 = vector.broadcast %cst_215 : f32 to vector<12x12xf32>
    %680 = arith.mulf %679, %676 : vector<12x12xf32>
    %681 = arith.select %678, %676, %680 : vector<12x12xi1>, vector<12x12xf32>
    %c5_216 = arith.constant 5 : index
    %c0_217 = arith.constant 0 : index
    %682 = memref.load %arg1[%c5_216, %c0_217] : memref<8x8xf32, #tpu.memory_space<smem>>
    %683 = vector.broadcast %682 : f32 to vector<12x12xf32>
    %684 = arith.mulf %683, %681 : vector<12x12xf32>
    %685 = arith.addf %671, %684 : vector<12x12xf32>
    %686 = vector.extract_strided_slice %669 {offsets = [0, 1], sizes = [12, 1], strides = [1, 1]} : vector<12x8xf32> to vector<12x1xf32>
    %687 = vector.extract_strided_slice %670 {offsets = [1, 0], sizes = [1, 12], strides = [1, 1]} : vector<8x12xf32> to vector<1x12xf32>
    %688 = vector.broadcast %686 : vector<12x1xf32> to vector<12x12xf32>
    %689 = vector.broadcast %687 : vector<1x12xf32> to vector<12x12xf32>
    %690 = arith.addf %688, %689 : vector<12x12xf32>
    %cst_218 = arith.constant 0.000000e+00 : f32
    %691 = vector.broadcast %cst_218 : f32 to vector<12x12xf32>
    %692 = arith.cmpf ogt, %690, %691 : vector<12x12xf32>
    %cst_219 = arith.constant 2.000000e-01 : f32
    %693 = vector.broadcast %cst_219 : f32 to vector<12x12xf32>
    %694 = arith.mulf %693, %690 : vector<12x12xf32>
    %695 = arith.select %692, %690, %694 : vector<12x12xi1>, vector<12x12xf32>
    %c5_220 = arith.constant 5 : index
    %c1_221 = arith.constant 1 : index
    %696 = memref.load %arg1[%c5_220, %c1_221] : memref<8x8xf32, #tpu.memory_space<smem>>
    %697 = vector.broadcast %696 : f32 to vector<12x12xf32>
    %698 = arith.mulf %697, %695 : vector<12x12xf32>
    %699 = arith.addf %685, %698 : vector<12x12xf32>
    %700 = vector.extract_strided_slice %669 {offsets = [0, 2], sizes = [12, 1], strides = [1, 1]} : vector<12x8xf32> to vector<12x1xf32>
    %701 = vector.extract_strided_slice %670 {offsets = [2, 0], sizes = [1, 12], strides = [1, 1]} : vector<8x12xf32> to vector<1x12xf32>
    %702 = vector.broadcast %700 : vector<12x1xf32> to vector<12x12xf32>
    %703 = vector.broadcast %701 : vector<1x12xf32> to vector<12x12xf32>
    %704 = arith.addf %702, %703 : vector<12x12xf32>
    %cst_222 = arith.constant 0.000000e+00 : f32
    %705 = vector.broadcast %cst_222 : f32 to vector<12x12xf32>
    %706 = arith.cmpf ogt, %704, %705 : vector<12x12xf32>
    %cst_223 = arith.constant 2.000000e-01 : f32
    %707 = vector.broadcast %cst_223 : f32 to vector<12x12xf32>
    %708 = arith.mulf %707, %704 : vector<12x12xf32>
    %709 = arith.select %706, %704, %708 : vector<12x12xi1>, vector<12x12xf32>
    %c5_224 = arith.constant 5 : index
    %c2_225 = arith.constant 2 : index
    %710 = memref.load %arg1[%c5_224, %c2_225] : memref<8x8xf32, #tpu.memory_space<smem>>
    %711 = vector.broadcast %710 : f32 to vector<12x12xf32>
    %712 = arith.mulf %711, %709 : vector<12x12xf32>
    %713 = arith.addf %699, %712 : vector<12x12xf32>
    %714 = vector.extract_strided_slice %669 {offsets = [0, 3], sizes = [12, 1], strides = [1, 1]} : vector<12x8xf32> to vector<12x1xf32>
    %715 = vector.extract_strided_slice %670 {offsets = [3, 0], sizes = [1, 12], strides = [1, 1]} : vector<8x12xf32> to vector<1x12xf32>
    %716 = vector.broadcast %714 : vector<12x1xf32> to vector<12x12xf32>
    %717 = vector.broadcast %715 : vector<1x12xf32> to vector<12x12xf32>
    %718 = arith.addf %716, %717 : vector<12x12xf32>
    %cst_226 = arith.constant 0.000000e+00 : f32
    %719 = vector.broadcast %cst_226 : f32 to vector<12x12xf32>
    %720 = arith.cmpf ogt, %718, %719 : vector<12x12xf32>
    %cst_227 = arith.constant 2.000000e-01 : f32
    %721 = vector.broadcast %cst_227 : f32 to vector<12x12xf32>
    %722 = arith.mulf %721, %718 : vector<12x12xf32>
    %723 = arith.select %720, %718, %722 : vector<12x12xi1>, vector<12x12xf32>
    %c5_228 = arith.constant 5 : index
    %c3_229 = arith.constant 3 : index
    %724 = memref.load %arg1[%c5_228, %c3_229] : memref<8x8xf32, #tpu.memory_space<smem>>
    %725 = vector.broadcast %724 : f32 to vector<12x12xf32>
    %726 = arith.mulf %725, %723 : vector<12x12xf32>
    %727 = arith.addf %713, %726 : vector<12x12xf32>
    %728 = vector.extract_strided_slice %669 {offsets = [0, 4], sizes = [12, 1], strides = [1, 1]} : vector<12x8xf32> to vector<12x1xf32>
    %729 = vector.extract_strided_slice %670 {offsets = [4, 0], sizes = [1, 12], strides = [1, 1]} : vector<8x12xf32> to vector<1x12xf32>
    %730 = vector.broadcast %728 : vector<12x1xf32> to vector<12x12xf32>
    %731 = vector.broadcast %729 : vector<1x12xf32> to vector<12x12xf32>
    %732 = arith.addf %730, %731 : vector<12x12xf32>
    %cst_230 = arith.constant 0.000000e+00 : f32
    %733 = vector.broadcast %cst_230 : f32 to vector<12x12xf32>
    %734 = arith.cmpf ogt, %732, %733 : vector<12x12xf32>
    %cst_231 = arith.constant 2.000000e-01 : f32
    %735 = vector.broadcast %cst_231 : f32 to vector<12x12xf32>
    %736 = arith.mulf %735, %732 : vector<12x12xf32>
    %737 = arith.select %734, %732, %736 : vector<12x12xi1>, vector<12x12xf32>
    %c5_232 = arith.constant 5 : index
    %c4_233 = arith.constant 4 : index
    %738 = memref.load %arg1[%c5_232, %c4_233] : memref<8x8xf32, #tpu.memory_space<smem>>
    %739 = vector.broadcast %738 : f32 to vector<12x12xf32>
    %740 = arith.mulf %739, %737 : vector<12x12xf32>
    %741 = arith.addf %727, %740 : vector<12x12xf32>
    %742 = vector.extract_strided_slice %669 {offsets = [0, 5], sizes = [12, 1], strides = [1, 1]} : vector<12x8xf32> to vector<12x1xf32>
    %743 = vector.extract_strided_slice %670 {offsets = [5, 0], sizes = [1, 12], strides = [1, 1]} : vector<8x12xf32> to vector<1x12xf32>
    %744 = vector.broadcast %742 : vector<12x1xf32> to vector<12x12xf32>
    %745 = vector.broadcast %743 : vector<1x12xf32> to vector<12x12xf32>
    %746 = arith.addf %744, %745 : vector<12x12xf32>
    %cst_234 = arith.constant 0.000000e+00 : f32
    %747 = vector.broadcast %cst_234 : f32 to vector<12x12xf32>
    %748 = arith.cmpf ogt, %746, %747 : vector<12x12xf32>
    %cst_235 = arith.constant 2.000000e-01 : f32
    %749 = vector.broadcast %cst_235 : f32 to vector<12x12xf32>
    %750 = arith.mulf %749, %746 : vector<12x12xf32>
    %751 = arith.select %748, %746, %750 : vector<12x12xi1>, vector<12x12xf32>
    %c5_236 = arith.constant 5 : index
    %c5_237 = arith.constant 5 : index
    %752 = memref.load %arg1[%c5_236, %c5_237] : memref<8x8xf32, #tpu.memory_space<smem>>
    %753 = vector.broadcast %752 : f32 to vector<12x12xf32>
    %754 = arith.mulf %753, %751 : vector<12x12xf32>
    %755 = arith.addf %741, %754 : vector<12x12xf32>
    %756 = vector.extract_strided_slice %669 {offsets = [0, 6], sizes = [12, 1], strides = [1, 1]} : vector<12x8xf32> to vector<12x1xf32>
    %757 = vector.extract_strided_slice %670 {offsets = [6, 0], sizes = [1, 12], strides = [1, 1]} : vector<8x12xf32> to vector<1x12xf32>
    %758 = vector.broadcast %756 : vector<12x1xf32> to vector<12x12xf32>
    %759 = vector.broadcast %757 : vector<1x12xf32> to vector<12x12xf32>
    %760 = arith.addf %758, %759 : vector<12x12xf32>
    %cst_238 = arith.constant 0.000000e+00 : f32
    %761 = vector.broadcast %cst_238 : f32 to vector<12x12xf32>
    %762 = arith.cmpf ogt, %760, %761 : vector<12x12xf32>
    %cst_239 = arith.constant 2.000000e-01 : f32
    %763 = vector.broadcast %cst_239 : f32 to vector<12x12xf32>
    %764 = arith.mulf %763, %760 : vector<12x12xf32>
    %765 = arith.select %762, %760, %764 : vector<12x12xi1>, vector<12x12xf32>
    %c5_240 = arith.constant 5 : index
    %c6_241 = arith.constant 6 : index
    %766 = memref.load %arg1[%c5_240, %c6_241] : memref<8x8xf32, #tpu.memory_space<smem>>
    %767 = vector.broadcast %766 : f32 to vector<12x12xf32>
    %768 = arith.mulf %767, %765 : vector<12x12xf32>
    %769 = arith.addf %755, %768 : vector<12x12xf32>
    %770 = vector.extract_strided_slice %669 {offsets = [0, 7], sizes = [12, 1], strides = [1, 1]} : vector<12x8xf32> to vector<12x1xf32>
    %771 = vector.extract_strided_slice %670 {offsets = [7, 0], sizes = [1, 12], strides = [1, 1]} : vector<8x12xf32> to vector<1x12xf32>
    %772 = vector.broadcast %770 : vector<12x1xf32> to vector<12x12xf32>
    %773 = vector.broadcast %771 : vector<1x12xf32> to vector<12x12xf32>
    %774 = arith.addf %772, %773 : vector<12x12xf32>
    %cst_242 = arith.constant 0.000000e+00 : f32
    %775 = vector.broadcast %cst_242 : f32 to vector<12x12xf32>
    %776 = arith.cmpf ogt, %774, %775 : vector<12x12xf32>
    %cst_243 = arith.constant 2.000000e-01 : f32
    %777 = vector.broadcast %cst_243 : f32 to vector<12x12xf32>
    %778 = arith.mulf %777, %774 : vector<12x12xf32>
    %779 = arith.select %776, %774, %778 : vector<12x12xi1>, vector<12x12xf32>
    %c5_244 = arith.constant 5 : index
    %c7_245 = arith.constant 7 : index
    %780 = memref.load %arg1[%c5_244, %c7_245] : memref<8x8xf32, #tpu.memory_space<smem>>
    %781 = vector.broadcast %780 : f32 to vector<12x12xf32>
    %782 = arith.mulf %781, %779 : vector<12x12xf32>
    %783 = arith.addf %769, %782 : vector<12x12xf32>
    %cst_246 = arith.constant -1.000000e+30 : f32
    %784 = vector.broadcast %cst_246 : f32 to vector<12x12xf32>
    %785 = arith.select %3, %784, %783 : vector<12x12xi1>, vector<12x12xf32>
    %cst_247 = arith.constant dense<0xFF800000> : vector<12xf32>
    %786 = vector.multi_reduction <maximumf>, %785, %cst_247 [1] : vector<12x12xf32> to vector<12xf32>
    %787 = vector.shape_cast %786 : vector<12xf32> to vector<12x1xf32>
    %788 = vector.broadcast %787 : vector<12x1xf32> to vector<12x12xf32>
    %789 = arith.subf %785, %788 : vector<12x12xf32>
    %790 = math.exp %789 : vector<12x12xf32>
    %cst_248 = arith.constant 0.000000e+00 : f32
    %791 = vector.broadcast %cst_248 : f32 to vector<12x12xf32>
    %792 = arith.select %3, %791, %790 : vector<12x12xi1>, vector<12x12xf32>
    %cst_249 = arith.constant dense<0.000000e+00> : vector<12xf32>
    %793 = vector.multi_reduction <add>, %792, %cst_249 [1] : vector<12x12xf32> to vector<12xf32>
    %794 = vector.shape_cast %793 : vector<12xf32> to vector<12x1xf32>
    %795 = tpu.reciprocal %794 {approx = true} : vector<12x1xf32> -> vector<12x1xf32>
    %796 = vector.broadcast %795 : vector<12x1xf32> to vector<12x12xf32>
    %797 = arith.mulf %792, %796 : vector<12x12xf32>
    %c0_250 = arith.constant 0 : index
    %c40_251 = arith.constant 40 : index
    %798 = vector.load %arg3[%c0_250, %c40_251] : memref<12x64xf32, #tpu.memory_space<vmem>>, vector<12x8xf32>
    %799 = arith.truncf %797 : vector<12x12xf32> to vector<12x12xbf16>
    %800 = arith.truncf %798 : vector<12x8xf32> to vector<12x8xbf16>
    %cst_252 = arith.constant dense<0.000000e+00> : vector<12x8xf32>
    %801 = tpu.matmul %799, %800, %cst_252 {dimension_numbers = #tpu.dot_dimension_numbers<[1], [0], [0], [1], [0, 0, 1, 1], [], []>} : vector<12x12xbf16>, vector<12x8xbf16>, vector<12x8xf32> -> vector<12x8xf32>
    %c0_253 = arith.constant 0 : index
    %c48 = arith.constant 48 : index
    %802 = vector.load %arg2[%c0_253, %c48] : memref<12x64xf32, #tpu.memory_space<vmem>>, vector<12x8xf32>
    %c48_254 = arith.constant 48 : index
    %c0_255 = arith.constant 0 : index
    %803 = vector.load %arg4[%c48_254, %c0_255] : memref<64x12xf32, #tpu.memory_space<vmem>>, vector<8x12xf32>
    %cst_256 = arith.constant 0.000000e+00 : f32
    %804 = vector.broadcast %cst_256 : f32 to vector<12x12xf32>
    %805 = vector.extract_strided_slice %802 {offsets = [0, 0], sizes = [12, 1], strides = [1, 1]} : vector<12x8xf32> to vector<12x1xf32>
    %806 = vector.extract_strided_slice %803 {offsets = [0, 0], sizes = [1, 12], strides = [1, 1]} : vector<8x12xf32> to vector<1x12xf32>
    %807 = vector.broadcast %805 : vector<12x1xf32> to vector<12x12xf32>
    %808 = vector.broadcast %806 : vector<1x12xf32> to vector<12x12xf32>
    %809 = arith.addf %807, %808 : vector<12x12xf32>
    %cst_257 = arith.constant 0.000000e+00 : f32
    %810 = vector.broadcast %cst_257 : f32 to vector<12x12xf32>
    %811 = arith.cmpf ogt, %809, %810 : vector<12x12xf32>
    %cst_258 = arith.constant 2.000000e-01 : f32
    %812 = vector.broadcast %cst_258 : f32 to vector<12x12xf32>
    %813 = arith.mulf %812, %809 : vector<12x12xf32>
    %814 = arith.select %811, %809, %813 : vector<12x12xi1>, vector<12x12xf32>
    %c6_259 = arith.constant 6 : index
    %c0_260 = arith.constant 0 : index
    %815 = memref.load %arg1[%c6_259, %c0_260] : memref<8x8xf32, #tpu.memory_space<smem>>
    %816 = vector.broadcast %815 : f32 to vector<12x12xf32>
    %817 = arith.mulf %816, %814 : vector<12x12xf32>
    %818 = arith.addf %804, %817 : vector<12x12xf32>
    %819 = vector.extract_strided_slice %802 {offsets = [0, 1], sizes = [12, 1], strides = [1, 1]} : vector<12x8xf32> to vector<12x1xf32>
    %820 = vector.extract_strided_slice %803 {offsets = [1, 0], sizes = [1, 12], strides = [1, 1]} : vector<8x12xf32> to vector<1x12xf32>
    %821 = vector.broadcast %819 : vector<12x1xf32> to vector<12x12xf32>
    %822 = vector.broadcast %820 : vector<1x12xf32> to vector<12x12xf32>
    %823 = arith.addf %821, %822 : vector<12x12xf32>
    %cst_261 = arith.constant 0.000000e+00 : f32
    %824 = vector.broadcast %cst_261 : f32 to vector<12x12xf32>
    %825 = arith.cmpf ogt, %823, %824 : vector<12x12xf32>
    %cst_262 = arith.constant 2.000000e-01 : f32
    %826 = vector.broadcast %cst_262 : f32 to vector<12x12xf32>
    %827 = arith.mulf %826, %823 : vector<12x12xf32>
    %828 = arith.select %825, %823, %827 : vector<12x12xi1>, vector<12x12xf32>
    %c6_263 = arith.constant 6 : index
    %c1_264 = arith.constant 1 : index
    %829 = memref.load %arg1[%c6_263, %c1_264] : memref<8x8xf32, #tpu.memory_space<smem>>
    %830 = vector.broadcast %829 : f32 to vector<12x12xf32>
    %831 = arith.mulf %830, %828 : vector<12x12xf32>
    %832 = arith.addf %818, %831 : vector<12x12xf32>
    %833 = vector.extract_strided_slice %802 {offsets = [0, 2], sizes = [12, 1], strides = [1, 1]} : vector<12x8xf32> to vector<12x1xf32>
    %834 = vector.extract_strided_slice %803 {offsets = [2, 0], sizes = [1, 12], strides = [1, 1]} : vector<8x12xf32> to vector<1x12xf32>
    %835 = vector.broadcast %833 : vector<12x1xf32> to vector<12x12xf32>
    %836 = vector.broadcast %834 : vector<1x12xf32> to vector<12x12xf32>
    %837 = arith.addf %835, %836 : vector<12x12xf32>
    %cst_265 = arith.constant 0.000000e+00 : f32
    %838 = vector.broadcast %cst_265 : f32 to vector<12x12xf32>
    %839 = arith.cmpf ogt, %837, %838 : vector<12x12xf32>
    %cst_266 = arith.constant 2.000000e-01 : f32
    %840 = vector.broadcast %cst_266 : f32 to vector<12x12xf32>
    %841 = arith.mulf %840, %837 : vector<12x12xf32>
    %842 = arith.select %839, %837, %841 : vector<12x12xi1>, vector<12x12xf32>
    %c6_267 = arith.constant 6 : index
    %c2_268 = arith.constant 2 : index
    %843 = memref.load %arg1[%c6_267, %c2_268] : memref<8x8xf32, #tpu.memory_space<smem>>
    %844 = vector.broadcast %843 : f32 to vector<12x12xf32>
    %845 = arith.mulf %844, %842 : vector<12x12xf32>
    %846 = arith.addf %832, %845 : vector<12x12xf32>
    %847 = vector.extract_strided_slice %802 {offsets = [0, 3], sizes = [12, 1], strides = [1, 1]} : vector<12x8xf32> to vector<12x1xf32>
    %848 = vector.extract_strided_slice %803 {offsets = [3, 0], sizes = [1, 12], strides = [1, 1]} : vector<8x12xf32> to vector<1x12xf32>
    %849 = vector.broadcast %847 : vector<12x1xf32> to vector<12x12xf32>
    %850 = vector.broadcast %848 : vector<1x12xf32> to vector<12x12xf32>
    %851 = arith.addf %849, %850 : vector<12x12xf32>
    %cst_269 = arith.constant 0.000000e+00 : f32
    %852 = vector.broadcast %cst_269 : f32 to vector<12x12xf32>
    %853 = arith.cmpf ogt, %851, %852 : vector<12x12xf32>
    %cst_270 = arith.constant 2.000000e-01 : f32
    %854 = vector.broadcast %cst_270 : f32 to vector<12x12xf32>
    %855 = arith.mulf %854, %851 : vector<12x12xf32>
    %856 = arith.select %853, %851, %855 : vector<12x12xi1>, vector<12x12xf32>
    %c6_271 = arith.constant 6 : index
    %c3_272 = arith.constant 3 : index
    %857 = memref.load %arg1[%c6_271, %c3_272] : memref<8x8xf32, #tpu.memory_space<smem>>
    %858 = vector.broadcast %857 : f32 to vector<12x12xf32>
    %859 = arith.mulf %858, %856 : vector<12x12xf32>
    %860 = arith.addf %846, %859 : vector<12x12xf32>
    %861 = vector.extract_strided_slice %802 {offsets = [0, 4], sizes = [12, 1], strides = [1, 1]} : vector<12x8xf32> to vector<12x1xf32>
    %862 = vector.extract_strided_slice %803 {offsets = [4, 0], sizes = [1, 12], strides = [1, 1]} : vector<8x12xf32> to vector<1x12xf32>
    %863 = vector.broadcast %861 : vector<12x1xf32> to vector<12x12xf32>
    %864 = vector.broadcast %862 : vector<1x12xf32> to vector<12x12xf32>
    %865 = arith.addf %863, %864 : vector<12x12xf32>
    %cst_273 = arith.constant 0.000000e+00 : f32
    %866 = vector.broadcast %cst_273 : f32 to vector<12x12xf32>
    %867 = arith.cmpf ogt, %865, %866 : vector<12x12xf32>
    %cst_274 = arith.constant 2.000000e-01 : f32
    %868 = vector.broadcast %cst_274 : f32 to vector<12x12xf32>
    %869 = arith.mulf %868, %865 : vector<12x12xf32>
    %870 = arith.select %867, %865, %869 : vector<12x12xi1>, vector<12x12xf32>
    %c6_275 = arith.constant 6 : index
    %c4_276 = arith.constant 4 : index
    %871 = memref.load %arg1[%c6_275, %c4_276] : memref<8x8xf32, #tpu.memory_space<smem>>
    %872 = vector.broadcast %871 : f32 to vector<12x12xf32>
    %873 = arith.mulf %872, %870 : vector<12x12xf32>
    %874 = arith.addf %860, %873 : vector<12x12xf32>
    %875 = vector.extract_strided_slice %802 {offsets = [0, 5], sizes = [12, 1], strides = [1, 1]} : vector<12x8xf32> to vector<12x1xf32>
    %876 = vector.extract_strided_slice %803 {offsets = [5, 0], sizes = [1, 12], strides = [1, 1]} : vector<8x12xf32> to vector<1x12xf32>
    %877 = vector.broadcast %875 : vector<12x1xf32> to vector<12x12xf32>
    %878 = vector.broadcast %876 : vector<1x12xf32> to vector<12x12xf32>
    %879 = arith.addf %877, %878 : vector<12x12xf32>
    %cst_277 = arith.constant 0.000000e+00 : f32
    %880 = vector.broadcast %cst_277 : f32 to vector<12x12xf32>
    %881 = arith.cmpf ogt, %879, %880 : vector<12x12xf32>
    %cst_278 = arith.constant 2.000000e-01 : f32
    %882 = vector.broadcast %cst_278 : f32 to vector<12x12xf32>
    %883 = arith.mulf %882, %879 : vector<12x12xf32>
    %884 = arith.select %881, %879, %883 : vector<12x12xi1>, vector<12x12xf32>
    %c6_279 = arith.constant 6 : index
    %c5_280 = arith.constant 5 : index
    %885 = memref.load %arg1[%c6_279, %c5_280] : memref<8x8xf32, #tpu.memory_space<smem>>
    %886 = vector.broadcast %885 : f32 to vector<12x12xf32>
    %887 = arith.mulf %886, %884 : vector<12x12xf32>
    %888 = arith.addf %874, %887 : vector<12x12xf32>
    %889 = vector.extract_strided_slice %802 {offsets = [0, 6], sizes = [12, 1], strides = [1, 1]} : vector<12x8xf32> to vector<12x1xf32>
    %890 = vector.extract_strided_slice %803 {offsets = [6, 0], sizes = [1, 12], strides = [1, 1]} : vector<8x12xf32> to vector<1x12xf32>
    %891 = vector.broadcast %889 : vector<12x1xf32> to vector<12x12xf32>
    %892 = vector.broadcast %890 : vector<1x12xf32> to vector<12x12xf32>
    %893 = arith.addf %891, %892 : vector<12x12xf32>
    %cst_281 = arith.constant 0.000000e+00 : f32
    %894 = vector.broadcast %cst_281 : f32 to vector<12x12xf32>
    %895 = arith.cmpf ogt, %893, %894 : vector<12x12xf32>
    %cst_282 = arith.constant 2.000000e-01 : f32
    %896 = vector.broadcast %cst_282 : f32 to vector<12x12xf32>
    %897 = arith.mulf %896, %893 : vector<12x12xf32>
    %898 = arith.select %895, %893, %897 : vector<12x12xi1>, vector<12x12xf32>
    %c6_283 = arith.constant 6 : index
    %c6_284 = arith.constant 6 : index
    %899 = memref.load %arg1[%c6_283, %c6_284] : memref<8x8xf32, #tpu.memory_space<smem>>
    %900 = vector.broadcast %899 : f32 to vector<12x12xf32>
    %901 = arith.mulf %900, %898 : vector<12x12xf32>
    %902 = arith.addf %888, %901 : vector<12x12xf32>
    %903 = vector.extract_strided_slice %802 {offsets = [0, 7], sizes = [12, 1], strides = [1, 1]} : vector<12x8xf32> to vector<12x1xf32>
    %904 = vector.extract_strided_slice %803 {offsets = [7, 0], sizes = [1, 12], strides = [1, 1]} : vector<8x12xf32> to vector<1x12xf32>
    %905 = vector.broadcast %903 : vector<12x1xf32> to vector<12x12xf32>
    %906 = vector.broadcast %904 : vector<1x12xf32> to vector<12x12xf32>
    %907 = arith.addf %905, %906 : vector<12x12xf32>
    %cst_285 = arith.constant 0.000000e+00 : f32
    %908 = vector.broadcast %cst_285 : f32 to vector<12x12xf32>
    %909 = arith.cmpf ogt, %907, %908 : vector<12x12xf32>
    %cst_286 = arith.constant 2.000000e-01 : f32
    %910 = vector.broadcast %cst_286 : f32 to vector<12x12xf32>
    %911 = arith.mulf %910, %907 : vector<12x12xf32>
    %912 = arith.select %909, %907, %911 : vector<12x12xi1>, vector<12x12xf32>
    %c6_287 = arith.constant 6 : index
    %c7_288 = arith.constant 7 : index
    %913 = memref.load %arg1[%c6_287, %c7_288] : memref<8x8xf32, #tpu.memory_space<smem>>
    %914 = vector.broadcast %913 : f32 to vector<12x12xf32>
    %915 = arith.mulf %914, %912 : vector<12x12xf32>
    %916 = arith.addf %902, %915 : vector<12x12xf32>
    %cst_289 = arith.constant -1.000000e+30 : f32
    %917 = vector.broadcast %cst_289 : f32 to vector<12x12xf32>
    %918 = arith.select %3, %917, %916 : vector<12x12xi1>, vector<12x12xf32>
    %cst_290 = arith.constant dense<0xFF800000> : vector<12xf32>
    %919 = vector.multi_reduction <maximumf>, %918, %cst_290 [1] : vector<12x12xf32> to vector<12xf32>
    %920 = vector.shape_cast %919 : vector<12xf32> to vector<12x1xf32>
    %921 = vector.broadcast %920 : vector<12x1xf32> to vector<12x12xf32>
    %922 = arith.subf %918, %921 : vector<12x12xf32>
    %923 = math.exp %922 : vector<12x12xf32>
    %cst_291 = arith.constant 0.000000e+00 : f32
    %924 = vector.broadcast %cst_291 : f32 to vector<12x12xf32>
    %925 = arith.select %3, %924, %923 : vector<12x12xi1>, vector<12x12xf32>
    %cst_292 = arith.constant dense<0.000000e+00> : vector<12xf32>
    %926 = vector.multi_reduction <add>, %925, %cst_292 [1] : vector<12x12xf32> to vector<12xf32>
    %927 = vector.shape_cast %926 : vector<12xf32> to vector<12x1xf32>
    %928 = tpu.reciprocal %927 {approx = true} : vector<12x1xf32> -> vector<12x1xf32>
    %929 = vector.broadcast %928 : vector<12x1xf32> to vector<12x12xf32>
    %930 = arith.mulf %925, %929 : vector<12x12xf32>
    %c0_293 = arith.constant 0 : index
    %c48_294 = arith.constant 48 : index
    %931 = vector.load %arg3[%c0_293, %c48_294] : memref<12x64xf32, #tpu.memory_space<vmem>>, vector<12x8xf32>
    %932 = arith.truncf %930 : vector<12x12xf32> to vector<12x12xbf16>
    %933 = arith.truncf %931 : vector<12x8xf32> to vector<12x8xbf16>
    %cst_295 = arith.constant dense<0.000000e+00> : vector<12x8xf32>
    %934 = tpu.matmul %932, %933, %cst_295 {dimension_numbers = #tpu.dot_dimension_numbers<[1], [0], [0], [1], [0, 0, 1, 1], [], []>} : vector<12x12xbf16>, vector<12x8xbf16>, vector<12x8xf32> -> vector<12x8xf32>
    %c0_296 = arith.constant 0 : index
    %c56 = arith.constant 56 : index
    %935 = vector.load %arg2[%c0_296, %c56] : memref<12x64xf32, #tpu.memory_space<vmem>>, vector<12x8xf32>
    %c56_297 = arith.constant 56 : index
    %c0_298 = arith.constant 0 : index
    %936 = vector.load %arg4[%c56_297, %c0_298] : memref<64x12xf32, #tpu.memory_space<vmem>>, vector<8x12xf32>
    %cst_299 = arith.constant 0.000000e+00 : f32
    %937 = vector.broadcast %cst_299 : f32 to vector<12x12xf32>
    %938 = vector.extract_strided_slice %935 {offsets = [0, 0], sizes = [12, 1], strides = [1, 1]} : vector<12x8xf32> to vector<12x1xf32>
    %939 = vector.extract_strided_slice %936 {offsets = [0, 0], sizes = [1, 12], strides = [1, 1]} : vector<8x12xf32> to vector<1x12xf32>
    %940 = vector.broadcast %938 : vector<12x1xf32> to vector<12x12xf32>
    %941 = vector.broadcast %939 : vector<1x12xf32> to vector<12x12xf32>
    %942 = arith.addf %940, %941 : vector<12x12xf32>
    %cst_300 = arith.constant 0.000000e+00 : f32
    %943 = vector.broadcast %cst_300 : f32 to vector<12x12xf32>
    %944 = arith.cmpf ogt, %942, %943 : vector<12x12xf32>
    %cst_301 = arith.constant 2.000000e-01 : f32
    %945 = vector.broadcast %cst_301 : f32 to vector<12x12xf32>
    %946 = arith.mulf %945, %942 : vector<12x12xf32>
    %947 = arith.select %944, %942, %946 : vector<12x12xi1>, vector<12x12xf32>
    %c7_302 = arith.constant 7 : index
    %c0_303 = arith.constant 0 : index
    %948 = memref.load %arg1[%c7_302, %c0_303] : memref<8x8xf32, #tpu.memory_space<smem>>
    %949 = vector.broadcast %948 : f32 to vector<12x12xf32>
    %950 = arith.mulf %949, %947 : vector<12x12xf32>
    %951 = arith.addf %937, %950 : vector<12x12xf32>
    %952 = vector.extract_strided_slice %935 {offsets = [0, 1], sizes = [12, 1], strides = [1, 1]} : vector<12x8xf32> to vector<12x1xf32>
    %953 = vector.extract_strided_slice %936 {offsets = [1, 0], sizes = [1, 12], strides = [1, 1]} : vector<8x12xf32> to vector<1x12xf32>
    %954 = vector.broadcast %952 : vector<12x1xf32> to vector<12x12xf32>
    %955 = vector.broadcast %953 : vector<1x12xf32> to vector<12x12xf32>
    %956 = arith.addf %954, %955 : vector<12x12xf32>
    %cst_304 = arith.constant 0.000000e+00 : f32
    %957 = vector.broadcast %cst_304 : f32 to vector<12x12xf32>
    %958 = arith.cmpf ogt, %956, %957 : vector<12x12xf32>
    %cst_305 = arith.constant 2.000000e-01 : f32
    %959 = vector.broadcast %cst_305 : f32 to vector<12x12xf32>
    %960 = arith.mulf %959, %956 : vector<12x12xf32>
    %961 = arith.select %958, %956, %960 : vector<12x12xi1>, vector<12x12xf32>
    %c7_306 = arith.constant 7 : index
    %c1_307 = arith.constant 1 : index
    %962 = memref.load %arg1[%c7_306, %c1_307] : memref<8x8xf32, #tpu.memory_space<smem>>
    %963 = vector.broadcast %962 : f32 to vector<12x12xf32>
    %964 = arith.mulf %963, %961 : vector<12x12xf32>
    %965 = arith.addf %951, %964 : vector<12x12xf32>
    %966 = vector.extract_strided_slice %935 {offsets = [0, 2], sizes = [12, 1], strides = [1, 1]} : vector<12x8xf32> to vector<12x1xf32>
    %967 = vector.extract_strided_slice %936 {offsets = [2, 0], sizes = [1, 12], strides = [1, 1]} : vector<8x12xf32> to vector<1x12xf32>
    %968 = vector.broadcast %966 : vector<12x1xf32> to vector<12x12xf32>
    %969 = vector.broadcast %967 : vector<1x12xf32> to vector<12x12xf32>
    %970 = arith.addf %968, %969 : vector<12x12xf32>
    %cst_308 = arith.constant 0.000000e+00 : f32
    %971 = vector.broadcast %cst_308 : f32 to vector<12x12xf32>
    %972 = arith.cmpf ogt, %970, %971 : vector<12x12xf32>
    %cst_309 = arith.constant 2.000000e-01 : f32
    %973 = vector.broadcast %cst_309 : f32 to vector<12x12xf32>
    %974 = arith.mulf %973, %970 : vector<12x12xf32>
    %975 = arith.select %972, %970, %974 : vector<12x12xi1>, vector<12x12xf32>
    %c7_310 = arith.constant 7 : index
    %c2_311 = arith.constant 2 : index
    %976 = memref.load %arg1[%c7_310, %c2_311] : memref<8x8xf32, #tpu.memory_space<smem>>
    %977 = vector.broadcast %976 : f32 to vector<12x12xf32>
    %978 = arith.mulf %977, %975 : vector<12x12xf32>
    %979 = arith.addf %965, %978 : vector<12x12xf32>
    %980 = vector.extract_strided_slice %935 {offsets = [0, 3], sizes = [12, 1], strides = [1, 1]} : vector<12x8xf32> to vector<12x1xf32>
    %981 = vector.extract_strided_slice %936 {offsets = [3, 0], sizes = [1, 12], strides = [1, 1]} : vector<8x12xf32> to vector<1x12xf32>
    %982 = vector.broadcast %980 : vector<12x1xf32> to vector<12x12xf32>
    %983 = vector.broadcast %981 : vector<1x12xf32> to vector<12x12xf32>
    %984 = arith.addf %982, %983 : vector<12x12xf32>
    %cst_312 = arith.constant 0.000000e+00 : f32
    %985 = vector.broadcast %cst_312 : f32 to vector<12x12xf32>
    %986 = arith.cmpf ogt, %984, %985 : vector<12x12xf32>
    %cst_313 = arith.constant 2.000000e-01 : f32
    %987 = vector.broadcast %cst_313 : f32 to vector<12x12xf32>
    %988 = arith.mulf %987, %984 : vector<12x12xf32>
    %989 = arith.select %986, %984, %988 : vector<12x12xi1>, vector<12x12xf32>
    %c7_314 = arith.constant 7 : index
    %c3_315 = arith.constant 3 : index
    %990 = memref.load %arg1[%c7_314, %c3_315] : memref<8x8xf32, #tpu.memory_space<smem>>
    %991 = vector.broadcast %990 : f32 to vector<12x12xf32>
    %992 = arith.mulf %991, %989 : vector<12x12xf32>
    %993 = arith.addf %979, %992 : vector<12x12xf32>
    %994 = vector.extract_strided_slice %935 {offsets = [0, 4], sizes = [12, 1], strides = [1, 1]} : vector<12x8xf32> to vector<12x1xf32>
    %995 = vector.extract_strided_slice %936 {offsets = [4, 0], sizes = [1, 12], strides = [1, 1]} : vector<8x12xf32> to vector<1x12xf32>
    %996 = vector.broadcast %994 : vector<12x1xf32> to vector<12x12xf32>
    %997 = vector.broadcast %995 : vector<1x12xf32> to vector<12x12xf32>
    %998 = arith.addf %996, %997 : vector<12x12xf32>
    %cst_316 = arith.constant 0.000000e+00 : f32
    %999 = vector.broadcast %cst_316 : f32 to vector<12x12xf32>
    %1000 = arith.cmpf ogt, %998, %999 : vector<12x12xf32>
    %cst_317 = arith.constant 2.000000e-01 : f32
    %1001 = vector.broadcast %cst_317 : f32 to vector<12x12xf32>
    %1002 = arith.mulf %1001, %998 : vector<12x12xf32>
    %1003 = arith.select %1000, %998, %1002 : vector<12x12xi1>, vector<12x12xf32>
    %c7_318 = arith.constant 7 : index
    %c4_319 = arith.constant 4 : index
    %1004 = memref.load %arg1[%c7_318, %c4_319] : memref<8x8xf32, #tpu.memory_space<smem>>
    %1005 = vector.broadcast %1004 : f32 to vector<12x12xf32>
    %1006 = arith.mulf %1005, %1003 : vector<12x12xf32>
    %1007 = arith.addf %993, %1006 : vector<12x12xf32>
    %1008 = vector.extract_strided_slice %935 {offsets = [0, 5], sizes = [12, 1], strides = [1, 1]} : vector<12x8xf32> to vector<12x1xf32>
    %1009 = vector.extract_strided_slice %936 {offsets = [5, 0], sizes = [1, 12], strides = [1, 1]} : vector<8x12xf32> to vector<1x12xf32>
    %1010 = vector.broadcast %1008 : vector<12x1xf32> to vector<12x12xf32>
    %1011 = vector.broadcast %1009 : vector<1x12xf32> to vector<12x12xf32>
    %1012 = arith.addf %1010, %1011 : vector<12x12xf32>
    %cst_320 = arith.constant 0.000000e+00 : f32
    %1013 = vector.broadcast %cst_320 : f32 to vector<12x12xf32>
    %1014 = arith.cmpf ogt, %1012, %1013 : vector<12x12xf32>
    %cst_321 = arith.constant 2.000000e-01 : f32
    %1015 = vector.broadcast %cst_321 : f32 to vector<12x12xf32>
    %1016 = arith.mulf %1015, %1012 : vector<12x12xf32>
    %1017 = arith.select %1014, %1012, %1016 : vector<12x12xi1>, vector<12x12xf32>
    %c7_322 = arith.constant 7 : index
    %c5_323 = arith.constant 5 : index
    %1018 = memref.load %arg1[%c7_322, %c5_323] : memref<8x8xf32, #tpu.memory_space<smem>>
    %1019 = vector.broadcast %1018 : f32 to vector<12x12xf32>
    %1020 = arith.mulf %1019, %1017 : vector<12x12xf32>
    %1021 = arith.addf %1007, %1020 : vector<12x12xf32>
    %1022 = vector.extract_strided_slice %935 {offsets = [0, 6], sizes = [12, 1], strides = [1, 1]} : vector<12x8xf32> to vector<12x1xf32>
    %1023 = vector.extract_strided_slice %936 {offsets = [6, 0], sizes = [1, 12], strides = [1, 1]} : vector<8x12xf32> to vector<1x12xf32>
    %1024 = vector.broadcast %1022 : vector<12x1xf32> to vector<12x12xf32>
    %1025 = vector.broadcast %1023 : vector<1x12xf32> to vector<12x12xf32>
    %1026 = arith.addf %1024, %1025 : vector<12x12xf32>
    %cst_324 = arith.constant 0.000000e+00 : f32
    %1027 = vector.broadcast %cst_324 : f32 to vector<12x12xf32>
    %1028 = arith.cmpf ogt, %1026, %1027 : vector<12x12xf32>
    %cst_325 = arith.constant 2.000000e-01 : f32
    %1029 = vector.broadcast %cst_325 : f32 to vector<12x12xf32>
    %1030 = arith.mulf %1029, %1026 : vector<12x12xf32>
    %1031 = arith.select %1028, %1026, %1030 : vector<12x12xi1>, vector<12x12xf32>
    %c7_326 = arith.constant 7 : index
    %c6_327 = arith.constant 6 : index
    %1032 = memref.load %arg1[%c7_326, %c6_327] : memref<8x8xf32, #tpu.memory_space<smem>>
    %1033 = vector.broadcast %1032 : f32 to vector<12x12xf32>
    %1034 = arith.mulf %1033, %1031 : vector<12x12xf32>
    %1035 = arith.addf %1021, %1034 : vector<12x12xf32>
    %1036 = vector.extract_strided_slice %935 {offsets = [0, 7], sizes = [12, 1], strides = [1, 1]} : vector<12x8xf32> to vector<12x1xf32>
    %1037 = vector.extract_strided_slice %936 {offsets = [7, 0], sizes = [1, 12], strides = [1, 1]} : vector<8x12xf32> to vector<1x12xf32>
    %1038 = vector.broadcast %1036 : vector<12x1xf32> to vector<12x12xf32>
    %1039 = vector.broadcast %1037 : vector<1x12xf32> to vector<12x12xf32>
    %1040 = arith.addf %1038, %1039 : vector<12x12xf32>
    %cst_328 = arith.constant 0.000000e+00 : f32
    %1041 = vector.broadcast %cst_328 : f32 to vector<12x12xf32>
    %1042 = arith.cmpf ogt, %1040, %1041 : vector<12x12xf32>
    %cst_329 = arith.constant 2.000000e-01 : f32
    %1043 = vector.broadcast %cst_329 : f32 to vector<12x12xf32>
    %1044 = arith.mulf %1043, %1040 : vector<12x12xf32>
    %1045 = arith.select %1042, %1040, %1044 : vector<12x12xi1>, vector<12x12xf32>
    %c7_330 = arith.constant 7 : index
    %c7_331 = arith.constant 7 : index
    %1046 = memref.load %arg1[%c7_330, %c7_331] : memref<8x8xf32, #tpu.memory_space<smem>>
    %1047 = vector.broadcast %1046 : f32 to vector<12x12xf32>
    %1048 = arith.mulf %1047, %1045 : vector<12x12xf32>
    %1049 = arith.addf %1035, %1048 : vector<12x12xf32>
    %cst_332 = arith.constant -1.000000e+30 : f32
    %1050 = vector.broadcast %cst_332 : f32 to vector<12x12xf32>
    %1051 = arith.select %3, %1050, %1049 : vector<12x12xi1>, vector<12x12xf32>
    %cst_333 = arith.constant dense<0xFF800000> : vector<12xf32>
    %1052 = vector.multi_reduction <maximumf>, %1051, %cst_333 [1] : vector<12x12xf32> to vector<12xf32>
    %1053 = vector.shape_cast %1052 : vector<12xf32> to vector<12x1xf32>
    %1054 = vector.broadcast %1053 : vector<12x1xf32> to vector<12x12xf32>
    %1055 = arith.subf %1051, %1054 : vector<12x12xf32>
    %1056 = math.exp %1055 : vector<12x12xf32>
    %cst_334 = arith.constant 0.000000e+00 : f32
    %1057 = vector.broadcast %cst_334 : f32 to vector<12x12xf32>
    %1058 = arith.select %3, %1057, %1056 : vector<12x12xi1>, vector<12x12xf32>
    %cst_335 = arith.constant dense<0.000000e+00> : vector<12xf32>
    %1059 = vector.multi_reduction <add>, %1058, %cst_335 [1] : vector<12x12xf32> to vector<12xf32>
    %1060 = vector.shape_cast %1059 : vector<12xf32> to vector<12x1xf32>
    %1061 = tpu.reciprocal %1060 {approx = true} : vector<12x1xf32> -> vector<12x1xf32>
    %1062 = vector.broadcast %1061 : vector<12x1xf32> to vector<12x12xf32>
    %1063 = arith.mulf %1058, %1062 : vector<12x12xf32>
    %c0_336 = arith.constant 0 : index
    %c56_337 = arith.constant 56 : index
    %1064 = vector.load %arg3[%c0_336, %c56_337] : memref<12x64xf32, #tpu.memory_space<vmem>>, vector<12x8xf32>
    %1065 = arith.truncf %1063 : vector<12x12xf32> to vector<12x12xbf16>
    %1066 = arith.truncf %1064 : vector<12x8xf32> to vector<12x8xbf16>
    %cst_338 = arith.constant dense<0.000000e+00> : vector<12x8xf32>
    %1067 = tpu.matmul %1065, %1066, %cst_338 {dimension_numbers = #tpu.dot_dimension_numbers<[1], [0], [0], [1], [0, 0, 1, 1], [], []>} : vector<12x12xbf16>, vector<12x8xbf16>, vector<12x8xf32> -> vector<12x8xf32>
    %1068 = tpu.concatenate %136, %269, %402, %535, %668, %801, %934, %1067 in 1 : vector<12x8xf32>, vector<12x8xf32>, vector<12x8xf32>, vector<12x8xf32>, vector<12x8xf32>, vector<12x8xf32>, vector<12x8xf32>, vector<12x8xf32> -> vector<12x64xf32>
    %c0_339 = arith.constant 0 : index
    %c0_340 = arith.constant 0 : index
    %1069 = vector.load %arg6[%c0_339, %c0_340] : memref<1x64xf32, #tpu.memory_space<vmem>>, vector<1x64xf32>
    %1070 = vector.broadcast %1069 : vector<1x64xf32> to vector<12x64xf32>
    %1071 = arith.addf %1068, %1070 : vector<12x64xf32>
    %cst_341 = arith.constant 0.000000e+00 : f32
    %1072 = vector.broadcast %cst_341 : f32 to vector<12x64xf32>
    %1073 = arith.cmpf ogt, %1071, %1072 : vector<12x64xf32>
    %1074 = math.exp %1071 : vector<12x64xf32>
    %cst_342 = arith.constant 1.000000e+00 : f32
    %1075 = vector.broadcast %cst_342 : f32 to vector<12x64xf32>
    %1076 = arith.subf %1074, %1075 : vector<12x64xf32>
    %1077 = arith.select %1073, %1071, %1076 : vector<12x64xi1>, vector<12x64xf32>
    %c0_343 = arith.constant 0 : index
    %c0_344 = arith.constant 0 : index
    %1078 = vector.load %arg7[%c0_343, %c0_344] : memref<12x64xf32, #tpu.memory_space<vmem>>, vector<12x64xf32>
    tpu.vector_store %arg7[%c0_343, %c0_344], %1077 {strides = array<i32>} : memref<12x64xf32, #tpu.memory_space<vmem>>, vector<12x64xf32>,
    return
  }
  func.func @transform_0(%arg0: i32) -> (i32, i32) {
    %c0_i32 = arith.constant 0 : i32
    %c0_i32_0 = arith.constant 0 : i32
    %c0_i32_1 = arith.constant 0 : i32
    return %c0_i32, %c0_i32_0 : i32, i32
  }
  func.func @transform_1(%arg0: i32) -> (i32, i32) {
    %c0_i32 = arith.constant 0 : i32
    %c0_i32_0 = arith.constant 0 : i32
    return %arg0, %c0_i32 : i32, i32
  }
  func.func @transform_2(%arg0: i32) -> (i32, i32) {
    %c0_i32 = arith.constant 0 : i32
    %c0_i32_0 = arith.constant 0 : i32
    %c0_i32_1 = arith.constant 0 : i32
    return %c0_i32, %c0_i32_0 : i32, i32
  }
  func.func @transform_3(%arg0: i32) -> (i32, i32) {
    %c0_i32 = arith.constant 0 : i32
    %c0_i32_0 = arith.constant 0 : i32
    %c0_i32_1 = arith.constant 0 : i32
    return %c0_i32, %c0_i32_0 : i32, i32
  }
  func.func @transform_4(%arg0: i32) -> (i32, i32) {
    %c0_i32 = arith.constant 0 : i32
    %c0_i32_0 = arith.constant 0 : i32
    return %arg0, %c0_i32 : i32, i32
  }
  func.func @transform_5(%arg0: i32) -> (i32, i32) {
    %c0_i32 = arith.constant 0 : i32
    %c0_i32_0 = arith.constant 0 : i32
    %c0_i32_1 = arith.constant 0 : i32
    return %c0_i32, %c0_i32_0 : i32, i32
  }
  func.func @transform_6(%arg0: i32) -> (i32, i32) {
    %c0_i32 = arith.constant 0 : i32
    %c0_i32_0 = arith.constant 0 : i32
    return %arg0, %c0_i32 : i32, i32
  }
}

module attributes {stable_mosaic.version = 11 : i64} {
  func.func @_proj_kernel(%arg0: i32, %arg1: memref<12x64xf32, #tpu.memory_space<vmem>>, %arg2: memref<64x64xf32, #tpu.memory_space<vmem>>, %arg3: memref<1x64xf32, #tpu.memory_space<vmem>>, %arg4: memref<12x64xf32, #tpu.memory_space<vmem>>) attributes {dimension_semantics = [#tpu.dimension_semantics<parallel>], iteration_bounds = array<i64: 1>, scalar_prefetch = 0 : i64, scratch_operands = 0 : i64, tpu.core_type = #tpu.core_type<tc>, window_params = [{transform_indices = @transform_0, window_bounds = array<i64: 12, 64>}, {pipeline_mode = #tpu.pipeline_mode<synchronous>, transform_indices = @transform_1, window_bounds = array<i64: 64, 64>}, {pipeline_mode = #tpu.pipeline_mode<synchronous>, transform_indices = @transform_2, window_bounds = array<i64: 1, 64>}, {transform_indices = @transform_3, window_bounds = array<i64: 12, 64>}]} {
    %c0 = arith.constant 0 : index
    %c0_0 = arith.constant 0 : index
    %0 = vector.load %arg1[%c0, %c0_0] : memref<12x64xf32, #tpu.memory_space<vmem>>, vector<12x64xf32>
    %1 = arith.truncf %0 : vector<12x64xf32> to vector<12x64xbf16>
    %c0_1 = arith.constant 0 : index
    %c0_2 = arith.constant 0 : index
    %2 = vector.load %arg2[%c0_1, %c0_2] : memref<64x64xf32, #tpu.memory_space<vmem>>, vector<64x64xf32>
    %3 = arith.truncf %2 : vector<64x64xf32> to vector<64x64xbf16>
    %cst = arith.constant dense<0.000000e+00> : vector<12x64xf32>
    %4 = tpu.matmul %1, %3, %cst {dimension_numbers = #tpu.dot_dimension_numbers<[1], [0], [0], [1], [0, 0, 1, 1], [], []>} : vector<12x64xbf16>, vector<64x64xbf16>, vector<12x64xf32> -> vector<12x64xf32>
    %c0_3 = arith.constant 0 : index
    %c0_4 = arith.constant 0 : index
    %5 = vector.load %arg3[%c0_3, %c0_4] : memref<1x64xf32, #tpu.memory_space<vmem>>, vector<1x64xf32>
    %6 = vector.broadcast %5 : vector<1x64xf32> to vector<12x64xf32>
    %7 = arith.addf %4, %6 : vector<12x64xf32>
    %c0_5 = arith.constant 0 : index
    %c0_6 = arith.constant 0 : index
    %8 = vector.load %arg4[%c0_5, %c0_6] : memref<12x64xf32, #tpu.memory_space<vmem>>, vector<12x64xf32>
    tpu.vector_store %arg4[%c0_5, %c0_6], %7 {strides = array<i32>} : memref<12x64xf32, #tpu.memory_space<vmem>>, vector<12x64xf32>,
    return
  }
  func.func @transform_0(%arg0: i32) -> (i32, i32) {
    %c0_i32 = arith.constant 0 : i32
    %c0_i32_0 = arith.constant 0 : i32
    return %arg0, %c0_i32 : i32, i32
  }
  func.func @transform_1(%arg0: i32) -> (i32, i32) {
    %c0_i32 = arith.constant 0 : i32
    %c0_i32_0 = arith.constant 0 : i32
    %c0_i32_1 = arith.constant 0 : i32
    return %c0_i32, %c0_i32_0 : i32, i32
  }
  func.func @transform_2(%arg0: i32) -> (i32, i32) {
    %c0_i32 = arith.constant 0 : i32
    %c0_i32_0 = arith.constant 0 : i32
    %c0_i32_1 = arith.constant 0 : i32
    return %c0_i32, %c0_i32_0 : i32, i32
  }
  func.func @transform_3(%arg0: i32) -> (i32, i32) {
    %c0_i32 = arith.constant 0 : i32
    %c0_i32_0 = arith.constant 0 : i32
    return %arg0, %c0_i32 : i32, i32
  }
}

module attributes {stable_mosaic.version = 11 : i64} {
  func.func @_gatv2_attn_kernel(%arg0: i32, %arg1: memref<8x4xf32, #tpu.memory_space<smem>>, %arg2: memref<12x32xf32, #tpu.memory_space<vmem>>, %arg3: memref<12x32xf32, #tpu.memory_space<vmem>>, %arg4: memref<32x12xf32, #tpu.memory_space<vmem>>, %arg5: memref<12x12xi8, #tpu.memory_space<vmem>>, %arg6: memref<1x32xf32, #tpu.memory_space<vmem>>, %arg7: memref<12x32xf32, #tpu.memory_space<vmem>>) attributes {dimension_semantics = [#tpu.dimension_semantics<parallel>], iteration_bounds = array<i64: 1>, scalar_prefetch = 0 : i64, scratch_operands = 0 : i64, tpu.core_type = #tpu.core_type<tc>, window_params = [{transform_indices = @transform_0, window_bounds = array<i64: 8, 4>}, {transform_indices = @transform_1, window_bounds = array<i64: 12, 32>}, {pipeline_mode = #tpu.pipeline_mode<synchronous>, transform_indices = @transform_2, window_bounds = array<i64: 12, 32>}, {pipeline_mode = #tpu.pipeline_mode<synchronous>, transform_indices = @transform_3, window_bounds = array<i64: 32, 12>}, {transform_indices = @transform_4, window_bounds = array<i64: 12, 12>}, {pipeline_mode = #tpu.pipeline_mode<synchronous>, transform_indices = @transform_5, window_bounds = array<i64: 1, 32>}, {transform_indices = @transform_6, window_bounds = array<i64: 12, 32>}]} {
    %c0 = arith.constant 0 : index
    %c0_0 = arith.constant 0 : index
    %0 = vector.load %arg5[%c0, %c0_0] : memref<12x12xi8, #tpu.memory_space<vmem>>, vector<12x12xi8>
    %1 = arith.sitofp %0 : vector<12x12xi8> to vector<12x12xf32>
    %cst = arith.constant 0.000000e+00 : f32
    %2 = vector.broadcast %cst : f32 to vector<12x12xf32>
    %3 = arith.cmpf oeq, %1, %2 : vector<12x12xf32>
    %c0_1 = arith.constant 0 : index
    %c0_2 = arith.constant 0 : index
    %4 = vector.load %arg2[%c0_1, %c0_2] : memref<12x32xf32, #tpu.memory_space<vmem>>, vector<12x4xf32>
    %c0_3 = arith.constant 0 : index
    %c0_4 = arith.constant 0 : index
    %5 = vector.load %arg4[%c0_3, %c0_4] : memref<32x12xf32, #tpu.memory_space<vmem>>, vector<4x12xf32>
    %cst_5 = arith.constant 0.000000e+00 : f32
    %6 = vector.broadcast %cst_5 : f32 to vector<12x12xf32>
    %7 = vector.extract_strided_slice %4 {offsets = [0, 0], sizes = [12, 1], strides = [1, 1]} : vector<12x4xf32> to vector<12x1xf32>
    %8 = vector.extract_strided_slice %5 {offsets = [0, 0], sizes = [1, 12], strides = [1, 1]} : vector<4x12xf32> to vector<1x12xf32>
    %9 = vector.broadcast %7 : vector<12x1xf32> to vector<12x12xf32>
    %10 = vector.broadcast %8 : vector<1x12xf32> to vector<12x12xf32>
    %11 = arith.addf %9, %10 : vector<12x12xf32>
    %cst_6 = arith.constant 0.000000e+00 : f32
    %12 = vector.broadcast %cst_6 : f32 to vector<12x12xf32>
    %13 = arith.cmpf ogt, %11, %12 : vector<12x12xf32>
    %cst_7 = arith.constant 2.000000e-01 : f32
    %14 = vector.broadcast %cst_7 : f32 to vector<12x12xf32>
    %15 = arith.mulf %14, %11 : vector<12x12xf32>
    %16 = arith.select %13, %11, %15 : vector<12x12xi1>, vector<12x12xf32>
    %c0_8 = arith.constant 0 : index
    %c0_9 = arith.constant 0 : index
    %17 = memref.load %arg1[%c0_8, %c0_9] : memref<8x4xf32, #tpu.memory_space<smem>>
    %18 = vector.broadcast %17 : f32 to vector<12x12xf32>
    %19 = arith.mulf %18, %16 : vector<12x12xf32>
    %20 = arith.addf %6, %19 : vector<12x12xf32>
    %21 = vector.extract_strided_slice %4 {offsets = [0, 1], sizes = [12, 1], strides = [1, 1]} : vector<12x4xf32> to vector<12x1xf32>
    %22 = vector.extract_strided_slice %5 {offsets = [1, 0], sizes = [1, 12], strides = [1, 1]} : vector<4x12xf32> to vector<1x12xf32>
    %23 = vector.broadcast %21 : vector<12x1xf32> to vector<12x12xf32>
    %24 = vector.broadcast %22 : vector<1x12xf32> to vector<12x12xf32>
    %25 = arith.addf %23, %24 : vector<12x12xf32>
    %cst_10 = arith.constant 0.000000e+00 : f32
    %26 = vector.broadcast %cst_10 : f32 to vector<12x12xf32>
    %27 = arith.cmpf ogt, %25, %26 : vector<12x12xf32>
    %cst_11 = arith.constant 2.000000e-01 : f32
    %28 = vector.broadcast %cst_11 : f32 to vector<12x12xf32>
    %29 = arith.mulf %28, %25 : vector<12x12xf32>
    %30 = arith.select %27, %25, %29 : vector<12x12xi1>, vector<12x12xf32>
    %c0_12 = arith.constant 0 : index
    %c1 = arith.constant 1 : index
    %31 = memref.load %arg1[%c0_12, %c1] : memref<8x4xf32, #tpu.memory_space<smem>>
    %32 = vector.broadcast %31 : f32 to vector<12x12xf32>
    %33 = arith.mulf %32, %30 : vector<12x12xf32>
    %34 = arith.addf %20, %33 : vector<12x12xf32>
    %35 = vector.extract_strided_slice %4 {offsets = [0, 2], sizes = [12, 1], strides = [1, 1]} : vector<12x4xf32> to vector<12x1xf32>
    %36 = vector.extract_strided_slice %5 {offsets = [2, 0], sizes = [1, 12], strides = [1, 1]} : vector<4x12xf32> to vector<1x12xf32>
    %37 = vector.broadcast %35 : vector<12x1xf32> to vector<12x12xf32>
    %38 = vector.broadcast %36 : vector<1x12xf32> to vector<12x12xf32>
    %39 = arith.addf %37, %38 : vector<12x12xf32>
    %cst_13 = arith.constant 0.000000e+00 : f32
    %40 = vector.broadcast %cst_13 : f32 to vector<12x12xf32>
    %41 = arith.cmpf ogt, %39, %40 : vector<12x12xf32>
    %cst_14 = arith.constant 2.000000e-01 : f32
    %42 = vector.broadcast %cst_14 : f32 to vector<12x12xf32>
    %43 = arith.mulf %42, %39 : vector<12x12xf32>
    %44 = arith.select %41, %39, %43 : vector<12x12xi1>, vector<12x12xf32>
    %c0_15 = arith.constant 0 : index
    %c2 = arith.constant 2 : index
    %45 = memref.load %arg1[%c0_15, %c2] : memref<8x4xf32, #tpu.memory_space<smem>>
    %46 = vector.broadcast %45 : f32 to vector<12x12xf32>
    %47 = arith.mulf %46, %44 : vector<12x12xf32>
    %48 = arith.addf %34, %47 : vector<12x12xf32>
    %49 = vector.extract_strided_slice %4 {offsets = [0, 3], sizes = [12, 1], strides = [1, 1]} : vector<12x4xf32> to vector<12x1xf32>
    %50 = vector.extract_strided_slice %5 {offsets = [3, 0], sizes = [1, 12], strides = [1, 1]} : vector<4x12xf32> to vector<1x12xf32>
    %51 = vector.broadcast %49 : vector<12x1xf32> to vector<12x12xf32>
    %52 = vector.broadcast %50 : vector<1x12xf32> to vector<12x12xf32>
    %53 = arith.addf %51, %52 : vector<12x12xf32>
    %cst_16 = arith.constant 0.000000e+00 : f32
    %54 = vector.broadcast %cst_16 : f32 to vector<12x12xf32>
    %55 = arith.cmpf ogt, %53, %54 : vector<12x12xf32>
    %cst_17 = arith.constant 2.000000e-01 : f32
    %56 = vector.broadcast %cst_17 : f32 to vector<12x12xf32>
    %57 = arith.mulf %56, %53 : vector<12x12xf32>
    %58 = arith.select %55, %53, %57 : vector<12x12xi1>, vector<12x12xf32>
    %c0_18 = arith.constant 0 : index
    %c3 = arith.constant 3 : index
    %59 = memref.load %arg1[%c0_18, %c3] : memref<8x4xf32, #tpu.memory_space<smem>>
    %60 = vector.broadcast %59 : f32 to vector<12x12xf32>
    %61 = arith.mulf %60, %58 : vector<12x12xf32>
    %62 = arith.addf %48, %61 : vector<12x12xf32>
    %cst_19 = arith.constant -1.000000e+30 : f32
    %63 = vector.broadcast %cst_19 : f32 to vector<12x12xf32>
    %64 = arith.select %3, %63, %62 : vector<12x12xi1>, vector<12x12xf32>
    %cst_20 = arith.constant dense<0xFF800000> : vector<12xf32>
    %65 = vector.multi_reduction <maximumf>, %64, %cst_20 [1] : vector<12x12xf32> to vector<12xf32>
    %66 = vector.shape_cast %65 : vector<12xf32> to vector<12x1xf32>
    %67 = vector.broadcast %66 : vector<12x1xf32> to vector<12x12xf32>
    %68 = arith.subf %64, %67 : vector<12x12xf32>
    %69 = math.exp %68 : vector<12x12xf32>
    %cst_21 = arith.constant 0.000000e+00 : f32
    %70 = vector.broadcast %cst_21 : f32 to vector<12x12xf32>
    %71 = arith.select %3, %70, %69 : vector<12x12xi1>, vector<12x12xf32>
    %cst_22 = arith.constant dense<0.000000e+00> : vector<12xf32>
    %72 = vector.multi_reduction <add>, %71, %cst_22 [1] : vector<12x12xf32> to vector<12xf32>
    %73 = vector.shape_cast %72 : vector<12xf32> to vector<12x1xf32>
    %74 = tpu.reciprocal %73 {approx = true} : vector<12x1xf32> -> vector<12x1xf32>
    %75 = vector.broadcast %74 : vector<12x1xf32> to vector<12x12xf32>
    %76 = arith.mulf %71, %75 : vector<12x12xf32>
    %c0_23 = arith.constant 0 : index
    %c0_24 = arith.constant 0 : index
    %77 = vector.load %arg3[%c0_23, %c0_24] : memref<12x32xf32, #tpu.memory_space<vmem>>, vector<12x4xf32>
    %78 = arith.truncf %76 : vector<12x12xf32> to vector<12x12xbf16>
    %79 = arith.truncf %77 : vector<12x4xf32> to vector<12x4xbf16>
    %cst_25 = arith.constant dense<0.000000e+00> : vector<12x4xf32>
    %80 = tpu.matmul %78, %79, %cst_25 {dimension_numbers = #tpu.dot_dimension_numbers<[1], [0], [0], [1], [0, 0, 1, 1], [], []>} : vector<12x12xbf16>, vector<12x4xbf16>, vector<12x4xf32> -> vector<12x4xf32>
    %c0_26 = arith.constant 0 : index
    %c4 = arith.constant 4 : index
    %81 = vector.load %arg2[%c0_26, %c4] : memref<12x32xf32, #tpu.memory_space<vmem>>, vector<12x4xf32>
    %c4_27 = arith.constant 4 : index
    %c0_28 = arith.constant 0 : index
    %82 = vector.load %arg4[%c4_27, %c0_28] : memref<32x12xf32, #tpu.memory_space<vmem>>, vector<4x12xf32>
    %cst_29 = arith.constant 0.000000e+00 : f32
    %83 = vector.broadcast %cst_29 : f32 to vector<12x12xf32>
    %84 = vector.extract_strided_slice %81 {offsets = [0, 0], sizes = [12, 1], strides = [1, 1]} : vector<12x4xf32> to vector<12x1xf32>
    %85 = vector.extract_strided_slice %82 {offsets = [0, 0], sizes = [1, 12], strides = [1, 1]} : vector<4x12xf32> to vector<1x12xf32>
    %86 = vector.broadcast %84 : vector<12x1xf32> to vector<12x12xf32>
    %87 = vector.broadcast %85 : vector<1x12xf32> to vector<12x12xf32>
    %88 = arith.addf %86, %87 : vector<12x12xf32>
    %cst_30 = arith.constant 0.000000e+00 : f32
    %89 = vector.broadcast %cst_30 : f32 to vector<12x12xf32>
    %90 = arith.cmpf ogt, %88, %89 : vector<12x12xf32>
    %cst_31 = arith.constant 2.000000e-01 : f32
    %91 = vector.broadcast %cst_31 : f32 to vector<12x12xf32>
    %92 = arith.mulf %91, %88 : vector<12x12xf32>
    %93 = arith.select %90, %88, %92 : vector<12x12xi1>, vector<12x12xf32>
    %c1_32 = arith.constant 1 : index
    %c0_33 = arith.constant 0 : index
    %94 = memref.load %arg1[%c1_32, %c0_33] : memref<8x4xf32, #tpu.memory_space<smem>>
    %95 = vector.broadcast %94 : f32 to vector<12x12xf32>
    %96 = arith.mulf %95, %93 : vector<12x12xf32>
    %97 = arith.addf %83, %96 : vector<12x12xf32>
    %98 = vector.extract_strided_slice %81 {offsets = [0, 1], sizes = [12, 1], strides = [1, 1]} : vector<12x4xf32> to vector<12x1xf32>
    %99 = vector.extract_strided_slice %82 {offsets = [1, 0], sizes = [1, 12], strides = [1, 1]} : vector<4x12xf32> to vector<1x12xf32>
    %100 = vector.broadcast %98 : vector<12x1xf32> to vector<12x12xf32>
    %101 = vector.broadcast %99 : vector<1x12xf32> to vector<12x12xf32>
    %102 = arith.addf %100, %101 : vector<12x12xf32>
    %cst_34 = arith.constant 0.000000e+00 : f32
    %103 = vector.broadcast %cst_34 : f32 to vector<12x12xf32>
    %104 = arith.cmpf ogt, %102, %103 : vector<12x12xf32>
    %cst_35 = arith.constant 2.000000e-01 : f32
    %105 = vector.broadcast %cst_35 : f32 to vector<12x12xf32>
    %106 = arith.mulf %105, %102 : vector<12x12xf32>
    %107 = arith.select %104, %102, %106 : vector<12x12xi1>, vector<12x12xf32>
    %c1_36 = arith.constant 1 : index
    %c1_37 = arith.constant 1 : index
    %108 = memref.load %arg1[%c1_36, %c1_37] : memref<8x4xf32, #tpu.memory_space<smem>>
    %109 = vector.broadcast %108 : f32 to vector<12x12xf32>
    %110 = arith.mulf %109, %107 : vector<12x12xf32>
    %111 = arith.addf %97, %110 : vector<12x12xf32>
    %112 = vector.extract_strided_slice %81 {offsets = [0, 2], sizes = [12, 1], strides = [1, 1]} : vector<12x4xf32> to vector<12x1xf32>
    %113 = vector.extract_strided_slice %82 {offsets = [2, 0], sizes = [1, 12], strides = [1, 1]} : vector<4x12xf32> to vector<1x12xf32>
    %114 = vector.broadcast %112 : vector<12x1xf32> to vector<12x12xf32>
    %115 = vector.broadcast %113 : vector<1x12xf32> to vector<12x12xf32>
    %116 = arith.addf %114, %115 : vector<12x12xf32>
    %cst_38 = arith.constant 0.000000e+00 : f32
    %117 = vector.broadcast %cst_38 : f32 to vector<12x12xf32>
    %118 = arith.cmpf ogt, %116, %117 : vector<12x12xf32>
    %cst_39 = arith.constant 2.000000e-01 : f32
    %119 = vector.broadcast %cst_39 : f32 to vector<12x12xf32>
    %120 = arith.mulf %119, %116 : vector<12x12xf32>
    %121 = arith.select %118, %116, %120 : vector<12x12xi1>, vector<12x12xf32>
    %c1_40 = arith.constant 1 : index
    %c2_41 = arith.constant 2 : index
    %122 = memref.load %arg1[%c1_40, %c2_41] : memref<8x4xf32, #tpu.memory_space<smem>>
    %123 = vector.broadcast %122 : f32 to vector<12x12xf32>
    %124 = arith.mulf %123, %121 : vector<12x12xf32>
    %125 = arith.addf %111, %124 : vector<12x12xf32>
    %126 = vector.extract_strided_slice %81 {offsets = [0, 3], sizes = [12, 1], strides = [1, 1]} : vector<12x4xf32> to vector<12x1xf32>
    %127 = vector.extract_strided_slice %82 {offsets = [3, 0], sizes = [1, 12], strides = [1, 1]} : vector<4x12xf32> to vector<1x12xf32>
    %128 = vector.broadcast %126 : vector<12x1xf32> to vector<12x12xf32>
    %129 = vector.broadcast %127 : vector<1x12xf32> to vector<12x12xf32>
    %130 = arith.addf %128, %129 : vector<12x12xf32>
    %cst_42 = arith.constant 0.000000e+00 : f32
    %131 = vector.broadcast %cst_42 : f32 to vector<12x12xf32>
    %132 = arith.cmpf ogt, %130, %131 : vector<12x12xf32>
    %cst_43 = arith.constant 2.000000e-01 : f32
    %133 = vector.broadcast %cst_43 : f32 to vector<12x12xf32>
    %134 = arith.mulf %133, %130 : vector<12x12xf32>
    %135 = arith.select %132, %130, %134 : vector<12x12xi1>, vector<12x12xf32>
    %c1_44 = arith.constant 1 : index
    %c3_45 = arith.constant 3 : index
    %136 = memref.load %arg1[%c1_44, %c3_45] : memref<8x4xf32, #tpu.memory_space<smem>>
    %137 = vector.broadcast %136 : f32 to vector<12x12xf32>
    %138 = arith.mulf %137, %135 : vector<12x12xf32>
    %139 = arith.addf %125, %138 : vector<12x12xf32>
    %cst_46 = arith.constant -1.000000e+30 : f32
    %140 = vector.broadcast %cst_46 : f32 to vector<12x12xf32>
    %141 = arith.select %3, %140, %139 : vector<12x12xi1>, vector<12x12xf32>
    %cst_47 = arith.constant dense<0xFF800000> : vector<12xf32>
    %142 = vector.multi_reduction <maximumf>, %141, %cst_47 [1] : vector<12x12xf32> to vector<12xf32>
    %143 = vector.shape_cast %142 : vector<12xf32> to vector<12x1xf32>
    %144 = vector.broadcast %143 : vector<12x1xf32> to vector<12x12xf32>
    %145 = arith.subf %141, %144 : vector<12x12xf32>
    %146 = math.exp %145 : vector<12x12xf32>
    %cst_48 = arith.constant 0.000000e+00 : f32
    %147 = vector.broadcast %cst_48 : f32 to vector<12x12xf32>
    %148 = arith.select %3, %147, %146 : vector<12x12xi1>, vector<12x12xf32>
    %cst_49 = arith.constant dense<0.000000e+00> : vector<12xf32>
    %149 = vector.multi_reduction <add>, %148, %cst_49 [1] : vector<12x12xf32> to vector<12xf32>
    %150 = vector.shape_cast %149 : vector<12xf32> to vector<12x1xf32>
    %151 = tpu.reciprocal %150 {approx = true} : vector<12x1xf32> -> vector<12x1xf32>
    %152 = vector.broadcast %151 : vector<12x1xf32> to vector<12x12xf32>
    %153 = arith.mulf %148, %152 : vector<12x12xf32>
    %c0_50 = arith.constant 0 : index
    %c4_51 = arith.constant 4 : index
    %154 = vector.load %arg3[%c0_50, %c4_51] : memref<12x32xf32, #tpu.memory_space<vmem>>, vector<12x4xf32>
    %155 = arith.truncf %153 : vector<12x12xf32> to vector<12x12xbf16>
    %156 = arith.truncf %154 : vector<12x4xf32> to vector<12x4xbf16>
    %cst_52 = arith.constant dense<0.000000e+00> : vector<12x4xf32>
    %157 = tpu.matmul %155, %156, %cst_52 {dimension_numbers = #tpu.dot_dimension_numbers<[1], [0], [0], [1], [0, 0, 1, 1], [], []>} : vector<12x12xbf16>, vector<12x4xbf16>, vector<12x4xf32> -> vector<12x4xf32>
    %c0_53 = arith.constant 0 : index
    %c8 = arith.constant 8 : index
    %158 = vector.load %arg2[%c0_53, %c8] : memref<12x32xf32, #tpu.memory_space<vmem>>, vector<12x4xf32>
    %c8_54 = arith.constant 8 : index
    %c0_55 = arith.constant 0 : index
    %159 = vector.load %arg4[%c8_54, %c0_55] : memref<32x12xf32, #tpu.memory_space<vmem>>, vector<4x12xf32>
    %cst_56 = arith.constant 0.000000e+00 : f32
    %160 = vector.broadcast %cst_56 : f32 to vector<12x12xf32>
    %161 = vector.extract_strided_slice %158 {offsets = [0, 0], sizes = [12, 1], strides = [1, 1]} : vector<12x4xf32> to vector<12x1xf32>
    %162 = vector.extract_strided_slice %159 {offsets = [0, 0], sizes = [1, 12], strides = [1, 1]} : vector<4x12xf32> to vector<1x12xf32>
    %163 = vector.broadcast %161 : vector<12x1xf32> to vector<12x12xf32>
    %164 = vector.broadcast %162 : vector<1x12xf32> to vector<12x12xf32>
    %165 = arith.addf %163, %164 : vector<12x12xf32>
    %cst_57 = arith.constant 0.000000e+00 : f32
    %166 = vector.broadcast %cst_57 : f32 to vector<12x12xf32>
    %167 = arith.cmpf ogt, %165, %166 : vector<12x12xf32>
    %cst_58 = arith.constant 2.000000e-01 : f32
    %168 = vector.broadcast %cst_58 : f32 to vector<12x12xf32>
    %169 = arith.mulf %168, %165 : vector<12x12xf32>
    %170 = arith.select %167, %165, %169 : vector<12x12xi1>, vector<12x12xf32>
    %c2_59 = arith.constant 2 : index
    %c0_60 = arith.constant 0 : index
    %171 = memref.load %arg1[%c2_59, %c0_60] : memref<8x4xf32, #tpu.memory_space<smem>>
    %172 = vector.broadcast %171 : f32 to vector<12x12xf32>
    %173 = arith.mulf %172, %170 : vector<12x12xf32>
    %174 = arith.addf %160, %173 : vector<12x12xf32>
    %175 = vector.extract_strided_slice %158 {offsets = [0, 1], sizes = [12, 1], strides = [1, 1]} : vector<12x4xf32> to vector<12x1xf32>
    %176 = vector.extract_strided_slice %159 {offsets = [1, 0], sizes = [1, 12], strides = [1, 1]} : vector<4x12xf32> to vector<1x12xf32>
    %177 = vector.broadcast %175 : vector<12x1xf32> to vector<12x12xf32>
    %178 = vector.broadcast %176 : vector<1x12xf32> to vector<12x12xf32>
    %179 = arith.addf %177, %178 : vector<12x12xf32>
    %cst_61 = arith.constant 0.000000e+00 : f32
    %180 = vector.broadcast %cst_61 : f32 to vector<12x12xf32>
    %181 = arith.cmpf ogt, %179, %180 : vector<12x12xf32>
    %cst_62 = arith.constant 2.000000e-01 : f32
    %182 = vector.broadcast %cst_62 : f32 to vector<12x12xf32>
    %183 = arith.mulf %182, %179 : vector<12x12xf32>
    %184 = arith.select %181, %179, %183 : vector<12x12xi1>, vector<12x12xf32>
    %c2_63 = arith.constant 2 : index
    %c1_64 = arith.constant 1 : index
    %185 = memref.load %arg1[%c2_63, %c1_64] : memref<8x4xf32, #tpu.memory_space<smem>>
    %186 = vector.broadcast %185 : f32 to vector<12x12xf32>
    %187 = arith.mulf %186, %184 : vector<12x12xf32>
    %188 = arith.addf %174, %187 : vector<12x12xf32>
    %189 = vector.extract_strided_slice %158 {offsets = [0, 2], sizes = [12, 1], strides = [1, 1]} : vector<12x4xf32> to vector<12x1xf32>
    %190 = vector.extract_strided_slice %159 {offsets = [2, 0], sizes = [1, 12], strides = [1, 1]} : vector<4x12xf32> to vector<1x12xf32>
    %191 = vector.broadcast %189 : vector<12x1xf32> to vector<12x12xf32>
    %192 = vector.broadcast %190 : vector<1x12xf32> to vector<12x12xf32>
    %193 = arith.addf %191, %192 : vector<12x12xf32>
    %cst_65 = arith.constant 0.000000e+00 : f32
    %194 = vector.broadcast %cst_65 : f32 to vector<12x12xf32>
    %195 = arith.cmpf ogt, %193, %194 : vector<12x12xf32>
    %cst_66 = arith.constant 2.000000e-01 : f32
    %196 = vector.broadcast %cst_66 : f32 to vector<12x12xf32>
    %197 = arith.mulf %196, %193 : vector<12x12xf32>
    %198 = arith.select %195, %193, %197 : vector<12x12xi1>, vector<12x12xf32>
    %c2_67 = arith.constant 2 : index
    %c2_68 = arith.constant 2 : index
    %199 = memref.load %arg1[%c2_67, %c2_68] : memref<8x4xf32, #tpu.memory_space<smem>>
    %200 = vector.broadcast %199 : f32 to vector<12x12xf32>
    %201 = arith.mulf %200, %198 : vector<12x12xf32>
    %202 = arith.addf %188, %201 : vector<12x12xf32>
    %203 = vector.extract_strided_slice %158 {offsets = [0, 3], sizes = [12, 1], strides = [1, 1]} : vector<12x4xf32> to vector<12x1xf32>
    %204 = vector.extract_strided_slice %159 {offsets = [3, 0], sizes = [1, 12], strides = [1, 1]} : vector<4x12xf32> to vector<1x12xf32>
    %205 = vector.broadcast %203 : vector<12x1xf32> to vector<12x12xf32>
    %206 = vector.broadcast %204 : vector<1x12xf32> to vector<12x12xf32>
    %207 = arith.addf %205, %206 : vector<12x12xf32>
    %cst_69 = arith.constant 0.000000e+00 : f32
    %208 = vector.broadcast %cst_69 : f32 to vector<12x12xf32>
    %209 = arith.cmpf ogt, %207, %208 : vector<12x12xf32>
    %cst_70 = arith.constant 2.000000e-01 : f32
    %210 = vector.broadcast %cst_70 : f32 to vector<12x12xf32>
    %211 = arith.mulf %210, %207 : vector<12x12xf32>
    %212 = arith.select %209, %207, %211 : vector<12x12xi1>, vector<12x12xf32>
    %c2_71 = arith.constant 2 : index
    %c3_72 = arith.constant 3 : index
    %213 = memref.load %arg1[%c2_71, %c3_72] : memref<8x4xf32, #tpu.memory_space<smem>>
    %214 = vector.broadcast %213 : f32 to vector<12x12xf32>
    %215 = arith.mulf %214, %212 : vector<12x12xf32>
    %216 = arith.addf %202, %215 : vector<12x12xf32>
    %cst_73 = arith.constant -1.000000e+30 : f32
    %217 = vector.broadcast %cst_73 : f32 to vector<12x12xf32>
    %218 = arith.select %3, %217, %216 : vector<12x12xi1>, vector<12x12xf32>
    %cst_74 = arith.constant dense<0xFF800000> : vector<12xf32>
    %219 = vector.multi_reduction <maximumf>, %218, %cst_74 [1] : vector<12x12xf32> to vector<12xf32>
    %220 = vector.shape_cast %219 : vector<12xf32> to vector<12x1xf32>
    %221 = vector.broadcast %220 : vector<12x1xf32> to vector<12x12xf32>
    %222 = arith.subf %218, %221 : vector<12x12xf32>
    %223 = math.exp %222 : vector<12x12xf32>
    %cst_75 = arith.constant 0.000000e+00 : f32
    %224 = vector.broadcast %cst_75 : f32 to vector<12x12xf32>
    %225 = arith.select %3, %224, %223 : vector<12x12xi1>, vector<12x12xf32>
    %cst_76 = arith.constant dense<0.000000e+00> : vector<12xf32>
    %226 = vector.multi_reduction <add>, %225, %cst_76 [1] : vector<12x12xf32> to vector<12xf32>
    %227 = vector.shape_cast %226 : vector<12xf32> to vector<12x1xf32>
    %228 = tpu.reciprocal %227 {approx = true} : vector<12x1xf32> -> vector<12x1xf32>
    %229 = vector.broadcast %228 : vector<12x1xf32> to vector<12x12xf32>
    %230 = arith.mulf %225, %229 : vector<12x12xf32>
    %c0_77 = arith.constant 0 : index
    %c8_78 = arith.constant 8 : index
    %231 = vector.load %arg3[%c0_77, %c8_78] : memref<12x32xf32, #tpu.memory_space<vmem>>, vector<12x4xf32>
    %232 = arith.truncf %230 : vector<12x12xf32> to vector<12x12xbf16>
    %233 = arith.truncf %231 : vector<12x4xf32> to vector<12x4xbf16>
    %cst_79 = arith.constant dense<0.000000e+00> : vector<12x4xf32>
    %234 = tpu.matmul %232, %233, %cst_79 {dimension_numbers = #tpu.dot_dimension_numbers<[1], [0], [0], [1], [0, 0, 1, 1], [], []>} : vector<12x12xbf16>, vector<12x4xbf16>, vector<12x4xf32> -> vector<12x4xf32>
    %c0_80 = arith.constant 0 : index
    %c12 = arith.constant 12 : index
    %235 = vector.load %arg2[%c0_80, %c12] : memref<12x32xf32, #tpu.memory_space<vmem>>, vector<12x4xf32>
    %c12_81 = arith.constant 12 : index
    %c0_82 = arith.constant 0 : index
    %236 = vector.load %arg4[%c12_81, %c0_82] : memref<32x12xf32, #tpu.memory_space<vmem>>, vector<4x12xf32>
    %cst_83 = arith.constant 0.000000e+00 : f32
    %237 = vector.broadcast %cst_83 : f32 to vector<12x12xf32>
    %238 = vector.extract_strided_slice %235 {offsets = [0, 0], sizes = [12, 1], strides = [1, 1]} : vector<12x4xf32> to vector<12x1xf32>
    %239 = vector.extract_strided_slice %236 {offsets = [0, 0], sizes = [1, 12], strides = [1, 1]} : vector<4x12xf32> to vector<1x12xf32>
    %240 = vector.broadcast %238 : vector<12x1xf32> to vector<12x12xf32>
    %241 = vector.broadcast %239 : vector<1x12xf32> to vector<12x12xf32>
    %242 = arith.addf %240, %241 : vector<12x12xf32>
    %cst_84 = arith.constant 0.000000e+00 : f32
    %243 = vector.broadcast %cst_84 : f32 to vector<12x12xf32>
    %244 = arith.cmpf ogt, %242, %243 : vector<12x12xf32>
    %cst_85 = arith.constant 2.000000e-01 : f32
    %245 = vector.broadcast %cst_85 : f32 to vector<12x12xf32>
    %246 = arith.mulf %245, %242 : vector<12x12xf32>
    %247 = arith.select %244, %242, %246 : vector<12x12xi1>, vector<12x12xf32>
    %c3_86 = arith.constant 3 : index
    %c0_87 = arith.constant 0 : index
    %248 = memref.load %arg1[%c3_86, %c0_87] : memref<8x4xf32, #tpu.memory_space<smem>>
    %249 = vector.broadcast %248 : f32 to vector<12x12xf32>
    %250 = arith.mulf %249, %247 : vector<12x12xf32>
    %251 = arith.addf %237, %250 : vector<12x12xf32>
    %252 = vector.extract_strided_slice %235 {offsets = [0, 1], sizes = [12, 1], strides = [1, 1]} : vector<12x4xf32> to vector<12x1xf32>
    %253 = vector.extract_strided_slice %236 {offsets = [1, 0], sizes = [1, 12], strides = [1, 1]} : vector<4x12xf32> to vector<1x12xf32>
    %254 = vector.broadcast %252 : vector<12x1xf32> to vector<12x12xf32>
    %255 = vector.broadcast %253 : vector<1x12xf32> to vector<12x12xf32>
    %256 = arith.addf %254, %255 : vector<12x12xf32>
    %cst_88 = arith.constant 0.000000e+00 : f32
    %257 = vector.broadcast %cst_88 : f32 to vector<12x12xf32>
    %258 = arith.cmpf ogt, %256, %257 : vector<12x12xf32>
    %cst_89 = arith.constant 2.000000e-01 : f32
    %259 = vector.broadcast %cst_89 : f32 to vector<12x12xf32>
    %260 = arith.mulf %259, %256 : vector<12x12xf32>
    %261 = arith.select %258, %256, %260 : vector<12x12xi1>, vector<12x12xf32>
    %c3_90 = arith.constant 3 : index
    %c1_91 = arith.constant 1 : index
    %262 = memref.load %arg1[%c3_90, %c1_91] : memref<8x4xf32, #tpu.memory_space<smem>>
    %263 = vector.broadcast %262 : f32 to vector<12x12xf32>
    %264 = arith.mulf %263, %261 : vector<12x12xf32>
    %265 = arith.addf %251, %264 : vector<12x12xf32>
    %266 = vector.extract_strided_slice %235 {offsets = [0, 2], sizes = [12, 1], strides = [1, 1]} : vector<12x4xf32> to vector<12x1xf32>
    %267 = vector.extract_strided_slice %236 {offsets = [2, 0], sizes = [1, 12], strides = [1, 1]} : vector<4x12xf32> to vector<1x12xf32>
    %268 = vector.broadcast %266 : vector<12x1xf32> to vector<12x12xf32>
    %269 = vector.broadcast %267 : vector<1x12xf32> to vector<12x12xf32>
    %270 = arith.addf %268, %269 : vector<12x12xf32>
    %cst_92 = arith.constant 0.000000e+00 : f32
    %271 = vector.broadcast %cst_92 : f32 to vector<12x12xf32>
    %272 = arith.cmpf ogt, %270, %271 : vector<12x12xf32>
    %cst_93 = arith.constant 2.000000e-01 : f32
    %273 = vector.broadcast %cst_93 : f32 to vector<12x12xf32>
    %274 = arith.mulf %273, %270 : vector<12x12xf32>
    %275 = arith.select %272, %270, %274 : vector<12x12xi1>, vector<12x12xf32>
    %c3_94 = arith.constant 3 : index
    %c2_95 = arith.constant 2 : index
    %276 = memref.load %arg1[%c3_94, %c2_95] : memref<8x4xf32, #tpu.memory_space<smem>>
    %277 = vector.broadcast %276 : f32 to vector<12x12xf32>
    %278 = arith.mulf %277, %275 : vector<12x12xf32>
    %279 = arith.addf %265, %278 : vector<12x12xf32>
    %280 = vector.extract_strided_slice %235 {offsets = [0, 3], sizes = [12, 1], strides = [1, 1]} : vector<12x4xf32> to vector<12x1xf32>
    %281 = vector.extract_strided_slice %236 {offsets = [3, 0], sizes = [1, 12], strides = [1, 1]} : vector<4x12xf32> to vector<1x12xf32>
    %282 = vector.broadcast %280 : vector<12x1xf32> to vector<12x12xf32>
    %283 = vector.broadcast %281 : vector<1x12xf32> to vector<12x12xf32>
    %284 = arith.addf %282, %283 : vector<12x12xf32>
    %cst_96 = arith.constant 0.000000e+00 : f32
    %285 = vector.broadcast %cst_96 : f32 to vector<12x12xf32>
    %286 = arith.cmpf ogt, %284, %285 : vector<12x12xf32>
    %cst_97 = arith.constant 2.000000e-01 : f32
    %287 = vector.broadcast %cst_97 : f32 to vector<12x12xf32>
    %288 = arith.mulf %287, %284 : vector<12x12xf32>
    %289 = arith.select %286, %284, %288 : vector<12x12xi1>, vector<12x12xf32>
    %c3_98 = arith.constant 3 : index
    %c3_99 = arith.constant 3 : index
    %290 = memref.load %arg1[%c3_98, %c3_99] : memref<8x4xf32, #tpu.memory_space<smem>>
    %291 = vector.broadcast %290 : f32 to vector<12x12xf32>
    %292 = arith.mulf %291, %289 : vector<12x12xf32>
    %293 = arith.addf %279, %292 : vector<12x12xf32>
    %cst_100 = arith.constant -1.000000e+30 : f32
    %294 = vector.broadcast %cst_100 : f32 to vector<12x12xf32>
    %295 = arith.select %3, %294, %293 : vector<12x12xi1>, vector<12x12xf32>
    %cst_101 = arith.constant dense<0xFF800000> : vector<12xf32>
    %296 = vector.multi_reduction <maximumf>, %295, %cst_101 [1] : vector<12x12xf32> to vector<12xf32>
    %297 = vector.shape_cast %296 : vector<12xf32> to vector<12x1xf32>
    %298 = vector.broadcast %297 : vector<12x1xf32> to vector<12x12xf32>
    %299 = arith.subf %295, %298 : vector<12x12xf32>
    %300 = math.exp %299 : vector<12x12xf32>
    %cst_102 = arith.constant 0.000000e+00 : f32
    %301 = vector.broadcast %cst_102 : f32 to vector<12x12xf32>
    %302 = arith.select %3, %301, %300 : vector<12x12xi1>, vector<12x12xf32>
    %cst_103 = arith.constant dense<0.000000e+00> : vector<12xf32>
    %303 = vector.multi_reduction <add>, %302, %cst_103 [1] : vector<12x12xf32> to vector<12xf32>
    %304 = vector.shape_cast %303 : vector<12xf32> to vector<12x1xf32>
    %305 = tpu.reciprocal %304 {approx = true} : vector<12x1xf32> -> vector<12x1xf32>
    %306 = vector.broadcast %305 : vector<12x1xf32> to vector<12x12xf32>
    %307 = arith.mulf %302, %306 : vector<12x12xf32>
    %c0_104 = arith.constant 0 : index
    %c12_105 = arith.constant 12 : index
    %308 = vector.load %arg3[%c0_104, %c12_105] : memref<12x32xf32, #tpu.memory_space<vmem>>, vector<12x4xf32>
    %309 = arith.truncf %307 : vector<12x12xf32> to vector<12x12xbf16>
    %310 = arith.truncf %308 : vector<12x4xf32> to vector<12x4xbf16>
    %cst_106 = arith.constant dense<0.000000e+00> : vector<12x4xf32>
    %311 = tpu.matmul %309, %310, %cst_106 {dimension_numbers = #tpu.dot_dimension_numbers<[1], [0], [0], [1], [0, 0, 1, 1], [], []>} : vector<12x12xbf16>, vector<12x4xbf16>, vector<12x4xf32> -> vector<12x4xf32>
    %c0_107 = arith.constant 0 : index
    %c16 = arith.constant 16 : index
    %312 = vector.load %arg2[%c0_107, %c16] : memref<12x32xf32, #tpu.memory_space<vmem>>, vector<12x4xf32>
    %c16_108 = arith.constant 16 : index
    %c0_109 = arith.constant 0 : index
    %313 = vector.load %arg4[%c16_108, %c0_109] : memref<32x12xf32, #tpu.memory_space<vmem>>, vector<4x12xf32>
    %cst_110 = arith.constant 0.000000e+00 : f32
    %314 = vector.broadcast %cst_110 : f32 to vector<12x12xf32>
    %315 = vector.extract_strided_slice %312 {offsets = [0, 0], sizes = [12, 1], strides = [1, 1]} : vector<12x4xf32> to vector<12x1xf32>
    %316 = vector.extract_strided_slice %313 {offsets = [0, 0], sizes = [1, 12], strides = [1, 1]} : vector<4x12xf32> to vector<1x12xf32>
    %317 = vector.broadcast %315 : vector<12x1xf32> to vector<12x12xf32>
    %318 = vector.broadcast %316 : vector<1x12xf32> to vector<12x12xf32>
    %319 = arith.addf %317, %318 : vector<12x12xf32>
    %cst_111 = arith.constant 0.000000e+00 : f32
    %320 = vector.broadcast %cst_111 : f32 to vector<12x12xf32>
    %321 = arith.cmpf ogt, %319, %320 : vector<12x12xf32>
    %cst_112 = arith.constant 2.000000e-01 : f32
    %322 = vector.broadcast %cst_112 : f32 to vector<12x12xf32>
    %323 = arith.mulf %322, %319 : vector<12x12xf32>
    %324 = arith.select %321, %319, %323 : vector<12x12xi1>, vector<12x12xf32>
    %c4_113 = arith.constant 4 : index
    %c0_114 = arith.constant 0 : index
    %325 = memref.load %arg1[%c4_113, %c0_114] : memref<8x4xf32, #tpu.memory_space<smem>>
    %326 = vector.broadcast %325 : f32 to vector<12x12xf32>
    %327 = arith.mulf %326, %324 : vector<12x12xf32>
    %328 = arith.addf %314, %327 : vector<12x12xf32>
    %329 = vector.extract_strided_slice %312 {offsets = [0, 1], sizes = [12, 1], strides = [1, 1]} : vector<12x4xf32> to vector<12x1xf32>
    %330 = vector.extract_strided_slice %313 {offsets = [1, 0], sizes = [1, 12], strides = [1, 1]} : vector<4x12xf32> to vector<1x12xf32>
    %331 = vector.broadcast %329 : vector<12x1xf32> to vector<12x12xf32>
    %332 = vector.broadcast %330 : vector<1x12xf32> to vector<12x12xf32>
    %333 = arith.addf %331, %332 : vector<12x12xf32>
    %cst_115 = arith.constant 0.000000e+00 : f32
    %334 = vector.broadcast %cst_115 : f32 to vector<12x12xf32>
    %335 = arith.cmpf ogt, %333, %334 : vector<12x12xf32>
    %cst_116 = arith.constant 2.000000e-01 : f32
    %336 = vector.broadcast %cst_116 : f32 to vector<12x12xf32>
    %337 = arith.mulf %336, %333 : vector<12x12xf32>
    %338 = arith.select %335, %333, %337 : vector<12x12xi1>, vector<12x12xf32>
    %c4_117 = arith.constant 4 : index
    %c1_118 = arith.constant 1 : index
    %339 = memref.load %arg1[%c4_117, %c1_118] : memref<8x4xf32, #tpu.memory_space<smem>>
    %340 = vector.broadcast %339 : f32 to vector<12x12xf32>
    %341 = arith.mulf %340, %338 : vector<12x12xf32>
    %342 = arith.addf %328, %341 : vector<12x12xf32>
    %343 = vector.extract_strided_slice %312 {offsets = [0, 2], sizes = [12, 1], strides = [1, 1]} : vector<12x4xf32> to vector<12x1xf32>
    %344 = vector.extract_strided_slice %313 {offsets = [2, 0], sizes = [1, 12], strides = [1, 1]} : vector<4x12xf32> to vector<1x12xf32>
    %345 = vector.broadcast %343 : vector<12x1xf32> to vector<12x12xf32>
    %346 = vector.broadcast %344 : vector<1x12xf32> to vector<12x12xf32>
    %347 = arith.addf %345, %346 : vector<12x12xf32>
    %cst_119 = arith.constant 0.000000e+00 : f32
    %348 = vector.broadcast %cst_119 : f32 to vector<12x12xf32>
    %349 = arith.cmpf ogt, %347, %348 : vector<12x12xf32>
    %cst_120 = arith.constant 2.000000e-01 : f32
    %350 = vector.broadcast %cst_120 : f32 to vector<12x12xf32>
    %351 = arith.mulf %350, %347 : vector<12x12xf32>
    %352 = arith.select %349, %347, %351 : vector<12x12xi1>, vector<12x12xf32>
    %c4_121 = arith.constant 4 : index
    %c2_122 = arith.constant 2 : index
    %353 = memref.load %arg1[%c4_121, %c2_122] : memref<8x4xf32, #tpu.memory_space<smem>>
    %354 = vector.broadcast %353 : f32 to vector<12x12xf32>
    %355 = arith.mulf %354, %352 : vector<12x12xf32>
    %356 = arith.addf %342, %355 : vector<12x12xf32>
    %357 = vector.extract_strided_slice %312 {offsets = [0, 3], sizes = [12, 1], strides = [1, 1]} : vector<12x4xf32> to vector<12x1xf32>
    %358 = vector.extract_strided_slice %313 {offsets = [3, 0], sizes = [1, 12], strides = [1, 1]} : vector<4x12xf32> to vector<1x12xf32>
    %359 = vector.broadcast %357 : vector<12x1xf32> to vector<12x12xf32>
    %360 = vector.broadcast %358 : vector<1x12xf32> to vector<12x12xf32>
    %361 = arith.addf %359, %360 : vector<12x12xf32>
    %cst_123 = arith.constant 0.000000e+00 : f32
    %362 = vector.broadcast %cst_123 : f32 to vector<12x12xf32>
    %363 = arith.cmpf ogt, %361, %362 : vector<12x12xf32>
    %cst_124 = arith.constant 2.000000e-01 : f32
    %364 = vector.broadcast %cst_124 : f32 to vector<12x12xf32>
    %365 = arith.mulf %364, %361 : vector<12x12xf32>
    %366 = arith.select %363, %361, %365 : vector<12x12xi1>, vector<12x12xf32>
    %c4_125 = arith.constant 4 : index
    %c3_126 = arith.constant 3 : index
    %367 = memref.load %arg1[%c4_125, %c3_126] : memref<8x4xf32, #tpu.memory_space<smem>>
    %368 = vector.broadcast %367 : f32 to vector<12x12xf32>
    %369 = arith.mulf %368, %366 : vector<12x12xf32>
    %370 = arith.addf %356, %369 : vector<12x12xf32>
    %cst_127 = arith.constant -1.000000e+30 : f32
    %371 = vector.broadcast %cst_127 : f32 to vector<12x12xf32>
    %372 = arith.select %3, %371, %370 : vector<12x12xi1>, vector<12x12xf32>
    %cst_128 = arith.constant dense<0xFF800000> : vector<12xf32>
    %373 = vector.multi_reduction <maximumf>, %372, %cst_128 [1] : vector<12x12xf32> to vector<12xf32>
    %374 = vector.shape_cast %373 : vector<12xf32> to vector<12x1xf32>
    %375 = vector.broadcast %374 : vector<12x1xf32> to vector<12x12xf32>
    %376 = arith.subf %372, %375 : vector<12x12xf32>
    %377 = math.exp %376 : vector<12x12xf32>
    %cst_129 = arith.constant 0.000000e+00 : f32
    %378 = vector.broadcast %cst_129 : f32 to vector<12x12xf32>
    %379 = arith.select %3, %378, %377 : vector<12x12xi1>, vector<12x12xf32>
    %cst_130 = arith.constant dense<0.000000e+00> : vector<12xf32>
    %380 = vector.multi_reduction <add>, %379, %cst_130 [1] : vector<12x12xf32> to vector<12xf32>
    %381 = vector.shape_cast %380 : vector<12xf32> to vector<12x1xf32>
    %382 = tpu.reciprocal %381 {approx = true} : vector<12x1xf32> -> vector<12x1xf32>
    %383 = vector.broadcast %382 : vector<12x1xf32> to vector<12x12xf32>
    %384 = arith.mulf %379, %383 : vector<12x12xf32>
    %c0_131 = arith.constant 0 : index
    %c16_132 = arith.constant 16 : index
    %385 = vector.load %arg3[%c0_131, %c16_132] : memref<12x32xf32, #tpu.memory_space<vmem>>, vector<12x4xf32>
    %386 = arith.truncf %384 : vector<12x12xf32> to vector<12x12xbf16>
    %387 = arith.truncf %385 : vector<12x4xf32> to vector<12x4xbf16>
    %cst_133 = arith.constant dense<0.000000e+00> : vector<12x4xf32>
    %388 = tpu.matmul %386, %387, %cst_133 {dimension_numbers = #tpu.dot_dimension_numbers<[1], [0], [0], [1], [0, 0, 1, 1], [], []>} : vector<12x12xbf16>, vector<12x4xbf16>, vector<12x4xf32> -> vector<12x4xf32>
    %c0_134 = arith.constant 0 : index
    %c20 = arith.constant 20 : index
    %389 = vector.load %arg2[%c0_134, %c20] : memref<12x32xf32, #tpu.memory_space<vmem>>, vector<12x4xf32>
    %c20_135 = arith.constant 20 : index
    %c0_136 = arith.constant 0 : index
    %390 = vector.load %arg4[%c20_135, %c0_136] : memref<32x12xf32, #tpu.memory_space<vmem>>, vector<4x12xf32>
    %cst_137 = arith.constant 0.000000e+00 : f32
    %391 = vector.broadcast %cst_137 : f32 to vector<12x12xf32>
    %392 = vector.extract_strided_slice %389 {offsets = [0, 0], sizes = [12, 1], strides = [1, 1]} : vector<12x4xf32> to vector<12x1xf32>
    %393 = vector.extract_strided_slice %390 {offsets = [0, 0], sizes = [1, 12], strides = [1, 1]} : vector<4x12xf32> to vector<1x12xf32>
    %394 = vector.broadcast %392 : vector<12x1xf32> to vector<12x12xf32>
    %395 = vector.broadcast %393 : vector<1x12xf32> to vector<12x12xf32>
    %396 = arith.addf %394, %395 : vector<12x12xf32>
    %cst_138 = arith.constant 0.000000e+00 : f32
    %397 = vector.broadcast %cst_138 : f32 to vector<12x12xf32>
    %398 = arith.cmpf ogt, %396, %397 : vector<12x12xf32>
    %cst_139 = arith.constant 2.000000e-01 : f32
    %399 = vector.broadcast %cst_139 : f32 to vector<12x12xf32>
    %400 = arith.mulf %399, %396 : vector<12x12xf32>
    %401 = arith.select %398, %396, %400 : vector<12x12xi1>, vector<12x12xf32>
    %c5 = arith.constant 5 : index
    %c0_140 = arith.constant 0 : index
    %402 = memref.load %arg1[%c5, %c0_140] : memref<8x4xf32, #tpu.memory_space<smem>>
    %403 = vector.broadcast %402 : f32 to vector<12x12xf32>
    %404 = arith.mulf %403, %401 : vector<12x12xf32>
    %405 = arith.addf %391, %404 : vector<12x12xf32>
    %406 = vector.extract_strided_slice %389 {offsets = [0, 1], sizes = [12, 1], strides = [1, 1]} : vector<12x4xf32> to vector<12x1xf32>
    %407 = vector.extract_strided_slice %390 {offsets = [1, 0], sizes = [1, 12], strides = [1, 1]} : vector<4x12xf32> to vector<1x12xf32>
    %408 = vector.broadcast %406 : vector<12x1xf32> to vector<12x12xf32>
    %409 = vector.broadcast %407 : vector<1x12xf32> to vector<12x12xf32>
    %410 = arith.addf %408, %409 : vector<12x12xf32>
    %cst_141 = arith.constant 0.000000e+00 : f32
    %411 = vector.broadcast %cst_141 : f32 to vector<12x12xf32>
    %412 = arith.cmpf ogt, %410, %411 : vector<12x12xf32>
    %cst_142 = arith.constant 2.000000e-01 : f32
    %413 = vector.broadcast %cst_142 : f32 to vector<12x12xf32>
    %414 = arith.mulf %413, %410 : vector<12x12xf32>
    %415 = arith.select %412, %410, %414 : vector<12x12xi1>, vector<12x12xf32>
    %c5_143 = arith.constant 5 : index
    %c1_144 = arith.constant 1 : index
    %416 = memref.load %arg1[%c5_143, %c1_144] : memref<8x4xf32, #tpu.memory_space<smem>>
    %417 = vector.broadcast %416 : f32 to vector<12x12xf32>
    %418 = arith.mulf %417, %415 : vector<12x12xf32>
    %419 = arith.addf %405, %418 : vector<12x12xf32>
    %420 = vector.extract_strided_slice %389 {offsets = [0, 2], sizes = [12, 1], strides = [1, 1]} : vector<12x4xf32> to vector<12x1xf32>
    %421 = vector.extract_strided_slice %390 {offsets = [2, 0], sizes = [1, 12], strides = [1, 1]} : vector<4x12xf32> to vector<1x12xf32>
    %422 = vector.broadcast %420 : vector<12x1xf32> to vector<12x12xf32>
    %423 = vector.broadcast %421 : vector<1x12xf32> to vector<12x12xf32>
    %424 = arith.addf %422, %423 : vector<12x12xf32>
    %cst_145 = arith.constant 0.000000e+00 : f32
    %425 = vector.broadcast %cst_145 : f32 to vector<12x12xf32>
    %426 = arith.cmpf ogt, %424, %425 : vector<12x12xf32>
    %cst_146 = arith.constant 2.000000e-01 : f32
    %427 = vector.broadcast %cst_146 : f32 to vector<12x12xf32>
    %428 = arith.mulf %427, %424 : vector<12x12xf32>
    %429 = arith.select %426, %424, %428 : vector<12x12xi1>, vector<12x12xf32>
    %c5_147 = arith.constant 5 : index
    %c2_148 = arith.constant 2 : index
    %430 = memref.load %arg1[%c5_147, %c2_148] : memref<8x4xf32, #tpu.memory_space<smem>>
    %431 = vector.broadcast %430 : f32 to vector<12x12xf32>
    %432 = arith.mulf %431, %429 : vector<12x12xf32>
    %433 = arith.addf %419, %432 : vector<12x12xf32>
    %434 = vector.extract_strided_slice %389 {offsets = [0, 3], sizes = [12, 1], strides = [1, 1]} : vector<12x4xf32> to vector<12x1xf32>
    %435 = vector.extract_strided_slice %390 {offsets = [3, 0], sizes = [1, 12], strides = [1, 1]} : vector<4x12xf32> to vector<1x12xf32>
    %436 = vector.broadcast %434 : vector<12x1xf32> to vector<12x12xf32>
    %437 = vector.broadcast %435 : vector<1x12xf32> to vector<12x12xf32>
    %438 = arith.addf %436, %437 : vector<12x12xf32>
    %cst_149 = arith.constant 0.000000e+00 : f32
    %439 = vector.broadcast %cst_149 : f32 to vector<12x12xf32>
    %440 = arith.cmpf ogt, %438, %439 : vector<12x12xf32>
    %cst_150 = arith.constant 2.000000e-01 : f32
    %441 = vector.broadcast %cst_150 : f32 to vector<12x12xf32>
    %442 = arith.mulf %441, %438 : vector<12x12xf32>
    %443 = arith.select %440, %438, %442 : vector<12x12xi1>, vector<12x12xf32>
    %c5_151 = arith.constant 5 : index
    %c3_152 = arith.constant 3 : index
    %444 = memref.load %arg1[%c5_151, %c3_152] : memref<8x4xf32, #tpu.memory_space<smem>>
    %445 = vector.broadcast %444 : f32 to vector<12x12xf32>
    %446 = arith.mulf %445, %443 : vector<12x12xf32>
    %447 = arith.addf %433, %446 : vector<12x12xf32>
    %cst_153 = arith.constant -1.000000e+30 : f32
    %448 = vector.broadcast %cst_153 : f32 to vector<12x12xf32>
    %449 = arith.select %3, %448, %447 : vector<12x12xi1>, vector<12x12xf32>
    %cst_154 = arith.constant dense<0xFF800000> : vector<12xf32>
    %450 = vector.multi_reduction <maximumf>, %449, %cst_154 [1] : vector<12x12xf32> to vector<12xf32>
    %451 = vector.shape_cast %450 : vector<12xf32> to vector<12x1xf32>
    %452 = vector.broadcast %451 : vector<12x1xf32> to vector<12x12xf32>
    %453 = arith.subf %449, %452 : vector<12x12xf32>
    %454 = math.exp %453 : vector<12x12xf32>
    %cst_155 = arith.constant 0.000000e+00 : f32
    %455 = vector.broadcast %cst_155 : f32 to vector<12x12xf32>
    %456 = arith.select %3, %455, %454 : vector<12x12xi1>, vector<12x12xf32>
    %cst_156 = arith.constant dense<0.000000e+00> : vector<12xf32>
    %457 = vector.multi_reduction <add>, %456, %cst_156 [1] : vector<12x12xf32> to vector<12xf32>
    %458 = vector.shape_cast %457 : vector<12xf32> to vector<12x1xf32>
    %459 = tpu.reciprocal %458 {approx = true} : vector<12x1xf32> -> vector<12x1xf32>
    %460 = vector.broadcast %459 : vector<12x1xf32> to vector<12x12xf32>
    %461 = arith.mulf %456, %460 : vector<12x12xf32>
    %c0_157 = arith.constant 0 : index
    %c20_158 = arith.constant 20 : index
    %462 = vector.load %arg3[%c0_157, %c20_158] : memref<12x32xf32, #tpu.memory_space<vmem>>, vector<12x4xf32>
    %463 = arith.truncf %461 : vector<12x12xf32> to vector<12x12xbf16>
    %464 = arith.truncf %462 : vector<12x4xf32> to vector<12x4xbf16>
    %cst_159 = arith.constant dense<0.000000e+00> : vector<12x4xf32>
    %465 = tpu.matmul %463, %464, %cst_159 {dimension_numbers = #tpu.dot_dimension_numbers<[1], [0], [0], [1], [0, 0, 1, 1], [], []>} : vector<12x12xbf16>, vector<12x4xbf16>, vector<12x4xf32> -> vector<12x4xf32>
    %c0_160 = arith.constant 0 : index
    %c24 = arith.constant 24 : index
    %466 = vector.load %arg2[%c0_160, %c24] : memref<12x32xf32, #tpu.memory_space<vmem>>, vector<12x4xf32>
    %c24_161 = arith.constant 24 : index
    %c0_162 = arith.constant 0 : index
    %467 = vector.load %arg4[%c24_161, %c0_162] : memref<32x12xf32, #tpu.memory_space<vmem>>, vector<4x12xf32>
    %cst_163 = arith.constant 0.000000e+00 : f32
    %468 = vector.broadcast %cst_163 : f32 to vector<12x12xf32>
    %469 = vector.extract_strided_slice %466 {offsets = [0, 0], sizes = [12, 1], strides = [1, 1]} : vector<12x4xf32> to vector<12x1xf32>
    %470 = vector.extract_strided_slice %467 {offsets = [0, 0], sizes = [1, 12], strides = [1, 1]} : vector<4x12xf32> to vector<1x12xf32>
    %471 = vector.broadcast %469 : vector<12x1xf32> to vector<12x12xf32>
    %472 = vector.broadcast %470 : vector<1x12xf32> to vector<12x12xf32>
    %473 = arith.addf %471, %472 : vector<12x12xf32>
    %cst_164 = arith.constant 0.000000e+00 : f32
    %474 = vector.broadcast %cst_164 : f32 to vector<12x12xf32>
    %475 = arith.cmpf ogt, %473, %474 : vector<12x12xf32>
    %cst_165 = arith.constant 2.000000e-01 : f32
    %476 = vector.broadcast %cst_165 : f32 to vector<12x12xf32>
    %477 = arith.mulf %476, %473 : vector<12x12xf32>
    %478 = arith.select %475, %473, %477 : vector<12x12xi1>, vector<12x12xf32>
    %c6 = arith.constant 6 : index
    %c0_166 = arith.constant 0 : index
    %479 = memref.load %arg1[%c6, %c0_166] : memref<8x4xf32, #tpu.memory_space<smem>>
    %480 = vector.broadcast %479 : f32 to vector<12x12xf32>
    %481 = arith.mulf %480, %478 : vector<12x12xf32>
    %482 = arith.addf %468, %481 : vector<12x12xf32>
    %483 = vector.extract_strided_slice %466 {offsets = [0, 1], sizes = [12, 1], strides = [1, 1]} : vector<12x4xf32> to vector<12x1xf32>
    %484 = vector.extract_strided_slice %467 {offsets = [1, 0], sizes = [1, 12], strides = [1, 1]} : vector<4x12xf32> to vector<1x12xf32>
    %485 = vector.broadcast %483 : vector<12x1xf32> to vector<12x12xf32>
    %486 = vector.broadcast %484 : vector<1x12xf32> to vector<12x12xf32>
    %487 = arith.addf %485, %486 : vector<12x12xf32>
    %cst_167 = arith.constant 0.000000e+00 : f32
    %488 = vector.broadcast %cst_167 : f32 to vector<12x12xf32>
    %489 = arith.cmpf ogt, %487, %488 : vector<12x12xf32>
    %cst_168 = arith.constant 2.000000e-01 : f32
    %490 = vector.broadcast %cst_168 : f32 to vector<12x12xf32>
    %491 = arith.mulf %490, %487 : vector<12x12xf32>
    %492 = arith.select %489, %487, %491 : vector<12x12xi1>, vector<12x12xf32>
    %c6_169 = arith.constant 6 : index
    %c1_170 = arith.constant 1 : index
    %493 = memref.load %arg1[%c6_169, %c1_170] : memref<8x4xf32, #tpu.memory_space<smem>>
    %494 = vector.broadcast %493 : f32 to vector<12x12xf32>
    %495 = arith.mulf %494, %492 : vector<12x12xf32>
    %496 = arith.addf %482, %495 : vector<12x12xf32>
    %497 = vector.extract_strided_slice %466 {offsets = [0, 2], sizes = [12, 1], strides = [1, 1]} : vector<12x4xf32> to vector<12x1xf32>
    %498 = vector.extract_strided_slice %467 {offsets = [2, 0], sizes = [1, 12], strides = [1, 1]} : vector<4x12xf32> to vector<1x12xf32>
    %499 = vector.broadcast %497 : vector<12x1xf32> to vector<12x12xf32>
    %500 = vector.broadcast %498 : vector<1x12xf32> to vector<12x12xf32>
    %501 = arith.addf %499, %500 : vector<12x12xf32>
    %cst_171 = arith.constant 0.000000e+00 : f32
    %502 = vector.broadcast %cst_171 : f32 to vector<12x12xf32>
    %503 = arith.cmpf ogt, %501, %502 : vector<12x12xf32>
    %cst_172 = arith.constant 2.000000e-01 : f32
    %504 = vector.broadcast %cst_172 : f32 to vector<12x12xf32>
    %505 = arith.mulf %504, %501 : vector<12x12xf32>
    %506 = arith.select %503, %501, %505 : vector<12x12xi1>, vector<12x12xf32>
    %c6_173 = arith.constant 6 : index
    %c2_174 = arith.constant 2 : index
    %507 = memref.load %arg1[%c6_173, %c2_174] : memref<8x4xf32, #tpu.memory_space<smem>>
    %508 = vector.broadcast %507 : f32 to vector<12x12xf32>
    %509 = arith.mulf %508, %506 : vector<12x12xf32>
    %510 = arith.addf %496, %509 : vector<12x12xf32>
    %511 = vector.extract_strided_slice %466 {offsets = [0, 3], sizes = [12, 1], strides = [1, 1]} : vector<12x4xf32> to vector<12x1xf32>
    %512 = vector.extract_strided_slice %467 {offsets = [3, 0], sizes = [1, 12], strides = [1, 1]} : vector<4x12xf32> to vector<1x12xf32>
    %513 = vector.broadcast %511 : vector<12x1xf32> to vector<12x12xf32>
    %514 = vector.broadcast %512 : vector<1x12xf32> to vector<12x12xf32>
    %515 = arith.addf %513, %514 : vector<12x12xf32>
    %cst_175 = arith.constant 0.000000e+00 : f32
    %516 = vector.broadcast %cst_175 : f32 to vector<12x12xf32>
    %517 = arith.cmpf ogt, %515, %516 : vector<12x12xf32>
    %cst_176 = arith.constant 2.000000e-01 : f32
    %518 = vector.broadcast %cst_176 : f32 to vector<12x12xf32>
    %519 = arith.mulf %518, %515 : vector<12x12xf32>
    %520 = arith.select %517, %515, %519 : vector<12x12xi1>, vector<12x12xf32>
    %c6_177 = arith.constant 6 : index
    %c3_178 = arith.constant 3 : index
    %521 = memref.load %arg1[%c6_177, %c3_178] : memref<8x4xf32, #tpu.memory_space<smem>>
    %522 = vector.broadcast %521 : f32 to vector<12x12xf32>
    %523 = arith.mulf %522, %520 : vector<12x12xf32>
    %524 = arith.addf %510, %523 : vector<12x12xf32>
    %cst_179 = arith.constant -1.000000e+30 : f32
    %525 = vector.broadcast %cst_179 : f32 to vector<12x12xf32>
    %526 = arith.select %3, %525, %524 : vector<12x12xi1>, vector<12x12xf32>
    %cst_180 = arith.constant dense<0xFF800000> : vector<12xf32>
    %527 = vector.multi_reduction <maximumf>, %526, %cst_180 [1] : vector<12x12xf32> to vector<12xf32>
    %528 = vector.shape_cast %527 : vector<12xf32> to vector<12x1xf32>
    %529 = vector.broadcast %528 : vector<12x1xf32> to vector<12x12xf32>
    %530 = arith.subf %526, %529 : vector<12x12xf32>
    %531 = math.exp %530 : vector<12x12xf32>
    %cst_181 = arith.constant 0.000000e+00 : f32
    %532 = vector.broadcast %cst_181 : f32 to vector<12x12xf32>
    %533 = arith.select %3, %532, %531 : vector<12x12xi1>, vector<12x12xf32>
    %cst_182 = arith.constant dense<0.000000e+00> : vector<12xf32>
    %534 = vector.multi_reduction <add>, %533, %cst_182 [1] : vector<12x12xf32> to vector<12xf32>
    %535 = vector.shape_cast %534 : vector<12xf32> to vector<12x1xf32>
    %536 = tpu.reciprocal %535 {approx = true} : vector<12x1xf32> -> vector<12x1xf32>
    %537 = vector.broadcast %536 : vector<12x1xf32> to vector<12x12xf32>
    %538 = arith.mulf %533, %537 : vector<12x12xf32>
    %c0_183 = arith.constant 0 : index
    %c24_184 = arith.constant 24 : index
    %539 = vector.load %arg3[%c0_183, %c24_184] : memref<12x32xf32, #tpu.memory_space<vmem>>, vector<12x4xf32>
    %540 = arith.truncf %538 : vector<12x12xf32> to vector<12x12xbf16>
    %541 = arith.truncf %539 : vector<12x4xf32> to vector<12x4xbf16>
    %cst_185 = arith.constant dense<0.000000e+00> : vector<12x4xf32>
    %542 = tpu.matmul %540, %541, %cst_185 {dimension_numbers = #tpu.dot_dimension_numbers<[1], [0], [0], [1], [0, 0, 1, 1], [], []>} : vector<12x12xbf16>, vector<12x4xbf16>, vector<12x4xf32> -> vector<12x4xf32>
    %c0_186 = arith.constant 0 : index
    %c28 = arith.constant 28 : index
    %543 = vector.load %arg2[%c0_186, %c28] : memref<12x32xf32, #tpu.memory_space<vmem>>, vector<12x4xf32>
    %c28_187 = arith.constant 28 : index
    %c0_188 = arith.constant 0 : index
    %544 = vector.load %arg4[%c28_187, %c0_188] : memref<32x12xf32, #tpu.memory_space<vmem>>, vector<4x12xf32>
    %cst_189 = arith.constant 0.000000e+00 : f32
    %545 = vector.broadcast %cst_189 : f32 to vector<12x12xf32>
    %546 = vector.extract_strided_slice %543 {offsets = [0, 0], sizes = [12, 1], strides = [1, 1]} : vector<12x4xf32> to vector<12x1xf32>
    %547 = vector.extract_strided_slice %544 {offsets = [0, 0], sizes = [1, 12], strides = [1, 1]} : vector<4x12xf32> to vector<1x12xf32>
    %548 = vector.broadcast %546 : vector<12x1xf32> to vector<12x12xf32>
    %549 = vector.broadcast %547 : vector<1x12xf32> to vector<12x12xf32>
    %550 = arith.addf %548, %549 : vector<12x12xf32>
    %cst_190 = arith.constant 0.000000e+00 : f32
    %551 = vector.broadcast %cst_190 : f32 to vector<12x12xf32>
    %552 = arith.cmpf ogt, %550, %551 : vector<12x12xf32>
    %cst_191 = arith.constant 2.000000e-01 : f32
    %553 = vector.broadcast %cst_191 : f32 to vector<12x12xf32>
    %554 = arith.mulf %553, %550 : vector<12x12xf32>
    %555 = arith.select %552, %550, %554 : vector<12x12xi1>, vector<12x12xf32>
    %c7 = arith.constant 7 : index
    %c0_192 = arith.constant 0 : index
    %556 = memref.load %arg1[%c7, %c0_192] : memref<8x4xf32, #tpu.memory_space<smem>>
    %557 = vector.broadcast %556 : f32 to vector<12x12xf32>
    %558 = arith.mulf %557, %555 : vector<12x12xf32>
    %559 = arith.addf %545, %558 : vector<12x12xf32>
    %560 = vector.extract_strided_slice %543 {offsets = [0, 1], sizes = [12, 1], strides = [1, 1]} : vector<12x4xf32> to vector<12x1xf32>
    %561 = vector.extract_strided_slice %544 {offsets = [1, 0], sizes = [1, 12], strides = [1, 1]} : vector<4x12xf32> to vector<1x12xf32>
    %562 = vector.broadcast %560 : vector<12x1xf32> to vector<12x12xf32>
    %563 = vector.broadcast %561 : vector<1x12xf32> to vector<12x12xf32>
    %564 = arith.addf %562, %563 : vector<12x12xf32>
    %cst_193 = arith.constant 0.000000e+00 : f32
    %565 = vector.broadcast %cst_193 : f32 to vector<12x12xf32>
    %566 = arith.cmpf ogt, %564, %565 : vector<12x12xf32>
    %cst_194 = arith.constant 2.000000e-01 : f32
    %567 = vector.broadcast %cst_194 : f32 to vector<12x12xf32>
    %568 = arith.mulf %567, %564 : vector<12x12xf32>
    %569 = arith.select %566, %564, %568 : vector<12x12xi1>, vector<12x12xf32>
    %c7_195 = arith.constant 7 : index
    %c1_196 = arith.constant 1 : index
    %570 = memref.load %arg1[%c7_195, %c1_196] : memref<8x4xf32, #tpu.memory_space<smem>>
    %571 = vector.broadcast %570 : f32 to vector<12x12xf32>
    %572 = arith.mulf %571, %569 : vector<12x12xf32>
    %573 = arith.addf %559, %572 : vector<12x12xf32>
    %574 = vector.extract_strided_slice %543 {offsets = [0, 2], sizes = [12, 1], strides = [1, 1]} : vector<12x4xf32> to vector<12x1xf32>
    %575 = vector.extract_strided_slice %544 {offsets = [2, 0], sizes = [1, 12], strides = [1, 1]} : vector<4x12xf32> to vector<1x12xf32>
    %576 = vector.broadcast %574 : vector<12x1xf32> to vector<12x12xf32>
    %577 = vector.broadcast %575 : vector<1x12xf32> to vector<12x12xf32>
    %578 = arith.addf %576, %577 : vector<12x12xf32>
    %cst_197 = arith.constant 0.000000e+00 : f32
    %579 = vector.broadcast %cst_197 : f32 to vector<12x12xf32>
    %580 = arith.cmpf ogt, %578, %579 : vector<12x12xf32>
    %cst_198 = arith.constant 2.000000e-01 : f32
    %581 = vector.broadcast %cst_198 : f32 to vector<12x12xf32>
    %582 = arith.mulf %581, %578 : vector<12x12xf32>
    %583 = arith.select %580, %578, %582 : vector<12x12xi1>, vector<12x12xf32>
    %c7_199 = arith.constant 7 : index
    %c2_200 = arith.constant 2 : index
    %584 = memref.load %arg1[%c7_199, %c2_200] : memref<8x4xf32, #tpu.memory_space<smem>>
    %585 = vector.broadcast %584 : f32 to vector<12x12xf32>
    %586 = arith.mulf %585, %583 : vector<12x12xf32>
    %587 = arith.addf %573, %586 : vector<12x12xf32>
    %588 = vector.extract_strided_slice %543 {offsets = [0, 3], sizes = [12, 1], strides = [1, 1]} : vector<12x4xf32> to vector<12x1xf32>
    %589 = vector.extract_strided_slice %544 {offsets = [3, 0], sizes = [1, 12], strides = [1, 1]} : vector<4x12xf32> to vector<1x12xf32>
    %590 = vector.broadcast %588 : vector<12x1xf32> to vector<12x12xf32>
    %591 = vector.broadcast %589 : vector<1x12xf32> to vector<12x12xf32>
    %592 = arith.addf %590, %591 : vector<12x12xf32>
    %cst_201 = arith.constant 0.000000e+00 : f32
    %593 = vector.broadcast %cst_201 : f32 to vector<12x12xf32>
    %594 = arith.cmpf ogt, %592, %593 : vector<12x12xf32>
    %cst_202 = arith.constant 2.000000e-01 : f32
    %595 = vector.broadcast %cst_202 : f32 to vector<12x12xf32>
    %596 = arith.mulf %595, %592 : vector<12x12xf32>
    %597 = arith.select %594, %592, %596 : vector<12x12xi1>, vector<12x12xf32>
    %c7_203 = arith.constant 7 : index
    %c3_204 = arith.constant 3 : index
    %598 = memref.load %arg1[%c7_203, %c3_204] : memref<8x4xf32, #tpu.memory_space<smem>>
    %599 = vector.broadcast %598 : f32 to vector<12x12xf32>
    %600 = arith.mulf %599, %597 : vector<12x12xf32>
    %601 = arith.addf %587, %600 : vector<12x12xf32>
    %cst_205 = arith.constant -1.000000e+30 : f32
    %602 = vector.broadcast %cst_205 : f32 to vector<12x12xf32>
    %603 = arith.select %3, %602, %601 : vector<12x12xi1>, vector<12x12xf32>
    %cst_206 = arith.constant dense<0xFF800000> : vector<12xf32>
    %604 = vector.multi_reduction <maximumf>, %603, %cst_206 [1] : vector<12x12xf32> to vector<12xf32>
    %605 = vector.shape_cast %604 : vector<12xf32> to vector<12x1xf32>
    %606 = vector.broadcast %605 : vector<12x1xf32> to vector<12x12xf32>
    %607 = arith.subf %603, %606 : vector<12x12xf32>
    %608 = math.exp %607 : vector<12x12xf32>
    %cst_207 = arith.constant 0.000000e+00 : f32
    %609 = vector.broadcast %cst_207 : f32 to vector<12x12xf32>
    %610 = arith.select %3, %609, %608 : vector<12x12xi1>, vector<12x12xf32>
    %cst_208 = arith.constant dense<0.000000e+00> : vector<12xf32>
    %611 = vector.multi_reduction <add>, %610, %cst_208 [1] : vector<12x12xf32> to vector<12xf32>
    %612 = vector.shape_cast %611 : vector<12xf32> to vector<12x1xf32>
    %613 = tpu.reciprocal %612 {approx = true} : vector<12x1xf32> -> vector<12x1xf32>
    %614 = vector.broadcast %613 : vector<12x1xf32> to vector<12x12xf32>
    %615 = arith.mulf %610, %614 : vector<12x12xf32>
    %c0_209 = arith.constant 0 : index
    %c28_210 = arith.constant 28 : index
    %616 = vector.load %arg3[%c0_209, %c28_210] : memref<12x32xf32, #tpu.memory_space<vmem>>, vector<12x4xf32>
    %617 = arith.truncf %615 : vector<12x12xf32> to vector<12x12xbf16>
    %618 = arith.truncf %616 : vector<12x4xf32> to vector<12x4xbf16>
    %cst_211 = arith.constant dense<0.000000e+00> : vector<12x4xf32>
    %619 = tpu.matmul %617, %618, %cst_211 {dimension_numbers = #tpu.dot_dimension_numbers<[1], [0], [0], [1], [0, 0, 1, 1], [], []>} : vector<12x12xbf16>, vector<12x4xbf16>, vector<12x4xf32> -> vector<12x4xf32>
    %620 = tpu.concatenate %80, %157, %234, %311, %388, %465, %542, %619 in 1 : vector<12x4xf32>, vector<12x4xf32>, vector<12x4xf32>, vector<12x4xf32>, vector<12x4xf32>, vector<12x4xf32>, vector<12x4xf32>, vector<12x4xf32> -> vector<12x32xf32>
    %c0_212 = arith.constant 0 : index
    %c0_213 = arith.constant 0 : index
    %621 = vector.load %arg6[%c0_212, %c0_213] : memref<1x32xf32, #tpu.memory_space<vmem>>, vector<1x32xf32>
    %622 = vector.broadcast %621 : vector<1x32xf32> to vector<12x32xf32>
    %623 = arith.addf %620, %622 : vector<12x32xf32>
    %cst_214 = arith.constant dense<0xFF800000> : vector<12xf32>
    %624 = vector.multi_reduction <maximumf>, %623, %cst_214 [1] : vector<12x32xf32> to vector<12xf32>
    %625 = vector.shape_cast %624 : vector<12xf32> to vector<12x1xf32>
    %626 = vector.broadcast %625 : vector<12x1xf32> to vector<12x32xf32>
    %627 = arith.subf %623, %626 : vector<12x32xf32>
    %628 = math.exp %627 : vector<12x32xf32>
    %cst_215 = arith.constant dense<0.000000e+00> : vector<12xf32>
    %629 = vector.multi_reduction <add>, %628, %cst_215 [1] : vector<12x32xf32> to vector<12xf32>
    %630 = vector.shape_cast %629 : vector<12xf32> to vector<12x1xf32>
    %631 = math.log %630 : vector<12x1xf32>
    %632 = arith.addf %625, %631 : vector<12x1xf32>
    %633 = vector.broadcast %632 : vector<12x1xf32> to vector<12x32xf32>
    %634 = arith.subf %623, %633 : vector<12x32xf32>
    %c0_216 = arith.constant 0 : index
    %c0_217 = arith.constant 0 : index
    %635 = vector.load %arg7[%c0_216, %c0_217] : memref<12x32xf32, #tpu.memory_space<vmem>>, vector<12x32xf32>
    tpu.vector_store %arg7[%c0_216, %c0_217], %634 {strides = array<i32>} : memref<12x32xf32, #tpu.memory_space<vmem>>, vector<12x32xf32>,
    return
  }
  func.func @transform_0(%arg0: i32) -> (i32, i32) {
    %c0_i32 = arith.constant 0 : i32
    %c0_i32_0 = arith.constant 0 : i32
    %c0_i32_1 = arith.constant 0 : i32
    return %c0_i32, %c0_i32_0 : i32, i32
  }
  func.func @transform_1(%arg0: i32) -> (i32, i32) {
    %c0_i32 = arith.constant 0 : i32
    %c0_i32_0 = arith.constant 0 : i32
    return %arg0, %c0_i32 : i32, i32
  }
  func.func @transform_2(%arg0: i32) -> (i32, i32) {
    %c0_i32 = arith.constant 0 : i32
    %c0_i32_0 = arith.constant 0 : i32
    %c0_i32_1 = arith.constant 0 : i32
    return %c0_i32, %c0_i32_0 : i32, i32
  }
  func.func @transform_3(%arg0: i32) -> (i32, i32) {
    %c0_i32 = arith.constant 0 : i32
    %c0_i32_0 = arith.constant 0 : i32
    %c0_i32_1 = arith.constant 0 : i32
    return %c0_i32, %c0_i32_0 : i32, i32
  }
  func.func @transform_4(%arg0: i32) -> (i32, i32) {
    %c0_i32 = arith.constant 0 : i32
    %c0_i32_0 = arith.constant 0 : i32
    return %arg0, %c0_i32 : i32, i32
  }
  func.func @transform_5(%arg0: i32) -> (i32, i32) {
    %c0_i32 = arith.constant 0 : i32
    %c0_i32_0 = arith.constant 0 : i32
    %c0_i32_1 = arith.constant 0 : i32
    return %c0_i32, %c0_i32_0 : i32, i32
  }
  func.func @transform_6(%arg0: i32) -> (i32, i32) {
    %c0_i32 = arith.constant 0 : i32
    %c0_i32_0 = arith.constant 0 : i32
    return %arg0, %c0_i32 : i32, i32
  }
}

</mosaic_0001>

<bundles_post_ra>
// kernel: gatv2_forward.4
= control target key start
LH: loop header
LB: loop body
LE: loop exit
PB: predicated region body
PF: predicated region fallthrough
CT: control target
= control target key end

     0   :  { %v91_v0 = vmov 0.0   ;;  %vm92_vm0 = vmmov 0   ;;  %vm28_vm1 = vcmask 130048   ;;  %s134_s1 = inlined_call_operand.vmem [shape: f32[16,128], index: 1, kind: input, shape index: {}]   ;;  %s135_s0 = inlined_call_operand.vmem [shape: f32[12,16], index: 0, kind: input, shape index: {}]   ;;  %s136_s2 = inlined_call_operand.vmem [shape: f32[1,128], index: 2, kind: input, shape index: {}]   ;;  %s137_s3 = inlined_call_operand.vmem [shape: f32[12,128], index: 3, kind: output, shape index: {}]  }
   0x1   :  { %83 = vmatprep.subr.bf16.mxu0 %v91_v0  ;;  %v18_v1 = vld [vmem:[%s134_s1] sm:$0xff]  ;;  %v19_v2 = vld [vmem:[%s134_s1 + $0x8] sm:$0xff]  ;;  %85 = vmatprep.mubr.msk.bf16.mxu0 %vm92_vm0, %v91_v0 }
   0x2   :  { %v15_v3 = vld [vmem:[%s135_s0] sm:$0xff]  ;;  %v20_v4 = vpack.c.bf16 %v19_v2, %v18_v1  ;;  %v16_v5 = vld [vmem:[%s135_s0 + $0x8] sm:$0xf] }
   0x3   :  { %v17_v6 = vpack.c.bf16 %v16_v5, %v15_v3  ;;  %v79_v7 = vld [vmem:[%s136_s2] ss:$0 sm:$0xff] }
   0x4   :  { %84 = vmatpush3.bf16.msra.mxu0 %v20_v4 }
   0x7   :  { %86 = vmatmul.mubr.msk.bf16.vlgmr.msra.gmra.mrb[0].mxu0 %vm28_vm1, %v17_v6 }
  0xda   :  { %v66_v8 = vpop.f32.mrb[0].mxu0 }
  0xdb   :  { %v67_v9 = vadd.f32 %v79_v7, %v66_v8  ;;  %v87_v10 = vpop.f32.mrb[1].mxu0 }
  0xdc   :  { %v69_v11 = vpop.f32.mrb[2].mxu0 }
  0xdd   :  { %73 = vst [vmem:[%s137_s3] sm:$0xff] %v67_v9  ;;  %v70_v12 = vadd.f32 %v79_v7, %v69_v11  ;;  %v88_v13 = vpop.f32.mrb[3].mxu0 }
  0xdf   :  { %74 = vst [vmem:[%s137_s3 + $0x8] sm:$0xf] %v70_v12 }

// kernel: gatv2_forward.6
= control target key start
LH: loop header
LB: loop body
LE: loop exit
PB: predicated region body
PF: predicated region fallthrough
CT: control target
= control target key end

     0   :  { %v110_v0 = vmov 0.0   ;;  %vm111_vm0 = vmmov 0   ;;  %vm37_vm1 = vcmask 523264   ;;  %vm83_vm2 = vcmask 519168   ;;  %s171_s1 = inlined_call_operand.vmem [shape: f32[64,64], index: 1, kind: input, shape index: {}]   ;;  %s172_s0 = inlined_call_operand.vmem [shape: f32[12,64], index: 0, kind: input, shape index: {}]   ;;  %s173_s2 = inlined_call_operand.vmem [shape: f32[1,64], index: 2, kind: input, shape index: {}]   ;;  %s174_s3 = inlined_call_operand.vmem [shape: f32[12,64], index: 3, kind: output, shape index: {}]  }
   0x1   :  { %96 = vmatprep.subr.bf16.mxu0 %v110_v0  ;;  %v18_v1 = vld [vmem:[%s171_s1] sm:$0xff]  ;;  %v19_v2 = vld [vmem:[%s171_s1 + $0x8] sm:$0xff]  ;;  %v20_v3 = vld [vmem:[%s171_s1 + $0x10] sm:$0xff]  ;;  %104 = vmatprep.mubr.msk.bf16.mxu0 %vm111_vm0, %v110_v0 }
   0x2   :  { %v26_v4 = vpack.c.bf16 %v19_v2, %v18_v1  ;;  %v21_v5 = vld [vmem:[%s171_s1 + $0x18] sm:$0xff]  ;;  %v22_v7 = vld [vmem:[%s171_s1 + $0x20] sm:$0xff]  ;;  %v23_v8 = vld [vmem:[%s171_s1 + $0x28] sm:$0xff] }
   0x3   :  { %v27_v6 = vpack.c.bf16 %v21_v5, %v20_v3  ;;  %v28_v9 = vpack.c.bf16 %v23_v8, %v22_v7  ;;  %v24_v10 = vld [vmem:[%s171_s1 + $0x30] sm:$0xff]  ;;  %v25_v11 = vld [vmem:[%s171_s1 + $0x38] sm:$0xff]  ;;  %v15_v13 = vld [vmem:[%s172_s0] sm:$0xff] }
   0x4   :  { %97 = vmatpush3.bf16.msra.mxu0 %v26_v4  ;;  %v29_v12 = vpack.c.bf16 %v25_v11, %v24_v10  ;;  %v16_v14 = vld [vmem:[%s172_s0 + $0x8] sm:$0xf]  ;;  %v89_v16 = vld [vmem:[%s173_s2] ss:$0 sm:$0xff] }
   0x5   :  { %98 = vmatprep.subr.bf16.mxu0 %v110_v0  ;;  %v17_v15 = vpack.c.bf16 %v16_v14, %v15_v13 }
   0x8   :  { %99 = vmatpush3.bf16.msra.mxu0 %v27_v6 }
   0x9   :  { %100 = vmatprep.subr.bf16.mxu0 %v110_v0 }
   0xc   :  { %101 = vmatpush3.bf16.msra.mxu0 %v28_v9 }
   0xd   :  { %102 = vmatprep.subr.bf16.mxu0 %v110_v0 }
  0x10   :  { %103 = vmatpush3.bf16.msra.mxu0 %v29_v12 }
  0x13   :  { %105 = vmatmul.mubr.msk.bf16.vlgmr.msra.gmra.mrb[0].mxu0 %vm37_vm1, %v17_v15 }
  0xe6   :  { %v75_v17 = vpop.f32.mrb[0].mxu0 }
  0xe7   :  { %v76_v18 = vadd.f32 %v89_v16, %v75_v17  ;;  %v106_v19 = vpop.f32.mrb[1].mxu0 }
  0xe8   :  { %v78_v20 = vpop.f32.mrb[2].mxu0 }
  0xe9   :  { %82 = vst.msk [vmem:[%s174_s3] sm:$0xff] %vm37_vm1, %v76_v18  ;;  %v79_v21 = vadd.f32 %v89_v16, %v78_v20  ;;  %v107_v22 = vpop.f32.mrb[3].mxu0 }
  0xeb   :  { %84 = vst.msk [vmem:[%s174_s3 + $0x8] sm:$0xf] %vm83_vm2, %v79_v21 }

// kernel: gatv2_forward.5
= control target key start
LH: loop header
LB: loop body
LE: loop exit
PB: predicated region body
PF: predicated region fallthrough
CT: control target
= control target key end

     0   :  { %11 = vsyncpa [#allocation3], 0  ;;  %s4499_s0 = inlined_call_operand.vmem [shape: f32[8,8], index: 0, kind: input, shape index: {}]   ;;  %s4500_s1 = inlined_call_operand.vmem [shape: f32[12,64], index: 1, kind: input, shape index: {}]   ;;  %s4501_s2 = inlined_call_operand.vmem [shape: f32[12,64], index: 2, kind: input, shape index: {}]   ;;  %s4502_s3 = inlined_call_operand.vmem [shape: f32[64,12], index: 3, kind: input, shape index: {}]   ;;  %s4503_s4 = inlined_call_operand.vmem [shape: s8[12,12], index: 4, kind: input, shape index: {}]   ;;  %s4504_s5 = inlined_call_operand.vmem [shape: f32[1,64], index: 5, kind: input, shape index: {}]   ;;  %s4505_s6 = inlined_call_operand.vmem [shape: f32[12,64], index: 6, kind: output, shape index: {}]  }
   0x1   :  { %s18_s23 = sshll.u32 %s4499_s0, 4  ;;  %s19_s23 = int_to_ptr.vmem [resolvable:$true] %s18_s23 }
   0x2   :  { %s2830_s24 = scalar_lea.vmem %s19_s23, 128  ;;  %p2835_p1 = scmp.lt.s32.totalorder %s19_s23, %s19_s23 }
   0x3   :  { %p2831_p0 = scmp.ne.s32.totalorder %s19_s23, %s2830_s24  ;;  %p2836_p2 = scmp.lt.s32.totalorder %s2830_s24, %s2830_s24 }
   0x5   :  { %p2837_p3 = por %p2836_p2, %p2835_p1 }
   0x7   :  { %p2838_p4 = pnand %p2837_p3, %p2831_p0 }
   0x9   :  { %2841 = shalt.err (!%p2838_p4)
}
   0xa   :  { %s2844_s25 = smov [#allocation2]  }
   0xb   :  { %21 = dma.vmem_to_smem %s19_s23, 128, %s2844_s25, [#allocation3]  }
   0xc   :  { %2842 = dma.done.wait [#allocation3], 128  }
   0xd   :  { %2843 = vsyncadd [#allocation3], 4294967168 }
   0xe   :  { %35 = sfence }
   0xf   :  { %v2966_v0 = vld [vmem:[%s4500_s1] sm:$0xff]  ;;  %v2845_v1 = vmov 1   ;;  %v2846_v2 = vmov 0   ;;  %v2973_v3 = vld [vmem:[%s4500_s1 + $0x8] sm:$0xf]  ;;  %v2847_v4 = vmov 2   ;;  %v58_v19 = vlaneseq }
  0x10   :  { %2659 = vset.pattern.permute.xlu1 %v2845_v1  ;;  %2658 = vset.pattern.permute.xlu0 %v2846_v2  ;;  %v2848_v5 = vmov 3   ;;  %v2849_v6 = vmov 4   ;;  %v2850_v7 = vmov 5   ;;  %v2851_v8 = vmov 6   ;;  %v3013_v25 = vld [vmem:[%s4502_s3] sm:$0xff]  ;;  %s3023_s7 = sld [smem:[#allocation2 + $0x1]] }
  0x11   :  { %77 = vperm.xlu1 %2659, %v2966_v0   ;;  %50 = vperm.xlu0 %2658, %v2966_v0   ;;  %v2852_v9 = vmov 8   ;;  %v2853_v10 = vmov 13   ;;  %v2854_v11 = vmov 7   ;;  %v2855_v12 = vmov 14   ;;  %s3027_s8 = sld [smem:[#allocation2]]  ;;  %s3029_s9 = sld [smem:[#allocation2 + $0x2]] }
  0x12   :  { %v2856_v13 = vmov 9   ;;  %v2857_v14 = vmov 10   ;;  %v2858_v15 = vmov 11   ;;  %v2859_v16 = vmov 12   ;;  %s3034_s10 = sld [smem:[#allocation2 + $0x3]]  ;;  %s3038_s11 = sld [smem:[#allocation2 + $0x4]] }
  0x13   :  { %v2860_v17 = vmov 15   ;;  %v2861_v18 = vmov 16   ;;  %v3005_v21 = vshrl.u32 %v58_v19, 7  ;;  %s3060_s12 = sld [smem:[#allocation2 + $0x5]]  ;;  %s3067_s13 = sld [smem:[#allocation2 + $0x6]] }
  0x14   :  { %s3069_s14 = sld [smem:[#allocation2 + $0x7]]  ;;  %s3115_s20 = sld [smem:[#allocation2 + $0x80]] }
  0x15   :  { %81 = vperm.xlu1 %2659, %v2973_v3   ;;  %55 = vperm.xlu0 %2658, %v2973_v3   ;;  %v3008_v24 = vsub.s32 1, %v3005_v21  ;;  %v3016_v26 = vsub.s32 0, %v3005_v21  ;;  %v3021_v30 = vsub.s32 2, %v3005_v21  ;;  %v3032_v34 = vsub.s32 3, %v3005_v21  ;;  %s3119_s21 = sld [smem:[#allocation2 + $0x81]]  ;;  %s3123_s22 = sld [smem:[#allocation2 + $0x82]] }
  0x16   :  { %v3041_v38 = vsub.s32 4, %v3005_v21  ;;  %v3046_v42 = vsub.s32 5, %v3005_v21  ;;  %v97_v43 = vstv %s3023_s7  ;;  %v3058_v59 = vsub.s32 6, %v3005_v21  ;;  %s3125_s23 = sld [smem:[#allocation2 + $0x83]]  ;;  %s3136_s24 = sld [smem:[#allocation2 + $0x84]] }
  0x17   :  { %4552 = vst [vmem:[#allocation5_spill] sm:$0xff] %v3008_v24  ;;  %4553 = vst [vmem:[#allocation6_spill] sm:$0xff] %v3016_v26  ;;  %v87_v28 = vrot.slane %v3013_v25, %v3008_v24  ;;  %v61_v31 = vrot.slane %v3013_v25, %v3016_v26  ;;  %v113_v35 = vrot.slane %v3013_v25, %v3021_v30  ;;  %v71_v49 = vstv %s3027_s8  ;;  %s3139_s25 = sld [smem:[#allocation2 + $0x85]]  ;;  %s3144_s26 = sld [smem:[#allocation2 + $0x86]] }
  0x18   :  { %4554 = vst [vmem:[#allocation7_spill] sm:$0xff] %v3021_v30  ;;  %4555 = vst [vmem:[#allocation8_spill] sm:$0xff] %v3032_v34  ;;  %v139_v40 = vrot.slane %v3013_v25, %v3032_v34  ;;  %v165_v47 = vrot.slane %v3013_v25, %v3041_v38  ;;  %v123_v53 = vstv %s3029_s9  ;;  %v149_v54 = vstv %s3034_s10  ;;  %s3148_s27 = sld [smem:[#allocation2 + $0x87]]  ;;  %s2862_s7 = smov 120  }
  0x19   :  { %2661 = vset.pattern.permute.xlu1 %v2847_v4  ;;  %2660 = vset.pattern.permute.xlu0 %v2847_v4  ;;  %4556 = vst [vmem:[#allocation9_spill] sm:$0xff] %v3041_v38  ;;  %4557 = vst [vmem:[#allocation10_spill] sm:$0xff] %v3046_v42  ;;  %v175_v57 = vstv %s3038_s11  ;;  %v191_v58 = vrot.slane %v3013_v25, %v3046_v42  ;;  %s3384_s11 = sld [smem:[#allocation2 + $0x101]]  ;;  %s3396_s15 = sld [smem:[#allocation2 + $0x182]] }
  0x1a   :  { %107 = vperm.xlu1 %2661, %v2973_v3   ;;  %103 = vperm.xlu0 %2660, %v2966_v0   ;;  %4558 = vst [vmem:[#allocation11_spill] sm:$0xff] %v3058_v59  ;;  %s3398_s16 = sld [smem:[#allocation2 + $0x103]]  ;;  %s3409_s19 = sld [smem:[#allocation2 + $0x105]] }
  0x1b   :  { %s3457_s29 = sld [smem:[#allocation2 + $0x201]]  ;;  %s3459_s30 = sld [smem:[#allocation2 + $0x202]] }
  0x1c   :  { %s3508_s8 = sld [smem:[#allocation2 + $0x282]]  ;;  %s3510_s9 = sld [smem:[#allocation2 + $0x281]] }
  0x1d   :  { %s3540_s10 = sld [smem:[#allocation2 + $0x186]]  ;;  %s3573_s17 = sld [smem:[#allocation2 + $0x107]] }
  0x1e   :  { %2662 = vset.pattern.permute.xlu1 %v2848_v5  ;;  %2663 = vset.pattern.permute.xlu0 %v2848_v5  ;;  %s3581_s18 = sld [smem:[#allocation2 + $0x203]]  ;;  %s3865_s0 = sld [smem:[#allocation2 + $0x286]] }
  0x1f   :  { %129 = vperm.xlu1 %2662, %v2966_v0   ;;  %133 = vperm.xlu0 %2663, %v2973_v3   ;;  %s3895_s28 = sld [smem:[#allocation2 + $0x302]] }
  0x23   :  { %2664 = vset.pattern.permute.xlu1 %v2849_v6  ;;  %2665 = vset.pattern.permute.xlu0 %v2850_v7 }
  0x24   :  { %155 = vperm.xlu1 %2664, %v2966_v0   ;;  %181 = vperm.xlu0 %2665, %v2966_v0  }
  0x28   :  { %159 = vperm.xlu1 %2664, %v2973_v3   ;;  %2668 = vset.pattern.permute.xlu0 %v2851_v8 }
  0x29   :  { %211 = vperm.xlu0 %2668, %v2973_v3  }
  0x2c   :  { %2666 = vset.pattern.permute.xlu1 %v2850_v7 }
  0x2d   :  { %185 = vperm.xlu1 %2666, %v2973_v3   ;;  %2671 = vset.pattern.permute.xlu0 %v2852_v9 }
  0x2e   :  { %344 = vperm.xlu0 %2671, %v2973_v3  }
  0x31   :  { %2667 = vset.pattern.permute.xlu1 %v2851_v8 }
  0x32   :  { %207 = vperm.xlu1 %2667, %v2966_v0   ;;  %2676 = vset.pattern.permute.xlu0 %v2853_v10 }
  0x33   :  { %470 = vperm.xlu0 %2676, %v2966_v0  }
  0x36   :  { %2669 = vset.pattern.permute.xlu1 %v2854_v11 }
  0x37   :  { %233 = vperm.xlu1 %2669, %v2966_v0   ;;  %2679 = vset.pattern.permute.xlu0 %v2855_v12 }
  0x38   :  { %500 = vperm.xlu0 %2679, %v2973_v3  }
  0x3b   :  { %237 = vperm.xlu1 %2669, %v2973_v3  }
  0x3c   :  { %2681 = vset.pattern.permute.xlu0 %v2861_v18 }
  0x3f   :  { %2670 = vset.pattern.permute.xlu1 %v2852_v9 }
  0x40   :  { %340 = vperm.xlu1 %2670, %v2966_v0  }
  0x44   :  { %2672 = vset.pattern.permute.xlu1 %v2856_v13 }
  0x45   :  { %366 = vperm.xlu1 %2672, %v2966_v0  }
  0x49   :  { %370 = vperm.xlu1 %2672, %v2973_v3  }
  0x4d   :  { %2673 = vset.pattern.permute.xlu1 %v2857_v14  ;;  %v217_v14 = vrot.slane %v3013_v25, %v3058_v59 }
  0x4e   :  { %392 = vperm.xlu1 %2673, %v2966_v0  }
  0x52   :  { %396 = vperm.xlu1 %2673, %v2973_v3  }
  0x56   :  { %2674 = vset.pattern.permute.xlu1 %v2858_v15 }
  0x57   :  { %418 = vperm.xlu1 %2674, %v2966_v0  }
  0x5b   :  { %422 = vperm.xlu1 %2674, %v2973_v3  }
  0x5f   :  { %2675 = vset.pattern.permute.xlu1 %v2859_v16 }
  0x60   :  { %444 = vperm.xlu1 %2675, %v2966_v0  }
  0x64   :  { %448 = vperm.xlu1 %2675, %v2973_v3  }
  0x68   :  { %2677 = vset.pattern.permute.xlu1 %v2853_v10 }
  0x69   :  { %474 = vperm.xlu1 %2677, %v2973_v3  }
  0x6d   :  { %2678 = vset.pattern.permute.xlu1 %v2855_v12 }
  0x6e   :  { %496 = vperm.xlu1 %2678, %v2966_v0  }
  0x72   :  { %2680 = vset.pattern.permute.xlu1 %v2860_v17 }
  0x73   :  { %522 = vperm.xlu1 %2680, %v2966_v0  }
  0x77   :  { %526 = vperm.xlu1 %2680, %v2973_v3  }
  0x7b   :  { %2682 = vset.pattern.permute.xlu1 %v2861_v18  ;;  %v3065_v18 = vsub.s32 7, %v3005_v21 }
  0x90   :  { %v78_v20 = vpop.permute.xlu1 %77  ;;  %v51_v22 = vpop.permute.xlu0 %50 }
  0x91   :  { %v88_v32 = vadd.f32 %v87_v28, %v78_v20  ;;  %v62_v37 = vadd.f32 %v61_v31, %v51_v22 }
  0x93   :  { %v92_v39 = vmul.f32 0.2, %v88_v32  ;;  %vm90_vm0 = vcmp.gt.f32.partialorder %v88_v32, 0.0  ;;  %v66_v44 = vmul.f32 0.2, %v62_v37  ;;  %vm64_vm1 = vcmp.gt.f32.partialorder %v62_v37, 0.0 }
  0x94   :  { %v82_v23 = vpop.permute.xlu1 %81  ;;  %v56_v27 = vpop.permute.xlu0 %55 }
  0x95   :  { %v89_v45 = vadd.f32 %v87_v28, %v82_v23  ;;  %v63_v50 = vadd.f32 %v61_v31, %v56_v27  ;;  %v94_v52 = vsel %vm90_vm0, %v88_v32, %v92_v39  ;;  %v68_v60 = vsel %vm64_vm1, %v62_v37, %v66_v44  ;;  %v37_v39 = vld [vmem:[%s4503_s4] sm:$0x3] }
  0x96   :  { %v98_v2 = vmul.f32 %v97_v43, %v94_v52  ;;  %v72_v8 = vmul.f32 %v71_v49, %v68_v60  ;;  %v201_v37 = vstv %s3060_s12  ;;  %v39_v52 = vunpack.c.0.s8 %v37_v39  ;;  %s3386_s12 = sld [smem:[#allocation2 + $0x104]] }
  0x97   :  { %v93_v61 = vmul.f32 0.2, %v89_v45  ;;  %vm91_vm3 = vcmp.gt.f32.partialorder %v89_v45, 0.0  ;;  %v67_v4 = vmul.f32 0.2, %v63_v50  ;;  %vm65_vm4 = vcmp.gt.f32.partialorder %v63_v50, 0.0 }
  0x98   :  { %v100_v27 = vadd.f32 %v98_v2, %v72_v8  ;;  %vm260_vm1 = vcmask 97280  }
  0x99   :  { %v108_v29 = vpop.permute.xlu1 %107  ;;  %v104_v33 = vpop.permute.xlu0 %103  ;;  %v95_v11 = vsel %vm91_vm3, %v89_v45, %v93_v61  ;;  %v69_v15 = vsel %vm65_vm4, %v63_v50, %v67_v4  ;;  %vm264_vm3 = vcmask 93184  }
  0x9a   :  { %v114_v41 = vadd.f32 %v113_v35, %v104_v33  ;;  %v115_v51 = vadd.f32 %v113_v35, %v108_v29  ;;  %v99_v28 = vmul.f32 %v97_v43, %v95_v11  ;;  %v73_v32 = vmul.f32 %v71_v49, %v69_v15 }
  0x9c   :  { %v118_v56 = vmul.f32 0.2, %v114_v41  ;;  %vm116_vm2 = vcmp.gt.f32.partialorder %v114_v41, 0.0  ;;  %v119_v5 = vmul.f32 0.2, %v115_v51  ;;  %vm117_vm5 = vcmp.gt.f32.partialorder %v115_v51, 0.0 }
  0x9d   :  { %v101_v49 = vadd.f32 %v99_v28, %v73_v32 }
  0x9e   :  { %v130_v36 = vpop.permute.xlu1 %129  ;;  %v134_v46 = vpop.permute.xlu0 %133  ;;  %v120_v9 = vsel %vm116_vm2, %v114_v41, %v118_v56  ;;  %v121_v16 = vsel %vm117_vm5, %v115_v51, %v119_v5  ;;  %v243_v51 = vrot.slane %v3013_v25, %v3065_v18  ;;  %v38_v25 = vld [vmem:[%s4503_s4 + $0x2] sm:$0x1]  ;;  %v227_v5 = vstv %s3067_s13  ;;  %s3388_s13 = sld [smem:[#allocation2 + $0x102]]  ;;  %s3407_s4 = sld [smem:[#allocation2 + $0x183]] }
  0x9f   :  { %v140_v55 = vadd.f32 %v139_v40, %v130_v36  ;;  %v141_v7 = vadd.f32 %v139_v40, %v134_v46  ;;  %v124_v19 = vmul.f32 %v123_v53, %v120_v9  ;;  %v125_v21 = vmul.f32 %v123_v53, %v121_v16 }
  0xa1   :  { %v144_v6 = vmul.f32 0.2, %v140_v55  ;;  %vm142_vm6 = vcmp.gt.f32.partialorder %v140_v55, 0.0  ;;  %v145_v22 = vmul.f32 0.2, %v141_v7  ;;  %vm143_vm8 = vcmp.gt.f32.partialorder %v141_v7, 0.0 }
  0xa2   :  { %v126_v40 = vadd.f32 %v124_v19, %v100_v27 }
  0xa3   :  { %v156_v48 = vpop.permute.xlu1 %155  ;;  %v182_v63 = vpop.permute.xlu0 %181  ;;  %v146_v20 = vsel %vm142_vm6, %v140_v55, %v144_v6  ;;  %v147_v41 = vsel %vm143_vm8, %v141_v7, %v145_v22  ;;  %v253_v7 = vstv %s3069_s14  ;;  %s3390_s14 = sld [smem:[#allocation2 + $0x180]] }
  0xa4   :  { %v166_v62 = vadd.f32 %v165_v47, %v156_v48  ;;  %v192_v10 = vadd.f32 %v191_v58, %v182_v63  ;;  %v150_v36 = vmul.f32 %v149_v54, %v146_v20  ;;  %v151_v55 = vmul.f32 %v149_v54, %v147_v41 }
  0xa6   :  { %v170_v12 = vmul.f32 0.2, %v166_v62  ;;  %vm168_vm7 = vcmp.gt.f32.partialorder %v166_v62, 0.0  ;;  %v196_v29 = vmul.f32 0.2, %v192_v10  ;;  %vm194_vm9 = vcmp.gt.f32.partialorder %v192_v10, 0.0 }
  0xa7   :  { %v160_v1 = vpop.permute.xlu1 %159  ;;  %v152_v53 = vadd.f32 %v150_v36, %v126_v40 }
  0xa8   :  { %v167_v13 = vadd.f32 %v165_v47, %v160_v1  ;;  %v212_v31 = vpop.permute.xlu0 %211  ;;  %v172_v33 = vsel %vm168_vm7, %v166_v62, %v170_v12  ;;  %v198_v47 = vsel %vm194_vm9, %v192_v10, %v196_v29  ;;  %v3090_v10 = vcvt.s32.f32 %v39_v52 }
  0xa9   :  { %v219_v44 = vadd.f32 %v217_v14, %v212_v31  ;;  %v176_v46 = vmul.f32 %v175_v57, %v172_v33  ;;  %v202_v60 = vmul.f32 %v201_v37, %v198_v47 }
  0xaa   :  { %v171_v35 = vmul.f32 0.2, %v167_v13  ;;  %vm169_vm10 = vcmp.gt.f32.partialorder %v167_v13, 0.0  ;;  %4559 = vst [vmem:[#allocation12_spill] sm:$0xff] %v3090_v10  ;;  %vm43_vm0 = vcmp.eq.f32.partialorder %v3090_v10, 0.0 }
  0xab   :  { %v223_v62 = vmul.f32 0.2, %v219_v44  ;;  %v178_v63 = vadd.f32 %v176_v46, %v152_v53  ;;  %vm221_vm13 = vcmp.gt.f32.partialorder %v219_v44, 0.0  ;;  %v3111_v46 = vld [vmem:[%s4502_s3 + $0x8] sm:$0xff] }
  0xac   :  { %v186_v17 = vpop.permute.xlu1 %185  ;;  %v173_v50 = vsel %vm169_vm10, %v167_v13, %v171_v35  ;;  %v40_v13 = vunpack.c.0.s8 %v38_v25 }
  0xad   :  { %v193_v23 = vadd.f32 %v191_v58, %v186_v17  ;;  %v127_v58 = vadd.f32 %v125_v21, %v101_v49  ;;  %v177_v1 = vmul.f32 %v175_v57, %v173_v50  ;;  %v225_v11 = vsel %vm221_vm13, %v219_v44, %v223_v62  ;;  %v345_v50 = vpop.permute.xlu0 %344 }
  0xae   :  { %v204_v15 = vadd.f32 %v202_v60, %v178_v63  ;;  %v229_v19 = vmul.f32 %v227_v5, %v225_v11  ;;  %v3093_v28 = vcvt.s32.f32 %v40_v13  ;;  %v350_v49 = vrot.slane %v3111_v46, %v3016_v26 }
  0xaf   :  { %v197_v43 = vmul.f32 0.2, %v193_v23  ;;  %vm195_vm11 = vcmp.gt.f32.partialorder %v193_v23, 0.0  ;;  %v153_v54 = vadd.f32 %v151_v55, %v127_v58  ;;  %v428_v58 = vrot.slane %v3111_v46, %v3032_v34 }
  0xb0   :  { %4560 = vst [vmem:[#allocation13_spill] sm:$0xff] %v3093_v28  ;;  %vm44_vm2 = vcmp.eq.f32.partialorder %v3093_v28, 0.0  ;;  %v352_v55 = vadd.f32 %v350_v49, %v345_v50  ;;  %v454_v63 = vrot.slane %v3111_v46, %v3041_v38 }
  0xb1   :  { %v208_v45 = vpop.permute.xlu1 %207  ;;  %v199_v61 = vsel %vm195_vm11, %v193_v23, %v197_v43  ;;  %v179_v57 = vadd.f32 %v177_v1, %v153_v54 }
  0xb2   :  { %v218_v48 = vadd.f32 %v217_v14, %v208_v45  ;;  %v203_v8 = vmul.f32 %v201_v37, %v199_v61  ;;  %v480_v61 = vrot.slane %v3111_v46, %v3046_v42  ;;  %vm354_vm5 = vcmp.gt.f32.partialorder %v352_v55, 0.0 }
  0xb4   :  { %vm220_vm12 = vcmp.gt.f32.partialorder %v218_v48, 0.0  ;;  %v222_v56 = vmul.f32 0.2, %v218_v48  ;;  %v205_v23 = vadd.f32 %v203_v8, %v179_v57  ;;  %v412_v8 = vstv %s3123_s22  ;;  %s2919_s22 = smov 16  }
  0xb6   :  { %v224_v2 = vsel %vm220_vm12, %v218_v48, %v222_v56  ;;  %v234_v4 = vpop.permute.xlu1 %233  ;;  %v231_v35 = vadd.f32 %v229_v19, %v205_v23  ;;  %v376_v48 = vrot.slane %v3111_v46, %v3008_v24  ;;  %v506_v19 = vrot.slane %v3111_v46, %v3058_v59 }
  0xb7   :  { %v244_v6 = vadd.f32 %v243_v51, %v234_v4  ;;  %v228_v9 = vmul.f32 %v227_v5, %v224_v2  ;;  %v471_v2 = vpop.permute.xlu0 %470  ;;  %v360_v4 = vstv %s3115_s20  ;;  %v356_v5 = vmul.f32 0.2, %v352_v55  ;;  %s3412_s20 = sld [smem:[#allocation2 + $0x200]] }
  0xb8   :  { %v481_v11 = vadd.f32 %v480_v61, %v471_v2 }
  0xb9   :  { %vm246_vm14 = vcmp.gt.f32.partialorder %v244_v6, 0.0  ;;  %v248_v12 = vmul.f32 0.2, %v244_v6  ;;  %v230_v20 = vadd.f32 %v228_v9, %v204_v15 }
  0xba   :  { %v238_v14 = vpop.permute.xlu1 %237  ;;  %vm483_vm10 = vcmp.gt.f32.partialorder %v481_v11, 0.0 }
  0xbb   :  { %v250_v16 = vsel %vm246_vm14, %v244_v6, %v248_v12  ;;  %v245_v17 = vadd.f32 %v243_v51, %v238_v14  ;;  %v402_v51 = vrot.slane %v3111_v46, %v3021_v30  ;;  %v501_v50 = vpop.permute.xlu0 %500 }
  0xbc   :  { %v254_v22 = vmul.f32 %v253_v7, %v250_v16  ;;  %v358_v16 = vsel %vm354_vm5, %v352_v55, %v356_v5 }
  0xbd   :  { %vm247_vm15 = vcmp.gt.f32.partialorder %v245_v17, 0.0  ;;  %v249_v27 = vmul.f32 0.2, %v245_v17 }
  0xbe   :  { %v256_v29 = vadd.f32 %v254_v22, %v230_v20 }
  0xbf   :  { %v251_v31 = vsel %vm247_vm15, %v245_v17, %v249_v27  ;;  %v341_v32 = vpop.permute.xlu1 %340  ;;  %v438_v17 = vstv %s3125_s23  ;;  %s2920_s23 = smov 24  }
  0xc0   :  { %v3097_v33 = vsel %vm43_vm0, -1e+30, %v256_v29  ;;  %v255_v21 = vmul.f32 %v253_v7, %v251_v31  ;;  %v351_v56 = vadd.f32 %v350_v49, %v341_v32  ;;  %v386_v7 = vstv %s3119_s21  ;;  %s3414_s21 = sld [smem:[#allocation2 + $0x185]] }
  0xc1   :  { %v261_v36 = vsel %vm260_vm1, %v3097_v33, -inf  ;;  %v464_v49 = vstv %s3136_s24  ;;  %s3424_s24 = sld [smem:[#allocation2 + $0x181]] }
  0xc2   :  { %262 = vmax.xlane.f32.xlu0 %v261_v36  ;;  %v257_v37 = vadd.f32 %v255_v21, %v231_v35  ;;  %v355_v6 = vmul.f32 0.2, %v351_v56  ;;  %vm353_vm6 = vcmp.gt.f32.partialorder %v351_v56, 0.0  ;;  %v485_v35 = vmul.f32 0.2, %v481_v11 }
  0xc4   :  { %v367_v39 = vpop.permute.xlu1 %366  ;;  %v3104_v40 = vsel %vm44_vm2, -1e+30, %v257_v37  ;;  %v357_v20 = vsel %vm353_vm6, %v351_v56, %v355_v6 }
  0xc5   :  { %v265_v41 = vsel %vm264_vm3, %v3104_v40, -inf  ;;  %v377_v53 = vadd.f32 %v376_v48, %v367_v39  ;;  %v361_v36 = vmul.f32 %v360_v4, %v357_v20 }
  0xc6   :  { %266 = vmax.xlane.f32.xlu1 %v265_v41 }
  0xc7   :  { %v381_v62 = vmul.f32 0.2, %v377_v53  ;;  %vm379_vm4 = vcmp.gt.f32.partialorder %v377_v53, 0.0 }
  0xc8   :  { %v371_v43 = vpop.permute.xlu1 %370 }
  0xc9   :  { %v378_v25 = vadd.f32 %v376_v48, %v371_v43  ;;  %v383_v12 = vsel %vm379_vm4, %v377_v53, %v381_v62  ;;  %v362_v48 = vmul.f32 %v360_v4, %v358_v16 }
  0xca   :  { %v387_v27 = vmul.f32 %v386_v7, %v383_v12 }
  0xcb   :  { %v382_v15 = vmul.f32 0.2, %v378_v25  ;;  %vm380_vm8 = vcmp.gt.f32.partialorder %v378_v25, 0.0 }
  0xcd   :  { %v393_v44 = vpop.permute.xlu1 %392  ;;  %v384_v37 = vsel %vm380_vm8, %v378_v25, %v382_v15  ;;  %vm293_vm8 = vcmask 1045504  }
  0xce   :  { %v403_v60 = vadd.f32 %v402_v51, %v393_v44 }
  0xd0   :  { %v407_v9 = vmul.f32 0.2, %v403_v60  ;;  %vm405_vm7 = vcmp.gt.f32.partialorder %v403_v60, 0.0 }
  0xd1   :  { %v397_v45 = vpop.permute.xlu1 %396 }
  0xd2   :  { %v404_v13 = vadd.f32 %v402_v51, %v397_v45  ;;  %v409_v29 = vsel %vm405_vm7, %v403_v60, %v407_v9  ;;  %v388_v51 = vmul.f32 %v386_v7, %v384_v37  ;;  %v487_v60 = vsel %vm483_vm10, %v481_v11, %v485_v35 }
  0xd3   :  { %v413_v41 = vmul.f32 %v412_v8, %v409_v29 }
  0xd4   :  { %v408_v31 = vmul.f32 0.2, %v404_v13  ;;  %vm406_vm11 = vcmp.gt.f32.partialorder %v404_v13, 0.0  ;;  %v390_v6 = vadd.f32 %v388_v51, %v362_v48 }
  0xd6   :  { %v419_v47 = vpop.permute.xlu1 %418 }
  0xd7   :  { %v429_v54 = vadd.f32 %v428_v58, %v419_v47  ;;  %v389_v47 = vadd.f32 %v387_v27, %v361_v36 }
  0xd9   :  { %v433_v22 = vmul.f32 0.2, %v429_v54  ;;  %vm431_vm9 = vcmp.gt.f32.partialorder %v429_v54, 0.0  ;;  %v415_v62 = vadd.f32 %v413_v41, %v389_v47 }
  0xda   :  { %v423_v52 = vpop.permute.xlu1 %422 }
  0xdb   :  { %v430_v23 = vadd.f32 %v428_v58, %v423_v52  ;;  %v435_v43 = vsel %vm431_vm9, %v429_v54, %v433_v22  ;;  %v410_v52 = vsel %vm406_vm11, %v404_v13, %v408_v31  ;;  %v490_v58 = vstv %s3139_s25  ;;  %s3426_s25 = sld [smem:[#allocation2 + $0x106]] }
  0xdc   :  { %v439_v56 = vmul.f32 %v438_v17, %v435_v43  ;;  %v414_v4 = vmul.f32 %v412_v8, %v410_v52  ;;  %v532_v54 = vrot.slane %v3111_v46, %v3065_v18  ;;  %v491_v13 = vmul.f32 %v490_v58, %v487_v60  ;;  %v286_v60 = vld [vmem:[%s4501_s2] sm:$0xff] }
  0xdd   :  { %v434_v44 = vmul.f32 0.2, %v430_v23  ;;  %vm432_vm13 = vcmp.gt.f32.partialorder %v430_v23, 0.0  ;;  %v516_v22 = vstv %s3144_s26  ;;  %vm2883_vm9 = vmmov 0   ;;  %s3440_s26 = sld [smem:[#allocation2 + $0x280]] }
  0xde   :  { %v441_v9 = vadd.f32 %v439_v56, %v415_v62  ;;  %v416_v15 = vadd.f32 %v414_v4, %v390_v6  ;;  %v287_v62 = vld [vmem:[%s4501_s2 + $0x8] sm:$0xf]  ;;  %v2866_v4 = vmov 24   ;;  %v2869_v6 = vmov 27   ;;  %s4195_s2 = sld [smem:[#allocation2 + $0x384]] }
  0xdf   :  { %v445_v1 = vpop.permute.xlu1 %444 }
  0xe0   :  { %v455_v57 = vadd.f32 %v454_v63, %v445_v1 }
  0xe2   :  { %v459_v32 = vmul.f32 0.2, %v455_v57  ;;  %vm457_vm12 = vcmp.gt.f32.partialorder %v455_v57, 0.0 }
  0xe3   :  { %v449_v14 = vpop.permute.xlu1 %448 }
  0xe4   :  { %v456_v21 = vadd.f32 %v454_v63, %v449_v14  ;;  %v461_v53 = vsel %vm457_vm12, %v455_v57, %v459_v32  ;;  %v436_v63 = vsel %vm432_vm13, %v430_v23, %v434_v44  ;;  %v542_v32 = vstv %s3148_s27  ;;  %s3442_s27 = sld [smem:[#allocation2 + $0x184]] }
  0xe5   :  { %v465_v25 = vmul.f32 %v464_v49, %v461_v53  ;;  %v440_v11 = vmul.f32 %v438_v17, %v436_v63  ;;  %v3172_v63 = vpack.c.bf16 %v287_v62, %v286_v60 }
  0xe6   :  { %v460_v55 = vmul.f32 0.2, %v456_v21  ;;  %vm458_vm14 = vcmp.gt.f32.partialorder %v456_v21, 0.0 }
  0xe7   :  { %v467_v8 = vadd.f32 %v465_v25, %v441_v9  ;;  %v442_v27 = vadd.f32 %v440_v11, %v416_v15  ;;  %4561 = vst [vmem:[#allocation14_spill] sm:$0xff] %v3172_v63  ;;  %v2867_v25 = vmov 26   ;;  %v2872_v9 = vmov 32  }
  0xe8   :  { %v475_v39 = vpop.permute.xlu1 %474  ;;  %v462_v7 = vsel %vm458_vm14, %v456_v21, %v460_v55  ;;  %v2873_v11 = vmov 29   ;;  %v2878_v15 = vmov 42  }
  0xe9   :  { %v482_v45 = vadd.f32 %v480_v61, %v475_v39  ;;  %v508_v61 = vadd.f32 %v506_v19, %v501_v50  ;;  %v466_v16 = vmul.f32 %v464_v49, %v462_v7  ;;  %v493_v36 = vadd.f32 %v491_v13, %v467_v8 }
  0xea   :  { %v2870_v7 = vmov 21   ;;  %v2875_v13 = vmov 25  }
  0xeb   :  { %v486_v1 = vmul.f32 0.2, %v482_v45  ;;  %vm484_vm15 = vcmp.gt.f32.partialorder %v482_v45, 0.0  ;;  %vm510_vm5 = vcmp.gt.f32.partialorder %v508_v61, 0.0  ;;  %v512_v14 = vmul.f32 0.2, %v508_v61 }
  0xec   :  { %v468_v35 = vadd.f32 %v466_v16, %v442_v27  ;;  %v2879_v16 = vmov 23  }
  0xed   :  { %v497_v2 = vpop.permute.xlu1 %496  ;;  %v488_v57 = vsel %vm484_vm15, %v482_v45, %v486_v1  ;;  %v514_v46 = vsel %vm510_vm5, %v508_v61, %v512_v14  ;;  %v4508_v1 = vmov 0.0   ;;  %v2864_v61 = vmov 20  }
  0xee   :  { %v507_v5 = vadd.f32 %v506_v19, %v497_v2  ;;  %v492_v29 = vmul.f32 %v490_v58, %v488_v57  ;;  %v518_v41 = vmul.f32 %v516_v22, %v514_v46  ;;  %2535 = vmatprep.subr.bf16.mxu1 %v4508_v1  ;;  %2529 = vmatprep.subr.bf16.mxu0 %v4508_v1  ;;  %v2865_v2 = vmov 17  }
  0xef   :  { %v2876_v57 = vmov 22   ;;  %v2877_v14 = vmov 34   ;;  %2531 = vmatprep.mubr.msk.bf16.mxu0 %vm2883_vm9, %v4508_v1  ;;  %2537 = vmatprep.mubr.msk.bf16.mxu1 %vm2883_vm9, %v4508_v1 }
  0xf0   :  { %vm509_vm4 = vcmp.gt.f32.partialorder %v507_v5, 0.0  ;;  %v511_v12 = vmul.f32 0.2, %v507_v5  ;;  %v494_v45 = vadd.f32 %v492_v29, %v468_v35 }
  0xf2   :  { %v513_v20 = vsel %vm509_vm4, %v507_v5, %v511_v12  ;;  %v523_v19 = vpop.permute.xlu1 %522  ;;  %v520_v51 = vadd.f32 %v518_v41, %v494_v45  ;;  %v2868_v5 = vmov 18   ;;  %v2874_v12 = vmov 40  }
  0xf3   :  { %v533_v23 = vadd.f32 %v532_v54, %v523_v19  ;;  %v517_v31 = vmul.f32 %v516_v22, %v513_v20  ;;  %v2880_v19 = vmov 28   ;;  %v2884_v41 = vmov 30  }
  0xf5   :  { %vm535_vm6 = vcmp.gt.f32.partialorder %v533_v23, 0.0  ;;  %v537_v17 = vmul.f32 0.2, %v533_v23  ;;  %v519_v43 = vadd.f32 %v517_v31, %v493_v36  ;;  %v2881_v31 = vmov 33  }
  0xf6   :  { %v527_v21 = vpop.permute.xlu1 %526  ;;  %v295_v36 = vsel %vm293_vm8, %v3172_v63, 0 }
  0xf7   :  { %v539_v37 = vsel %vm535_vm6, %v533_v23, %v537_v17  ;;  %v534_v39 = vadd.f32 %v532_v54, %v527_v21  ;;  %v2871_v54 = vmov 19   ;;  %v2882_v21 = vmov 41   ;;  %2530 = vmatpush3.bf16.msra.mxu0 %v295_v36 }
  0xf8   :  { %v543_v44 = vmul.f32 %v542_v32, %v539_v37  ;;  %2541 = vmatprep.subr.bf16.mxu0 %v4508_v1  ;;  %v2895_v36 = vmov 57  }
  0xf9   :  { %vm536_vm7 = vcmp.gt.f32.partialorder %v534_v39, 0.0  ;;  %v538_v47 = vmul.f32 0.2, %v534_v39 }
  0xfa   :  { %v545_v48 = vadd.f32 %v543_v44, %v519_v43 }
  0xfb   :  { %v540_v49 = vsel %vm536_vm7, %v534_v39, %v538_v47 }
  0xfc   :  { %v3156_v50 = vsel %vm43_vm0, -1e+30, %v545_v48  ;;  %v544_v52 = vmul.f32 %v542_v32, %v540_v49 }
  0xfd   :  { %v549_v53 = vsel %vm260_vm1, %v3156_v50, -inf }
  0xfe   :  { %550 = vmax.xlane.f32.xlu0 %v549_v53  ;;  %v546_v55 = vadd.f32 %v544_v52, %v520_v51  ;;  %v3251_v51 = vld [vmem:[%s4500_s1] sm:$0xff] }
 0x100   :  { %v3162_v56 = vsel %vm44_vm2, -1e+30, %v546_v55 }
 0x101   :  { %v552_v58 = vsel %vm264_vm3, %v3162_v56, -inf }
 0x102   :  { %553 = vmax.xlane.f32.xlu1 %v552_v58 }
 0x113   :  { %575 = vrot.lane.b32.xlu1 %v3172_v63, %s2862_s7  ;;  %s4184_s7 = sld [smem:[#allocation2 + $0x383]] }
 0x114   :  { %626 = vperm.xlu0 %2681, %v2966_v0  }
 0x117   :  { %630 = vperm.xlu1 %2682, %v2973_v3  }
 0x118   :  { %2686 = vset.pattern.permute.xlu0 %v2864_v61 }
 0x119   :  { %730 = vperm.xlu0 %2686, %v2966_v0  }
 0x11b   :  { %2683 = vset.pattern.permute.xlu1 %v2865_v2 }
 0x11c   :  { %652 = vperm.xlu1 %2683, %v2966_v0  }
 0x11d   :  { %2689 = vset.pattern.permute.xlu0 %v2866_v4 }
 0x11e   :  { %915 = vperm.xlu0 %2689, %v2973_v3  }
 0x120   :  { %656 = vperm.xlu1 %2683, %v2973_v3  }
 0x122   :  { %2691 = vset.pattern.permute.xlu0 %v2867_v25 }
 0x123   :  { %963 = vperm.xlu0 %2691, %v2966_v0  }
 0x124   :  { %2684 = vset.pattern.permute.xlu1 %v2868_v5  ;;  %v2887_v5 = vmov 43  }
 0x125   :  { %678 = vperm.xlu1 %2684, %v2966_v0  }
 0x127   :  { %2694 = vset.pattern.permute.xlu0 %v2869_v6 }
 0x128   :  { %993 = vperm.xlu0 %2694, %v2973_v3  }
 0x129   :  { %682 = vperm.xlu1 %2684, %v2973_v3  }
 0x12c   :  { %2696 = vset.pattern.permute.xlu0 %v2870_v7 }
 0x12d   :  { %2685 = vset.pattern.permute.xlu1 %v2871_v54  ;;  %756 = vperm.xlu0 %2696, %v2966_v0   ;;  %v2888_v54 = vmov 36  }
 0x12e   :  { %704 = vperm.xlu1 %2685, %v2966_v0  }
 0x131   :  { %2699 = vset.pattern.permute.xlu0 %v2872_v9 }
 0x132   :  { %708 = vperm.xlu1 %2685, %v2973_v3   ;;  %1200 = vperm.xlu0 %2699, %v2973_v3  }
 0x136   :  { %2687 = vset.pattern.permute.xlu1 %v2864_v61  ;;  %2701 = vset.pattern.permute.xlu0 %v2873_v11  ;;  %v3274_v61 = vld [vmem:[%s4500_s1 + $0x8] sm:$0xf]  ;;  %s3382_s1 = sld [smem:[#allocation2 + $0x100]] }
 0x137   :  { %734 = vperm.xlu1 %2687, %v2973_v3   ;;  %1041 = vperm.xlu0 %2701, %v2966_v0  }
 0x13b   :  { %2688 = vset.pattern.permute.xlu1 %v2866_v4  ;;  %2704 = vset.pattern.permute.xlu0 %v2874_v12  ;;  %v2886_v4 = vmov 31  }
 0x13c   :  { %911 = vperm.xlu1 %2688, %v2966_v0   ;;  %1485 = vperm.xlu0 %2704, %v2973_v3  }
 0x140   :  { %2690 = vset.pattern.permute.xlu1 %v2875_v13  ;;  %2706 = vset.pattern.permute.xlu0 %v2876_v57  ;;  %v2889_v13 = vmov 44  }
 0x141   :  { %937 = vperm.xlu1 %2690, %v2966_v0   ;;  %782 = vperm.xlu0 %2706, %v2966_v0  }
 0x145   :  { %941 = vperm.xlu1 %2690, %v2973_v3   ;;  %2709 = vset.pattern.permute.xlu0 %v2877_v14 }
 0x146   :  { %1252 = vperm.xlu0 %2709, %v2973_v3  }
 0x149   :  { %2692 = vset.pattern.permute.xlu1 %v2867_v25 }
 0x14a   :  { %967 = vperm.xlu1 %2692, %v2973_v3   ;;  %2711 = vset.pattern.permute.xlu0 %v2878_v15 }
 0x14b   :  { %1533 = vperm.xlu0 %2711, %v2966_v0  }
 0x14e   :  { %2693 = vset.pattern.permute.xlu1 %v2869_v6 }
 0x14f   :  { %989 = vperm.xlu1 %2693, %v2966_v0   ;;  %v263_v8 = vpop.xlane.xlu0 %262  ;;  %2714 = vset.pattern.permute.xlu0 %v2879_v16 }
 0x150   :  { %v268_v20 = vsub.f32 %v3097_v33, %v263_v8 }
 0x152   :  { %v270_v23 = vmul.f32 1.442695, %v268_v20 }
 0x153   :  { %2695 = vset.pattern.permute.xlu1 %v2880_v19  ;;  %v267_v22 = vpop.xlane.xlu1 %266  ;;  %v2891_v19 = vmov 48  }
 0x154   :  { %1015 = vperm.xlu1 %2695, %v2966_v0   ;;  %v269_v27 = vsub.f32 %v3104_v40, %v267_v22  ;;  %2760 = vpow2.f32 %v270_v23 }
 0x156   :  { %v272_v29 = vmul.f32 1.442695, %v269_v27  ;;  %v2892_v27 = vmov 49  }
 0x158   :  { %1019 = vperm.xlu1 %2695, %v2973_v3   ;;  %2762 = vpow2.f32 %v272_v29 }
 0x15c   :  { %2697 = vset.pattern.permute.xlu1 %v2870_v7 }
 0x15d   :  { %760 = vperm.xlu1 %2697, %v2973_v3  }
 0x15e   :  { %v2761_v33 = vpop.eup %2760 }
 0x15f   :  { %v3212_v46 = vsel %vm43_vm0, 0.0, %v2761_v33 }
 0x160   :  { %v276_v40 = vsel %vm260_vm1, %v3212_v46, 0.0 }
 0x161   :  { %2698 = vset.pattern.permute.xlu1 %v2872_v9 }
 0x162   :  { %1196 = vperm.xlu1 %2698, %v2966_v0   ;;  %v2763_v17 = vpop.eup %2762 }
 0x163   :  { %v3219_v32 = vsel %vm44_vm2, 0.0, %v2763_v17 }
 0x164   :  { %v279_v35 = vsel %vm264_vm3, %v3219_v32, 0.0 }
 0x166   :  { %2700 = vset.pattern.permute.xlu1 %v2881_v31  ;;  %v2893_v31 = vmov 45  }
 0x167   :  { %1222 = vperm.xlu1 %2700, %v2966_v0  }
 0x16a   :  { %277 = vadd.xlane.f32.xlu0 %v276_v40 }
 0x16b   :  { %1226 = vperm.xlu1 %2700, %v2973_v3  }
 0x16e   :  { %280 = vadd.xlane.f32.xlu0 %v279_v35 }
 0x16f   :  { %2702 = vset.pattern.permute.xlu1 %v2873_v11 }
 0x170   :  { %1045 = vperm.xlu1 %2702, %v2973_v3  }
 0x174   :  { %2703 = vset.pattern.permute.xlu1 %v2874_v12 }
 0x175   :  { %1481 = vperm.xlu1 %2703, %v2966_v0  }
 0x179   :  { %2705 = vset.pattern.permute.xlu1 %v2882_v21  ;;  %v2894_v21 = vmov 56  }
 0x17a   :  { %1507 = vperm.xlu1 %2705, %v2966_v0  }
 0x17e   :  { %1511 = vperm.xlu1 %2705, %v2973_v3  }
 0x182   :  { %2707 = vset.pattern.permute.xlu1 %v2876_v57 }
 0x183   :  { %786 = vperm.xlu1 %2707, %v2973_v3  }
 0x187   :  { %2708 = vset.pattern.permute.xlu1 %v2877_v14 }
 0x188   :  { %1248 = vperm.xlu1 %2708, %v2966_v0  }
 0x18b   :  { %v551_v37 = vpop.xlane.xlu0 %550 }
 0x18c   :  { %v555_v39 = vsub.f32 %v3156_v50, %v551_v37  ;;  %2710 = vset.pattern.permute.xlu1 %v2884_v41  ;;  %v2896_v41 = vmov 38  }
 0x18d   :  { %1067 = vperm.xlu1 %2710, %v2966_v0  }
 0x18e   :  { %v557_v43 = vmul.f32 1.442695, %v555_v39 }
 0x18f   :  { %v554_v44 = vpop.xlane.xlu1 %553 }
 0x190   :  { %2764 = vpow2.f32 %v557_v43  ;;  %v556_v45 = vsub.f32 %v3162_v56, %v554_v44  ;;  %v2885_v56 = vmov 35  }
 0x191   :  { %1071 = vperm.xlu1 %2710, %v2973_v3  }
 0x192   :  { %v559_v47 = vmul.f32 1.442695, %v556_v45  ;;  %v2897_v45 = vmov 46  }
 0x193   :  { %v576_v48 = vpop.permute.xlu1 %575  ;;  %v3287_v9 = vpop.permute.xlu0 %626 }
 0x194   :  { %2766 = vpow2.f32 %v559_v47  ;;  %v581_v49 = vsel %vm293_vm8, %v576_v48, 0 }
 0x195   :  { %2712 = vset.pattern.permute.xlu1 %v2878_v15  ;;  %2536 = vmatpush3.bf16.msra.mxu1 %v581_v49  ;;  %v2890_v15 = vmov 37   ;;  %v2898_v49 = vmov 58  }
 0x196   :  { %1537 = vperm.xlu1 %2712, %v2973_v3   ;;  %2547 = vmatprep.subr.bf16.mxu1 %v4508_v1 }
 0x197   :  { %v3245_v0 = vpop.permute.xlu1 %630 }
 0x198   :  { %v3294_v12 = vpop.permute.xlu0 %730 }
 0x19a   :  { %v2765_v50 = vpop.eup %2764  ;;  %2713 = vset.pattern.permute.xlu1 %v2879_v16 }
 0x19b   :  { %808 = vperm.xlu1 %2713, %v3251_v51   ;;  %v3254_v52 = vpop.permute.xlu1 %652  ;;  %v3258_v53 = vsel %vm43_vm0, 0.0, %v2765_v50 }
 0x19c   :  { %v563_v3 = vsel %vm260_vm1, %v3258_v53, 0.0 }
 0x19d   :  { %564 = vadd.xlane.f32.xlu0 %v563_v3  ;;  %v3300_v14 = vpop.permute.xlu0 %915  ;;  %v2899_v3 = vmov 50  }
 0x19e   :  { %v2767_v55 = vpop.eup %2766 }
 0x19f   :  { %2715 = vset.pattern.permute.xlu1 %v2885_v56  ;;  %v3262_v58 = vpop.permute.xlu1 %656  ;;  %v3266_v60 = vsel %vm44_vm2, 0.0, %v2767_v55  ;;  %v2900_v56 = vmov 51  }
 0x1a0   :  { %1274 = vperm.xlu1 %2715, %v3251_v51   ;;  %v566_v62 = vsel %vm264_vm3, %v3266_v60, 0.0 }
 0x1a1   :  { %567 = vadd.xlane.f32.xlu0 %v566_v62 }
 0x1a2   :  { %v3308_v20 = vpop.permute.xlu0 %963 }
 0x1a4   :  { %1278 = vperm.xlu1 %2715, %v3274_v61   ;;  %v3277_v2 = vpop.permute.xlu1 %678 }
 0x1a7   :  { %v3315_v23 = vpop.permute.xlu0 %993 }
 0x1a8   :  { %2717 = vset.pattern.permute.xlu1 %v2886_v4  ;;  %v3279_v25 = vpop.permute.xlu1 %682 }
 0x1a9   :  { %1097 = vperm.xlu1 %2717, %v3274_v61  }
 0x1ac   :  { %v3321_v33 = vpop.permute.xlu0 %756 }
 0x1ad   :  { %2718 = vset.pattern.permute.xlu1 %v2887_v5  ;;  %v3282_v6 = vpop.permute.xlu1 %704 }
 0x1ae   :  { %1559 = vperm.xlu1 %2718, %v3251_v51  }
 0x1b1   :  { %v3285_v7 = vpop.permute.xlu1 %708  ;;  %v3328_v40 = vpop.permute.xlu0 %1200 }
 0x1b2   :  { %2720 = vset.pattern.permute.xlu1 %v2888_v54 }
 0x1b3   :  { %1300 = vperm.xlu1 %2720, %v3251_v51  }
 0x1b6   :  { %v3290_v11 = vpop.permute.xlu1 %734  ;;  %v3336_v39 = vpop.permute.xlu0 %1041 }
 0x1b7   :  { %1304 = vperm.xlu1 %2720, %v3274_v61   ;;  %812 = vperm.xlu0 %2714, %v3274_v61  }
 0x1bb   :  { %2722 = vset.pattern.permute.xlu1 %v2889_v13  ;;  %v3296_v57 = vpop.permute.xlu1 %911  ;;  %2716 = vset.pattern.permute.xlu0 %v2886_v4  ;;  %v3343_v44 = vpop.permute.xlu0 %1485 }
 0x1bc   :  { %1589 = vperm.xlu1 %2722, %v3274_v61   ;;  %1093 = vperm.xlu0 %2716, %v3251_v51   ;;  %4565 = vst [vmem:[#allocation18_spill] sm:$0xff] %v3343_v44 }
 0x1c0   :  { %2723 = vset.pattern.permute.xlu1 %v2890_v15  ;;  %v3302_v8 = vpop.permute.xlu1 %937  ;;  %2719 = vset.pattern.permute.xlu0 %v2887_v5  ;;  %v3349_v48 = vpop.permute.xlu0 %782  ;;  %v2901_v5 = vmov 47  }
 0x1c1   :  { %1326 = vperm.xlu1 %2723, %v3251_v51   ;;  %1563 = vperm.xlu0 %2719, %v3274_v61  }
 0x1c4   :  { %v3306_v16 = vpop.permute.xlu1 %941 }
 0x1c5   :  { %2725 = vset.pattern.permute.xlu1 %v2891_v19  ;;  %2721 = vset.pattern.permute.xlu0 %v2889_v13  ;;  %v3355_v55 = vpop.permute.xlu0 %1252 }
 0x1c6   :  { %1766 = vperm.xlu1 %2725, %v3251_v51   ;;  %1585 = vperm.xlu0 %2721, %v3251_v51   ;;  %4568 = vst [vmem:[#allocation21_spill] sm:$0xff] %v3355_v55 }
 0x1c9   :  { %v3312_v22 = vpop.permute.xlu1 %967 }
 0x1ca   :  { %1770 = vperm.xlu1 %2725, %v3274_v61   ;;  %2724 = vset.pattern.permute.xlu0 %v2890_v15  ;;  %v3361_v4 = vpop.permute.xlu0 %1533  ;;  %v4512_v15 = vmov 52  }
 0x1cb   :  { %1330 = vperm.xlu0 %2724, %v3274_v61   ;;  %4569 = vst [vmem:[#allocation22_spill] sm:$0xff] %v3361_v4 }
 0x1ce   :  { %2727 = vset.pattern.permute.xlu1 %v2892_v27  ;;  %v3318_v29 = vpop.permute.xlu1 %989 }
 0x1cf   :  { %4562 = vst [vmem:[#allocation15_spill] sm:$0xff] %v3318_v29  ;;  %1796 = vperm.xlu1 %2727, %v3274_v61   ;;  %2726 = vset.pattern.permute.xlu0 %v2892_v27 }
 0x1d0   :  { %1792 = vperm.xlu0 %2726, %v3251_v51  }
 0x1d3   :  { %2728 = vset.pattern.permute.xlu1 %v2893_v31  ;;  %v3324_v17 = vpop.permute.xlu1 %1015 }
 0x1d4   :  { %4563 = vst [vmem:[#allocation16_spill] sm:$0xff] %v3324_v17  ;;  %1611 = vperm.xlu1 %2728, %v3251_v51   ;;  %2729 = vset.pattern.permute.xlu0 %v2893_v31 }
 0x1d5   :  { %1615 = vperm.xlu0 %2729, %v3274_v61  }
 0x1d7   :  { %v3330_v35 = vpop.permute.xlu1 %1019 }
 0x1d8   :  { %2730 = vset.pattern.permute.xlu1 %v2894_v21  ;;  %v4510_v21 = vmov 60  }
 0x1d9   :  { %2051 = vperm.xlu1 %2730, %v3251_v51   ;;  %2731 = vset.pattern.permute.xlu0 %v2895_v36 }
 0x1da   :  { %2077 = vperm.xlu0 %2731, %v3251_v51  }
 0x1dc   :  { %v3334_v37 = vpop.permute.xlu1 %760 }
 0x1dd   :  { %2055 = vperm.xlu1 %2730, %v3274_v61  }
 0x1de   :  { %2734 = vset.pattern.permute.xlu0 %v2896_v41 }
 0x1df   :  { %1356 = vperm.xlu0 %2734, %v3274_v61  }
 0x1e1   :  { %2732 = vset.pattern.permute.xlu1 %v2895_v36  ;;  %v3340_v43 = vpop.permute.xlu1 %1196  ;;  %v2904_v36 = vmov 39  }
 0x1e2   :  { %4564 = vst [vmem:[#allocation17_spill] sm:$0xff] %v3340_v43  ;;  %2081 = vperm.xlu1 %2732, %v3274_v61   ;;  %v2908_v43 = vmov 59  }
 0x1e3   :  { %2736 = vset.pattern.permute.xlu0 %v2897_v45 }
 0x1e4   :  { %1637 = vperm.xlu0 %2736, %v3251_v51  }
 0x1e6   :  { %2733 = vset.pattern.permute.xlu1 %v2896_v41  ;;  %v3346_v47 = vpop.permute.xlu1 %1222 }
 0x1e7   :  { %4566 = vst [vmem:[#allocation19_spill] sm:$0xff] %v3346_v47  ;;  %1352 = vperm.xlu1 %2733, %v3251_v51  }
 0x1e8   :  { %2739 = vset.pattern.permute.xlu0 %v2898_v49 }
 0x1e9   :  { %2107 = vperm.xlu0 %2739, %v3274_v61  }
 0x1ea   :  { %v3352_v50 = vpop.permute.xlu1 %1226 }
 0x1eb   :  { %4567 = vst [vmem:[#allocation20_spill] sm:$0xff] %v3352_v50  ;;  %2735 = vset.pattern.permute.xlu1 %v2899_v3 }
 0x1ec   :  { %1818 = vperm.xlu1 %2735, %v3251_v51  }
 0x1ed   :  { %2741 = vset.pattern.permute.xlu0 %v2900_v56 }
 0x1ee   :  { %1844 = vperm.xlu0 %2741, %v3251_v51  }
 0x1ef   :  { %v3358_v62 = vpop.permute.xlu1 %1045 }
 0x1f0   :  { %1822 = vperm.xlu1 %2735, %v3274_v61  }
 0x1f2   :  { %2744 = vset.pattern.permute.xlu0 %v2901_v5 }
 0x1f3   :  { %1667 = vperm.xlu0 %2744, %v3274_v61  }
 0x1f4   :  { %2737 = vset.pattern.permute.xlu1 %v2897_v45  ;;  %v3364_v54 = vpop.permute.xlu1 %1481  ;;  %v4506_v45 = vmov 61  }
 0x1f5   :  { %4570 = vst [vmem:[#allocation23_spill] sm:$0xff] %v3364_v54  ;;  %1641 = vperm.xlu1 %2737, %v3274_v61  }
 0x1f7   :  { %v278_v13 = vpop.xlane.xlu0 %277  ;;  %2746 = vset.pattern.permute.xlu0 %v4512_v15 }
 0x1f8   :  { %1870 = vperm.xlu0 %2746, %v3251_v51   ;;  %2768 = vrcp.f32 %v278_v13 }
 0x1f9   :  { %2738 = vset.pattern.permute.xlu1 %v2898_v49  ;;  %v3369_v19 = vpop.permute.xlu1 %1507 }
 0x1fa   :  { %4571 = vst [vmem:[#allocation24_spill] sm:$0xff] %v3369_v19  ;;  %2103 = vperm.xlu1 %2738, %v3251_v51  }
 0x1fb   :  { %v281_v27 = vpop.xlane.xlu0 %280 }
 0x1fc   :  { %2770 = vrcp.f32 %v281_v27  ;;  %2749 = vset.pattern.permute.xlu0 %v4510_v21 }
 0x1fd   :  { %v3372_v31 = vpop.permute.xlu1 %1511  ;;  %2159 = vperm.xlu0 %2749, %v3274_v61  }
 0x1fe   :  { %4572 = vst [vmem:[#allocation25_spill] sm:$0xff] %v3372_v31  ;;  %2740 = vset.pattern.permute.xlu1 %v2904_v36  ;;  %v3487_v31 = vld [vmem:[%s4502_s3 + $0x28] sm:$0xff] }
 0x1ff   :  { %1378 = vperm.xlu1 %2740, %v3251_v51   ;;  %v3519_v54 = vrot.slane %v3487_v31, %v3016_v26 }
 0x201   :  { %2751 = vset.pattern.permute.xlu0 %v4506_v45  ;;  %v4507_v45 = vmov 54   ;;  %4575 = vst [vmem:[#allocation28_spill] sm:$0xff] %v3519_v54 }
 0x202   :  { %v3377_v41 = vpop.permute.xlu1 %786  ;;  %v2769_v49 = vpop.eup %2768  ;;  %2181 = vperm.xlu0 %2751, %v3251_v51  }
 0x203   :  { %1382 = vperm.xlu1 %2740, %v3274_v61   ;;  %v284_v27 = vmul.f32 %v2769_v49, %v3212_v46  ;;  %v3422_v49 = vld [vmem:[%s4502_s3 + $0x18] sm:$0xff] }
 0x204   :  { %v3477_v63 = vrot.slane %v3422_v49, %v3032_v34  ;;  %v3502_v4 = vrot.slane %v3422_v49, %v3046_v42  ;;  %v3506_v47 = vrot.slane %v3422_v49, %v3008_v24 }
 0x206   :  { %v2771_v3 = vpop.eup %2770  ;;  %2754 = vset.pattern.permute.xlu0 %v4507_v45 }
 0x207   :  { %2742 = vset.pattern.permute.xlu1 %v2900_v56  ;;  %v3392_v13 = vpop.permute.xlu1 %1248  ;;  %v285_v36 = vmul.f32 %v2771_v3, %v3219_v32  ;;  %v3405_v56 = vld [vmem:[%s4502_s3 + $0x10] sm:$0xff]  ;;  %1926 = vperm.xlu0 %2754, %v3274_v61  }
 0x208   :  { %4573 = vst [vmem:[#allocation26_spill] sm:$0xff] %v3392_v13  ;;  %1848 = vperm.xlu1 %2742, %v3274_v61   ;;  %v636_v32 = vrot.slane %v3405_v56, %v3016_v26  ;;  %v3438_v45 = vrot.slane %v3405_v56, %v3021_v30  ;;  %v3472_v21 = vrot.slane %v3405_v56, %v3032_v34 }
 0x209   :  { %v288_v46 = vpack.c.bf16 %v285_v36, %v284_v27  ;;  %v662_v36 = vrot.slane %v3405_v56, %v3008_v24  ;;  %v3455_v27 = vld [vmem:[%s4502_s3 + $0x20] sm:$0xff]  ;;  %v3482_v13 = vrot.slane %v3405_v56, %v3046_v42  ;;  %v3523_v19 = vrot.slane %v3405_v56, %v3058_v59 }
 0x20a   :  { %v3496_v15 = vrot.slane %v3455_v27, %v3016_v26  ;;  %v637_v10 = vadd.f32 %v636_v32, %v3287_v9  ;;  %v4519_v9 = vmov 63  }
 0x20b   :  { %2532 = vmatmul.mubr.msk.bf16.vlgmr.msra.gmra.mrb[0].mxu0 %vm260_vm1, %v288_v46  ;;  %v3468_v46 = vrot.slane %v3422_v49, %v3021_v30  ;;  %v663_v42 = vadd.f32 %v662_v36, %v3254_v52  ;;  %v3547_v52 = vrot.slane %v3455_v27, %v3021_v30 }
 0x20c   :  { %2743 = vset.pattern.permute.xlu1 %v2901_v5  ;;  %v3428_v3 = vpop.permute.xlu1 %1067  ;;  %2543 = vmatprep.mubr.msk.bf16.mxu0 %vm2883_vm9, %v4508_v1  ;;  %v4511_v5 = vmov 55   ;;  %v3448_v1 = vrot.slane %v3405_v56, %v3041_v38  ;;  %v641_v44 = vmul.f32 0.2, %v637_v10  ;;  %vm639_vm10 = vcmp.gt.f32.partialorder %v637_v10, 0.0 }
 0x20d   :  { %4574 = vst [vmem:[#allocation27_spill] sm:$0xff] %v3428_v3  ;;  %1663 = vperm.xlu1 %2743, %v3251_v51   ;;  %2756 = vset.pattern.permute.xlu0 %v4511_v5  ;;  %v3464_v5 = vrot.slane %v3422_v49, %v3016_v26  ;;  %v3538_v26 = vrot.slane %v3455_v27, %v3008_v24  ;;  %4578 = vst [vmem:[#allocation31_spill] sm:$0xff] %v3547_v52  ;;  %v667_v55 = vmul.f32 0.2, %v663_v42 }
 0x20e   :  { %1948 = vperm.xlu0 %2756, %v3251_v51   ;;  %v741_v50 = vadd.f32 %v3448_v1, %v3294_v12  ;;  %v3533_v12 = vrot.slane %v3422_v49, %v3041_v38  ;;  %vm665_vm13 = vcmp.gt.f32.partialorder %v663_v42, 0.0  ;;  %v3568_v38 = vrot.slane %v3422_v49, %v3058_v59 }
 0x20f   :  { %4576 = vst [vmem:[#allocation29_spill] sm:$0xff] %v3538_v26  ;;  %v923_v17 = vadd.f32 %v3464_v5, %v3300_v14  ;;  %v3562_v26 = vrot.slane %v3487_v31, %v3008_v24  ;;  %v4581_v14 = vmov 52   ;;  %v690_v52 = vadd.f32 %v3438_v45, %v3279_v25 }
 0x210   :  { %v3489_v3 = vpop.permute.xlu1 %1071  ;;  %v745_v28 = vmul.f32 0.2, %v741_v50  ;;  %vm743_vm12 = vcmp.gt.f32.partialorder %v741_v50, 0.0 }
 0x211   :  { %2745 = vset.pattern.permute.xlu1 %v2908_v43  ;;  %v638_v43 = vadd.f32 %v636_v32, %v3245_v0  ;;  %v3558_v32 = vrot.slane %v3487_v31, %v3021_v30  ;;  %4580 = vst [vmem:[#allocation33_spill] sm:$0xff] %v3562_v26  ;;  %vm925_vm15 = vcmp.gt.f32.partialorder %v923_v17, 0.0  ;;  %vm692_vm6 = vcmp.gt.f32.partialorder %v690_v52, 0.0 }
 0x212   :  { %2129 = vperm.xlu1 %2745, %v3251_v51   ;;  %2759 = vset.pattern.permute.xlu0 %v4519_v9  ;;  %v664_v9 = vadd.f32 %v662_v36, %v3262_v58  ;;  %v643_v58 = vsel %vm639_vm10, %v637_v10, %v641_v44  ;;  %v747_v24 = vsel %vm743_vm12, %v741_v50, %v745_v28 }
 0x213   :  { %2237 = vperm.xlu0 %2759, %v3274_v61   ;;  %v642_v0 = vmul.f32 0.2, %v638_v43  ;;  %vm640_vm11 = vcmp.gt.f32.partialorder %v638_v43, 0.0  ;;  %4579 = vst [vmem:[#allocation32_spill] sm:$0xff] %v3558_v32  ;;  %v974_v10 = vadd.f32 %v3468_v46, %v3308_v20  ;;  %v669_v44 = vsel %vm665_vm13, %v663_v42, %v667_v55 }
 0x214   :  { %v668_v30 = vmul.f32 0.2, %v664_v9  ;;  %vm666_vm14 = vcmp.gt.f32.partialorder %v664_v9, 0.0  ;;  %v1001_v28 = vadd.f32 %v3477_v63, %v3315_v23  ;;  %v3592_v42 = vrot.slane %v3405_v56, %v3065_v18 }
 0x215   :  { %v3542_v54 = vpop.permute.xlu1 %1537  ;;  %v4585_v55 = vstv %s3384_s11  ;;  %v978_v32 = vmul.f32 0.2, %v974_v10  ;;  %v4587_v23 = vmov 60   ;;  %vm976_vm5 = vcmp.gt.f32.partialorder %v974_v10, 0.0  ;;  %s3702_s11 = sld [smem:[#allocation2 + $0x283]] }
 0x216   :  { %4577 = vst [vmem:[#allocation30_spill] sm:$0xff] %v3542_v54  ;;  %2133 = vperm.xlu1 %2745, %v3274_v61   ;;  %v689_v54 = vadd.f32 %v3438_v45, %v3277_v2  ;;  %v644_v2 = vsel %vm640_vm11, %v638_v43, %v642_v0  ;;  %v4583_v43 = vstv %s3382_s1  ;;  %v673_v25 = vmul.f32 %v4585_v55, %v669_v44  ;;  %s3612_s1 = sld [smem:[#allocation2 + $0x187]] }
 0x217   :  { %v648_v20 = vmul.f32 %v4583_v43, %v644_v2  ;;  %v4584_v0 = vmov %v4583_v43  ;;  %v670_v45 = vsel %vm666_vm14, %v664_v9, %v668_v30  ;;  %v1005_v30 = vmul.f32 0.2, %v1001_v28 }
 0x218   :  { %v693_v36 = vmul.f32 0.2, %v689_v54  ;;  %v647_v59 = vmul.f32 %v4584_v0, %v643_v58  ;;  %vm691_vm4 = vcmp.gt.f32.partialorder %v689_v54, 0.0  ;;  %v694_v58 = vmul.f32 0.2, %v690_v52 }
 0x219   :  { %vm1003_vm7 = vcmp.gt.f32.partialorder %v1001_v28, 0.0  ;;  %v3610_v44 = vrot.slane %v3455_v27, %v3032_v34  ;;  %v980_v43 = vsel %vm976_vm5, %v974_v10, %v978_v32  ;;  %v4591_v0 = vstv %s3388_s13  ;;  %s3777_s13 = sld [smem:[#allocation2 + $0x284]] }
 0x21a   :  { %2747 = vset.pattern.permute.xlu1 %v4581_v14  ;;  %v3571_v29 = vpop.permute.xlu1 %808  ;;  %v927_v14 = vmul.f32 0.2, %v923_v17  ;;  %v695_v56 = vsel %vm691_vm4, %v689_v54, %v693_v36  ;;  %v767_v54 = vadd.f32 %v3482_v13, %v3321_v33  ;;  %v975_v36 = vadd.f32 %v3468_v46, %v3312_v22 }
 0x21b   :  { %4582 = vst [vmem:[#allocation34_spill] sm:$0xff] %v3571_v29  ;;  %1874 = vperm.xlu1 %2747, %v3274_v61   ;;  %v4586_v29 = vstv %s3386_s12  ;;  %4590 = vst [vmem:[#allocation36_spill] sm:$0xff] %v3610_v44  ;;  %v715_v32 = vadd.f32 %v3472_v21, %v3282_v6  ;;  %v716_v33 = vadd.f32 %v3472_v21, %v3285_v7  ;;  %v4593_v10 = vstv %s3396_s15 }
 0x21c   :  { %v3598_v26 = vmul.f32 %v4586_v29, %v747_v24  ;;  %v929_v2 = vsel %vm925_vm15, %v923_v17, %v927_v14  ;;  %v949_v24 = vadd.f32 %v3506_v47, %v3306_v16  ;;  %v4589_v29 = vmov %v4585_v55 }
 0x21d   :  { %v674_v9 = vmul.f32 %v4589_v29, %v670_v45  ;;  %v4539_v17 = vstv %s3573_s17  ;;  %v675_v14 = vadd.f32 %v673_v25, %v647_v59  ;;  %v699_v55 = vmul.f32 %v4591_v0, %v695_v56 }
 0x21e   :  { %v4592_v45 = vstv %s3390_s14  ;;  %v696_v29 = vsel %vm692_vm6, %v690_v52, %v694_v58  ;;  %v1007_v59 = vsel %vm1003_vm7, %v1001_v28, %v1005_v30  ;;  %v953_v22 = vmul.f32 0.2, %v949_v24 }
 0x21f   :  { %2748 = vset.pattern.permute.xlu1 %v4587_v23  ;;  %v3601_v50 = vpop.permute.xlu1 %1274  ;;  %v933_v23 = vmul.f32 %v4592_v45, %v929_v2  ;;  %v676_v46 = vadd.f32 %v674_v9, %v648_v20  ;;  %v3633_v25 = vmul.f32 %v4593_v10, %v980_v43  ;;  %vm951_vm10 = vcmp.gt.f32.partialorder %v949_v24, 0.0 }
 0x220   :  { %4588 = vst [vmem:[#allocation35_spill] sm:$0xff] %v3601_v50  ;;  %2155 = vperm.xlu1 %2748, %v3251_v51   ;;  %v2910_v50 = vmov 53   ;;  %v3637_v52 = vrot.slane %v3422_v49, %v3065_v18  ;;  %v771_v2 = vmul.f32 0.2, %v767_v54  ;;  %v742_v6 = vadd.f32 %v3448_v1, %v3290_v11 }
 0x221   :  { %v979_v7 = vmul.f32 0.2, %v975_v36  ;;  %v3643_v21 = vadd.f32 %v699_v55, %v675_v14  ;;  %v4595_v58 = vstv %s3407_s4  ;;  %vm769_vm11 = vcmp.gt.f32.partialorder %v767_v54, 0.0 }
 0x222   :  { %v3647_v20 = vmul.f32 %v4595_v58, %v1007_v59  ;;  %vm977_vm12 = vcmp.gt.f32.partialorder %v975_v36, 0.0  ;;  %v719_v30 = vmul.f32 0.2, %v715_v32  ;;  %v720_v49 = vmul.f32 0.2, %v716_v33 }
 0x223   :  { %v3619_v16 = vpop.permute.xlu1 %1278  ;;  %v955_v9 = vsel %vm951_vm10, %v949_v24, %v953_v22  ;;  %v1027_v43 = vadd.f32 %v3533_v12, %v3330_v35  ;;  %vm717_vm13 = vcmp.gt.f32.partialorder %v715_v32, 0.0  ;;  %vm718_vm14 = vcmp.gt.f32.partialorder %v716_v33, 0.0 }
 0x224   :  { %2750 = vset.pattern.permute.xlu1 %v2910_v50  ;;  %v4594_v50 = vmov %v4591_v0  ;;  %v3654_v11 = vrot.slane %v3487_v31, %v3032_v34  ;;  %v4538_v14 = vstv %s3612_s1  ;;  %v773_v55 = vsel %vm769_vm11, %v767_v54, %v771_v2 }
 0x225   :  { %1896 = vperm.xlu1 %2750, %v3251_v51   ;;  %v700_v28 = vmul.f32 %v4594_v50, %v696_v29  ;;  %v746_v45 = vmul.f32 0.2, %v742_v6  ;;  %v981_v29 = vsel %vm977_vm12, %v975_v36, %v979_v7  ;;  %vm744_vm15 = vcmp.gt.f32.partialorder %v742_v6, 0.0 }
 0x226   :  { %v4596_v24 = vstv %s3424_s24  ;;  %v768_v35 = vadd.f32 %v3482_v13, %v3334_v37  ;;  %v1053_v22 = vadd.f32 %v3502_v4, %v3358_v62  ;;  %v721_v10 = vsel %vm717_vm13, %v715_v32, %v719_v30 }
 0x227   :  { %v702_v0 = vadd.f32 %v700_v28, %v676_v46  ;;  %v959_v59 = vmul.f32 %v4596_v24, %v955_v9  ;;  %v722_v50 = vsel %vm718_vm14, %v716_v33, %v720_v49  ;;  %v1031_v58 = vmul.f32 0.2, %v1027_v43 }
 0x228   :  { %v1098_v56 = vpop.permute.xlu1 %1097  ;;  %v4597_v44 = vmov 61   ;;  %v4598_v36 = vstv %s3396_s15  ;;  %vm1029_vm4 = vcmp.gt.f32.partialorder %v1027_v43, 0.0  ;;  %v794_v28 = vadd.f32 %v3523_v19, %v3377_v41  ;;  %s3791_s15 = sld [smem:[#allocation2 + $0x205]] }
 0x229   :  { %1900 = vperm.xlu1 %2750, %v3274_v61   ;;  %v985_v46 = vmul.f32 %v4598_v36, %v981_v29  ;;  %v1079_v37 = vadd.f32 %v3568_v38, %v3489_v3  ;;  %v4599_v13 = vstv %s3409_s19  ;;  %v748_v33 = vsel %vm744_vm15, %v742_v6, %v746_v45 }
 0x22a   :  { %v565_v1 = vpop.xlane.xlu0 %564  ;;  %v3675_v32 = vmul.f32 %v4599_v13, %v773_v55  ;;  %v961_v2 = vadd.f32 %v959_v59, %v933_v23  ;;  %v772_v41 = vmul.f32 0.2, %v768_v35  ;;  %v1057_v7 = vmul.f32 0.2, %v1053_v22 }
 0x22b   :  { %2772 = vrcp.f32 %v565_v1  ;;  %v1105_v3 = vadd.f32 %v3637_v52, %v1098_v56  ;;  %v4600_v30 = vstv %s3398_s16  ;;  %v1033_v9 = vsel %vm1029_vm4, %v1027_v43, %v1031_v58  ;;  %s3816_s16 = sld [smem:[#allocation2 + $0x301]] }
 0x22c   :  { %v726_v49 = vmul.f32 %v4600_v30, %v722_v50  ;;  %vm770_vm5 = vcmp.gt.f32.partialorder %v768_v35, 0.0  ;;  %vm1055_vm6 = vcmp.gt.f32.partialorder %v1053_v22, 0.0  ;;  %v4601_v1 = vmov %v4600_v30 }
 0x22d   :  { %2752 = vset.pattern.permute.xlu1 %v4597_v44  ;;  %v3664_v54 = vpop.permute.xlu1 %1559  ;;  %v3679_v44 = vadd.f32 %v3496_v15, %v3328_v40  ;;  %v725_v55 = vmul.f32 %v4601_v1, %v721_v10  ;;  %v987_v29 = vadd.f32 %v985_v46, %v961_v2  ;;  %v798_v40 = vmul.f32 0.2, %v794_v28 }
 0x22e   :  { %2185 = vperm.xlu1 %2752, %v3274_v61   ;;  %v568_v62 = vpop.xlane.xlu0 %567  ;;  %v1083_v24 = vmul.f32 0.2, %v1079_v37  ;;  %v4602_v36 = vmov 54   ;;  %v4603_v23 = vstv %s3386_s12  ;;  %vm796_vm7 = vcmp.gt.f32.partialorder %v794_v28, 0.0  ;;  %s3735_s12 = sld [smem:[#allocation2 + $0x204]] }
 0x22f   :  { %2774 = vrcp.f32 %v568_v62  ;;  %v752_v45 = vmul.f32 %v4603_v23, %v748_v33  ;;  %vm1081_vm10 = vcmp.gt.f32.partialorder %v1079_v37, 0.0  ;;  %v4604_v56 = vstv %s3442_s27 }
 0x230   :  { %v1037_v59 = vmul.f32 %v4604_v56, %v1033_v9  ;;  %v774_v43 = vsel %vm770_vm5, %v768_v35, %v772_v41  ;;  %v1059_v50 = vsel %vm1055_vm6, %v1053_v22, %v1057_v7  ;;  %v1109_v10 = vmul.f32 0.2, %v1105_v3 }
 0x231   :  { %v728_v58 = vadd.f32 %v726_v49, %v702_v0  ;;  %vm1210_vm11 = vcmp.gt.f32.partialorder %v3679_v44, 0.0  ;;  %v1212_v46 = vmul.f32 0.2, %v3679_v44  ;;  %vm1107_vm12 = vcmp.gt.f32.partialorder %v1105_v3, 0.0 }
 0x232   :  { %2753 = vset.pattern.permute.xlu1 %v4602_v36  ;;  %v3688_v6 = vpop.permute.xlu1 %1300  ;;  %v948_v62 = vadd.f32 %v3506_v47, %v3302_v8  ;;  %v1013_v13 = vadd.f32 %v3647_v20, %v987_v29  ;;  %v800_v33 = vsel %vm796_vm7, %v794_v28, %v798_v40  ;;  %v1085_v2 = vsel %vm1081_vm10, %v1079_v37, %v1083_v24 }
 0x233   :  { %1922 = vperm.xlu1 %2753, %v3251_v51   ;;  %v727_v22 = vadd.f32 %v725_v55, %v3643_v21  ;;  %v4605_v41 = vstv %s3409_s19  ;;  %v4606_v49 = vstv %s3414_s21  ;;  %v2911_v47 = vmov 62   ;;  %s3818_s19 = sld [smem:[#allocation2 + $0x285]] }
 0x234   :  { %v778_v7 = vmul.f32 %v4605_v41, %v774_v43  ;;  %v1063_v9 = vmul.f32 %v4606_v49, %v1059_v50  ;;  %v754_v20 = vadd.f32 %v752_v45, %v728_v58  ;;  %v922_v28 = vadd.f32 %v3464_v5, %v3296_v57 }
 0x235   :  { %v2773_v0 = vpop.eup %2772  ;;  %v1039_v37 = vadd.f32 %v1037_v59, %v1013_v13  ;;  %v1111_v1 = vsel %vm1107_vm12, %v1105_v3, %v1109_v10  ;;  %v4607_v21 = vstv %s3426_s25  ;;  %v4608_v40 = vstv %s3540_s10 }
 0x236   :  { %v3700_v30 = vpop.permute.xlu1 %1304  ;;  %v813_v35 = vpop.permute.xlu0 %812  ;;  %v804_v55 = vmul.f32 %v4607_v21, %v800_v33  ;;  %v1089_v24 = vmul.f32 %v4608_v40, %v1085_v2  ;;  %v3720_v23 = vadd.f32 %v3502_v4, %v3336_v39  ;;  %v952_v45 = vmul.f32 0.2, %v948_v62  ;;  %v4609_v4 = vld [vmem:[#allocation15_spill] sm:$0xff] }
 0x237   :  { %v820_v8 = vadd.f32 %v3592_v42, %v813_v35  ;;  %2755 = vset.pattern.permute.xlu1 %v2911_v47  ;;  %v571_v57 = vmul.f32 %v2773_v0, %v3258_v53  ;;  %v780_v43 = vadd.f32 %v778_v7, %v754_v20  ;;  %v1065_v50 = vadd.f32 %v1063_v9, %v1039_v37  ;;  %v4610_v0 = vld [vmem:[#allocation9_spill] sm:$0xff]  ;;  %v4614_v47 = vld [vmem:[#allocation28_spill] sm:$0xff] }
 0x238   :  { %2207 = vperm.xlu1 %2755, %v3251_v51   ;;  %v1115_v10 = vmul.f32 %v4538_v14, %v1111_v1  ;;  %v926_v58 = vmul.f32 0.2, %v922_v28  ;;  %vm950_vm14 = vcmp.gt.f32.partialorder %v948_v62, 0.0  ;;  %v793_v39 = vadd.f32 %v3523_v19, %v3349_v48  ;;  %v4648_v14 = vld [vmem:[#allocation33_spill] sm:$0xff] }
 0x239   :  { %v2775_v29 = vpop.eup %2774  ;;  %vm822_vm13 = vcmp.gt.f32.partialorder %v820_v8, 0.0  ;;  %v824_v36 = vmul.f32 0.2, %v820_v8  ;;  %v806_v13 = vadd.f32 %v804_v55, %v780_v43  ;;  %v1091_v2 = vadd.f32 %v1089_v24, %v1065_v50 }
 0x23a   :  { %v572_v5 = vmul.f32 %v2775_v29, %v3266_v60  ;;  %v1000_v60 = vadd.f32 %v3477_v63, %v4609_v4  ;;  %v1214_v35 = vsel %vm1210_vm11, %v3679_v44, %v1212_v46  ;;  %vm924_vm15 = vcmp.gt.f32.partialorder %v922_v28, 0.0  ;;  %v4611_v63 = vld [vmem:[#allocation16_spill] sm:$0xff]  ;;  %v4613_v46 = vld [vmem:[#allocation18_spill] sm:$0xff] }
 0x23b   :  { %v826_v3 = vsel %vm822_vm13, %v820_v8, %v824_v36  ;;  %v3724_v56 = vpop.permute.xlu1 %1589  ;;  %v3726_v59 = vpop.permute.xlu0 %1093  ;;  %v3744_v48 = vrot.slane %v3455_v27, %v4610_v0  ;;  %v954_v41 = vsel %vm950_vm14, %v948_v62, %v952_v45  ;;  %v1026_v7 = vadd.f32 %v3533_v12, %v4611_v63  ;;  %v4625_v4 = vld [vmem:[#allocation32_spill] sm:$0xff] }
 0x23c   :  { %2211 = vperm.xlu1 %2755, %v3274_v61   ;;  %v573_v53 = vpack.c.bf16 %v572_v5, %v571_v57  ;;  %v830_v33 = vmul.f32 %v4539_v17, %v826_v3  ;;  %v1117_v9 = vadd.f32 %v1115_v10, %v1091_v2  ;;  %v4612_v8 = vmov 0.0   ;;  %v4620_v5 = vld [vmem:[#allocation21_spill] sm:$0xff]  ;;  %v4621_v3 = vld [vmem:[#allocation31_spill] sm:$0xff]  ;;  %v4649_v17 = vld [vmem:[#allocation34_spill] sm:$0xff] }
 0x23d   :  { %vm1054_vm4 = vcmp.gt.f32.partialorder %v3720_v23, 0.0  ;;  %v1056_v44 = vmul.f32 0.2, %v3720_v23  ;;  %v1493_v20 = vadd.f32 %v4614_v47, %v4613_v46  ;;  %v4615_v37 = vmov 55   ;;  %v4629_v46 = vld [vmem:[#allocation29_spill] sm:$0xff] }
 0x23e   :  { %2538 = vmatmul.mubr.msk.bf16.vlgmr.msra.gmra.mrb[0].mxu1 %vm260_vm1, %v573_v53  ;;  %v832_v49 = vadd.f32 %v830_v33, %v806_v13  ;;  %v753_v12 = vadd.f32 %v3598_v26, %v727_v22  ;;  %v928_v1 = vsel %vm924_vm15, %v922_v28, %v926_v58  ;;  %v797_v29 = vmul.f32 0.2, %v793_v39  ;;  %v4624_v53 = vld [vmem:[#allocation22_spill] sm:$0xff] }
 0x23f   :  { %2549 = vmatprep.mubr.msk.bf16.mxu1 %vm2883_vm9, %v4612_v8  ;;  %v1004_v21 = vmul.f32 0.2, %v1000_v60  ;;  %v4618_v36 = vstv %s3424_s24  ;;  %vm795_vm5 = vcmp.gt.f32.partialorder %v793_v39, 0.0  ;;  %vm1002_vm6 = vcmp.gt.f32.partialorder %v1000_v60, 0.0  ;;  %s2923_s24 = smov 48  }
 0x240   :  { %2757 = vset.pattern.permute.xlu1 %v4615_v37  ;;  %v3757_v62 = vpop.permute.xlu1 %1326  ;;  %v3760_v55 = vpop.permute.xlu0 %1563  ;;  %v3765_v24 = vsel %vm44_vm2, -1e+30, %v832_v49  ;;  %v958_v45 = vmul.f32 %v4618_v36, %v954_v41  ;;  %v4619_v22 = vstv %s3412_s20  ;;  %v1030_v57 = vmul.f32 0.2, %v1026_v7 }
 0x241   :  { %1952 = vperm.xlu1 %2757, %v3274_v61   ;;  %4617 = vst [vmem:[#allocation15_spill] sm:$0xff] %v3765_v24  ;;  %v838_v26 = vsel %vm264_vm3, %v3765_v24, -inf  ;;  %v3773_v28 = vmul.f32 %v4619_v22, %v1214_v35  ;;  %v1260_v43 = vadd.f32 %v4621_v3, %v4620_v5  ;;  %v3781_v61 = vsel %vm44_vm2, -1e+30, %v1117_v9  ;;  %v4628_v9 = vld [vmem:[#allocation20_spill] sm:$0xff]  ;;  %v4643_v35 = vld [vmem:[#allocation5_spill] sm:$0xff] }
 0x242   :  { %839 = vmax.xlane.f32.xlu0 %v838_v26  ;;  %4622 = vst [vmem:[#allocation16_spill] sm:$0xff] %v3781_v61  ;;  %v4623_v50 = vstv %s3390_s14  ;;  %v1497_v58 = vmul.f32 0.2, %v1493_v20  ;;  %vm1028_vm7 = vcmp.gt.f32.partialorder %v1026_v7, 0.0  ;;  %v1544_v13 = vadd.f32 %v4625_v4, %v4624_v53  ;;  %s3809_s14 = sld [smem:[#allocation2 + $0x300]] }
 0x243   :  { %v932_v10 = vmul.f32 %v4623_v50, %v928_v1  ;;  %vm1495_vm10 = vcmp.gt.f32.partialorder %v1493_v20, 0.0  ;;  %v799_v33 = vsel %vm795_vm5, %v793_v39, %v797_v29  ;;  %v1006_v2 = vsel %vm1002_vm6, %v1000_v60, %v1004_v21 }
 0x244   :  { %v4626_v41 = vmov 63   ;;  %v1234_v37 = vadd.f32 %v4629_v46, %v4628_v9  ;;  %v1123_v39 = vsel %vm264_vm3, %v3781_v61, -inf  ;;  %v779_v60 = vadd.f32 %v3675_v32, %v753_v12 }
 0x245   :  { %2758 = vset.pattern.permute.xlu1 %v4626_v41  ;;  %v3789_v63 = vpop.permute.xlu1 %1766  ;;  %v960_v49 = vadd.f32 %v958_v45, %v932_v10  ;;  %v3795_v1 = vpop.permute.xlu0 %1585  ;;  %v1058_v29 = vsel %vm1054_vm4, %v3720_v23, %v1056_v44  ;;  %v1032_v21 = vsel %vm1028_vm7, %v1026_v7, %v1030_v57  ;;  %v1264_v36 = vmul.f32 0.2, %v1260_v43  ;;  %v4632_v7 = vld [vmem:[#allocation17_spill] sm:$0xff]  ;;  %v4633_v57 = vld [vmem:[#allocation19_spill] sm:$0xff] }
 0x246   :  { %4627 = vst [vmem:[#allocation18_spill] sm:$0xff] %v3789_v63  ;;  %2233 = vperm.xlu1 %2758, %v3251_v51   ;;  %v3807_v45 = vrot.slane %v3487_v31, %v4610_v0  ;;  %1124 = vmax.xlane.f32.xlu0 %v1123_v39  ;;  %v1499_v51 = vsel %vm1495_vm10, %v1493_v20, %v1497_v58  ;;  %v4630_v26 = vstv %s3426_s25  ;;  %v4631_v12 = vstv %s3407_s4  ;;  %v3827_v20 = vld [vmem:[%s4502_s3 + $0x30] sm:$0xff]  ;;  %s3847_s4 = sld [smem:[#allocation2 + $0x380]]  ;;  %v4659_v63 = vld [vmem:[#allocation26_spill] sm:$0xff]  ;;  %s2924_s25 = smov 56  }
 0x247   :  { %v803_v32 = vmul.f32 %v4630_v26, %v799_v33  ;;  %v1010_v22 = vmul.f32 %v4631_v12, %v1006_v2  ;;  %v1548_v23 = vmul.f32 0.2, %v1544_v13  ;;  %v1207_v44 = vadd.f32 %v3496_v15, %v4632_v7  ;;  %4634 = vst [vmem:[#allocation28_spill] sm:$0xff] %v3827_v20  ;;  %v3860_v7 = vld [vmem:[%s4502_s3 + $0x38] sm:$0xff]  ;;  %s3893_s3 = sld [smem:[#allocation2 + $0x382]] }
 0x248   :  { %v1233_v5 = vadd.f32 %v4629_v46, %v4633_v57  ;;  %vm1262_vm11 = vcmp.gt.f32.partialorder %v1260_v43, 0.0  ;;  %vm1546_vm12 = vcmp.gt.f32.partialorder %v1544_v13, 0.0  ;;  %v4635_v10 = vstv %s3414_s21  ;;  %v4638_v46 = vld [vmem:[#allocation10_spill] sm:$0xff]  ;;  %s3849_s21 = sld [smem:[#allocation2 + $0x381]]  ;;  %4640 = vst [vmem:[#allocation21_spill] sm:$0xff] %v3860_v7 }
 0x249   :  { %v3829_v50 = vpop.permute.xlu1 %1770  ;;  %v1062_v58 = vmul.f32 %v4635_v10, %v1058_v29  ;;  %v986_v53 = vadd.f32 %v3633_v25, %v960_v49  ;;  %v4636_v33 = vstv %s3442_s27  ;;  %v1238_v41 = vmul.f32 0.2, %v1234_v37  ;;  %s3862_s27 = sld [smem:[#allocation2 + $0x206]] }
 0x24a   :  { %v1036_v2 = vmul.f32 %v4636_v33, %v1032_v21  ;;  %v4637_v15 = vstv %s3440_s26  ;;  %vm1236_vm13 = vcmp.gt.f32.partialorder %v1234_v37, 0.0  ;;  %v3842_v39 = vrot.slane %v3455_v27, %v4638_v46  ;;  %v3845_v12 = vpop.permute.xlu0 %1330  ;;  %v4639_v21 = vld [vmem:[#allocation6_spill] sm:$0xff] }
 0x24b   :  { %v3838_v9 = vmul.f32 %v4637_v15, %v1499_v51  ;;  %v1012_v25 = vadd.f32 %v1010_v22, %v986_v53  ;;  %v1266_v49 = vsel %vm1262_vm11, %v1260_v43, %v1264_v36  ;;  %v1550_v29 = vsel %vm1546_vm12, %v1544_v13, %v1548_v23 }
 0x24c   :  { %v3855_v51 = vrot.slane %v3827_v20, %v4639_v21  ;;  %v1211_v22 = vmul.f32 0.2, %v1207_v44  ;;  %v1237_v57 = vmul.f32 0.2, %v1233_v5  ;;  %v3867_v13 = vadd.f32 %v803_v32, %v779_v60  ;;  %v4647_v60 = vld [vmem:[#allocation24_spill] sm:$0xff] }
 0x24d   :  { %v1038_v36 = vadd.f32 %v1036_v2, %v1012_v25  ;;  %vm1209_vm14 = vcmp.gt.f32.partialorder %v1207_v44, 0.0  ;;  %vm1235_vm15 = vcmp.gt.f32.partialorder %v1233_v5, 0.0  ;;  %v1240_v23 = vsel %vm1236_vm13, %v1234_v37, %v1238_v41 }
 0x24e   :  { %v3870_v10 = vpop.permute.xlu1 %1796  ;;  %v4641_v53 = vstv %s3459_s30  ;;  %v4642_v15 = vstv %s3508_s8  ;;  %v3881_v43 = vrot.slane %v3827_v20, %v4643_v35  ;;  %v3888_v37 = vrot.slane %v3487_v31, %v4638_v46  ;;  %v4654_v46 = vld [vmem:[#allocation7_spill] sm:$0xff] }
 0x24f   :  { %v1270_v33 = vmul.f32 %v4641_v53, %v1266_v49  ;;  %v3876_v26 = vmul.f32 %v4642_v15, %v1550_v29  ;;  %v3884_v32 = vpop.permute.xlu0 %1792  ;;  %v2061_v41 = vrot.slane %v3860_v7, %v4639_v21  ;;  %v1213_v25 = vsel %vm1209_vm14, %v1207_v44, %v1211_v22  ;;  %v4646_v15 = vld [vmem:[#allocation23_spill] sm:$0xff] }
 0x250   :  { %4644 = vst [vmem:[#allocation31_spill] sm:$0xff] %v3884_v32  ;;  %v1239_v49 = vsel %vm1235_vm15, %v1233_v5, %v1237_v57  ;;  %v4645_v29 = vstv %s3457_s29  ;;  %v1492_v19 = vadd.f32 %v4614_v47, %v4646_v15  ;;  %v1518_v2 = vadd.f32 %v4648_v14, %v4647_v60  ;;  %v4650_v57 = vld [vmem:[#allocation11_spill] sm:$0xff]  ;;  %s4180_s29 = sld [smem:[#allocation2 + $0x303]] }
 0x251   :  { %v1244_v53 = vmul.f32 %v4645_v29, %v1240_v23  ;;  %v819_v21 = vadd.f32 %v3592_v42, %v4649_v17  ;;  %v3907_v8 = vrot.slane %v3860_v7, %v4643_v35  ;;  %v3909_v61 = vadd.f32 %v1062_v58, %v1038_v36  ;;  %v4653_v35 = vld [vmem:[#allocation27_spill] sm:$0xff] }
 0x252   :  { %v3917_v47 = vrot.slane %v3455_v27, %v4650_v57  ;;  %v3921_v23 = vrot.slane %v3487_v31, %v4650_v57  ;;  %v4651_v60 = vstv %s3412_s20  ;;  %v4652_v17 = vmov %v4645_v29  ;;  %s3950_s20 = sld [smem:[#allocation2 + $0x287]] }
 0x253   :  { %v3911_v44 = vpop.permute.xlu1 %1611  ;;  %v1217_v42 = vmul.f32 %v4651_v60, %v1213_v25  ;;  %v1243_v29 = vmul.f32 %v4652_v17, %v1239_v49  ;;  %v1078_v58 = vadd.f32 %v3568_v38, %v4653_v35  ;;  %v1246_v15 = vadd.f32 %v1244_v53, %v3773_v28  ;;  %v4655_v60 = vld [vmem:[#allocation25_spill] sm:$0xff] }
 0x254   :  { %v1496_v22 = vmul.f32 0.2, %v1492_v19  ;;  %v3931_v5 = vpop.permute.xlu0 %1615  ;;  %v3936_v57 = vrot.slane %v3860_v7, %v4654_v46  ;;  %vm1494_vm4 = vcmp.gt.f32.partialorder %v1492_v19, 0.0  ;;  %v1522_v25 = vmul.f32 0.2, %v1518_v2 }
 0x255   :  { %v1519_v49 = vadd.f32 %v4648_v14, %v4655_v60  ;;  %v823_v17 = vmul.f32 0.2, %v819_v21  ;;  %vm1520_vm5 = vcmp.gt.f32.partialorder %v1518_v2, 0.0  ;;  %vm821_vm6 = vcmp.gt.f32.partialorder %v819_v21, 0.0 }
 0x256   :  { %v1104_v38 = vadd.f32 %v3637_v52, %v3726_v59  ;;  %v3944_v28 = vrot.slane %v3827_v20, %v4654_v46  ;;  %v3946_v53 = vadd.f32 %v1243_v29, %v1217_v42  ;;  %v1082_v35 = vmul.f32 0.2, %v1078_v58 }
 0x257   :  { %v3952_v14 = vadd.f32 %v1270_v33, %v1246_v15  ;;  %v1498_v60 = vsel %vm1494_vm4, %v1492_v19, %v1496_v22  ;;  %vm1080_vm7 = vcmp.gt.f32.partialorder %v1078_v58, 0.0  ;;  %v1524_v52 = vsel %vm1520_vm5, %v1518_v2, %v1522_v25 }
 0x258   :  { %v2052_v24 = vpop.permute.xlu1 %2051  ;;  %v1523_v59 = vmul.f32 0.2, %v1519_v49  ;;  %v825_v46 = vsel %vm821_vm6, %v819_v21, %v823_v17  ;;  %v3956_v42 = vrot.slane %v3487_v31, %v3065_v18  ;;  %vm1521_vm10 = vcmp.gt.f32.partialorder %v1519_v49, 0.0 }
 0x259   :  { %v2062_v0 = vadd.f32 %v2061_v41, %v2052_v24  ;;  %v2078_v20 = vpop.permute.xlu0 %2077  ;;  %v1108_v29 = vmul.f32 0.2, %v1104_v38  ;;  %v4656_v33 = vstv %s3440_s26  ;;  %v1084_v19 = vsel %vm1080_vm7, %v1078_v58, %v1082_v35  ;;  %s3995_s26 = sld [smem:[#allocation2 + $0x207]] }
 0x25a   :  { %v1502_v15 = vmul.f32 %v4656_v33, %v1498_v60  ;;  %vm1106_vm12 = vcmp.gt.f32.partialorder %v1104_v38, 0.0  ;;  %v2088_v24 = vadd.f32 %v3907_v8, %v2078_v20  ;;  %v4657_v21 = vstv %s3510_s9  ;;  %v4661_v20 = vld [vmem:[#allocation30_spill] sm:$0xff] }
 0x25b   :  { %vm2064_vm11 = vcmp.gt.f32.partialorder %v2062_v0, 0.0  ;;  %v2066_v36 = vmul.f32 0.2, %v2062_v0  ;;  %v1528_v22 = vmul.f32 %v4657_v21, %v1524_v52  ;;  %v4658_v17 = vstv %s3573_s17  ;;  %s4220_s17 = sld [smem:[#allocation2 + $0x307]] }
 0x25c   :  { %v2056_v2 = vpop.permute.xlu1 %2055  ;;  %v829_v7 = vmul.f32 %v4658_v17, %v825_v46  ;;  %v1525_v34 = vsel %vm1521_vm10, %v1519_v49, %v1523_v59  ;;  %v1259_v32 = vadd.f32 %v4621_v3, %v4659_v63  ;;  %vm2090_vm13 = vcmp.gt.f32.partialorder %v2088_v24, 0.0 }
 0x25d   :  { %v2068_v25 = vsel %vm2064_vm11, %v2062_v0, %v2066_v36  ;;  %v2063_v31 = vadd.f32 %v2061_v41, %v2056_v2  ;;  %v2092_v60 = vmul.f32 0.2, %v2088_v24  ;;  %v4660_v58 = vstv %s3540_s10  ;;  %s4203_s10 = sld [smem:[#allocation2 + $0x306]] }
 0x25e   :  { %v1088_v35 = vmul.f32 %v4660_v58, %v1084_v19  ;;  %v1545_v33 = vadd.f32 %v4625_v4, %v4661_v20  ;;  %v1110_v40 = vsel %vm1106_vm12, %v1104_v38, %v1108_v29  ;;  %v4662_v52 = vstv %s3847_s4  ;;  %v4667_v58 = vld [vmem:[#allocation36_spill] sm:$0xff] }
 0x25f   :  { %v2072_v21 = vmul.f32 %v4662_v52, %v2068_v25  ;;  %v2094_v0 = vsel %vm2090_vm13, %v2088_v24, %v2092_v60  ;;  %v2067_v36 = vmul.f32 0.2, %v2063_v31  ;;  %v1683_v41 = vstv %s3950_s20 }
 0x260   :  { %v3976_v49 = vrot.slane %v3455_v27, %v3065_v18  ;;  %v4663_v59 = vstv %s3510_s9  ;;  %v4664_v63 = vstv %s3849_s21  ;;  %vm2065_vm14 = vcmp.gt.f32.partialorder %v2063_v31, 0.0  ;;  %s4201_s9 = sld [smem:[#allocation2 + $0x305]]  ;;  %s2922_s21 = smov 40  }
 0x261   :  { %v1529_v3 = vmul.f32 %v4663_v59, %v1525_v34  ;;  %v2098_v46 = vmul.f32 %v4664_v63, %v2094_v0  ;;  %v2082_v2 = vpop.permute.xlu1 %2081  ;;  %v831_v19 = vadd.f32 %v829_v7, %v3867_v13  ;;  %v3983_v17 = vadd.f32 %v1528_v22, %v1502_v15  ;;  %v4666_v34 = vld [vmem:[#allocation35_spill] sm:$0xff]  ;;  %v3993_v0 = vpop.permute.xlu0 %1356 }
 0x262   :  { %vm1261_vm15 = vcmp.gt.f32.partialorder %v1259_v32, 0.0  ;;  %v4665_v4 = vstv %s3612_s1  ;;  %v2089_v29 = vadd.f32 %v3907_v8, %v2082_v2  ;;  %v1263_v24 = vmul.f32 0.2, %v1259_v32  ;;  %s4232_s1 = sld [smem:[#allocation2 + $0x387]] }
 0x263   :  { %v1114_v38 = vmul.f32 %v4665_v4, %v1110_v40  ;;  %v1549_v25 = vmul.f32 0.2, %v1545_v33  ;;  %v3988_v60 = vadd.f32 %v2098_v46, %v2072_v21  ;;  %v1090_v27 = vadd.f32 %v1088_v35, %v3909_v61 }
 0x264   :  { %v1285_v20 = vadd.f32 %v4667_v58, %v4666_v34  ;;  %v2069_v52 = vsel %vm2065_vm14, %v2063_v31, %v2067_v36  ;;  %vm2091_vm4 = vcmp.gt.f32.partialorder %v2089_v29, 0.0  ;;  %v2093_v7 = vmul.f32 0.2, %v2089_v29 }
 0x265   :  { %v1531_v8 = vadd.f32 %v1529_v3, %v3838_v9  ;;  %vm1547_vm5 = vcmp.gt.f32.partialorder %v1545_v33, 0.0  ;;  %v1286_v40 = vadd.f32 %v4667_v58, %v3619_v16  ;;  %v4002_v61 = vsel %vm43_vm0, -1e+30, %v831_v19 }
 0x266   :  { %v1311_v15 = vadd.f32 %v3744_v48, %v3688_v6  ;;  %v1804_v22 = vadd.f32 %v3881_v43, %v3870_v10  ;;  %v2095_v31 = vsel %vm2091_vm4, %v2089_v29, %v2093_v7  ;;  %v4008_v35 = vpop.permute.xlu1 %1352  ;;  %v1116_v21 = vadd.f32 %v1114_v38, %v1090_v27  ;;  %v4025_v29 = vpop.permute.xlu0 %1637 }
 0x267   :  { %v1265_v9 = vsel %vm1261_vm15, %v1259_v32, %v1263_v24  ;;  %v1312_v16 = vadd.f32 %v3744_v48, %v3700_v30  ;;  %v4669_v36 = vstv %s3847_s4  ;;  %v4670_v3 = vmov %v4664_v63  ;;  %s2921_s4 = smov 32  }
 0x268   :  { %v2073_v59 = vmul.f32 %v4669_v36, %v2069_v52  ;;  %v2099_v63 = vmul.f32 %v4670_v3, %v2095_v31  ;;  %v1551_v46 = vsel %vm1547_vm5, %v1545_v33, %v1549_v25  ;;  %vm1287_vm6 = vcmp.gt.f32.partialorder %v1285_v20, 0.0 }
 0x269   :  { %v1289_v6 = vmul.f32 0.2, %v1285_v20  ;;  %v1778_v10 = vadd.f32 %v3855_v51, %v3829_v50  ;;  %vm1288_vm7 = vcmp.gt.f32.partialorder %v1286_v40, 0.0  ;;  %v1290_v2 = vmul.f32 0.2, %v1286_v40 }
 0x26a   :  { %v4019_v19 = vadd.f32 %v2099_v63, %v2073_v59  ;;  %v835_v32 = vsel %vm260_vm1, %v4002_v61, -inf  ;;  %v4671_v30 = vstv %s3459_s30  ;;  %v1315_v4 = vmul.f32 0.2, %v1311_v15  ;;  %s4182_s30 = sld [smem:[#allocation2 + $0x304]] }
 0x26b   :  { %v1269_v48 = vmul.f32 %v4671_v30, %v1265_v9  ;;  %v1808_v38 = vmul.f32 0.2, %v1804_v22  ;;  %836 = vmax.xlane.f32.xlu1 %v835_v32  ;;  %v4029_v33 = vsel %vm43_vm0, -1e+30, %v1116_v21  ;;  %v4672_v50 = vstv %s3508_s8  ;;  %v4033_v27 = vpop.permute.xlu1 %1818  ;;  %v4055_v32 = vpop.permute.xlu0 %2107  ;;  %s4197_s8 = sld [smem:[#allocation2 + $0x385]] }
 0x26c   :  { %v1555_v24 = vmul.f32 %v4672_v50, %v1551_v46  ;;  %vm1313_vm10 = vcmp.gt.f32.partialorder %v1311_v15, 0.0  ;;  %v1316_v25 = vmul.f32 0.2, %v1312_v16  ;;  %vm1806_vm11 = vcmp.gt.f32.partialorder %v1804_v22, 0.0 }
 0x26d   :  { %v1291_v34 = vsel %vm1287_vm6, %v1285_v20, %v1289_v6  ;;  %vm1314_vm12 = vcmp.gt.f32.partialorder %v1312_v16, 0.0  ;;  %v1782_v58 = vmul.f32 0.2, %v1778_v10  ;;  %v1398_v52 = vstv %s3995_s26 }
 0x26e   :  { %v1292_v7 = vsel %vm1288_vm7, %v1286_v40, %v1290_v2  ;;  %v1570_v31 = vadd.f32 %v3654_v11, %v3664_v54  ;;  %vm1780_vm13 = vcmp.gt.f32.partialorder %v1778_v10, 0.0  ;;  %v1120_v21 = vsel %vm260_vm1, %v4029_v33, -inf }
 0x26f   :  { %v1271_v9 = vadd.f32 %v1269_v48, %v3946_v53  ;;  %v1317_v36 = vsel %vm1313_vm10, %v1311_v15, %v1315_v4  ;;  %v1337_v20 = vadd.f32 %v3842_v39, %v3757_v62  ;;  %v1810_v59 = vsel %vm1806_vm11, %v1804_v22, %v1808_v38  ;;  %1121 = vmax.xlane.f32.xlu1 %v1120_v21  ;;  %v1823_v6 = vpop.permute.xlu1 %1822 }
 0x270   :  { %v4045_v3 = vadd.f32 %v1555_v24, %v1531_v8  ;;  %v4673_v40 = vstv %s3581_s18  ;;  %v1318_v54 = vsel %vm1314_vm12, %v1312_v16, %v1316_v25  ;;  %v1571_v46 = vadd.f32 %v3654_v11, %v3760_v55  ;;  %s4222_s18 = sld [smem:[#allocation2 + $0x386]] }
 0x271   :  { %v1295_v63 = vmul.f32 %v4673_v40, %v1291_v34  ;;  %v4674_v2 = vmov %v4673_v40  ;;  %v1597_v15 = vadd.f32 %v3807_v45, %v3724_v56  ;;  %v1784_v62 = vsel %vm1780_vm13, %v1778_v10, %v1782_v58 }
 0x272   :  { %v1296_v53 = vmul.f32 %v4674_v2, %v1292_v7  ;;  %v1830_v22 = vadd.f32 %v3944_v28, %v1823_v6  ;;  %vm1572_vm14 = vcmp.gt.f32.partialorder %v1570_v31, 0.0  ;;  %v1574_v8 = vmul.f32 0.2, %v1570_v31 }
 0x273   :  { %v4675_v30 = vstv %s3735_s12  ;;  %v4676_v16 = vstv %s3816_s16  ;;  %v1341_v55 = vmul.f32 0.2, %v1337_v20  ;;  %vm1339_vm4 = vcmp.gt.f32.partialorder %v1337_v20, 0.0  ;;  %s2913_s12 = smov 96  }
 0x274   :  { %v1321_v48 = vmul.f32 %v4675_v30, %v1317_v36  ;;  %v1814_v4 = vmul.f32 %v4676_v16, %v1810_v59  ;;  %v4677_v38 = vmov %v4675_v30  ;;  %vm1832_vm15 = vcmp.gt.f32.partialorder %v1830_v22, 0.0  ;;  %v1642_v7 = vpop.permute.xlu1 %1641 }
 0x275   :  { %v1322_v11 = vmul.f32 %v4677_v38, %v1318_v54  ;;  %v1834_v50 = vmul.f32 0.2, %v1830_v22  ;;  %v1575_v24 = vmul.f32 0.2, %v1571_v46  ;;  %v4678_v56 = vstv %s3809_s14 }
 0x276   :  { %v1788_v10 = vmul.f32 %v4678_v56, %v1784_v62  ;;  %v1338_v25 = vadd.f32 %v3842_v39, %v3845_v12  ;;  %vm1599_vm5 = vcmp.gt.f32.partialorder %v1597_v15, 0.0  ;;  %v1601_v34 = vmul.f32 0.2, %v1597_v15  ;;  %v4079_v62 = vpop.permute.xlu0 %1844 }
 0x277   :  { %vm1573_vm6 = vcmp.gt.f32.partialorder %v1571_v46, 0.0  ;;  %v1836_v58 = vsel %vm1832_vm15, %v1830_v22, %v1834_v50  ;;  %v1623_v36 = vadd.f32 %v3888_v37, %v3931_v5  ;;  %v1363_v59 = vadd.f32 %v3917_v47, %v4008_v35 }
 0x278   :  { %v1816_v21 = vadd.f32 %v1814_v4, %v1788_v10  ;;  %v4679_v40 = vstv %s3895_s28  ;;  %v1297_v6 = vadd.f32 %v1295_v63, %v1271_v9  ;;  %v1298_v2 = vadd.f32 %v1296_v53, %v3952_v14 }
 0x279   :  { %v1840_v54 = vmul.f32 %v4679_v40, %v1836_v58  ;;  %v4076_v39 = vsel %vm1572_vm14, %v1570_v31, %v1574_v8  ;;  %v1343_v12 = vsel %vm1339_vm4, %v1337_v20, %v1341_v55  ;;  %v1577_v22 = vsel %vm1573_vm6, %v1571_v46, %v1575_v24  ;;  %v2104_v8 = vpop.permute.xlu1 %2103 }
 0x27a   :  { %v1342_v30 = vmul.f32 0.2, %v1338_v25  ;;  %v1649_v35 = vadd.f32 %v3921_v23, %v1642_v7  ;;  %v1323_v16 = vadd.f32 %v1321_v48, %v1297_v6  ;;  %v1324_v4 = vadd.f32 %v1322_v11, %v1298_v2  ;;  %v1668_v55 = vpop.permute.xlu0 %1667 }
 0x27b   :  { %v4081_v5 = vadd.f32 %v1840_v54, %v1816_v21  ;;  %v1603_v9 = vsel %vm1599_vm5, %v1597_v15, %v1601_v34  ;;  %vm1340_vm7 = vcmp.gt.f32.partialorder %v1338_v25, 0.0  ;;  %v4680_v14 = vstv %s3791_s15  ;;  %s2915_s15 = smov 88  }
 0x27c   :  { %v1347_v31 = vmul.f32 %v4680_v14, %v1343_v12  ;;  %v1627_v63 = vmul.f32 0.2, %v1623_v36  ;;  %v1364_v20 = vadd.f32 %v3917_v47, %v3993_v0  ;;  %v1367_v53 = vmul.f32 0.2, %v1363_v59 }
 0x27d   :  { %v4681_v46 = vstv %s3702_s11  ;;  %vm1625_vm10 = vcmp.gt.f32.partialorder %v1623_v36, 0.0  ;;  %vm1365_vm11 = vcmp.gt.f32.partialorder %v1363_v59, 0.0  ;;  %v2114_v48 = vadd.f32 %v3936_v57, %v2104_v8 }
 0x27e   :  { %v1581_v38 = vmul.f32 %v4681_v46, %v1577_v22  ;;  %v4682_v11 = vstv %s3777_s13  ;;  %v1344_v15 = vsel %vm1340_vm7, %v1338_v25, %v1342_v30  ;;  %v1675_v24 = vadd.f32 %v3956_v42, %v1668_v55  ;;  %v1379_v6 = vpop.permute.xlu1 %1378 }
 0x27f   :  { %v1607_v50 = vmul.f32 %v4682_v11, %v1603_v9  ;;  %v1653_v56 = vmul.f32 0.2, %v1649_v35  ;;  %v1596_v47 = vadd.f32 %v3807_v45, %v3795_v1  ;;  %vm1651_vm12 = vcmp.gt.f32.partialorder %v1649_v35, 0.0 }
 0x280   :  { %vm2116_vm13 = vcmp.gt.f32.partialorder %v2114_v48, 0.0  ;;  %v2118_v0 = vmul.f32 0.2, %v2114_v48  ;;  %v1629_v10 = vsel %vm1625_vm10, %v1623_v36, %v1627_v63  ;;  %v1368_v34 = vmul.f32 0.2, %v1364_v20 }
 0x281   :  { %v1369_v58 = vsel %vm1365_vm11, %v1363_v59, %v1367_v53  ;;  %v1349_v7 = vadd.f32 %v1347_v31, %v1323_v16  ;;  %v1583_v21 = vadd.f32 %v1581_v38, %v4045_v3  ;;  %v4683_v40 = vmov %v4680_v14 }
 0x282   :  { %v1348_v25 = vmul.f32 %v4683_v40, %v1344_v15  ;;  %vm1366_vm14 = vcmp.gt.f32.partialorder %v1364_v20, 0.0  ;;  %v2120_v54 = vsel %vm2116_vm13, %v2114_v48, %v2118_v0  ;;  %v1679_v2 = vmul.f32 0.2, %v1675_v24 }
 0x283   :  { %v1655_v12 = vsel %vm1651_vm12, %v1649_v35, %v1653_v56  ;;  %v4684_v1 = vstv %s3893_s3  ;;  %v1389_v22 = vadd.f32 %v3976_v49, %v1379_v6  ;;  %v1622_v36 = vadd.f32 %v3888_v37, %v3911_v44  ;;  %v1383_v37 = vpop.permute.xlu1 %1382 }
 0x284   :  { %v2124_v45 = vmul.f32 %v4684_v1, %v2120_v54  ;;  %v4685_v30 = vstv %s3818_s19  ;;  %v4686_v16 = vstv %s3862_s27  ;;  %vm1677_vm15 = vcmp.gt.f32.partialorder %v1675_v24, 0.0  ;;  %s2918_s19 = smov 8  }
 0x285   :  { %v1633_v59 = vmul.f32 %v4685_v30, %v1629_v10  ;;  %v1373_v9 = vmul.f32 %v4686_v16, %v1369_v58  ;;  %v1370_v3 = vsel %vm1366_vm14, %v1364_v20, %v1368_v34  ;;  %vm1391_vm4 = vcmp.gt.f32.partialorder %v1389_v22, 0.0 }
 0x286   :  { %v4110_v14 = vadd.f32 %v2124_v45, %v3988_v60  ;;  %v1393_v35 = vmul.f32 0.2, %v1389_v22  ;;  %vm1598_vm5 = vcmp.gt.f32.partialorder %v1596_v47, 0.0  ;;  %v1600_v31 = vmul.f32 0.2, %v1596_v47 }
 0x287   :  { %v1609_v63 = vadd.f32 %v1607_v50, %v1583_v21  ;;  %v4687_v53 = vstv %s3865_s0  ;;  %v1648_v44 = vadd.f32 %v3921_v23, %v4025_v29  ;;  %v1681_v46 = vsel %vm1677_vm15, %v1675_v24, %v1679_v2 }
 0x288   :  { %v1659_v8 = vmul.f32 %v4687_v53, %v1655_v12  ;;  %v1395_v38 = vsel %vm1391_vm4, %v1389_v22, %v1393_v35  ;;  %v1390_v20 = vadd.f32 %v3976_v49, %v1383_v37  ;;  %v4688_v60 = vmov %v4686_v16 }
 0x289   :  { %v1635_v55 = vadd.f32 %v1633_v59, %v1609_v63  ;;  %v1374_v48 = vmul.f32 %v4688_v60, %v1370_v3  ;;  %v1399_v11 = vmul.f32 %v1398_v52, %v1395_v38  ;;  %v1375_v15 = vadd.f32 %v1373_v9, %v1349_v7  ;;  %v4127_v7 = vpop.permute.xlu1 %1848 }
 0x28a   :  { %v1626_v56 = vmul.f32 0.2, %v1622_v36  ;;  %vm1392_vm6 = vcmp.gt.f32.partialorder %v1390_v20, 0.0  ;;  %v1394_v50 = vmul.f32 0.2, %v1390_v20  ;;  %v1350_v0 = vadd.f32 %v1348_v25, %v1324_v4 }
 0x28b   :  { %vm1624_vm7 = vcmp.gt.f32.partialorder %v1622_v36, 0.0  ;;  %v1685_v23 = vmul.f32 %v1683_v41, %v1681_v46  ;;  %v1401_v29 = vadd.f32 %v1399_v11, %v1375_v15  ;;  %v1661_v24 = vadd.f32 %v1659_v8, %v1635_v55  ;;  %v1871_v55 = vpop.permute.xlu0 %1870  ;;  %v4693_v11 = vld [vmem:[#allocation31_spill] sm:$0xff] }
 0x28c   :  { %v4689_v10 = vstv %s3702_s11  ;;  %v1602_v34 = vsel %vm1598_vm5, %v1596_v47, %v1600_v31  ;;  %v1652_v58 = vmul.f32 0.2, %v1648_v44  ;;  %v1396_v21 = vsel %vm1392_vm6, %v1390_v20, %v1394_v50  ;;  %s2912_s11 = smov 112  }
 0x28d   :  { %v1580_v49 = vmul.f32 %v4689_v10, %v4076_v39  ;;  %vm1650_vm10 = vcmp.gt.f32.partialorder %v1648_v44, 0.0  ;;  %v4131_v4 = vsel %vm43_vm0, -1e+30, %v1401_v29  ;;  %v1376_v40 = vadd.f32 %v1374_v48, %v1350_v0  ;;  %v1664_v16 = vpop.permute.xlu1 %1663  ;;  %v4695_v29 = vld [vmem:[#allocation8_spill] sm:$0xff] }
 0x28e   :  { %v1400_v25 = vmul.f32 %v1398_v52, %v1396_v21  ;;  %v1628_v54 = vsel %vm1624_vm7, %v1622_v36, %v1626_v56  ;;  %v1405_v39 = vsel %vm260_vm1, %v4131_v4, -inf  ;;  %v1556_v47 = vadd.f32 %v3876_v26, %v3983_v17 }
 0x28f   :  { %v4690_v6 = vstv %s3777_s13  ;;  %1406 = vmax.xlane.f32.xlu1 %v1405_v39  ;;  %v1687_v1 = vadd.f32 %v1685_v23, %v1661_v24  ;;  %v1654_v45 = vsel %vm1650_vm10, %v1648_v44, %v1652_v58  ;;  %v1632_v59 = vmul.f32 %v4685_v30, %v1628_v54  ;;  %v2160_v56 = vpop.permute.xlu0 %2159  ;;  %v4696_v24 = vld [vmem:[#allocation28_spill] sm:$0xff]  ;;  %v4697_v58 = vld [vmem:[#allocation9_spill] sm:$0xff]  ;;  %v4700_v30 = vld [vmem:[#allocation10_spill] sm:$0xff]  ;;  %s2914_s13 = smov 104  }
 0x290   :  { %v1606_v2 = vmul.f32 %v4690_v6, %v1602_v34  ;;  %v1402_v12 = vadd.f32 %v1400_v25, %v1376_v40  ;;  %v1582_v22 = vadd.f32 %v1580_v49, %v1556_v47  ;;  %v1674_v9 = vadd.f32 %v3956_v42, %v1664_v16 }
 0x291   :  { %v4692_v3 = vmov %v4687_v53  ;;  %v4154_v31 = vsel %vm44_vm2, -1e+30, %v1687_v1  ;;  %v4156_v37 = vpop.permute.xlu1 %2129  ;;  %v1803_v15 = vadd.f32 %v3881_v43, %v4693_v11  ;;  %v1829_v23 = vadd.f32 %v3944_v28, %v4033_v27 }
 0x292   :  { %v4145_v36 = vsel %vm44_vm2, -1e+30, %v1402_v12  ;;  %v1608_v17 = vadd.f32 %v1606_v2, %v1582_v22  ;;  %v1658_v35 = vmul.f32 %v4692_v3, %v1654_v45  ;;  %vm1676_vm11 = vcmp.gt.f32.partialorder %v1674_v9, 0.0 }
 0x293   :  { %v1408_v26 = vsel %vm264_vm3, %v4145_v36, -inf  ;;  %v1678_v63 = vmul.f32 0.2, %v1674_v9  ;;  %v1693_v42 = vsel %vm264_vm3, %v4154_v31, -inf  ;;  %v1854_v10 = vrot.slane %v4696_v24, %v4695_v29  ;;  %v4186_v43 = vpop.permute.xlu0 %2181 }
 0x294   :  { %1409 = vmax.xlane.f32.xlu0 %v1408_v26  ;;  %v1634_v53 = vadd.f32 %v1632_v59, %v1608_v17  ;;  %v1807_v49 = vmul.f32 0.2, %v1803_v15  ;;  %vm1805_vm12 = vcmp.gt.f32.partialorder %v1803_v15, 0.0  ;;  %v1833_v28 = vmul.f32 0.2, %v1829_v23 }
 0x295   :  { %v1680_v8 = vsel %vm1676_vm11, %v1674_v9, %v1678_v63  ;;  %v4162_v20 = vpop.permute.xlu1 %2133  ;;  %v1855_v27 = vadd.f32 %v1854_v10, %v4079_v62  ;;  %vm1831_vm14 = vcmp.gt.f32.partialorder %v1829_v23, 0.0  ;;  %v2115_v25 = vadd.f32 %v3936_v57, %v4055_v32  ;;  %v4698_v62 = vld [vmem:[#allocation21_spill] sm:$0xff] }
 0x296   :  { %v1684_v44 = vmul.f32 %v1683_v41, %v1680_v8  ;;  %v1660_v46 = vadd.f32 %v1658_v35, %v1634_v53  ;;  %v4694_v41 = vld [vmem:[#allocation18_spill] sm:$0xff]  ;;  %v1809_v40 = vsel %vm1805_vm12, %v1803_v15, %v1807_v49  ;;  %v4208_v6 = vrot.slane %v4698_v62, %v4697_v58 }
 0x297   :  { %v1777_v0 = vadd.f32 %v3855_v51, %v4694_v41  ;;  %v4190_v51 = vrot.slane %v4696_v24, %v4697_v58  ;;  %v1927_v54 = vpop.permute.xlu0 %1926  ;;  %v1835_v2 = vsel %vm1831_vm14, %v1829_v23, %v1833_v28  ;;  %v1864_v12 = vstv %s4180_s29 }
 0x298   :  { %1694 = vmax.xlane.f32.xlu0 %v1693_v42  ;;  %v1686_v38 = vadd.f32 %v1684_v44, %v1660_v46  ;;  %v1859_v1 = vmul.f32 0.2, %v1855_v27  ;;  %v1890_v45 = vstv %s4182_s30  ;;  %v4699_v32 = vstv %s3816_s16  ;;  %s2917_s16 = smov 72  }
 0x299   :  { %v1781_v34 = vmul.f32 0.2, %v1777_v0  ;;  %vm1779_vm13 = vcmp.gt.f32.partialorder %v1777_v0, 0.0  ;;  %v1881_v47 = vadd.f32 %v4190_v51, %v1871_v55  ;;  %v1813_v22 = vmul.f32 %v4699_v32, %v1809_v40 }
 0x29a   :  { %v4166_v60 = vsel %vm43_vm0, -1e+30, %v1686_v38  ;;  %v4172_v50 = vpop.permute.xlu1 %1874  ;;  %vm1857_vm15 = vcmp.gt.f32.partialorder %v1855_v27, 0.0  ;;  %v1906_v59 = vrot.slane %v4696_v24, %v4700_v30  ;;  %v4218_v16 = vrot.slane %v4696_v24, %v3065_v18 }
 0x29b   :  { %v1690_v48 = vsel %vm260_vm1, %v4166_v60, -inf  ;;  %v1783_v39 = vsel %vm1779_vm13, %v1777_v0, %v1781_v34  ;;  %v4701_v9 = vstv %s3809_s14  ;;  %v2119_v17 = vmul.f32 0.2, %v2115_v25  ;;  %v1949_v63 = vpop.permute.xlu0 %1948  ;;  %s2916_s14 = smov 80  }
 0x29c   :  { %1691 = vmax.xlane.f32.xlu1 %v1690_v48  ;;  %v1787_v26 = vmul.f32 %v4701_v9, %v1783_v39  ;;  %v2139_v3 = vrot.slane %v4698_v62, %v4695_v29  ;;  %v2149_v35 = vstv %s4184_s7  ;;  %vm2117_vm4 = vcmp.gt.f32.partialorder %v2115_v25, 0.0 }
 0x29d   :  { %v4702_v53 = vstv %s3895_s28  ;;  %v1885_v42 = vmul.f32 0.2, %v1881_v47  ;;  %v2167_v44 = vadd.f32 %v4208_v6, %v2160_v56  ;;  %v1861_v46 = vsel %vm1857_vm15, %v1855_v27, %v1859_v1  ;;  %v4703_v56 = vld [vmem:[#allocation11_spill] sm:$0xff] }
 0x29e   :  { %v1839_v8 = vmul.f32 %v4702_v53, %v1835_v2  ;;  %vm1883_vm5 = vcmp.gt.f32.partialorder %v1881_v47, 0.0  ;;  %v2175_v38 = vstv %s4195_s2  ;;  %v2191_v55 = vrot.slane %v4698_v62, %v4700_v30 }
 0x29f   :  { %v4192_v21 = vpop.permute.xlu1 %2155  ;;  %v1815_v11 = vadd.f32 %v1813_v22, %v1787_v26  ;;  %v2201_v15 = vstv %s4197_s8  ;;  %v1959_v0 = vadd.f32 %v4218_v16, %v1949_v63  ;;  %v2121_v23 = vsel %vm2117_vm4, %v2115_v25, %v2119_v17 }
 0x2a0   :  { %v1916_v29 = vstv %s4201_s9  ;;  %v1932_v49 = vrot.slane %v4696_v24, %v4703_v56  ;;  %v1942_v34 = vstv %s4203_s10  ;;  %v1865_v28 = vmul.f32 %v1864_v12, %v1861_v46 }
 0x2a1   :  { %v1841_v58 = vadd.f32 %v1839_v8, %v1815_v11  ;;  %v1887_v27 = vsel %vm1883_vm5, %v1881_v47, %v1885_v42  ;;  %v2171_v40 = vmul.f32 0.2, %v2167_v44  ;;  %v1856_v39 = vadd.f32 %v1854_v10, %v4127_v7 }
 0x2a2   :  { %v2141_v2 = vadd.f32 %v2139_v3, %v4162_v20  ;;  %vm2169_vm6 = vcmp.gt.f32.partialorder %v2167_v44, 0.0  ;;  %v4249_v25 = vrot.slane %v4698_v62, %v4703_v56  ;;  %v1968_v24 = vstv %s4220_s17 }
 0x2a3   :  { %v1963_v32 = vmul.f32 0.2, %v1959_v0  ;;  %v2227_v22 = vstv %s4222_s18  ;;  %v4704_v30 = vstv %s3893_s3  ;;  %v1891_v47 = vmul.f32 %v1890_v45, %v1887_v27  ;;  %v2238_v27 = vpop.permute.xlu0 %2237 }
 0x2a4   :  { %v1897_v57 = vpop.permute.xlu1 %1896  ;;  %v2125_v9 = vmul.f32 %v4704_v30, %v2121_v23  ;;  %vm1961_vm10 = vcmp.gt.f32.partialorder %v1959_v0, 0.0  ;;  %v1867_v7 = vadd.f32 %v1865_v28, %v1841_v58  ;;  %v2173_v10 = vsel %vm2169_vm6, %v2167_v44, %v2171_v40 }
 0x2a5   :  { %v1907_v41 = vadd.f32 %v1906_v59, %v1897_v57  ;;  %v4259_v20 = vrot.slane %v4698_v62, %v3065_v18  ;;  %v2253_v26 = vstv %s4232_s1  ;;  %vm1858_vm11 = vcmp.gt.f32.partialorder %v1856_v39, 0.0 }
 0x2a6   :  { %v1860_v17 = vmul.f32 0.2, %v1856_v39  ;;  %v2145_v63 = vmul.f32 0.2, %v2141_v2  ;;  %v4262_v53 = vadd.f32 %v1932_v49, %v1927_v54  ;;  %vm2143_vm12 = vcmp.gt.f32.partialorder %v2141_v2, 0.0 }
 0x2a7   :  { %v1911_v1 = vmul.f32 0.2, %v1907_v41  ;;  %vm1909_vm7 = vcmp.gt.f32.partialorder %v1907_v41, 0.0  ;;  %v1882_v8 = vadd.f32 %v4190_v51, %v4172_v50  ;;  %v1965_v46 = vsel %vm1961_vm10, %v1959_v0, %v1963_v32 }
 0x2a8   :  { %v1901_v48 = vpop.permute.xlu1 %1900  ;;  %v2127_v44 = vadd.f32 %v2125_v9, %v4019_v19  ;;  %v1893_v11 = vadd.f32 %v1891_v47, %v1867_v7  ;;  %v2140_v18 = vadd.f32 %v2139_v3, %v4156_v37  ;;  %v2177_v56 = vmul.f32 %v2175_v38, %v2173_v10 }
 0x2a9   :  { %v1913_v42 = vsel %vm1909_vm7, %v1907_v41, %v1911_v1  ;;  %v1908_v62 = vadd.f32 %v1906_v59, %v1901_v48  ;;  %v4271_v54 = vadd.f32 %v2191_v55, %v4186_v43  ;;  %v1862_v50 = vsel %vm1858_vm11, %v1856_v39, %v1860_v17 }
 0x2aa   :  { %v2147_v51 = vsel %vm2143_vm12, %v2141_v2, %v2145_v63  ;;  %v1917_v41 = vmul.f32 %v1916_v29, %v1913_v42  ;;  %vm1936_vm13 = vcmp.gt.f32.partialorder %v4262_v53, 0.0  ;;  %v1969_v19 = vmul.f32 %v1968_v24, %v1965_v46 }
 0x2ab   :  { %v1886_v37 = vmul.f32 0.2, %v1882_v8  ;;  %v2166_v59 = vadd.f32 %v4208_v6, %v4192_v21  ;;  %v2144_v3 = vmul.f32 0.2, %v2140_v18  ;;  %vm1884_vm15 = vcmp.gt.f32.partialorder %v1882_v8, 0.0 }
 0x2ac   :  { %v2245_v48 = vadd.f32 %v4259_v20, %v2238_v27  ;;  %v2151_v0 = vmul.f32 %v2149_v35, %v2147_v51  ;;  %vm2194_vm4 = vcmp.gt.f32.partialorder %v4271_v54, 0.0  ;;  %vm1910_vm5 = vcmp.gt.f32.partialorder %v1908_v62, 0.0 }
 0x2ad   :  { %v2186_v57 = vpop.permute.xlu1 %2185  ;;  %vm2142_vm6 = vcmp.gt.f32.partialorder %v2140_v18, 0.0  ;;  %v1919_v2 = vadd.f32 %v1917_v41, %v1893_v11  ;;  %v1866_v6 = vmul.f32 %v1864_v12, %v1862_v50  ;;  %v1888_v1 = vsel %vm1884_vm15, %v1882_v8, %v1886_v37 }
 0x2ae   :  { %v2193_v58 = vadd.f32 %v2191_v55, %v2186_v57  ;;  %v1912_v55 = vmul.f32 0.2, %v1908_v62  ;;  %v2170_v57 = vmul.f32 0.2, %v2166_v59  ;;  %v1938_v32 = vmul.f32 0.2, %v4262_v53 }
 0x2af   :  { %vm2168_vm10 = vcmp.gt.f32.partialorder %v2166_v59, 0.0  ;;  %vm2247_vm11 = vcmp.gt.f32.partialorder %v2245_v48, 0.0  ;;  %v2146_v47 = vsel %vm2142_vm6, %v2140_v18, %v2144_v3  ;;  %v2153_v7 = vadd.f32 %v2151_v0, %v2127_v44 }
 0x2b0   :  { %vm2195_vm7 = vcmp.gt.f32.partialorder %v2193_v58, 0.0  ;;  %v1914_v30 = vsel %vm1910_vm5, %v1908_v62, %v1912_v55  ;;  %v2249_v63 = vmul.f32 0.2, %v2245_v48  ;;  %v1892_v42 = vmul.f32 %v1890_v45, %v1888_v1 }
 0x2b1   :  { %v1868_v11 = vadd.f32 %v1866_v6, %v4081_v5  ;;  %v2196_v62 = vmul.f32 0.2, %v4271_v54  ;;  %v1918_v18 = vmul.f32 %v1916_v29, %v1914_v30  ;;  %v1940_v5 = vsel %vm1936_vm13, %v4262_v53, %v1938_v32 }
 0x2b2   :  { %v1923_v23 = vpop.permute.xlu1 %1922  ;;  %v2179_v27 = vadd.f32 %v2177_v56, %v2153_v7  ;;  %vm2430_vm5 = vcmask 523264  }
 0x2b3   :  { %v1933_v28 = vadd.f32 %v1932_v49, %v1923_v23  ;;  %v2197_v49 = vmul.f32 0.2, %v2193_v58  ;;  %v2172_v23 = vsel %vm2168_vm10, %v2166_v59, %v2170_v57  ;;  %v1894_v50 = vadd.f32 %v1892_v42, %v1868_v11 }
 0x2b4   :  { %v2198_v59 = vsel %vm2194_vm4, %v4271_v54, %v2196_v62  ;;  %vm2408_vm4 = vcmask 457728  }
 0x2b5   :  { %vm1935_vm14 = vcmp.gt.f32.partialorder %v1933_v28, 0.0  ;;  %v1937_v43 = vmul.f32 0.2, %v1933_v28  ;;  %v2199_v10 = vsel %vm2195_vm7, %v2193_v58, %v2197_v49  ;;  %v1920_v56 = vadd.f32 %v1918_v18, %v1894_v50 }
 0x2b6   :  { %v2203_v44 = vmul.f32 %v2201_v15, %v2199_v10  ;;  %vm2432_vm7 = vcmask 519168  }
 0x2b7   :  { %v1939_v40 = vsel %vm1935_vm14, %v1933_v28, %v1937_v43  ;;  %v2208_v39 = vpop.permute.xlu1 %2207  ;;  %v2251_v28 = vsel %vm2247_vm11, %v2245_v48, %v2249_v63  ;;  %v1944_v43 = vmul.f32 %v1942_v34, %v1940_v5  ;;  %v4705_v63 = vld [vmem:[#allocation15_spill] sm:$0xff] }
 0x2b8   :  { %v1943_v21 = vmul.f32 %v1942_v34, %v1939_v40  ;;  %v2218_v12 = vadd.f32 %v4249_v25, %v2208_v39  ;;  %v2205_v3 = vadd.f32 %v2203_v44, %v2179_v27  ;;  %v2255_v0 = vmul.f32 %v2253_v26, %v2251_v28 }
 0x2b9   :  { %v1946_v34 = vadd.f32 %v1944_v43, %v1920_v56 }
 0x2ba   :  { %v1945_v9 = vadd.f32 %v1943_v21, %v1919_v2  ;;  %v2222_v51 = vmul.f32 0.2, %v2218_v12  ;;  %vm2220_vm14 = vcmp.gt.f32.partialorder %v2218_v12, 0.0 }
 0x2bb   :  { %v2212_v17 = vpop.permute.xlu1 %2211 }
 0x2bc   :  { %v2219_v8 = vadd.f32 %v4249_v25, %v2212_v17  ;;  %v1971_v46 = vadd.f32 %v1969_v19, %v1945_v9  ;;  %v2150_v25 = vmul.f32 %v2149_v35, %v2146_v47  ;;  %v2176_v35 = vmul.f32 %v2175_v38, %v2172_v23 }
 0x2bd   :  { %v2224_v38 = vsel %vm2220_vm14, %v2218_v12, %v2222_v51 }
 0x2be   :  { %vm2221_vm12 = vcmp.gt.f32.partialorder %v2219_v8, 0.0  ;;  %v2223_v58 = vmul.f32 0.2, %v2219_v8  ;;  %v4302_v45 = vsel %vm43_vm0, -1e+30, %v1971_v46  ;;  %v2152_v55 = vadd.f32 %v2150_v25, %v4110_v14  ;;  %v4706_v46 = vld [vmem:[#allocation16_spill] sm:$0xff] }
 0x2bf   :  { %v1975_v29 = vsel %vm260_vm1, %v4302_v45, -inf  ;;  %v2228_v6 = vmul.f32 %v2227_v22, %v2224_v38 }
 0x2c0   :  { %v2225_v41 = vsel %vm2221_vm12, %v2219_v8, %v2223_v58  ;;  %v1953_v19 = vpop.permute.xlu1 %1952  ;;  %1976 = vmax.xlane.f32.xlu1 %v1975_v29  ;;  %v2178_v40 = vadd.f32 %v2176_v35, %v2152_v55 }
 0x2c1   :  { %v2229_v37 = vmul.f32 %v2227_v22, %v2225_v41  ;;  %v1960_v53 = vadd.f32 %v4218_v16, %v1953_v19  ;;  %v2202_v16 = vmul.f32 %v2201_v15, %v2198_v59 }
 0x2c3   :  { %vm1962_vm13 = vcmp.gt.f32.partialorder %v1960_v53, 0.0  ;;  %v1964_v48 = vmul.f32 0.2, %v1960_v53  ;;  %v2231_v49 = vadd.f32 %v2229_v37, %v2205_v3  ;;  %v2204_v32 = vadd.f32 %v2202_v16, %v2178_v40 }
 0x2c5   :  { %v1966_v39 = vsel %vm1962_vm13, %v1960_v53, %v1964_v48  ;;  %v2234_v2 = vpop.permute.xlu1 %2233  ;;  %v2257_v57 = vadd.f32 %v2255_v0, %v2231_v49  ;;  %v2230_v47 = vadd.f32 %v2228_v6, %v2204_v32 }
 0x2c6   :  { %v1970_v54 = vmul.f32 %v1968_v24, %v1966_v39  ;;  %v2244_v21 = vadd.f32 %v4259_v20, %v2234_v2 }
 0x2c7   :  { %v4342_v22 = vsel %vm44_vm2, -1e+30, %v2257_v57 }
 0x2c8   :  { %vm2246_vm15 = vcmp.gt.f32.partialorder %v2244_v21, 0.0  ;;  %v2248_v14 = vmul.f32 0.2, %v2244_v21  ;;  %v1972_v1 = vadd.f32 %v1970_v54, %v1946_v34  ;;  %v2263_v7 = vsel %vm264_vm3, %v4342_v22, -inf }
 0x2ca   :  { %v2250_v30 = vsel %vm2246_vm15, %v2244_v21, %v2248_v14  ;;  %v4334_v9 = vsel %vm44_vm2, -1e+30, %v1972_v1 }
 0x2cb   :  { %v2254_v15 = vmul.f32 %v2253_v26, %v2250_v30  ;;  %v1978_v24 = vsel %vm264_vm3, %v4334_v9, -inf }
 0x2cc   :  { %1979 = vmax.xlane.f32.xlu0 %v1978_v24 }
 0x2cd   :  { %v2256_v20 = vadd.f32 %v2254_v15, %v2230_v47 }
 0x2cf   :  { %v4348_v10 = vsel %vm43_vm0, -1e+30, %v2256_v20  ;;  %v840_v17 = vpop.xlane.xlu0 %839 }
 0x2d0   :  { %2264 = vmax.xlane.f32.xlu0 %v2263_v7  ;;  %v2260_v26 = vsel %vm260_vm1, %v4348_v10, -inf  ;;  %v842_v42 = vsub.f32 %v4705_v63, %v840_v17 }
 0x2d1   :  { %2261 = vmax.xlane.f32.xlu1 %v2260_v26 }
 0x2d2   :  { %v845_v12 = vmul.f32 1.442695, %v842_v42 }
 0x2d3   :  { %v1125_v8 = vpop.xlane.xlu0 %1124 }
 0x2d4   :  { %2776 = vpow2.f32 %v845_v12  ;;  %v1127_v11 = vsub.f32 %v4706_v46, %v1125_v8 }
 0x2d6   :  { %v1130_v23 = vmul.f32 1.442695, %v1127_v11 }
 0x2d8   :  { %2778 = vpow2.f32 %v1130_v23 }
 0x2de   :  { %v4354_v62 = vpop.f32.mrb[0].mxu0  ;;  %v2777_v18 = vpop.eup %2776 }
 0x2df   :  { %v2533_v44 = vpop.f32.mrb[1].mxu0  ;;  %v4360_v25 = vsel %vm44_vm2, 0.0, %v2777_v18 }
 0x2e0   :  { %v4356_v58 = vpop.f32.mrb[2].mxu0  ;;  %v852_v28 = vsel %vm264_vm3, %v4360_v25, 0.0 }
 0x2e1   :  { %v2534_v5 = vpop.f32.mrb[3].mxu0  ;;  %853 = vadd.xlane.f32.xlu0 %v852_v28 }
 0x2e2   :  { %v2779_v29 = vpop.eup %2778 }
 0x2e3   :  { %v4366_v27 = vsel %vm44_vm2, 0.0, %v2779_v29 }
 0x2e4   :  { %v1137_v50 = vsel %vm264_vm3, %v4366_v27, 0.0 }
 0x2e5   :  { %1138 = vadd.xlane.f32.xlu0 %v1137_v50 }
 0x2f8   :  { %v837_v51 = vpop.xlane.xlu1 %836 }
 0x2f9   :  { %v841_v41 = vsub.f32 %v4002_v61, %v837_v51 }
 0x2fb   :  { %v843_v19 = vmul.f32 1.442695, %v841_v41 }
 0x2fc   :  { %v1122_v35 = vpop.xlane.xlu1 %1121 }
 0x2fd   :  { %2780 = vpow2.f32 %v843_v19  ;;  %v1126_v37 = vsub.f32 %v4029_v33, %v1122_v35 }
 0x2ff   :  { %v1128_v53 = vmul.f32 1.442695, %v1126_v37 }
 0x301   :  { %2782 = vpow2.f32 %v1128_v53 }
 0x307   :  { %v2781_v59 = vpop.eup %2780 }
 0x308   :  { %v4374_v56 = vsel %vm43_vm0, 0.0, %v2781_v59  ;;  %v4707_v59 = vld [vmem:[#allocation14_spill] sm:$0xff] }
 0x309   :  { %v849_v43 = vsel %vm260_vm1, %v4374_v56, 0.0 }
 0x30a   :  { %850 = vadd.xlane.f32.xlu1 %v849_v43 }
 0x30b   :  { %v2783_v3 = vpop.eup %2782 }
 0x30c   :  { %v4380_v61 = vsel %vm43_vm0, 0.0, %v2783_v3 }
 0x30d   :  { %v1134_v55 = vsel %vm260_vm1, %v4380_v61, 0.0 }
 0x30e   :  { %1135 = vadd.xlane.f32.xlu1 %v1134_v55 }
 0x311   :  { %v4384_v33 = vpop.f32.mrb[0].mxu1 }
 0x312   :  { %v2539_v48 = vpop.f32.mrb[1].mxu1 }
 0x313   :  { %v4386_v38 = vpop.f32.mrb[2].mxu1 }
 0x314   :  { %v2540_v0 = vpop.f32.mrb[3].mxu1 }
 0x31c   :  { %v1407_v49 = vpop.xlane.xlu1 %1406 }
 0x31d   :  { %v1411_v40 = vsub.f32 %v4131_v4, %v1407_v49 }
 0x31f   :  { %v1413_v16 = vmul.f32 1.442695, %v1411_v40 }
 0x321   :  { %v1410_v39 = vpop.xlane.xlu0 %1409  ;;  %2784 = vpow2.f32 %v1413_v16 }
 0x322   :  { %v1412_v2 = vsub.f32 %v4145_v36, %v1410_v39 }
 0x324   :  { %v1415_v54 = vmul.f32 1.442695, %v1412_v2 }
 0x325   :  { %v1695_v21 = vpop.xlane.xlu0 %1694 }
 0x326   :  { %2786 = vpow2.f32 %v1415_v54  ;;  %v1697_v34 = vsub.f32 %v4154_v31, %v1695_v21 }
 0x328   :  { %v1700_v6 = vmul.f32 1.442695, %v1697_v34 }
 0x329   :  { %v1692_v14 = vpop.xlane.xlu1 %1691 }
 0x32a   :  { %2788 = vpow2.f32 %v1700_v6  ;;  %v1696_v57 = vsub.f32 %v4166_v60, %v1692_v14 }
 0x32b   :  { %v2785_v1 = vpop.eup %2784 }
 0x32c   :  { %v4394_v32 = vsel %vm43_vm0, 0.0, %v2785_v1  ;;  %v1698_v4 = vmul.f32 1.442695, %v1696_v57 }
 0x32d   :  { %v1419_v30 = vsel %vm260_vm1, %v4394_v32, 0.0 }
 0x32e   :  { %1420 = vadd.xlane.f32.xlu1 %v1419_v30  ;;  %2790 = vpow2.f32 %v1698_v4 }
 0x330   :  { %v2787_v36 = vpop.eup %2786 }
 0x331   :  { %v4400_v31 = vsel %vm44_vm2, 0.0, %v2787_v36 }
 0x332   :  { %v1422_v15 = vsel %vm264_vm3, %v4400_v31, 0.0 }
 0x333   :  { %1423 = vadd.xlane.f32.xlu0 %v1422_v15 }
 0x334   :  { %v2789_v60 = vpop.eup %2788 }
 0x335   :  { %v4406_v24 = vsel %vm44_vm2, 0.0, %v2789_v60  ;;  %v4708_v60 = vmov 0.0  }
 0x336   :  { %v1707_v47 = vsel %vm264_vm3, %v4406_v24, 0.0 }
 0x337   :  { %1708 = vadd.xlane.f32.xlu0 %v1707_v47 }
 0x338   :  { %v2791_v20 = vpop.eup %2790 }
 0x339   :  { %v4412_v7 = vsel %vm43_vm0, 0.0, %v2791_v20 }
 0x33a   :  { %v1704_v17 = vsel %vm260_vm1, %v4412_v7, 0.0 }
 0x33b   :  { %1705 = vadd.xlane.f32.xlu1 %v1704_v17 }
 0x34d   :  { %v1977_v26 = vpop.xlane.xlu1 %1976 }
 0x34e   :  { %v1981_v63 = vsub.f32 %v4302_v45, %v1977_v26 }
 0x350   :  { %v1983_v42 = vmul.f32 1.442695, %v1981_v63 }
 0x352   :  { %2792 = vpow2.f32 %v1983_v42 }
 0x359   :  { %v1980_v12 = vpop.xlane.xlu0 %1979 }
 0x35a   :  { %v1982_v8 = vsub.f32 %v4334_v9, %v1980_v12 }
 0x35c   :  { %v2793_v46 = vpop.eup %2792  ;;  %v1985_v11 = vmul.f32 1.442695, %v1982_v8 }
 0x35d   :  { %v2265_v23 = vpop.xlane.xlu0 %2264  ;;  %v4420_v18 = vsel %vm43_vm0, 0.0, %v2793_v46 }
 0x35e   :  { %2794 = vpow2.f32 %v1985_v11  ;;  %v2267_v44 = vsub.f32 %v4342_v22, %v2265_v23  ;;  %v2262_v5 = vpop.xlane.xlu1 %2261  ;;  %v1989_v28 = vsel %vm260_vm1, %v4420_v18, 0.0 }
 0x35f   :  { %v2266_v45 = vsub.f32 %v4348_v10, %v2262_v5  ;;  %1990 = vadd.xlane.f32.xlu1 %v1989_v28 }
 0x360   :  { %v2270_v29 = vmul.f32 1.442695, %v2267_v44 }
 0x361   :  { %v2268_v50 = vmul.f32 1.442695, %v2266_v45 }
 0x362   :  { %2796 = vpow2.f32 %v2270_v29 }
 0x363   :  { %2798 = vpow2.f32 %v2268_v50 }
 0x368   :  { %v2795_v9 = vpop.eup %2794 }
 0x369   :  { %v4428_v51 = vsel %vm44_vm2, 0.0, %v2795_v9 }
 0x36a   :  { %v1992_v41 = vsel %vm264_vm3, %v4428_v51, 0.0 }
 0x36b   :  { %1993 = vadd.xlane.f32.xlu0 %v1992_v41 }
 0x36c   :  { %v2797_v22 = vpop.eup %2796 }
 0x36d   :  { %v2799_v19 = vpop.eup %2798  ;;  %v4434_v35 = vsel %vm44_vm2, 0.0, %v2797_v22  ;;  %vm2396_vm2 = vcmask 195584  }
 0x36e   :  { %v2277_v10 = vsel %vm264_vm3, %v4434_v35, 0.0  ;;  %v4440_v37 = vsel %vm43_vm0, 0.0, %v2799_v19  ;;  %v854_v13 = vpop.xlane.xlu0 %853  ;;  %vm2390_vm0 = vcmask 64512   ;;  %vm2399_vm3 = vcmask 261120  }
 0x36f   :  { %2278 = vadd.xlane.f32.xlu0 %v2277_v10  ;;  %v2274_v53 = vsel %vm260_vm1, %v4440_v37, 0.0 }
 0x370   :  { %2275 = vadd.xlane.f32.xlu1 %v2274_v53 }
 0x372   :  { %v1139_v43 = vpop.xlane.xlu0 %1138 }
 0x381   :  { %860 = vrot.lane.b32.xlu1 %v4707_v59, %s2912_s11 }
 0x385   :  { %1430 = vrot.lane.b32.xlu1 %v4707_v59, %s2913_s12  ;;  %1145 = vrot.lane.b32.xlu0 %v4707_v59, %s2914_s13 }
 0x389   :  { %1715 = vrot.lane.b32.xlu1 %v4707_v59, %s2915_s15  ;;  %2000 = vrot.lane.b32.xlu0 %v4707_v59, %s2916_s14 }
 0x38d   :  { %2285 = vrot.lane.b32.xlu1 %v4707_v59, %s2917_s16  ;;  %2336 = vrot.lane.b32.xlu0 %v4384_v33, %s2918_s19 }
 0x391   :  { %2338 = vrot.lane.b32.xlu1 %v4386_v38, %s2918_s19 }
 0x397   :  { %v851_v52 = vpop.xlane.xlu1 %850 }
 0x39b   :  { %v1136_v3 = vpop.xlane.xlu1 %1135 }
 0x39c   :  { %2800 = vrcp.f32 %v1136_v3 }
 0x39d   :  { %2802 = vrcp.f32 %v851_v52 }
 0x39e   :  { %2804 = vrcp.f32 %v1139_v43 }
 0x39f   :  { %2806 = vrcp.f32 %v854_v13 }
 0x3a6   :  { %v2801_v39 = vpop.eup %2800 }
 0x3a7   :  { %v2803_v38 = vpop.eup %2802  ;;  %v1142_v34 = vmul.f32 %v2801_v39, %v4380_v61 }
 0x3a8   :  { %v2805_v54 = vpop.eup %2804  ;;  %v857_v6 = vmul.f32 %v2803_v38, %v4374_v56 }
 0x3a9   :  { %v2807_v21 = vpop.eup %2806  ;;  %v1143_v1 = vmul.f32 %v2805_v54, %v4366_v27 }
 0x3aa   :  { %v858_v30 = vmul.f32 %v2807_v21, %v4360_v25 }
 0x3ab   :  { %v1144_v15 = vpack.c.bf16 %v1143_v1, %v1142_v34 }
 0x3ac   :  { %v859_v56 = vpack.c.bf16 %v858_v30, %v857_v6 }
 0x3bb   :  { %v1421_v48 = vpop.xlane.xlu1 %1420 }
 0x3c0   :  { %v1424_v55 = vpop.xlane.xlu0 %1423 }
 0x3c1   :  { %2808 = vrcp.f32 %v1424_v55 }
 0x3c4   :  { %v1709_v0 = vpop.xlane.xlu0 %1708 }
 0x3c8   :  { %v1706_v49 = vpop.xlane.xlu1 %1705 }
 0x3c9   :  { %2810 = vrcp.f32 %v1706_v49 }
 0x3ca   :  { %2812 = vrcp.f32 %v1421_v48 }
 0x3cb   :  { %2814 = vrcp.f32 %v1709_v0  ;;  %v2809_v61 = vpop.eup %2808 }
 0x3cc   :  { %v1428_v26 = vmul.f32 %v2809_v61, %v4400_v31 }
 0x3d3   :  { %v2811_v27 = vpop.eup %2810 }
 0x3d4   :  { %v2813_v20 = vpop.eup %2812  ;;  %v1712_v63 = vmul.f32 %v2811_v27, %v4412_v7 }
 0x3d5   :  { %v2815_v17 = vpop.eup %2814  ;;  %v1427_v12 = vmul.f32 %v2813_v20, %v4394_v32 }
 0x3d6   :  { %v1713_v8 = vmul.f32 %v2815_v17, %v4406_v24 }
 0x3d7   :  { %v1429_v28 = vpack.c.bf16 %v1428_v26, %v1427_v12 }
 0x3d8   :  { %v1714_v45 = vpack.c.bf16 %v1713_v8, %v1712_v63  ;;  %v2510_v8 = vld [vmem:[%s4504_s5] ss:$0 sm:$0xff] }
 0x3ec   :  { %v1991_v16 = vpop.xlane.xlu1 %1990 }
 0x3f8   :  { %v1994_v40 = vpop.xlane.xlu0 %1993 }
 0x3f9   :  { %2816 = vrcp.f32 %v1994_v40 }
 0x3fc   :  { %v2279_v33 = vpop.xlane.xlu0 %2278 }
 0x3fd   :  { %v2276_v2 = vpop.xlane.xlu1 %2275  ;;  %2818 = vrcp.f32 %v2279_v33 }
 0x3fe   :  { %2820 = vrcp.f32 %v2276_v2 }
 0x3ff   :  { %2822 = vrcp.f32 %v1991_v16 }
 0x400   :  { %v1146_v14 = vpop.permute.xlu0 %1145 }
 0x401   :  { %v1151_v57 = vsel %vm293_vm8, %v1146_v14, 0  ;;  %v861_v4 = vpop.permute.xlu1 %860 }
 0x402   :  { %v866_v36 = vsel %vm293_vm8, %v861_v4, 0  ;;  %2548 = vmatpush3.bf16.msra.mxu1 %v1151_v57 }
 0x403   :  { %2542 = vmatpush3.bf16.msra.mxu0 %v866_v36  ;;  %2559 = vmatprep.subr.bf16.mxu1 %v4708_v60  ;;  %v2817_v11 = vpop.eup %2816 }
 0x404   :  { %2553 = vmatprep.subr.bf16.mxu0 %v4708_v60  ;;  %v2001_v23 = vpop.permute.xlu0 %2000  ;;  %v1998_v24 = vmul.f32 %v2817_v11, %v4428_v51 }
 0x405   :  { %v1431_v47 = vpop.permute.xlu1 %1430  ;;  %2550 = vmatmul.mubr.msk.bf16.vlgmr.msra.gmra.mrb[4].mxu1 %vm260_vm1, %v1144_v15  ;;  %v2006_v5 = vsel %vm293_vm8, %v2001_v23, 0 }
 0x406   :  { %v1436_v25 = vsel %vm293_vm8, %v1431_v47, 0  ;;  %2544 = vmatmul.mubr.msk.bf16.vlgmr.msra.gmra.mrb[4].mxu0 %vm260_vm1, %v859_v56  ;;  %2561 = vmatprep.mubr.msk.bf16.mxu1 %vm2883_vm9, %v4708_v60 }
 0x407   :  { %2554 = vmatpush3.bf16.msra.mxu0 %v1436_v25  ;;  %2555 = vmatprep.mubr.msk.bf16.mxu0 %vm2883_vm9, %v4708_v60  ;;  %v2819_v44 = vpop.eup %2818 }
 0x408   :  { %2565 = vmatprep.subr.bf16.mxu0 %v4708_v60  ;;  %v2821_v31 = vpop.eup %2820  ;;  %v2283_v50 = vmul.f32 %v2819_v44, %v4434_v35  ;;  %v2337_v6 = vpop.permute.xlu0 %2336 }
 0x409   :  { %v1716_v42 = vpop.permute.xlu1 %1715  ;;  %v2823_v32 = vpop.eup %2822  ;;  %v2282_v9 = vmul.f32 %v2821_v31, %v4440_v37  ;;  %v2391_v56 = vsel %vm2390_vm0, %v4354_v62, %v2337_v6 }
 0x40a   :  { %v1721_v46 = vsel %vm293_vm8, %v1716_v42, 0  ;;  %v1997_v41 = vmul.f32 %v2823_v32, %v4420_v18 }
 0x40b   :  { %2560 = vmatpush3.bf16.msra.mxu1 %v1721_v46  ;;  %v2284_v19 = vpack.c.bf16 %v2283_v50, %v2282_v9 }
 0x40c   :  { %2571 = vmatprep.subr.bf16.mxu1 %v4708_v60  ;;  %v1999_v22 = vpack.c.bf16 %v1998_v24, %v1997_v41 }
 0x40d   :  { %v2286_v7 = vpop.permute.xlu1 %2285 }
 0x40e   :  { %v2291_v29 = vsel %vm293_vm8, %v2286_v7, 0  ;;  %2556 = vmatmul.mubr.msk.bf16.vlgmr.msra.gmra.mrb[8].mxu0 %vm260_vm1, %v1429_v28  ;;  %2562 = vmatmul.mubr.msk.bf16.vlgmr.msra.gmra.mrb[8].mxu1 %vm260_vm1, %v1714_v45  ;;  %vm2402_vm8 = vcmask 326656  }
 0x40f   :  { %2566 = vmatpush3.bf16.msra.mxu0 %v2006_v5  ;;  %2572 = vmatpush3.bf16.msra.mxu1 %v2291_v29 }
 0x410   :  { %2567 = vmatprep.mubr.msk.bf16.mxu0 %vm2883_vm9, %v4708_v60  ;;  %2573 = vmatprep.mubr.msk.bf16.mxu1 %vm2883_vm9, %v4708_v60  ;;  %vm2405_vm9 = vcmask 392192  }
 0x411   :  { %v2339_v14 = vpop.permute.xlu1 %2338 }
 0x412   :  { %v2392_v20 = vsel %vm2390_vm0, %v4356_v58, %v2339_v14 }
 0x416   :  { %2568 = vmatmul.mubr.msk.bf16.vlgmr.msra.gmra.mrb[12].mxu0 %vm260_vm1, %v1999_v22  ;;  %2574 = vmatmul.mubr.msk.bf16.vlgmr.msra.gmra.mrb[12].mxu1 %vm260_vm1, %v2284_v19  ;;  %vm2393_vm1 = vcmask 130048  }
 0x4d8   :  { %v1187_v10 = vpop.f32.mrb[4].mxu1 }
 0x4d9   :  { %v902_v51 = vpop.f32.mrb[4].mxu0  ;;  %v2551_v53 = vpop.f32.mrb[5].mxu1 }
 0x4da   :  { %2344 = vrot.lane.b32.xlu0 %v902_v51, %s2919_s22  ;;  %v2545_v35 = vpop.f32.mrb[5].mxu0  ;;  %v1190_v37 = vpop.f32.mrb[6].mxu1 }
 0x4db   :  { %v905_v59 = vpop.f32.mrb[6].mxu0  ;;  %v2552_v13 = vpop.f32.mrb[7].mxu1 }
 0x4dc   :  { %2346 = vrot.lane.b32.xlu1 %v905_v59, %s2919_s22  ;;  %v2546_v52 = vpop.f32.mrb[7].mxu0 }
 0x4de   :  { %2352 = vrot.lane.b32.xlu0 %v1187_v10, %s2920_s23 }
 0x4e0   :  { %2354 = vrot.lane.b32.xlu1 %v1190_v37, %s2920_s23 }
 0x4e1   :  { %v1472_v18 = vpop.f32.mrb[8].mxu0  ;;  %v1757_v43 = vpop.f32.mrb[8].mxu1 }
 0x4e2   :  { %v2557_v3 = vpop.f32.mrb[9].mxu0  ;;  %2360 = vrot.lane.b32.xlu0 %v1472_v18, %s2921_s4  ;;  %v2563_v55 = vpop.f32.mrb[9].mxu1 }
 0x4e3   :  { %v1475_v48 = vpop.f32.mrb[10].mxu0  ;;  %v1760_v0 = vpop.f32.mrb[10].mxu1 }
 0x4e4   :  { %v2558_v49 = vpop.f32.mrb[11].mxu0  ;;  %2362 = vrot.lane.b32.xlu1 %v1475_v48, %s2921_s4  ;;  %v2564_v40 = vpop.f32.mrb[11].mxu1 }
 0x4e6   :  { %2368 = vrot.lane.b32.xlu0 %v1757_v43, %s2922_s21 }
 0x4e8   :  { %2370 = vrot.lane.b32.xlu1 %v1760_v0, %s2922_s21 }
 0x4e9   :  { %v2042_v16 = vpop.f32.mrb[12].mxu0  ;;  %v2327_v39 = vpop.f32.mrb[12].mxu1 }
 0x4ea   :  { %v2575_v33 = vpop.f32.mrb[13].mxu1  ;;  %2376 = vrot.lane.b32.xlu0 %v2042_v16, %s2923_s24  ;;  %v2569_v38 = vpop.f32.mrb[13].mxu0 }
 0x4eb   :  { %v2045_v2 = vpop.f32.mrb[14].mxu0  ;;  %v2330_v54 = vpop.f32.mrb[14].mxu1 }
 0x4ec   :  { %v2576_v21 = vpop.f32.mrb[15].mxu1  ;;  %2378 = vrot.lane.b32.xlu1 %v2045_v2, %s2923_s24  ;;  %v2570_v34 = vpop.f32.mrb[15].mxu0 }
 0x4ee   :  { %2384 = vrot.lane.b32.xlu0 %v2327_v39, %s2924_s25 }
 0x4f0   :  { %2386 = vrot.lane.b32.xlu1 %v2330_v54, %s2924_s25 }
 0x54c   :  { %v2345_v1 = vpop.permute.xlu0 %2344 }
 0x54d   :  { %v2394_v27 = vsel %vm2393_vm1, %v2391_v56, %v2345_v1 }
 0x54e   :  { %v2347_v57 = vpop.permute.xlu1 %2346 }
 0x54f   :  { %v2395_v17 = vsel %vm2393_vm1, %v2392_v20, %v2347_v57 }
 0x550   :  { %v2353_v4 = vpop.permute.xlu0 %2352 }
 0x551   :  { %v2397_v25 = vsel %vm2396_vm2, %v2394_v27, %v2353_v4 }
 0x552   :  { %v2355_v30 = vpop.permute.xlu1 %2354 }
 0x553   :  { %v2398_v42 = vsel %vm2396_vm2, %v2395_v17, %v2355_v30 }
 0x554   :  { %v2361_v36 = vpop.permute.xlu0 %2360 }
 0x555   :  { %v2400_v26 = vsel %vm2399_vm3, %v2397_v25, %v2361_v36 }
 0x556   :  { %v2363_v15 = vpop.permute.xlu1 %2362 }
 0x557   :  { %v2401_v46 = vsel %vm2399_vm3, %v2398_v42, %v2363_v15 }
 0x558   :  { %v2369_v60 = vpop.permute.xlu0 %2368 }
 0x559   :  { %v2403_v12 = vsel %vm2402_vm8, %v2400_v26, %v2369_v60 }
 0x55a   :  { %v2371_v61 = vpop.permute.xlu1 %2370 }
 0x55b   :  { %v2404_v23 = vsel %vm2402_vm8, %v2401_v46, %v2371_v61 }
 0x55c   :  { %v2377_v47 = vpop.permute.xlu0 %2376 }
 0x55d   :  { %v2406_v62 = vsel %vm2405_vm9, %v2403_v12, %v2377_v47 }
 0x55e   :  { %v2379_v63 = vpop.permute.xlu1 %2378 }
 0x55f   :  { %v2407_v5 = vsel %vm2405_vm9, %v2404_v23, %v2379_v63 }
 0x560   :  { %v2385_v11 = vpop.permute.xlu0 %2384 }
 0x561   :  { %v2409_v44 = vsel %vm2408_vm4, %v2406_v62, %v2385_v11 }
 0x562   :  { %v2418_v28 = vadd.f32 %v2510_v8, %v2409_v44  ;;  %v2387_v58 = vpop.permute.xlu1 %2386 }
 0x563   :  { %v2410_v45 = vsel %vm2408_vm4, %v2407_v5, %v2387_v58 }
 0x564   :  { %v2422_v31 = vmul.f32 1.442695, %v2418_v28  ;;  %v2419_v7 = vadd.f32 %v2510_v8, %v2410_v45  ;;  %vm2420_vm6 = vcmp.gt.f32.partialorder %v2418_v28, 0.0 }
 0x566   :  { %2824 = vpow2.f32 %v2422_v31  ;;  %v2424_v29 = vmul.f32 1.442695, %v2419_v7  ;;  %vm2421_vm10 = vcmp.gt.f32.partialorder %v2419_v7, 0.0 }
 0x568   :  { %2826 = vpow2.f32 %v2424_v29 }
 0x570   :  { %v2825_v32 = vpop.eup %2824 }
 0x571   :  { %v2511_v24 = vadd.f32 -1.0, %v2825_v32 }
 0x572   :  { %v2827_v50 = vpop.eup %2826 }
 0x573   :  { %v2428_v9 = vsel %vm2420_vm6, %v2418_v28, %v2511_v24  ;;  %v2512_v41 = vadd.f32 -1.0, %v2827_v50 }
 0x574   :  { %2431 = vst.msk [vmem:[%s4505_s6] sm:$0xff] %vm2430_vm5, %v2428_v9 }
 0x575   :  { %v2429_v22 = vsel %vm2421_vm10, %v2419_v7, %v2512_v41 }
 0x576   :  { %2433 = vst.msk [vmem:[%s4505_s6 + $0x8] sm:$0xf] %vm2432_vm7, %v2429_v22 }
 0x577   :  { %2438 = vsyncpa [#allocation3], 1 }

// kernel: gatv2_forward.7
= control target key start
LH: loop header
LB: loop body
LE: loop exit
PB: predicated region body
PF: predicated region fallthrough
CT: control target
= control target key end

     0   :  { %11 = vsyncpa [#allocation4], 0  ;;  %s2790_s0 = inlined_call_operand.vmem [shape: f32[8,4], index: 0, kind: input, shape index: {}]   ;;  %s2791_s1 = inlined_call_operand.vmem [shape: f32[12,32], index: 1, kind: input, shape index: {}]   ;;  %s2792_s2 = inlined_call_operand.vmem [shape: f32[12,32], index: 2, kind: input, shape index: {}]   ;;  %s2793_s3 = inlined_call_operand.vmem [shape: f32[32,12], index: 3, kind: input, shape index: {}]   ;;  %s2794_s4 = inlined_call_operand.vmem [shape: s8[12,12], index: 4, kind: input, shape index: {}]   ;;  %s2795_s5 = inlined_call_operand.vmem [shape: f32[1,32], index: 5, kind: input, shape index: {}]   ;;  %s2796_s6 = inlined_call_operand.hbm [shape: f32[12,32], index: 6, kind: output, shape index: {}]  }
   0x1   :  { %12 = vsyncpa [#allocation3], 0  ;;  %s19_s23 = sshll.u32 %s2790_s0, 4  ;;  %s20_s23 = int_to_ptr.vmem [resolvable:$true] %s19_s23 }
   0x2   :  { %s1915_s24 = scalar_lea.vmem %s20_s23, 128  ;;  %p1920_p1 = scmp.lt.s32.totalorder %s20_s23, %s20_s23 }
   0x3   :  { %p1916_p0 = scmp.ne.s32.totalorder %s20_s23, %s1915_s24  ;;  %p1921_p2 = scmp.lt.s32.totalorder %s1915_s24, %s1915_s24 }
   0x5   :  { %p1922_p3 = por %p1921_p2, %p1920_p1 }
   0x7   :  { %p1923_p4 = pnand %p1922_p3, %p1916_p0 }
   0x9   :  { %1926 = shalt.err (!%p1923_p4)
}
   0xa   :  { %s1953_s25 = smov [#allocation2]  }
   0xb   :  { %22 = dma.vmem_to_smem %s20_s23, 128, %s1953_s25, [#allocation4]  }
   0xc   :  { %1949 = dma.done.wait [#allocation4], 128  }
   0xd   :  { %1950 = vsyncadd [#allocation4], 4294967168 }
   0xe   :  { %36 = sfence }
   0xf   :  { %v2045_v0 = vld [vmem:[%s2791_s1] sm:$0xff]  ;;  %v1954_v1 = vmov 1   ;;  %v1955_v2 = vmov 0   ;;  %v2052_v3 = vld [vmem:[%s2791_s1 + $0x8] sm:$0xf]  ;;  %v1956_v4 = vmov 4   ;;  %v59_v35 = vlaneseq }
  0x10   :  { %1791 = vset.pattern.permute.xlu1 %v1954_v1  ;;  %1790 = vset.pattern.permute.xlu0 %v1955_v2  ;;  %v1957_v5 = vmov 5   ;;  %v1958_v6 = vmov 2   ;;  %v1959_v7 = vmov 6   ;;  %v1960_v8 = vmov 3   ;;  %v48_v43 = vld [vmem:[%s2793_s3] sm:$0xf] }
  0x11   :  { %78 = vperm.xlu1 %1791, %v2045_v0   ;;  %51 = vperm.xlu0 %1790, %v2045_v0   ;;  %v1961_v9 = vmov 8   ;;  %v1962_v10 = vmov 9   ;;  %v1963_v11 = vmov 7   ;;  %v1964_v12 = vmov 13   ;;  %s2125_s30 = sld [smem:[#allocation2 + $0x1]]  ;;  %s2133_s7 = sld [smem:[#allocation2]] }
  0x12   :  { %v1965_v13 = vmov 10   ;;  %v1966_v14 = vmov 11   ;;  %v1967_v15 = vmov 15   ;;  %v1968_v16 = vmov 12   ;;  %s2135_s8 = sld [smem:[#allocation2 + $0x80]]  ;;  %s2137_s9 = sld [smem:[#allocation2 + $0x81]] }
  0x13   :  { %v1969_v17 = vmov 17   ;;  %v1970_v18 = vmov 20   ;;  %v1971_v19 = vmov 18   ;;  %v1972_v20 = vmov 22   ;;  %s2142_s10 = sld [smem:[#allocation2 + $0x2]]  ;;  %s2152_s14 = sld [smem:[#allocation2 + $0x3]] }
  0x14   :  { %v1973_v21 = vmov 14   ;;  %v1974_v22 = vmov 23   ;;  %v1975_v23 = vmov 24   ;;  %v1976_v24 = vmov 28   ;;  %s2145_s11 = sld [smem:[#allocation2 + $0x82]]  ;;  %s2182_s17 = sld [smem:[#allocation2 + $0x83]] }
  0x15   :  { %82 = vperm.xlu1 %1791, %v2052_v3   ;;  %56 = vperm.xlu0 %1790, %v2052_v3   ;;  %v1977_v25 = vmov 29   ;;  %v1978_v26 = vmov 16   ;;  %v1979_v27 = vmov 30   ;;  %v1980_v28 = vmov 27   ;;  %v235_v52 = vld [vmem:[%s2793_s3 + $0x4] sm:$0xf] }
  0x16   :  { %v1981_v29 = vmov 31   ;;  %v1982_v30 = vmov 21   ;;  %v1983_v34 = vmov 19   ;;  %v60_v37 = vshrl.u32 %v59_v35, 7  ;;  %v38_v55 = vld [vmem:[%s2794_s4] sm:$0x3] }
  0x17   :  { %v1984_v57 = vmov 25   ;;  %v98_v58 = vstv %s2125_s30  ;;  %v72_v63 = vstv %s2133_s7  ;;  %vm157_vm11 = vcmask 97280   ;;  %s2252_s20 = sld [smem:[#allocation2 + $0x101]]  ;;  %s2260_s22 = sld [smem:[#allocation2 + $0x102]] }
  0x18   :  { %v2115_v39 = vsub.s32 1, %v60_v37  ;;  %v2117_v40 = vsub.s32 0, %v60_v37  ;;  %v2123_v44 = vsub.s32 2, %v60_v37  ;;  %v2165_v61 = vsub.s32 3, %v60_v37  ;;  %s2254_s21 = sld [smem:[#allocation2 + $0x181]]  ;;  %s2268_s27 = sld [smem:[#allocation2 + $0x180]] }
  0x19   :  { %1793 = vset.pattern.permute.xlu1 %v1956_v4  ;;  %1792 = vset.pattern.permute.xlu0 %v1956_v4  ;;  %v40_v4 = vunpack.c.0.s8 %v38_v55  ;;  %vm161_vm15 = vcmask 93184   ;;  %s2272_s0 = sld [smem:[#allocation2 + $0x182]]  ;;  %s2274_s28 = sld [smem:[#allocation2 + $0x103]] }
  0x1a   :  { %241 = vperm.xlu1 %1793, %v2052_v3   ;;  %237 = vperm.xlu0 %1792, %v2045_v0   ;;  %v2128_v45 = vrot.slane %v48_v43, %v2115_v39  ;;  %v2131_v46 = vrot.slane %v48_v43, %v2117_v40  ;;  %v2140_v49 = vrot.slane %v48_v43, %v2123_v44  ;;  %s2286_s1 = sld [smem:[#allocation2 + $0x183]]  ;;  %s2397_s7 = sld [smem:[#allocation2 + $0x201]] }
  0x1b   :  { %v273_v53 = vrot.slane %v235_v52, %v2115_v39  ;;  %v247_v59 = vrot.slane %v235_v52, %v2117_v40  ;;  %v299_v60 = vrot.slane %v235_v52, %v2123_v44  ;;  %s2406_s12 = sld [smem:[#allocation2 + $0x202]]  ;;  %s2408_s13 = sld [smem:[#allocation2 + $0x281]] }
  0x1c   :  { %s2416_s15 = sld [smem:[#allocation2 + $0x283]]  ;;  %s2500_s19 = sld [smem:[#allocation2 + $0x300]] }
  0x1d   :  { %s2418_s16 = sld [smem:[#allocation2 + $0x203]]  ;;  %s2524_s24 = sld [smem:[#allocation2 + $0x381]] }
  0x1e   :  { %1794 = vset.pattern.permute.xlu1 %v1957_v5  ;;  %1795 = vset.pattern.permute.xlu0 %v1957_v5  ;;  %s2516_s23 = sld [smem:[#allocation2 + $0x303]]  ;;  %s2534_s25 = sld [smem:[#allocation2 + $0x382]] }
  0x1f   :  { %263 = vperm.xlu1 %1794, %v2045_v0   ;;  %267 = vperm.xlu0 %1795, %v2052_v3   ;;  %s2541_s26 = sld [smem:[#allocation2 + $0x383]]  ;;  %s1986_s29 = smov 124  }
  0x20   :  { %s1987_s30 = smov 116  }
  0x23   :  { %1796 = vset.pattern.permute.xlu1 %v1958_v6  ;;  %1797 = vset.pattern.permute.xlu0 %v1959_v7 }
  0x24   :  { %104 = vperm.xlu1 %1796, %v2045_v0   ;;  %289 = vperm.xlu0 %1797, %v2045_v0  }
  0x28   :  { %108 = vperm.xlu1 %1796, %v2052_v3   ;;  %1800 = vset.pattern.permute.xlu0 %v1960_v8 }
  0x29   :  { %134 = vperm.xlu0 %1800, %v2052_v3  }
  0x2c   :  { %1798 = vset.pattern.permute.xlu1 %v1959_v7  ;;  %v257_v7 = vstv %s2135_s8  ;;  %s2399_s8 = sld [smem:[#allocation2 + $0x280]] }
  0x2d   :  { %293 = vperm.xlu1 %1798, %v2052_v3   ;;  %1802 = vset.pattern.permute.xlu0 %v1961_v9 }
  0x2e   :  { %419 = vperm.xlu0 %1802, %v2045_v0  }
  0x31   :  { %1799 = vset.pattern.permute.xlu1 %v1960_v8  ;;  %v283_v8 = vstv %s2137_s9  ;;  %s2401_s9 = sld [smem:[#allocation2 + $0x200]] }
  0x32   :  { %130 = vperm.xlu1 %1799, %v2045_v0   ;;  %1805 = vset.pattern.permute.xlu0 %v1962_v10 }
  0x33   :  { %449 = vperm.xlu0 %1805, %v2052_v3  }
  0x36   :  { %1801 = vset.pattern.permute.xlu1 %v1963_v11 }
  0x37   :  { %315 = vperm.xlu1 %1801, %v2045_v0   ;;  %1807 = vset.pattern.permute.xlu0 %v1964_v12 }
  0x38   :  { %626 = vperm.xlu0 %1807, %v2045_v0  }
  0x3b   :  { %319 = vperm.xlu1 %1801, %v2052_v3  }
  0x3c   :  { %1810 = vset.pattern.permute.xlu0 %v1965_v13 }
  0x3d   :  { %475 = vperm.xlu0 %1810, %v2052_v3  }
  0x3f   :  { %1803 = vset.pattern.permute.xlu1 %v1961_v9  ;;  %v124_v9 = vstv %s2142_s10  ;;  %s1994_s10 = smov 100  }
  0x40   :  { %423 = vperm.xlu1 %1803, %v2052_v3  }
  0x41   :  { %1812 = vset.pattern.permute.xlu0 %v1966_v14 }
  0x42   :  { %497 = vperm.xlu0 %1812, %v2045_v0  }
  0x44   :  { %1804 = vset.pattern.permute.xlu1 %v1962_v10 }
  0x45   :  { %445 = vperm.xlu1 %1804, %v2045_v0  }
  0x46   :  { %1815 = vset.pattern.permute.xlu0 %v1967_v15 }
  0x47   :  { %682 = vperm.xlu0 %1815, %v2052_v3  }
  0x49   :  { %1806 = vset.pattern.permute.xlu1 %v1968_v16 }
  0x4a   :  { %600 = vperm.xlu1 %1806, %v2045_v0  }
  0x4b   :  { %1817 = vset.pattern.permute.xlu0 %v1969_v17 }
  0x4c   :  { %807 = vperm.xlu0 %1817, %v2045_v0  }
  0x4e   :  { %604 = vperm.xlu1 %1806, %v2052_v3  }
  0x50   :  { %1820 = vset.pattern.permute.xlu0 %v1970_v18 }
  0x51   :  { %966 = vperm.xlu0 %1820, %v2052_v3  }
  0x52   :  { %1808 = vset.pattern.permute.xlu1 %v1964_v12  ;;  %v309_v12 = vstv %s2145_s11  ;;  %s1995_s11 = smov 4  }
  0x53   :  { %630 = vperm.xlu1 %1808, %v2052_v3  }
  0x55   :  { %1822 = vset.pattern.permute.xlu0 %v1971_v19 }
  0x56   :  { %833 = vperm.xlu0 %1822, %v2045_v0  }
  0x57   :  { %1809 = vset.pattern.permute.xlu1 %v1965_v13 }
  0x58   :  { %471 = vperm.xlu1 %1809, %v2045_v0  }
  0x5a   :  { %1825 = vset.pattern.permute.xlu0 %v1972_v20 }
  0x5b   :  { %1018 = vperm.xlu0 %1825, %v2052_v3  }
  0x5c   :  { %1811 = vset.pattern.permute.xlu1 %v1973_v21 }
  0x5d   :  { %652 = vperm.xlu1 %1811, %v2045_v0  }
  0x5f   :  { %1827 = vset.pattern.permute.xlu0 %v1974_v22 }
  0x60   :  { %1040 = vperm.xlu0 %1827, %v2045_v0  }
  0x61   :  { %656 = vperm.xlu1 %1811, %v2052_v3  }
  0x64   :  { %1830 = vset.pattern.permute.xlu0 %v1975_v23 }
  0x65   :  { %1813 = vset.pattern.permute.xlu1 %v1966_v14  ;;  %1147 = vperm.xlu0 %1830, %v2052_v3   ;;  %v2173_v14 = vrot.slane %v48_v43, %v2165_v61 }
  0x66   :  { %501 = vperm.xlu1 %1813, %v2052_v3  }
  0x69   :  { %1832 = vset.pattern.permute.xlu0 %v1976_v24 }
  0x6a   :  { %1814 = vset.pattern.permute.xlu1 %v1967_v15  ;;  %1324 = vperm.xlu0 %1832, %v2045_v0  }
  0x6b   :  { %678 = vperm.xlu1 %1814, %v2045_v0  }
  0x6e   :  { %1835 = vset.pattern.permute.xlu0 %v1977_v25 }
  0x6f   :  { %1816 = vset.pattern.permute.xlu1 %v1978_v26  ;;  %1354 = vperm.xlu0 %1835, %v2052_v3  }
  0x70   :  { %781 = vperm.xlu1 %1816, %v2045_v0  }
  0x73   :  { %1837 = vset.pattern.permute.xlu0 %v1979_v27 }
  0x74   :  { %785 = vperm.xlu1 %1816, %v2052_v3   ;;  %1376 = vperm.xlu0 %1837, %v2045_v0  }
  0x78   :  { %1818 = vset.pattern.permute.xlu1 %v1969_v17  ;;  %1840 = vset.pattern.permute.xlu0 %v1980_v28  ;;  %v2176_v17 = vcvt.s32.f32 %v40_v4 }
  0x79   :  { %811 = vperm.xlu1 %1818, %v2052_v3   ;;  %1225 = vperm.xlu0 %1840, %v2052_v3  }
  0x7a   :  { %vm44_vm6 = vcmp.eq.f32.partialorder %v2176_v17, 0.0 }
  0x7d   :  { %1819 = vset.pattern.permute.xlu1 %v1970_v18  ;;  %1842 = vset.pattern.permute.xlu0 %v1981_v29  ;;  %v150_v18 = vstv %s2152_s14  ;;  %s2411_s14 = sld [smem:[#allocation2 + $0x282]] }
  0x7e   :  { %962 = vperm.xlu1 %1819, %v2045_v0  }
  0x82   :  { %1821 = vset.pattern.permute.xlu1 %v1982_v30 }
  0x83   :  { %988 = vperm.xlu1 %1821, %v2045_v0  }
  0x87   :  { %992 = vperm.xlu1 %1821, %v2052_v3  }
  0x8b   :  { %1823 = vset.pattern.permute.xlu1 %v1971_v19 }
  0x8c   :  { %837 = vperm.xlu1 %1823, %v2052_v3  }
  0x90   :  { %1824 = vset.pattern.permute.xlu1 %v1972_v20  ;;  %v79_v31 = vpop.permute.xlu1 %78  ;;  %v52_v32 = vpop.permute.xlu0 %51 }
  0x91   :  { %1014 = vperm.xlu1 %1824, %v2045_v0   ;;  %v89_v50 = vadd.f32 %v2128_v45, %v79_v31  ;;  %v63_v51 = vadd.f32 %v2131_v46, %v52_v32 }
  0x93   :  { %v93_v62 = vmul.f32 0.2, %v89_v50  ;;  %v67_v1 = vmul.f32 0.2, %v63_v51  ;;  %vm91_vm0 = vcmp.gt.f32.partialorder %v89_v50, 0.0  ;;  %vm65_vm1 = vcmp.gt.f32.partialorder %v63_v51, 0.0 }
  0x94   :  { %v2107_v33 = vpop.permute.xlu1 %82  ;;  %v2112_v38 = vpop.permute.xlu0 %56 }
  0x95   :  { %1826 = vset.pattern.permute.xlu1 %v1983_v34  ;;  %v95_v15 = vsel %vm91_vm0, %v89_v50, %v93_v62  ;;  %v69_v16 = vsel %vm65_vm1, %v63_v51, %v67_v1  ;;  %v39_v1 = vld [vmem:[%s2794_s4 + $0x2] sm:$0x1]  ;;  %s2247_s4 = sld [smem:[#allocation2 + $0x100]] }
  0x96   :  { %859 = vperm.xlu1 %1826, %v2045_v0   ;;  %v99_v30 = vmul.f32 %v98_v58, %v95_v15  ;;  %v73_v31 = vmul.f32 %v72_v63, %v69_v16  ;;  %v41_v16 = vunpack.c.0.s8 %v39_v1 }
  0x98   :  { %v101_v51 = vadd.f32 %v99_v30, %v73_v31 }
  0x99   :  { %v2110_v36 = vpop.permute.xlu1 %241  ;;  %v238_v41 = vpop.permute.xlu0 %237 }
  0x9a   :  { %863 = vperm.xlu1 %1826, %v2052_v3   ;;  %v248_v5 = vadd.f32 %v247_v59, %v238_v41 }
  0x9b   :  { %v439_v1 = vstv %s2247_s4  ;;  %s2502_s4 = sld [smem:[#allocation2 + $0x301]] }
  0x9c   :  { %v252_v19 = vmul.f32 0.2, %v248_v5  ;;  %vm250_vm3 = vcmp.gt.f32.partialorder %v248_v5, 0.0 }
  0x9e   :  { %1828 = vset.pattern.permute.xlu1 %v1974_v22  ;;  %v264_v42 = vpop.permute.xlu1 %263  ;;  %v268_v48 = vpop.permute.xlu0 %267  ;;  %v325_v22 = vrot.slane %v235_v52, %v2165_v61  ;;  %v254_v37 = vsel %vm250_vm3, %v248_v5, %v252_v19 }
  0x9f   :  { %1044 = vperm.xlu1 %1828, %v2052_v3   ;;  %v274_v6 = vadd.f32 %v273_v53, %v264_v42  ;;  %v275_v21 = vadd.f32 %v273_v53, %v268_v48  ;;  %v258_v52 = vmul.f32 %v257_v7, %v254_v37 }
  0xa1   :  { %v278_v20 = vmul.f32 0.2, %v274_v6  ;;  %vm276_vm4 = vcmp.gt.f32.partialorder %v274_v6, 0.0  ;;  %v279_v42 = vmul.f32 0.2, %v275_v21  ;;  %vm277_vm7 = vcmp.gt.f32.partialorder %v275_v21, 0.0 }
  0xa3   :  { %1829 = vset.pattern.permute.xlu1 %v1975_v23  ;;  %v105_v47 = vpop.permute.xlu1 %104  ;;  %v290_v2 = vpop.permute.xlu0 %289  ;;  %v249_v23 = vadd.f32 %v247_v59, %v2110_v36  ;;  %v280_v41 = vsel %vm276_vm4, %v274_v6, %v278_v20 }
  0xa4   :  { %1143 = vperm.xlu1 %1829, %v2045_v0   ;;  %v115_v56 = vadd.f32 %v2140_v49, %v105_v47  ;;  %v300_v13 = vadd.f32 %v299_v60, %v290_v2  ;;  %v284_v53 = vmul.f32 %v283_v8, %v280_v41  ;;  %v2224_v41 = vcvt.s32.f32 %v41_v16 }
  0xa5   :  { %v253_v47 = vmul.f32 0.2, %v249_v23  ;;  %vm251_vm9 = vcmp.gt.f32.partialorder %v249_v23, 0.0 }
  0xa6   :  { %v119_v10 = vmul.f32 0.2, %v115_v56  ;;  %vm117_vm2 = vcmp.gt.f32.partialorder %v115_v56, 0.0  ;;  %v304_v32 = vmul.f32 0.2, %v300_v13  ;;  %vm302_vm5 = vcmp.gt.f32.partialorder %v300_v13, 0.0 }
  0xa7   :  { %v2155_v54 = vpop.permute.xlu1 %108  ;;  %v255_v2 = vsel %vm251_vm9, %v249_v23, %v253_v47  ;;  %v286_v15 = vadd.f32 %v284_v53, %v258_v52  ;;  %vm45_vm14 = vcmp.eq.f32.partialorder %v2224_v41, 0.0 }
  0xa8   :  { %1831 = vset.pattern.permute.xlu1 %v1984_v57  ;;  %v121_v26 = vsel %vm117_vm2, %v115_v56, %v119_v10  ;;  %v306_v48 = vsel %vm302_vm5, %v300_v13, %v304_v32  ;;  %v281_v57 = vsel %vm277_vm7, %v275_v21, %v279_v42  ;;  %v259_v19 = vmul.f32 %v257_v7, %v255_v2 }
  0xa9   :  { %1169 = vperm.xlu1 %1831, %v2045_v0   ;;  %v125_v43 = vmul.f32 %v124_v9, %v121_v26  ;;  %v310_v4 = vmul.f32 %v309_v12, %v306_v48  ;;  %v1985_v26 = vmov 26  }
  0xab   :  { %v312_v31 = vadd.f32 %v310_v4, %v286_v15  ;;  %v465_v4 = vstv %s2252_s20  ;;  %v491_v15 = vstv %s2260_s22  ;;  %s2514_s22 = sld [smem:[#allocation2 + $0x302]] }
  0xac   :  { %v294_v11 = vpop.permute.xlu1 %293 }
  0xad   :  { %1173 = vperm.xlu1 %1831, %v2052_v3   ;;  %v301_v34 = vadd.f32 %v299_v60, %v294_v11  ;;  %v127_v60 = vadd.f32 %v125_v43, %v101_v51  ;;  %v285_v11 = vmul.f32 %v283_v8, %v281_v57 }
  0xaf   :  { %v305_v50 = vmul.f32 0.2, %v301_v34  ;;  %vm303_vm10 = vcmp.gt.f32.partialorder %v301_v34, 0.0 }
  0xb1   :  { %1833 = vset.pattern.permute.xlu1 %v1976_v24  ;;  %v131_v35 = vpop.permute.xlu1 %130  ;;  %v307_v5 = vsel %vm303_vm10, %v301_v34, %v305_v50  ;;  %v2222_v34 = vpop.permute.xlu0 %134 }
  0xb2   :  { %v141_v36 = vadd.f32 %v2173_v14, %v131_v35  ;;  %1328 = vperm.xlu1 %1833, %v2052_v3   ;;  %v311_v30 = vmul.f32 %v309_v12, %v307_v5  ;;  %v287_v35 = vadd.f32 %v285_v11, %v259_v19 }
  0xb4   :  { %vm143_vm8 = vcmp.gt.f32.partialorder %v141_v36, 0.0  ;;  %v145_v24 = vmul.f32 0.2, %v141_v36  ;;  %v313_v42 = vadd.f32 %v311_v30, %v287_v35 }
  0xb5   :  { %v420_v47 = vpop.permute.xlu0 %419 }
  0xb6   :  { %v147_v55 = vsel %vm143_vm8, %v141_v36, %v145_v24  ;;  %1834 = vset.pattern.permute.xlu1 %v1977_v25  ;;  %v316_v56 = vpop.permute.xlu1 %315  ;;  %v335_v25 = vstv %s2182_s17  ;;  %s2001_s17 = smov 28  }
  0xb7   :  { %v326_v59 = vadd.f32 %v325_v22, %v316_v56  ;;  %1350 = vperm.xlu1 %1834, %v2045_v0   ;;  %v151_v62 = vmul.f32 %v150_v18, %v147_v55  ;;  %v64_v56 = vadd.f32 %v2131_v46, %v2112_v38  ;;  %v116_v46 = vadd.f32 %v2140_v49, %v2155_v54 }
  0xb9   :  { %vm328_vm12 = vcmp.gt.f32.partialorder %v326_v59, 0.0  ;;  %v330_v6 = vmul.f32 0.2, %v326_v59  ;;  %v153_v10 = vadd.f32 %v151_v62, %v127_v60  ;;  %v450_v53 = vpop.permute.xlu0 %449  ;;  %vm66_vm1 = vcmp.gt.f32.partialorder %v64_v56, 0.0 }
  0xba   :  { %v320_v13 = vpop.permute.xlu1 %319  ;;  %v120_v54 = vmul.f32 0.2, %v116_v46  ;;  %vm118_vm2 = vcmp.gt.f32.partialorder %v116_v46, 0.0 }
  0xbb   :  { %v332_v20 = vsel %vm328_vm12, %v326_v59, %v330_v6  ;;  %v327_v21 = vadd.f32 %v325_v22, %v320_v13  ;;  %1836 = vset.pattern.permute.xlu1 %v1985_v26  ;;  %v2215_v23 = vsel %vm44_vm6, -1e+30, %v153_v10  ;;  %v417_v59 = vld [vmem:[%s2793_s3 + $0x8] sm:$0xf]  ;;  %v142_v10 = vadd.f32 %v2173_v14, %v2222_v34 }
  0xbc   :  { %1195 = vperm.xlu1 %1836, %v2045_v0   ;;  %v158_v8 = vsel %vm157_vm11, %v2215_v23, -inf  ;;  %v336_v32 = vmul.f32 %v335_v25, %v332_v20  ;;  %v455_v60 = vrot.slane %v417_v59, %v2115_v39  ;;  %v429_v62 = vrot.slane %v417_v59, %v2117_v40 }
  0xbd   :  { %vm329_vm13 = vcmp.gt.f32.partialorder %v327_v21, 0.0  ;;  %v331_v7 = vmul.f32 0.2, %v327_v21  ;;  %159 = vmax.xlane.f32.xlu0 %v158_v8  ;;  %v2258_v57 = vpop.permute.xlu0 %626  ;;  %v481_v5 = vrot.slane %v417_v59, %v2123_v44  ;;  %v620_v20 = vstv %s2268_s27 }
  0xbe   :  { %v338_v22 = vadd.f32 %v336_v32, %v312_v31  ;;  %v430_v11 = vadd.f32 %v429_v62, %v420_v47  ;;  %v457_v13 = vadd.f32 %v455_v60, %v450_v53  ;;  %v672_v31 = vstv %s2272_s0 }
  0xbf   :  { %v333_v36 = vsel %vm329_vm13, %v327_v21, %v331_v7  ;;  %v424_v37 = vpop.permute.xlu1 %423  ;;  %v517_v32 = vstv %s2274_s28  ;;  %v122_v34 = vsel %vm118_vm2, %v116_v46, %v120_v54  ;;  %v146_v7 = vmul.f32 0.2, %v142_v10 }
  0xc0   :  { %1199 = vperm.xlu1 %1836, %v2052_v3   ;;  %v2229_v12 = vsel %vm44_vm6, -1e+30, %v338_v22  ;;  %v337_v43 = vmul.f32 %v335_v25, %v333_v36  ;;  %v646_v25 = vstv %s2254_s21  ;;  %v431_v19 = vadd.f32 %v429_v62, %v424_v37 }
  0xc1   :  { %v342_v24 = vsel %vm157_vm11, %v2229_v12, -inf  ;;  %v476_v6 = vpop.permute.xlu0 %475  ;;  %v434_v22 = vmul.f32 0.2, %v430_v11  ;;  %vm144_vm3 = vcmp.gt.f32.partialorder %v142_v10, 0.0  ;;  %vm432_vm4 = vcmp.gt.f32.partialorder %v430_v11, 0.0 }
  0xc2   :  { %343 = vmax.xlane.f32.xlu0 %v342_v24  ;;  %v339_v48 = vadd.f32 %v337_v43, %v313_v42  ;;  %v461_v36 = vmul.f32 0.2, %v457_v13  ;;  %v483_v37 = vadd.f32 %v481_v5, %v476_v6  ;;  %vm459_vm5 = vcmp.gt.f32.partialorder %v457_v13, 0.0 }
  0xc3   :  { %v435_v42 = vmul.f32 0.2, %v431_v19  ;;  %v126_v43 = vmul.f32 %v124_v9, %v122_v34  ;;  %vm433_vm7 = vcmp.gt.f32.partialorder %v431_v19, 0.0  ;;  %v698_v24 = vstv %s2286_s1 }
  0xc4   :  { %1838 = vset.pattern.permute.xlu1 %v1979_v27  ;;  %v2235_v50 = vpop.permute.xlu1 %445  ;;  %v2239_v51 = vsel %vm45_vm14, -1e+30, %v339_v48  ;;  %v90_v27 = vadd.f32 %v2128_v45, %v2107_v33  ;;  %v598_v33 = vld [vmem:[%s2793_s3 + $0xc] sm:$0xf]  ;;  %v68_v45 = vmul.f32 0.2, %v64_v56  ;;  %v436_v53 = vsel %vm432_vm4, %v430_v11, %v434_v22 }
  0xc5   :  { %1380 = vperm.xlu1 %1838, %v2052_v3   ;;  %v345_v52 = vsel %vm161_vm15, %v2239_v51, -inf  ;;  %v2292_v16 = vrot.slane %v598_v33, %v2117_v40  ;;  %v2299_v21 = vrot.slane %v598_v33, %v2123_v44  ;;  %v498_v8 = vpop.permute.xlu0 %497  ;;  %v437_v9 = vsel %vm433_vm7, %v431_v19, %v435_v42 }
  0xc6   :  { %346 = vmax.xlane.f32.xlu0 %v345_v52  ;;  %v94_v38 = vmul.f32 0.2, %v90_v27  ;;  %vm92_vm0 = vcmp.gt.f32.partialorder %v90_v27, 0.0  ;;  %v70_v49 = vsel %vm66_vm1, %v64_v56, %v68_v45  ;;  %v148_v52 = vsel %vm144_vm3, %v142_v10, %v146_v7 }
  0xc7   :  { %v74_v30 = vmul.f32 %v72_v63, %v70_v49  ;;  %v2309_v63 = vrot.slane %v598_v33, %v2165_v61  ;;  %vm485_vm9 = vcmp.gt.f32.partialorder %v483_v37, 0.0  ;;  %v440_v62 = vmul.f32 %v439_v1, %v436_v53 }
  0xc8   :  { %v441_v49 = vmul.f32 %v439_v1, %v437_v9 }
  0xc9   :  { %1839 = vset.pattern.permute.xlu1 %v1980_v28  ;;  %v2245_v55 = vpop.permute.xlu1 %600  ;;  %v683_v47 = vpop.permute.xlu0 %682 }
  0xca   :  { %1221 = vperm.xlu1 %1839, %v2045_v0   ;;  %v690_v46 = vadd.f32 %v2309_v63, %v683_v47 }
  0xcd   :  { %v605_v28 = vpop.permute.xlu1 %604 }
  0xce   :  { %1841 = vset.pattern.permute.xlu1 %v1981_v29  ;;  %v636_v29 = vrot.slane %v598_v33, %v2115_v39  ;;  %v487_v33 = vmul.f32 0.2, %v483_v37 }
  0xcf   :  { %1402 = vperm.xlu1 %1841, %v2045_v0   ;;  %v96_v0 = vsel %vm92_vm0, %v90_v27, %v94_v38  ;;  %v456_v27 = vadd.f32 %v455_v60, %v2235_v50  ;;  %v463_v38 = vsel %vm459_vm5, %v457_v13, %v461_v36  ;;  %v152_v50 = vmul.f32 %v150_v18, %v148_v52 }
  0xd0   :  { %v100_v26 = vmul.f32 %v98_v58, %v96_v0  ;;  %v612_v58 = vadd.f32 %v2292_v16, %v605_v28  ;;  %v637_v28 = vadd.f32 %v636_v29, %v2258_v57  ;;  %v467_v60 = vmul.f32 %v465_v4, %v463_v38 }
  0xd1   :  { %v460_v0 = vmul.f32 0.2, %v456_v27  ;;  %v489_v54 = vsel %vm485_vm9, %v483_v37, %v487_v33  ;;  %vm458_vm12 = vcmp.gt.f32.partialorder %v456_v27, 0.0  ;;  %v694_v18 = vmul.f32 0.2, %v690_v46 }
  0xd2   :  { %v631_v2 = vpop.permute.xlu1 %630  ;;  %v102_v48 = vadd.f32 %v100_v26, %v74_v30  ;;  %v616_v45 = vmul.f32 0.2, %v612_v58  ;;  %vm614_vm10 = vcmp.gt.f32.partialorder %v612_v58, 0.0  ;;  %v641_v11 = vmul.f32 0.2, %v637_v28 }
  0xd3   :  { %1406 = vperm.xlu1 %1841, %v2052_v3   ;;  %v2296_v3 = vrot.slane %v417_v59, %v2165_v61  ;;  %v638_v35 = vadd.f32 %v636_v29, %v631_v2  ;;  %vm692_vm0 = vcmp.gt.f32.partialorder %v690_v46, 0.0  ;;  %v462_v1 = vsel %vm458_vm12, %v456_v27, %v460_v0 }
  0xd4   :  { %v2319_v2 = vadd.f32 %v126_v43, %v102_v48  ;;  %v618_v13 = vsel %vm614_vm10, %v612_v58, %v616_v45  ;;  %v696_v42 = vsel %vm692_vm0, %v690_v46, %v694_v18  ;;  %vm639_vm2 = vcmp.gt.f32.partialorder %v637_v28, 0.0 }
  0xd5   :  { %v642_v56 = vmul.f32 0.2, %v638_v35  ;;  %vm640_vm8 = vcmp.gt.f32.partialorder %v638_v35, 0.0  ;;  %v508_v19 = vadd.f32 %v2296_v3, %v498_v8  ;;  %v622_v7 = vmul.f32 %v620_v20, %v618_v13 }
  0xd6   :  { %v466_v43 = vmul.f32 %v465_v4, %v462_v1  ;;  %v643_v27 = vsel %vm639_vm2, %v637_v28, %v641_v11 }
  0xd7   :  { %v472_v14 = vpop.permute.xlu1 %471  ;;  %v644_v57 = vsel %vm640_vm8, %v638_v35, %v642_v56  ;;  %v469_v35 = vadd.f32 %v467_v60, %v441_v49  ;;  %vm510_vm5 = vcmp.gt.f32.partialorder %v508_v19, 0.0 }
  0xd8   :  { %v482_v29 = vadd.f32 %v481_v5, %v472_v14  ;;  %v648_v26 = vmul.f32 %v646_v25, %v644_v57  ;;  %v493_v5 = vmul.f32 %v491_v15, %v489_v54  ;;  %v611_v14 = vadd.f32 %v2292_v16, %v2245_v55 }
  0xd9   :  { %v512_v55 = vmul.f32 0.2, %v508_v19  ;;  %v468_v60 = vadd.f32 %v466_v43, %v440_v62 }
  0xda   :  { %v486_v34 = vmul.f32 0.2, %v482_v29  ;;  %vm484_vm1 = vcmp.gt.f32.partialorder %v482_v29, 0.0  ;;  %v650_v16 = vadd.f32 %v648_v26, %v622_v7  ;;  %v615_v47 = vmul.f32 0.2, %v611_v14 }
  0xdb   :  { %vm613_vm4 = vcmp.gt.f32.partialorder %v611_v14, 0.0  ;;  %v495_v4 = vadd.f32 %v493_v5, %v469_v35  ;;  %v514_v46 = vsel %vm510_vm5, %v508_v19, %v512_v55 }
  0xdc   :  { %v653_v59 = vpop.permute.xlu1 %652  ;;  %v488_v48 = vsel %vm484_vm1, %v482_v29, %v486_v34  ;;  %v617_v45 = vsel %vm613_vm4, %v611_v14, %v615_v47  ;;  %v647_v29 = vmul.f32 %v646_v25, %v643_v27  ;;  %v518_v62 = vmul.f32 %v517_v32, %v514_v46 }
  0xdd   :  { %v663_v36 = vadd.f32 %v2299_v21, %v653_v59  ;;  %v492_v38 = vmul.f32 %v491_v15, %v488_v48  ;;  %v154_v15 = vadd.f32 %v152_v50, %v2319_v2  ;;  %v621_v49 = vmul.f32 %v620_v20, %v617_v45 }
  0xde   :  { %v801_v45 = vstv %s2401_s9  ;;  %s1990_s9 = smov 108  }
  0xdf   :  { %v667_v56 = vmul.f32 0.2, %v663_v36  ;;  %vm665_vm7 = vcmp.gt.f32.partialorder %v663_v36, 0.0  ;;  %v2373_v50 = vsel %vm45_vm14, -1e+30, %v154_v15  ;;  %v649_v18 = vadd.f32 %v647_v29, %v621_v49 }
  0xe0   :  { %v657_v6 = vpop.permute.xlu1 %656  ;;  %v162_v5 = vsel %vm161_vm15, %v2373_v50, -inf  ;;  %v1034_v49 = vstv %s2411_s14  ;;  %s1998_s14 = smov 16  }
  0xe1   :  { %v664_v10 = vadd.f32 %v2299_v21, %v657_v6  ;;  %v700_v21 = vmul.f32 %v698_v24, %v696_v42  ;;  %v669_v6 = vsel %vm665_vm7, %v663_v36, %v667_v56 }
  0xe2   :  { %v673_v25 = vmul.f32 %v672_v31, %v669_v6 }
  0xe3   :  { %vm666_vm13 = vcmp.gt.f32.partialorder %v664_v10, 0.0  ;;  %v668_v30 = vmul.f32 0.2, %v664_v10 }
  0xe5   :  { %v670_v22 = vsel %vm666_vm13, %v664_v10, %v668_v30  ;;  %v502_v8 = vpop.permute.xlu1 %501  ;;  %v494_v10 = vadd.f32 %v492_v38, %v468_v60  ;;  %v808_v30 = vpop.permute.xlu0 %807  ;;  %v827_v38 = vstv %s2397_s7  ;;  %v853_v60 = vstv %s2406_s12  ;;  %s1988_s7 = smov 112   ;;  %s1996_s12 = smov 8  }
  0xe6   :  { %v674_v37 = vmul.f32 %v672_v31, %v670_v22  ;;  %v509_v58 = vadd.f32 %v2296_v3, %v502_v8  ;;  %v675_v31 = vadd.f32 %v673_v25, %v649_v18  ;;  %v779_v8 = vld [vmem:[%s2793_s3 + $0x10] sm:$0xf]  ;;  %v1060_v25 = vstv %s2416_s15  ;;  %s1999_s15 = smov 20  }
  0xe7   :  { %v520_v19 = vadd.f32 %v518_v62, %v494_v10 }
  0xe8   :  { %vm511_vm3 = vcmp.gt.f32.partialorder %v509_v58, 0.0  ;;  %v513_v52 = vmul.f32 0.2, %v509_v58  ;;  %v676_v53 = vadd.f32 %v674_v37, %v650_v16  ;;  %v817_v37 = vrot.slane %v779_v8, %v2115_v39 }
  0xe9   :  { %v2383_v1 = vsel %vm44_vm6, -1e+30, %v520_v19  ;;  %v791_v16 = vrot.slane %v779_v8, %v2117_v40 }
  0xea   :  { %v515_v3 = vsel %vm511_vm3, %v509_v58, %v513_v52  ;;  %v679_v59 = vpop.permute.xlu1 %678  ;;  %v702_v57 = vadd.f32 %v700_v21, %v676_v53  ;;  %v524_v7 = vsel %vm157_vm11, %v2383_v1, -inf  ;;  %v960_v58 = vld [vmem:[%s2793_s3 + $0x14] sm:$0xf]  ;;  %v818_v55 = vadd.f32 %v817_v37, %v808_v30 }
  0xeb   :  { %v689_v33 = vadd.f32 %v2309_v63, %v679_v59  ;;  %v519_v9 = vmul.f32 %v517_v32, %v515_v3  ;;  %v998_v47 = vrot.slane %v960_v58, %v2115_v39  ;;  %v972_v48 = vrot.slane %v960_v58, %v2117_v40 }
  0xec   :  { %v2367_v2 = vsel %vm45_vm14, -1e+30, %v702_v57  ;;  %v843_v52 = vrot.slane %v779_v8, %v2123_v44  ;;  %v822_v27 = vmul.f32 0.2, %v818_v55  ;;  %vm820_vm9 = vcmp.gt.f32.partialorder %v818_v55, 0.0 }
  0xed   :  { %vm691_vm8 = vcmp.gt.f32.partialorder %v689_v33, 0.0  ;;  %v693_v28 = vmul.f32 0.2, %v689_v33  ;;  %v521_v0 = vadd.f32 %v519_v9, %v495_v4  ;;  %v708_v26 = vsel %vm161_vm15, %v2367_v2, -inf }
  0xee   :  { %v2421_v4 = vrot.slane %v960_v58, %v2165_v61  ;;  %v1024_v57 = vrot.slane %v960_v58, %v2123_v44  ;;  %v824_v29 = vsel %vm820_vm9, %v818_v55, %v822_v27 }
  0xef   :  { %v782_v63 = vpop.permute.xlu1 %781  ;;  %v2357_v54 = vsel %vm45_vm14, -1e+30, %v521_v0  ;;  %v695_v11 = vsel %vm691_vm8, %v689_v33, %v693_v28  ;;  %v982_v33 = vstv %s2399_s8  ;;  %v1008_v0 = vstv %s2408_s13  ;;  %s1989_s8 = smov 120   ;;  %s1997_s13 = smov 12  }
  0xf0   :  { %v527_v13 = vsel %vm161_vm15, %v2357_v54, -inf  ;;  %v699_v32 = vmul.f32 %v698_v24, %v695_v11  ;;  %v967_v24 = vpop.permute.xlu0 %966  ;;  %v792_v3 = vadd.f32 %v791_v16, %v782_v63 }
  0xf1   :  { %528 = vmax.xlane.f32.xlu0 %v527_v13  ;;  %v974_v56 = vadd.f32 %v972_v48, %v967_v24  ;;  %v869_v13 = vrot.slane %v779_v8, %v2165_v61 }
  0xf2   :  { %v701_v14 = vadd.f32 %v699_v32, %v675_v31  ;;  %v796_v15 = vmul.f32 0.2, %v792_v3  ;;  %vm794_vm12 = vcmp.gt.f32.partialorder %v792_v3, 0.0  ;;  %v879_v32 = vstv %s2418_s16  ;;  %s2000_s16 = smov 24  }
  0xf3   :  { %v2369_v20 = vpop.permute.xlu1 %785  ;;  %v978_v6 = vmul.f32 0.2, %v974_v56  ;;  %vm976_vm10 = vcmp.gt.f32.partialorder %v974_v56, 0.0 }
  0xf4   :  { %v2389_v22 = vsel %vm44_vm6, -1e+30, %v701_v14  ;;  %v834_v42 = vpop.permute.xlu0 %833  ;;  %v798_v31 = vsel %vm794_vm12, %v792_v3, %v796_v15 }
  0xf5   :  { %709 = vmax.xlane.f32.xlu0 %v708_v26  ;;  %v705_v36 = vsel %vm157_vm11, %v2389_v22, -inf  ;;  %v844_v9 = vadd.f32 %v843_v52, %v834_v42  ;;  %v828_v26 = vmul.f32 %v827_v38, %v824_v29  ;;  %v980_v30 = vsel %vm976_vm10, %v974_v56, %v978_v6 }
  0xf7   :  { %163 = vmax.xlane.f32.xlu1 %v162_v5  ;;  %v848_v11 = vmul.f32 0.2, %v844_v9  ;;  %vm846_vm0 = vcmp.gt.f32.partialorder %v844_v9, 0.0  ;;  %v793_v5 = vadd.f32 %v791_v16, %v2369_v20 }
  0xf8   :  { %v812_v34 = vpop.permute.xlu1 %811  ;;  %v1019_v53 = vpop.permute.xlu0 %1018 }
  0xf9   :  { %v819_v19 = vadd.f32 %v817_v37, %v812_v34  ;;  %v802_v34 = vmul.f32 %v801_v45, %v798_v31  ;;  %vm795_vm5 = vcmp.gt.f32.partialorder %v793_v5, 0.0  ;;  %v797_v16 = vmul.f32 0.2, %v793_v5 }
  0xfb   :  { %525 = vmax.xlane.f32.xlu1 %v524_v7  ;;  %v823_v37 = vmul.f32 0.2, %v819_v19  ;;  %vm821_vm3 = vcmp.gt.f32.partialorder %v819_v19, 0.0  ;;  %v799_v29 = vsel %vm795_vm5, %v793_v5, %v797_v16 }
  0xfc   :  { %v1041_v46 = vpop.permute.xlu0 %1040 }
  0xfd   :  { %v963_v35 = vpop.permute.xlu1 %962  ;;  %v1051_v62 = vadd.f32 %v2421_v4, %v1041_v46  ;;  %v825_v3 = vsel %vm821_vm3, %v819_v19, %v823_v37 }
  0xfe   :  { %v973_v28 = vadd.f32 %v972_v48, %v963_v35 }
  0xff   :  { %706 = vmax.xlane.f32.xlu1 %v705_v36  ;;  %v1055_v35 = vmul.f32 0.2, %v1051_v62  ;;  %v850_v36 = vsel %vm846_vm0, %v844_v9, %v848_v11  ;;  %vm1053_vm2 = vcmp.gt.f32.partialorder %v1051_v62, 0.0 }
 0x100   :  { %v977_v18 = vmul.f32 0.2, %v973_v28  ;;  %vm975_vm1 = vcmp.gt.f32.partialorder %v973_v28, 0.0  ;;  %v854_v9 = vmul.f32 %v853_v60, %v850_v36  ;;  %v1148_v16 = vpop.permute.xlu0 %1147 }
 0x102   :  { %v989_v43 = vpop.permute.xlu1 %988  ;;  %v979_v58 = vsel %vm975_vm1, %v973_v28, %v977_v18  ;;  %v830_v28 = vadd.f32 %v828_v26, %v802_v34  ;;  %v803_v26 = vmul.f32 %v801_v45, %v799_v29 }
 0x103   :  { %v999_v59 = vadd.f32 %v998_v47, %v989_v43  ;;  %v1026_v43 = vadd.f32 %v1024_v57, %v1019_v53 }
 0x104   :  { %v856_v5 = vadd.f32 %v854_v9, %v830_v28 }
 0x105   :  { %v1003_v10 = vmul.f32 0.2, %v999_v59  ;;  %vm1001_vm13 = vcmp.gt.f32.partialorder %v999_v59, 0.0  ;;  %v1030_v46 = vmul.f32 0.2, %v1026_v43  ;;  %vm1028_vm10 = vcmp.gt.f32.partialorder %v1026_v43, 0.0 }
 0x106   :  { %v993_v21 = vpop.permute.xlu1 %992 }
 0x107   :  { %v1005_v14 = vsel %vm1001_vm13, %v999_v59, %v1003_v10  ;;  %v1000_v8 = vadd.f32 %v998_v47, %v993_v21  ;;  %v983_v47 = vmul.f32 %v982_v33, %v979_v58  ;;  %v1032_v36 = vsel %vm1028_vm10, %v1026_v43, %v1030_v46 }
 0x108   :  { %v1009_v55 = vmul.f32 %v1008_v0, %v1005_v14 }
 0x109   :  { %v1004_v21 = vmul.f32 0.2, %v1000_v8  ;;  %vm1002_vm8 = vcmp.gt.f32.partialorder %v1000_v8, 0.0 }
 0x10b   :  { %v838_v63 = vpop.permute.xlu1 %837  ;;  %v1006_v10 = vsel %vm1002_vm8, %v1000_v8, %v1004_v21 }
 0x10c   :  { %v845_v7 = vadd.f32 %v843_v52, %v838_v63  ;;  %v1057_v52 = vsel %vm1053_vm2, %v1051_v62, %v1055_v35  ;;  %v829_v63 = vmul.f32 %v827_v38, %v825_v3  ;;  %v1010_v38 = vmul.f32 %v1008_v0, %v1006_v10  ;;  %v2507_v10 = vld [vmem:[%s2793_s3 + $0x1c] sm:$0xf] }
 0x10d   :  { %v1061_v19 = vmul.f32 %v1060_v25, %v1057_v52 }
 0x10e   :  { %v849_v48 = vmul.f32 0.2, %v845_v7  ;;  %vm847_vm7 = vcmp.gt.f32.partialorder %v845_v7, 0.0  ;;  %v831_v34 = vadd.f32 %v829_v63, %v803_v26 }
 0x110   :  { %v1015_v24 = vpop.permute.xlu1 %1014  ;;  %v851_v6 = vsel %vm847_vm7, %v845_v7, %v849_v48 }
 0x111   :  { %v1025_v42 = vadd.f32 %v1024_v57, %v1015_v24  ;;  %v1011_v57 = vadd.f32 %v1009_v55, %v983_v47  ;;  %v855_v14 = vmul.f32 %v853_v60, %v851_v6  ;;  %v984_v24 = vmul.f32 %v982_v33, %v980_v30 }
 0x112   :  { %v1036_v33 = vmul.f32 %v1034_v49, %v1032_v36  ;;  %v1189_v36 = vstv %s2502_s4 }
 0x113   :  { %vm1027_vm4 = vcmp.gt.f32.partialorder %v1025_v42, 0.0  ;;  %v1029_v20 = vmul.f32 0.2, %v1025_v42  ;;  %v857_v58 = vadd.f32 %v855_v14, %v831_v34  ;;  %v1012_v30 = vadd.f32 %v1010_v38, %v984_v24 }
 0x115   :  { %v1031_v27 = vsel %vm1027_vm4, %v1025_v42, %v1029_v20  ;;  %v860_v56 = vpop.permute.xlu1 %859  ;;  %v1038_v21 = vadd.f32 %v1036_v33, %v1012_v30  ;;  %v1215_v33 = vstv %s2514_s22 }
 0x116   :  { %v1035_v53 = vmul.f32 %v1034_v49, %v1031_v27  ;;  %v870_v59 = vadd.f32 %v869_v13, %v860_v56 }
 0x118   :  { %vm872_vm9 = vcmp.gt.f32.partialorder %v870_v59, 0.0  ;;  %v874_v15 = vmul.f32 0.2, %v870_v59  ;;  %v1037_v11 = vadd.f32 %v1035_v53, %v1011_v57  ;;  %v1141_v57 = vld [vmem:[%s2793_s3 + $0x18] sm:$0xf]  ;;  %s2522_s3 = sld [smem:[#allocation2 + $0x380]] }
 0x119   :  { %v864_v62 = vpop.permute.xlu1 %863  ;;  %v1153_v6 = vrot.slane %v1141_v57, %v2117_v40  ;;  %v1205_v38 = vrot.slane %v1141_v57, %v2123_v44 }
 0x11a   :  { %v876_v18 = vsel %vm872_vm9, %v870_v59, %v874_v15  ;;  %v871_v31 = vadd.f32 %v869_v13, %v864_v62  ;;  %v1063_v42 = vadd.f32 %v1061_v19, %v1037_v11  ;;  %v1325_v59 = vpop.permute.xlu0 %1324  ;;  %v1179_v15 = vrot.slane %v1141_v57, %v2115_v39 }
 0x11b   :  { %v880_v7 = vmul.f32 %v879_v32, %v876_v18  ;;  %v1155_v63 = vadd.f32 %v1153_v6, %v1148_v16  ;;  %v2510_v62 = vrot.slane %v1141_v57, %v2165_v61 }
 0x11c   :  { %vm873_vm12 = vcmp.gt.f32.partialorder %v871_v31, 0.0  ;;  %v875_v35 = vmul.f32 0.2, %v871_v31 }
 0x11d   :  { %v882_v8 = vadd.f32 %v880_v7, %v856_v5  ;;  %v1159_v26 = vmul.f32 0.2, %v1155_v63  ;;  %vm1157_vm0 = vcmp.gt.f32.partialorder %v1155_v63, 0.0 }
 0x11e   :  { %v877_v13 = vsel %vm873_vm12, %v871_v31, %v875_v35  ;;  %v1045_v37 = vpop.permute.xlu1 %1044  ;;  %v1355_v28 = vpop.permute.xlu0 %1354  ;;  %v1334_v31 = vrot.slane %v2507_v10, %v2117_v40  ;;  %v1163_v35 = vstv %s2500_s19 }
 0x11f   :  { %v1052_v45 = vadd.f32 %v2421_v4, %v1045_v37  ;;  %v2465_v60 = vsel %vm44_vm6, -1e+30, %v882_v8  ;;  %v881_v55 = vmul.f32 %v879_v32, %v877_v13  ;;  %v2475_v4 = vsel %vm44_vm6, -1e+30, %v1063_v42 }
 0x120   :  { %v886_v0 = vsel %vm157_vm11, %v2465_v60, -inf  ;;  %v1067_v49 = vsel %vm157_vm11, %v2475_v4, -inf  ;;  %v1335_v7 = vadd.f32 %v1334_v31, %v1325_v59  ;;  %v1161_v8 = vsel %vm1157_vm0, %v1155_v63, %v1159_v26 }
 0x121   :  { %vm1054_vm13 = vcmp.gt.f32.partialorder %v1052_v45, 0.0  ;;  %v1056_v43 = vmul.f32 0.2, %v1052_v45  ;;  %887 = vmax.xlane.f32.xlu1 %v886_v0  ;;  %v883_v20 = vadd.f32 %v881_v55, %v857_v58  ;;  %v1386_v58 = vrot.slane %v2507_v10, %v2123_v44 }
 0x122   :  { %v1377_v29 = vpop.permute.xlu0 %1376  ;;  %v1339_v13 = vmul.f32 0.2, %v1335_v7  ;;  %vm1337_vm3 = vcmp.gt.f32.partialorder %v1335_v7, 0.0  ;;  %v1344_v63 = vstv %s2522_s3 }
 0x123   :  { %v1058_v48 = vsel %vm1054_vm13, %v1052_v45, %v1056_v43  ;;  %v1144_v52 = vpop.permute.xlu1 %1143  ;;  %v2479_v32 = vsel %vm45_vm14, -1e+30, %v883_v20  ;;  %v1360_v45 = vrot.slane %v2507_v10, %v2115_v39  ;;  %v1241_v43 = vstv %s2516_s23 }
 0x124   :  { %v889_v47 = vsel %vm161_vm15, %v2479_v32, -inf  ;;  %v1062_v27 = vmul.f32 %v1060_v25, %v1058_v48  ;;  %v1154_v37 = vadd.f32 %v1153_v6, %v1144_v52  ;;  %v1165_v20 = vmul.f32 %v1163_v35, %v1161_v8 }
 0x125   :  { %1068 = vmax.xlane.f32.xlu1 %v1067_v49  ;;  %890 = vmax.xlane.f32.xlu0 %v889_v47  ;;  %v1362_v39 = vadd.f32 %v1360_v45, %v1355_v28  ;;  %v1387_v44 = vadd.f32 %v1386_v58, %v1377_v29 }
 0x126   :  { %v1064_v56 = vadd.f32 %v1062_v27, %v1038_v21  ;;  %v1226_v18 = vpop.permute.xlu0 %1225  ;;  %v1341_v21 = vsel %vm1337_vm3, %v1335_v7, %v1339_v13  ;;  %v1158_v27 = vmul.f32 0.2, %v1154_v37  ;;  %vm1156_vm7 = vcmp.gt.f32.partialorder %v1154_v37, 0.0 }
 0x127   :  { %v1233_v14 = vadd.f32 %v2510_v62, %v1226_v18  ;;  %v1412_v18 = vrot.slane %v2507_v10, %v2165_v61  ;;  %v1345_v26 = vmul.f32 %v1344_v63, %v1341_v21  ;;  %vm1364_vm10 = vcmp.gt.f32.partialorder %v1362_v39, 0.0 }
 0x128   :  { %v1170_v3 = vpop.permute.xlu1 %1169  ;;  %v2489_v53 = vsel %vm45_vm14, -1e+30, %v1064_v56  ;;  %vm1389_vm12 = vcmp.gt.f32.partialorder %v1387_v44, 0.0  ;;  %v1422_v21 = vstv %s2541_s26 }
 0x129   :  { %v1070_v9 = vsel %vm161_vm15, %v2489_v53, -inf  ;;  %v1237_v40 = vmul.f32 0.2, %v1233_v14  ;;  %v1180_v42 = vadd.f32 %v1179_v15, %v1170_v3  ;;  %vm1235_vm2 = vcmp.gt.f32.partialorder %v1233_v14, 0.0 }
 0x12a   :  { %1071 = vmax.xlane.f32.xlu0 %v1070_v9 }
 0x12b   :  { %v1239_v49 = vsel %vm1235_vm2, %v1233_v14, %v1237_v40  ;;  %v1184_v47 = vmul.f32 0.2, %v1180_v42  ;;  %vm1182_vm5 = vcmp.gt.f32.partialorder %v1180_v42, 0.0  ;;  %v1391_v14 = vmul.f32 0.2, %v1387_v44 }
 0x12c   :  { %v1174_v46 = vpop.permute.xlu1 %1173  ;;  %v1243_v9 = vmul.f32 %v1241_v43, %v1239_v49 }
 0x12d   :  { %v1181_v11 = vadd.f32 %v1179_v15, %v1174_v46  ;;  %v1186_v15 = vsel %vm1182_vm5, %v1180_v42, %v1184_v47  ;;  %vm1992_vm5 = vmmov 0  }
 0x12e   :  { %v1190_v7 = vmul.f32 %v1189_v36, %v1186_v15 }
 0x12f   :  { %v1185_v5 = vmul.f32 0.2, %v1181_v11  ;;  %vm1183_vm1 = vcmp.gt.f32.partialorder %v1181_v11, 0.0 }
 0x131   :  { %v2496_v25 = vpop.permute.xlu1 %1328  ;;  %v1187_v34 = vsel %vm1183_vm1, %v1181_v11, %v1185_v5  ;;  %v1370_v11 = vstv %s2524_s24 }
 0x132   :  { %v1191_v16 = vmul.f32 %v1189_v36, %v1187_v34  ;;  %v1336_v28 = vadd.f32 %v1334_v31, %v2496_v25  ;;  %v1366_v34 = vmul.f32 0.2, %v1362_v39 }
 0x134   :  { %v1193_v6 = vadd.f32 %v1191_v16, %v1165_v20  ;;  %vm1338_vm13 = vcmp.gt.f32.partialorder %v1336_v28, 0.0  ;;  %v1340_v31 = vmul.f32 0.2, %v1336_v28 }
 0x136   :  { %v1351_v19 = vpop.permute.xlu1 %1350 }
 0x137   :  { %v1361_v48 = vadd.f32 %v1360_v45, %v1351_v19  ;;  %v1160_v19 = vsel %vm1156_vm7, %v1154_v37, %v1158_v27  ;;  %v1393_v45 = vsel %vm1389_vm12, %v1387_v44, %v1391_v14  ;;  %vm1570_vm7 = vcmask 162816  }
 0x138   :  { %v1164_v42 = vmul.f32 %v1163_v35, %v1160_v19  ;;  %v1396_v35 = vstv %s2534_s25  ;;  %vm1592_vm12 = vcmask 257024  }
 0x139   :  { %v1365_v46 = vmul.f32 0.2, %v1361_v48  ;;  %vm1363_vm9 = vcmp.gt.f32.partialorder %v1361_v48, 0.0  ;;  %v1397_v49 = vmul.f32 %v1396_v35, %v1393_v45 }
 0x13b   :  { %v1196_v24 = vpop.permute.xlu1 %1195 }
 0x13c   :  { %v1206_v0 = vadd.f32 %v1205_v38, %v1196_v24  ;;  %v1367_v24 = vsel %vm1363_vm9, %v1361_v48, %v1365_v46  ;;  %vm1576_vm9 = vcmask 228352  }
 0x13d   :  { %v1371_v13 = vmul.f32 %v1370_v11, %v1367_v24 }
 0x13e   :  { %v1210_v56 = vmul.f32 0.2, %v1206_v0  ;;  %vm1208_vm8 = vcmp.gt.f32.partialorder %v1206_v0, 0.0 }
 0x13f   :  { %v1200_v55 = vpop.permute.xlu1 %1199  ;;  %v1373_v47 = vadd.f32 %v1371_v13, %v1345_v26 }
 0x140   :  { %v1207_v30 = vadd.f32 %v1205_v38, %v1200_v55  ;;  %v1212_v5 = vsel %vm1208_vm8, %v1206_v0, %v1210_v56  ;;  %v1368_v55 = vsel %vm1364_vm10, %v1362_v39, %v1366_v34  ;;  %vm1573_vm8 = vcmask 195584  }
 0x141   :  { %v1216_v61 = vmul.f32 %v1215_v33, %v1212_v5  ;;  %vm1588_vm10 = vcmask 261120  }
 0x142   :  { %vm1209_vm4 = vcmp.gt.f32.partialorder %v1207_v30, 0.0  ;;  %v1211_v52 = vmul.f32 0.2, %v1207_v30 }
 0x144   :  { %v1213_v3 = vsel %vm1209_vm4, %v1207_v30, %v1211_v52  ;;  %v1381_v59 = vpop.permute.xlu1 %1380  ;;  %v1342_v30 = vsel %vm1338_vm13, %v1336_v28, %v1340_v31  ;;  %vm190_vm4 = vcmask 1045504  }
 0x145   :  { %v1217_v57 = vmul.f32 %v1215_v33, %v1213_v3  ;;  %v1388_v38 = vadd.f32 %v1386_v58, %v1381_v59  ;;  %v1346_v56 = vmul.f32 %v1344_v63, %v1342_v30  ;;  %v1372_v3 = vmul.f32 %v1370_v11, %v1368_v55 }
 0x147   :  { %v1219_v29 = vadd.f32 %v1217_v57, %v1193_v6  ;;  %v1392_v58 = vmul.f32 0.2, %v1388_v38  ;;  %vm1390_vm1 = vcmp.gt.f32.partialorder %v1388_v38, 0.0  ;;  %v1399_v6 = vadd.f32 %v1397_v49, %v1373_v47 }
 0x149   :  { %v1222_v8 = vpop.permute.xlu1 %1221  ;;  %v1245_v40 = vadd.f32 %v1243_v9, %v1219_v29  ;;  %v1394_v52 = vsel %vm1390_vm1, %v1388_v38, %v1392_v58  ;;  %v1374_v29 = vadd.f32 %v1372_v3, %v1346_v56  ;;  %v183_v38 = vld [vmem:[%s2792_s2] sm:$0xff] }
 0x14a   :  { %v1232_v25 = vadd.f32 %v2510_v62, %v1222_v8  ;;  %v1192_v62 = vadd.f32 %v1190_v7, %v1164_v42  ;;  %v1398_v57 = vmul.f32 %v1396_v35, %v1394_v52  ;;  %v184_v8 = vld [vmem:[%s2792_s2 + $0x8] sm:$0xf]  ;;  %v160_v42 = vpop.xlane.xlu0 %159  ;;  %s1993_s2 = smov 104  }
 0x14b   :  { %v2546_v10 = vsel %vm45_vm14, -1e+30, %v1245_v40  ;;  %v2580_v40 = vpack.c.bf16 %v184_v8, %v183_v38  ;;  %v165_v31 = vsub.f32 %v2215_v23, %v160_v42 }
 0x14c   :  { %vm1234_vm0 = vcmp.gt.f32.partialorder %v1232_v25, 0.0  ;;  %v1236_v36 = vmul.f32 0.2, %v1232_v25  ;;  %v1251_v37 = vsel %vm161_vm15, %v2546_v10, -inf  ;;  %v1218_v16 = vadd.f32 %v1216_v61, %v1192_v62 }
 0x14d   :  { %1252 = vmax.xlane.f32.xlu0 %v1251_v37  ;;  %v192_v38 = vsel %vm190_vm4, %v2580_v40, 0 }
 0x14e   :  { %v1238_v33 = vsel %vm1234_vm0, %v1232_v25, %v1236_v36  ;;  %v1403_v0 = vpop.permute.xlu1 %1402  ;;  %v167_v36 = vmul.f32 1.442695, %v165_v31 }
 0x14f   :  { %v1413_v20 = vadd.f32 %v1412_v18, %v1403_v0  ;;  %v1242_v48 = vmul.f32 %v1241_v43, %v1238_v33  ;;  %v344_v34 = vpop.xlane.xlu0 %343 }
 0x150   :  { %v348_v61 = vsub.f32 %v2229_v12, %v344_v34  ;;  %1843 = vpow2.f32 %v167_v36 }
 0x151   :  { %vm1415_vm2 = vcmp.gt.f32.partialorder %v1413_v20, 0.0  ;;  %v1417_v27 = vmul.f32 0.2, %v1413_v20  ;;  %v1244_v44 = vadd.f32 %v1242_v48, %v1218_v16 }
 0x152   :  { %v1407_v59 = vpop.permute.xlu1 %1406  ;;  %v350_v35 = vmul.f32 1.442695, %v348_v61 }
 0x153   :  { %v1419_v39 = vsel %vm1415_vm2, %v1413_v20, %v1417_v27  ;;  %v1414_v9 = vadd.f32 %v1412_v18, %v1407_v59  ;;  %v2558_v46 = vsel %vm44_vm6, -1e+30, %v1244_v44  ;;  %v1400_v18 = vadd.f32 %v1398_v57, %v1374_v29  ;;  %v347_v25 = vpop.xlane.xlu0 %346 }
 0x154   :  { %v1248_v43 = vsel %vm157_vm11, %v2558_v46, -inf  ;;  %v1423_v15 = vmul.f32 %v1422_v21, %v1419_v39  ;;  %v349_v37 = vsub.f32 %v2239_v51, %v347_v25  ;;  %1845 = vpow2.f32 %v350_v35 }
 0x155   :  { %vm1416_vm3 = vcmp.gt.f32.partialorder %v1414_v9, 0.0  ;;  %v1418_v19 = vmul.f32 0.2, %v1414_v9  ;;  %1249 = vmax.xlane.f32.xlu1 %v1248_v43 }
 0x156   :  { %v1425_v28 = vadd.f32 %v1423_v15, %v1399_v6  ;;  %v352_v55 = vmul.f32 1.442695, %v349_v37 }
 0x157   :  { %v1420_v63 = vsel %vm1416_vm3, %v1414_v9, %v1418_v19 }
 0x158   :  { %v2564_v11 = vsel %vm44_vm6, -1e+30, %v1425_v28  ;;  %v1424_v26 = vmul.f32 %v1422_v21, %v1420_v63 }
 0x159   :  { %v1429_v14 = vsel %vm157_vm11, %v2564_v11, -inf }
 0x15a   :  { %1430 = vmax.xlane.f32.xlu1 %v1429_v14  ;;  %v1426_v5 = vadd.f32 %v1424_v26, %v1400_v18  ;;  %v1844_v49 = vpop.eup %1843  ;;  %v1991_v14 = vmov 0.0  }
 0x15b   :  { %1697 = vmatprep.subr.bf16.mxu1 %v1991_v14  ;;  %1691 = vmatprep.subr.bf16.mxu0 %v1991_v14 }
 0x15c   :  { %v2570_v7 = vsel %vm45_vm14, -1e+30, %v1426_v5  ;;  %1692 = vmatpush3.bf16.msra.mxu0 %v192_v38  ;;  %1693 = vmatprep.mubr.msk.bf16.mxu0 %vm1992_vm5, %v1991_v14 }
 0x15d   :  { %v1432_v24 = vsel %vm161_vm15, %v2570_v7, -inf  ;;  %1703 = vmatprep.subr.bf16.mxu0 %v1991_v14  ;;  %1699 = vmatprep.mubr.msk.bf16.mxu1 %vm1992_vm5, %v1991_v14 }
 0x15e   :  { %1433 = vmax.xlane.f32.xlu0 %v1432_v24  ;;  %v1846_v47 = vpop.eup %1845 }
 0x15f   :  { %v2609_v56 = vsel %vm44_vm6, 0.0, %v1846_v47 }
 0x160   :  { %v356_v39 = vsel %vm157_vm11, %v2609_v56, 0.0 }
 0x16b   :  { %368 = vrot.lane.b32.xlu1 %v2580_v40, %s1986_s29 }
 0x16f   :  { %730 = vrot.lane.b32.xlu1 %v2580_v40, %s1987_s30 }
 0x173   :  { %911 = vrot.lane.b32.xlu1 %v2580_v40, %s1988_s7 }
 0x174   :  { %549 = vrot.lane.b32.xlu0 %v2580_v40, %s1989_s8 }
 0x178   :  { %1092 = vrot.lane.b32.xlu0 %v2580_v40, %s1990_s9 }
 0x17e   :  { %v529_v13 = vpop.xlane.xlu0 %528 }
 0x17f   :  { %v531_v58 = vsub.f32 %v2357_v54, %v529_v13 }
 0x181   :  { %v534_v20 = vmul.f32 1.442695, %v531_v58 }
 0x182   :  { %v710_v33 = vpop.xlane.xlu0 %709 }
 0x183   :  { %v712_v23 = vsub.f32 %v2367_v2, %v710_v33  ;;  %v2597_v2 = vsel %vm44_vm6, 0.0, %v1844_v49 }
 0x184   :  { %v164_v45 = vpop.xlane.xlu1 %163 }
 0x185   :  { %v166_v62 = vsub.f32 %v2373_v50, %v164_v45  ;;  %v715_v48 = vmul.f32 1.442695, %v712_v23 }
 0x187   :  { %v169_v0 = vmul.f32 1.442695, %v166_v62 }
 0x188   :  { %v526_v30 = vpop.xlane.xlu1 %525 }
 0x189   :  { %1847 = vpow2.f32 %v169_v0  ;;  %v530_v12 = vsub.f32 %v2383_v1, %v526_v30 }
 0x18a   :  { %1849 = vpow2.f32 %v352_v55 }
 0x18b   :  { %v532_v51 = vmul.f32 1.442695, %v530_v12  ;;  %1851 = vpow2.f32 %v534_v20 }
 0x18c   :  { %v707_v16 = vpop.xlane.xlu1 %706 }
 0x18d   :  { %v711_v54 = vsub.f32 %v2389_v22, %v707_v16  ;;  %1853 = vpow2.f32 %v532_v51  ;;  %v173_v22 = vsel %vm157_vm11, %v2597_v2, 0.0 }
 0x18e   :  { %1855 = vpow2.f32 %v715_v48 }
 0x18f   :  { %v713_v50 = vmul.f32 1.442695, %v711_v54 }
 0x191   :  { %1857 = vpow2.f32 %v713_v50 }
 0x193   :  { %v1848_v21 = vpop.eup %1847 }
 0x194   :  { %v1850_v52 = vpop.eup %1849  ;;  %v2601_v1 = vsel %vm45_vm14, 0.0, %v1848_v21 }
 0x195   :  { %v176_v27 = vsel %vm161_vm15, %v2601_v1, 0.0  ;;  %v1852_v44 = vpop.eup %1851  ;;  %v2613_v3 = vsel %vm45_vm14, 0.0, %v1850_v52 }
 0x196   :  { %v359_v9 = vsel %vm161_vm15, %v2613_v3, 0.0  ;;  %v2625_v6 = vsel %vm45_vm14, 0.0, %v1852_v44 }
 0x197   :  { %177 = vadd.xlane.f32.xlu0 %v176_v27  ;;  %174 = vadd.xlane.f32.xlu1 %v173_v22  ;;  %v1854_v59 = vpop.eup %1853  ;;  %v541_v28 = vsel %vm161_vm15, %v2625_v6, 0.0 }
 0x198   :  { %v1856_v57 = vpop.eup %1855  ;;  %v2621_v43 = vsel %vm44_vm6, 0.0, %v1854_v59 }
 0x199   :  { %v538_v19 = vsel %vm157_vm11, %v2621_v43, 0.0  ;;  %v2637_v63 = vsel %vm45_vm14, 0.0, %v1856_v57 }
 0x19a   :  { %v722_v26 = vsel %vm161_vm15, %v2637_v63, 0.0 }
 0x19b   :  { %357 = vadd.xlane.f32.xlu1 %v356_v39  ;;  %360 = vadd.xlane.f32.xlu0 %v359_v9  ;;  %v1858_v15 = vpop.eup %1857 }
 0x19c   :  { %v2633_v29 = vsel %vm44_vm6, 0.0, %v1858_v15 }
 0x19d   :  { %v719_v18 = vsel %vm157_vm11, %v2633_v29, 0.0 }
 0x19f   :  { %539 = vadd.xlane.f32.xlu1 %v538_v19  ;;  %542 = vadd.xlane.f32.xlu0 %v541_v28 }
 0x1a3   :  { %720 = vadd.xlane.f32.xlu1 %v719_v18  ;;  %723 = vadd.xlane.f32.xlu0 %v722_v26 }
 0x1ae   :  { %v888_v5 = vpop.xlane.xlu1 %887 }
 0x1af   :  { %v892_v24 = vsub.f32 %v2465_v60, %v888_v5 }
 0x1b1   :  { %v894_v8 = vmul.f32 1.442695, %v892_v24 }
 0x1b2   :  { %v1069_v42 = vpop.xlane.xlu1 %1068  ;;  %v891_v34 = vpop.xlane.xlu0 %890 }
 0x1b3   :  { %1859 = vpow2.f32 %v894_v8  ;;  %v1073_v25 = vsub.f32 %v2475_v4, %v1069_v42  ;;  %v893_v31 = vsub.f32 %v2479_v32, %v891_v34 }
 0x1b5   :  { %v1075_v60 = vmul.f32 1.442695, %v1073_v25  ;;  %v896_v61 = vmul.f32 1.442695, %v893_v31 }
 0x1b7   :  { %1861 = vpow2.f32 %v1075_v60  ;;  %v1072_v13 = vpop.xlane.xlu0 %1071 }
 0x1b8   :  { %1863 = vpow2.f32 %v896_v61  ;;  %v1074_v36 = vsub.f32 %v2489_v53, %v1072_v13 }
 0x1ba   :  { %v1077_v37 = vmul.f32 1.442695, %v1074_v36 }
 0x1bc   :  { %1865 = vpow2.f32 %v1077_v37 }
 0x1bd   :  { %v1860_v35 = vpop.eup %1859 }
 0x1be   :  { %v2658_v4 = vsel %vm44_vm6, 0.0, %v1860_v35 }
 0x1bf   :  { %v900_v32 = vsel %vm157_vm11, %v2658_v4, 0.0 }
 0x1c0   :  { %901 = vadd.xlane.f32.xlu1 %v900_v32 }
 0x1c1   :  { %v1862_v45 = vpop.eup %1861 }
 0x1c2   :  { %v1864_v58 = vpop.eup %1863  ;;  %v2664_v62 = vsel %vm44_vm6, 0.0, %v1862_v45 }
 0x1c3   :  { %v1081_v53 = vsel %vm157_vm11, %v2664_v62, 0.0  ;;  %v2670_v55 = vsel %vm45_vm14, 0.0, %v1864_v58 }
 0x1c4   :  { %1082 = vadd.xlane.f32.xlu1 %v1081_v53  ;;  %v903_v33 = vsel %vm161_vm15, %v2670_v55, 0.0 }
 0x1c5   :  { %904 = vadd.xlane.f32.xlu0 %v903_v33 }
 0x1c6   :  { %v1866_v0 = vpop.eup %1865 }
 0x1c7   :  { %v2676_v30 = vsel %vm45_vm14, 0.0, %v1866_v0 }
 0x1c8   :  { %v1084_v20 = vsel %vm161_vm15, %v2676_v30, 0.0 }
 0x1c9   :  { %1085 = vadd.xlane.f32.xlu0 %v1084_v20 }
 0x1da   :  { %v1253_v23 = vpop.xlane.xlu0 %1252 }
 0x1db   :  { %v1255_v12 = vsub.f32 %v2546_v10, %v1253_v23 }
 0x1dd   :  { %v1258_v51 = vmul.f32 1.442695, %v1255_v12 }
 0x1df   :  { %1867 = vpow2.f32 %v1258_v51 }
 0x1e2   :  { %v1250_v16 = vpop.xlane.xlu1 %1249 }
 0x1e3   :  { %v1254_v48 = vsub.f32 %v2558_v46, %v1250_v16 }
 0x1e5   :  { %v1256_v54 = vmul.f32 1.442695, %v1254_v48 }
 0x1e7   :  { %1869 = vpow2.f32 %v1256_v54  ;;  %v1431_v50 = vpop.xlane.xlu1 %1430 }
 0x1e8   :  { %v1435_v49 = vsub.f32 %v2564_v11, %v1431_v50 }
 0x1e9   :  { %v1868_v47 = vpop.eup %1867 }
 0x1ea   :  { %v1437_v21 = vmul.f32 1.442695, %v1435_v49  ;;  %v2685_v52 = vsel %vm45_vm14, 0.0, %v1868_v47 }
 0x1eb   :  { %v1434_v27 = vpop.xlane.xlu0 %1433  ;;  %v1265_v10 = vsel %vm161_vm15, %v2685_v52, 0.0  ;;  %v369_v22 = vpop.permute.xlu1 %368 }
 0x1ec   :  { %1871 = vpow2.f32 %v1437_v21  ;;  %v1436_v44 = vsub.f32 %v2570_v7, %v1434_v27  ;;  %1266 = vadd.xlane.f32.xlu0 %v1265_v10  ;;  %v374_v46 = vsel %vm190_vm4, %v369_v22, 0 }
 0x1ed   :  { %1698 = vmatpush3.bf16.msra.mxu1 %v374_v46 }
 0x1ee   :  { %v1439_v59 = vmul.f32 1.442695, %v1436_v44  ;;  %1709 = vmatprep.subr.bf16.mxu1 %v1991_v14 }
 0x1ef   :  { %v731_v17 = vpop.permute.xlu1 %730  ;;  %v550_v26 = vpop.permute.xlu0 %549 }
 0x1f0   :  { %1873 = vpow2.f32 %v1439_v59  ;;  %v555_v58 = vsel %vm190_vm4, %v550_v26, 0  ;;  %v736_v20 = vsel %vm190_vm4, %v731_v17, 0 }
 0x1f1   :  { %v1870_v11 = vpop.eup %1869 }
 0x1f2   :  { %v2694_v39 = vsel %vm44_vm6, 0.0, %v1870_v11 }
 0x1f3   :  { %v1262_v9 = vsel %vm157_vm11, %v2694_v39, 0.0  ;;  %v912_v5 = vpop.permute.xlu1 %911  ;;  %v1093_v24 = vpop.permute.xlu0 %1092 }
 0x1f4   :  { %1263 = vadd.xlane.f32.xlu1 %v1262_v9  ;;  %v917_v16 = vsel %vm190_vm4, %v912_v5, 0  ;;  %v1098_v48 = vsel %vm190_vm4, %v1093_v24, 0 }
 0x1f6   :  { %v1872_v57 = vpop.eup %1871 }
 0x1f7   :  { %v2700_v7 = vsel %vm44_vm6, 0.0, %v1872_v57  ;;  %vm1559_vm6 = vcmask 31744  }
 0x1f8   :  { %v1443_v15 = vsel %vm157_vm11, %v2700_v7, 0.0 }
 0x1f9   :  { %1444 = vadd.xlane.f32.xlu1 %v1443_v15 }
 0x1fa   :  { %v1874_v19 = vpop.eup %1873 }
 0x1fb   :  { %v2706_v28 = vsel %vm45_vm14, 0.0, %v1874_v19  ;;  %vm1562_vm14 = vcmask 64512  }
 0x1fc   :  { %v1446_v18 = vsel %vm161_vm15, %v2706_v28, 0.0  ;;  %vm1567_vm15 = vcmask 130048  }
 0x1fd   :  { %1447 = vadd.xlane.f32.xlu0 %v1446_v18 }
 0x20a   :  { %1273 = vrot.lane.b32.xlu1 %v2580_v40, %s1993_s2 }
 0x213   :  { %1454 = vrot.lane.b32.xlu0 %v2580_v40, %s1994_s10 }
 0x224   :  { %v175_v38 = vpop.xlane.xlu1 %174  ;;  %v178_v8 = vpop.xlane.xlu0 %177 }
 0x225   :  { %1875 = vrcp.f32 %v175_v38 }
 0x226   :  { %1877 = vrcp.f32 %v178_v8 }
 0x228   :  { %v358_v41 = vpop.xlane.xlu1 %357  ;;  %v361_v42 = vpop.xlane.xlu0 %360 }
 0x229   :  { %1879 = vrcp.f32 %v358_v41 }
 0x22a   :  { %1881 = vrcp.f32 %v361_v42 }
 0x22c   :  { %v540_v34 = vpop.xlane.xlu1 %539  ;;  %v543_v25 = vpop.xlane.xlu0 %542 }
 0x22d   :  { %1883 = vrcp.f32 %v540_v34 }
 0x22e   :  { %1885 = vrcp.f32 %v543_v25 }
 0x22f   :  { %v1876_v31 = vpop.eup %1875 }
 0x230   :  { %v1878_v60 = vpop.eup %1877  ;;  %v721_v61 = vpop.xlane.xlu1 %720  ;;  %v181_v13 = vmul.f32 %v1876_v31, %v2597_v2 }
 0x231   :  { %v724_v40 = vpop.xlane.xlu0 %723  ;;  %1887 = vrcp.f32 %v721_v61  ;;  %v182_v36 = vmul.f32 %v1878_v60, %v2601_v1 }
 0x232   :  { %1889 = vrcp.f32 %v724_v40 }
 0x233   :  { %v1880_v37 = vpop.eup %1879  ;;  %v185_v35 = vpack.c.bf16 %v182_v36, %v181_v13 }
 0x234   :  { %v1882_v32 = vpop.eup %1881  ;;  %v364_v45 = vmul.f32 %v1880_v37, %v2609_v56 }
 0x235   :  { %1694 = vmatmul.mubr.msk.bf16.vlgmr.msra.gmra.mrb[0].mxu0 %vm157_vm11, %v185_v35  ;;  %v365_v53 = vmul.f32 %v1882_v32, %v2613_v3 }
 0x236   :  { %1704 = vmatpush3.bf16.msra.mxu0 %v555_v58  ;;  %1705 = vmatprep.mubr.msk.bf16.mxu0 %vm1992_vm5, %v1991_v14 }
 0x237   :  { %v1884_v2 = vpop.eup %1883  ;;  %v366_v33 = vpack.c.bf16 %v365_v53, %v364_v45  ;;  %1715 = vmatprep.subr.bf16.mxu0 %v1991_v14 }
 0x238   :  { %v1886_v1 = vpop.eup %1885  ;;  %v546_v0 = vmul.f32 %v1884_v2, %v2621_v43 }
 0x239   :  { %v547_v56 = vmul.f32 %v1886_v1, %v2625_v6  ;;  %1700 = vmatmul.mubr.msk.bf16.vlgmr.msra.gmra.mrb[0].mxu1 %vm157_vm11, %v366_v33 }
 0x23a   :  { %1710 = vmatpush3.bf16.msra.mxu1 %v736_v20  ;;  %1711 = vmatprep.mubr.msk.bf16.mxu1 %vm1992_vm5, %v1991_v14 }
 0x23b   :  { %v1888_v3 = vpop.eup %1887  ;;  %v548_v23 = vpack.c.bf16 %v547_v56, %v546_v0  ;;  %1721 = vmatprep.subr.bf16.mxu1 %v1991_v14 }
 0x23c   :  { %v1890_v12 = vpop.eup %1889  ;;  %v727_v51 = vmul.f32 %v1888_v3, %v2633_v29 }
 0x23d   :  { %v728_v43 = vmul.f32 %v1890_v12, %v2637_v63  ;;  %1706 = vmatmul.mubr.msk.bf16.vlgmr.msra.gmra.mrb[4].mxu0 %vm157_vm11, %v548_v23 }
 0x23e   :  { %1716 = vmatpush3.bf16.msra.mxu0 %v917_v16  ;;  %1717 = vmatprep.mubr.msk.bf16.mxu0 %vm1992_vm5, %v1991_v14 }
 0x23f   :  { %v729_v6 = vpack.c.bf16 %v728_v43, %v727_v51  ;;  %1727 = vmatprep.subr.bf16.mxu0 %v1991_v14 }
 0x241   :  { %1712 = vmatmul.mubr.msk.bf16.vlgmr.msra.gmra.mrb[4].mxu1 %vm157_vm11, %v729_v6 }
 0x242   :  { %1722 = vmatpush3.bf16.msra.mxu1 %v1098_v48  ;;  %1723 = vmatprep.mubr.msk.bf16.mxu1 %vm1992_vm5, %v1991_v14 }
 0x243   :  { %1733 = vmatprep.subr.bf16.mxu1 %v1991_v14 }
 0x24d   :  { %v902_v29 = vpop.xlane.xlu1 %901 }
 0x24e   :  { %1891 = vrcp.f32 %v902_v29 }
 0x251   :  { %v1083_v63 = vpop.xlane.xlu1 %1082 }
 0x252   :  { %v905_v54 = vpop.xlane.xlu0 %904 }
 0x253   :  { %1893 = vrcp.f32 %v905_v54 }
 0x254   :  { %1895 = vrcp.f32 %v1083_v63 }
 0x256   :  { %v1086_v50 = vpop.xlane.xlu0 %1085 }
 0x257   :  { %1897 = vrcp.f32 %v1086_v50 }
 0x258   :  { %v1892_v49 = vpop.eup %1891 }
 0x259   :  { %v908_v21 = vmul.f32 %v1892_v49, %v2658_v4 }
 0x25d   :  { %v1894_v47 = vpop.eup %1893 }
 0x25e   :  { %v909_v27 = vmul.f32 %v1894_v47, %v2670_v55  ;;  %v1896_v10 = vpop.eup %1895 }
 0x25f   :  { %v1089_v46 = vmul.f32 %v1896_v10, %v2664_v62 }
 0x260   :  { %v910_v22 = vpack.c.bf16 %v909_v27, %v908_v21 }
 0x261   :  { %v1898_v44 = vpop.eup %1897 }
 0x262   :  { %v1090_v59 = vmul.f32 %v1898_v44, %v2676_v30  ;;  %1718 = vmatmul.mubr.msk.bf16.vlgmr.msra.gmra.mrb[8].mxu0 %vm157_vm11, %v910_v22 }
 0x263   :  { %1729 = vmatprep.mubr.msk.bf16.mxu0 %vm1992_vm5, %v1991_v14 }
 0x264   :  { %v1091_v11 = vpack.c.bf16 %v1090_v59, %v1089_v46 }
 0x266   :  { %1724 = vmatmul.mubr.msk.bf16.vlgmr.msra.gmra.mrb[8].mxu1 %vm157_vm11, %v1091_v11 }
 0x267   :  { %1735 = vmatprep.mubr.msk.bf16.mxu1 %vm1992_vm5, %v1991_v14 }
 0x279   :  { %v1267_v4 = vpop.xlane.xlu0 %1266 }
 0x27a   :  { %1899 = vrcp.f32 %v1267_v4 }
 0x281   :  { %v1264_v55 = vpop.xlane.xlu1 %1263 }
 0x282   :  { %1901 = vrcp.f32 %v1264_v55 }
 0x284   :  { %v1900_v62 = vpop.eup %1899 }
 0x285   :  { %v1271_v18 = vmul.f32 %v1900_v62, %v2685_v52 }
 0x286   :  { %v1445_v9 = vpop.xlane.xlu1 %1444 }
 0x287   :  { %1903 = vrcp.f32 %v1445_v9 }
 0x28a   :  { %v1448_v57 = vpop.xlane.xlu0 %1447  ;;  %v1274_v30 = vpop.permute.xlu1 %1273 }
 0x28b   :  { %1905 = vrcp.f32 %v1448_v57  ;;  %v1279_v15 = vsel %vm190_vm4, %v1274_v30, 0 }
 0x28c   :  { %v1902_v19 = vpop.eup %1901  ;;  %1728 = vmatpush3.bf16.msra.mxu0 %v1279_v15  ;;  %v1674_v15 = vld [vmem:[%s2795_s5] ss:$0 sm:$0xff]  ;;  %s2002_s5 = smov [#allocation5]  }
 0x28d   :  { %v1270_v17 = vmul.f32 %v1902_v19, %v2694_v39  ;;  %s1623_s4 = sshll.u32 %s2002_s5, 4  ;;  %s1624_s4 = int_to_ptr.vmem [resolvable:$true] %s1623_s4 }
 0x28e   :  { %v1455_v26 = vpop.permute.xlu0 %1454  ;;  %s1927_s20 = scalar_lea.vmem %s1624_s4, 256  ;;  %p1932_p6 = scmp.lt.s32.totalorder %s1624_s4, %s1624_s4 }
 0x28f   :  { %v1460_v14 = vsel %vm190_vm4, %v1455_v26, 0  ;;  %v1272_v5 = vpack.c.bf16 %v1271_v18, %v1270_v17  ;;  %p1928_p5 = scmp.ne.s32.totalorder %s1624_s4, %s1927_s20  ;;  %p1933_p7 = scmp.lt.s32.totalorder %s1927_s20, %s1927_s20 }
 0x290   :  { %1734 = vmatpush3.bf16.msra.mxu1 %v1460_v14 }
 0x291   :  { %1730 = vmatmul.mubr.msk.bf16.vlgmr.msra.gmra.mrb[12].mxu0 %vm157_vm11, %v1272_v5  ;;  %v1904_v24 = vpop.eup %1903  ;;  %p1934_p8 = por %p1933_p7, %p1932_p6 }
 0x292   :  { %v1451_v8 = vmul.f32 %v1904_v24, %v2700_v7 }
 0x293   :  { %p1935_p9 = pnand %p1934_p8, %p1928_p5 }
 0x295   :  { %v1906_v38 = vpop.eup %1905 }
 0x296   :  { %v1452_v41 = vmul.f32 %v1906_v38, %v2706_v28 }
 0x298   :  { %v1453_v42 = vpack.c.bf16 %v1452_v41, %v1451_v8 }
 0x29a   :  { %1736 = vmatmul.mubr.msk.bf16.vlgmr.msra.gmra.mrb[12].mxu1 %vm157_vm11, %v1453_v42 }
 0x308   :  { %v2758_v34 = vpop.f32.mrb[0].mxu0 }
 0x309   :  { %v1695_v52 = vpop.f32.mrb[1].mxu0 }
 0x30a   :  { %v2760_v39 = vpop.f32.mrb[2].mxu0 }
 0x30b   :  { %v1696_v25 = vpop.f32.mrb[3].mxu0 }
 0x30c   :  { %v410_v31 = vpop.f32.mrb[0].mxu1 }
 0x30d   :  { %1505 = vrot.lane.b32.xlu1 %v410_v31, %s1995_s11  ;;  %v1701_v60 = vpop.f32.mrb[1].mxu1 }
 0x30e   :  { %v413_v61 = vpop.f32.mrb[2].mxu1 }
 0x30f   :  { %1507 = vrot.lane.b32.xlu0 %v413_v61, %s1995_s11  ;;  %v1702_v40 = vpop.f32.mrb[3].mxu1 }
 0x310   :  { %v591_v13 = vpop.f32.mrb[4].mxu0 }
 0x311   :  { %1513 = vrot.lane.b32.xlu1 %v591_v13, %s1996_s12  ;;  %v1707_v7 = vpop.f32.mrb[5].mxu0 }
 0x312   :  { %v594_v28 = vpop.f32.mrb[6].mxu0 }
 0x313   :  { %1515 = vrot.lane.b32.xlu0 %v594_v28, %s1996_s12  ;;  %v1708_v36 = vpop.f32.mrb[7].mxu0 }
 0x314   :  { %v772_v37 = vpop.f32.mrb[4].mxu1 }
 0x315   :  { %1521 = vrot.lane.b32.xlu1 %v772_v37, %s1997_s13  ;;  %v1713_v35 = vpop.f32.mrb[5].mxu1 }
 0x316   :  { %v775_v32 = vpop.f32.mrb[6].mxu1 }
 0x317   :  { %1523 = vrot.lane.b32.xlu0 %v775_v32, %s1997_s13  ;;  %v1714_v45 = vpop.f32.mrb[7].mxu1 }
 0x335   :  { %v953_v58 = vpop.f32.mrb[8].mxu0 }
 0x336   :  { %1529 = vrot.lane.b32.xlu1 %v953_v58, %s1998_s14  ;;  %v1719_v53 = vpop.f32.mrb[9].mxu0 }
 0x337   :  { %v956_v2 = vpop.f32.mrb[10].mxu0 }
 0x338   :  { %1531 = vrot.lane.b32.xlu0 %v956_v2, %s1998_s14  ;;  %v1720_v33 = vpop.f32.mrb[11].mxu0 }
 0x339   :  { %v1134_v1 = vpop.f32.mrb[8].mxu1 }
 0x33a   :  { %1537 = vrot.lane.b32.xlu1 %v1134_v1, %s1999_s15  ;;  %v1725_v0 = vpop.f32.mrb[9].mxu1 }
 0x33b   :  { %v1137_v20 = vpop.f32.mrb[10].mxu1 }
 0x33c   :  { %1539 = vrot.lane.b32.xlu0 %v1137_v20, %s1999_s15  ;;  %v1726_v56 = vpop.f32.mrb[11].mxu1 }
 0x364   :  { %v1315_v3 = vpop.f32.mrb[12].mxu0 }
 0x365   :  { %1545 = vrot.lane.b32.xlu1 %v1315_v3, %s2000_s16  ;;  %v1731_v23 = vpop.f32.mrb[13].mxu0 }
 0x366   :  { %v1318_v12 = vpop.f32.mrb[14].mxu0 }
 0x367   :  { %1547 = vrot.lane.b32.xlu0 %v1318_v12, %s2000_s16  ;;  %v1732_v51 = vpop.f32.mrb[15].mxu0 }
 0x36d   :  { %v1496_v16 = vpop.f32.mrb[12].mxu1 }
 0x36e   :  { %1553 = vrot.lane.b32.xlu1 %v1496_v16, %s2001_s17  ;;  %v1737_v43 = vpop.f32.mrb[13].mxu1 }
 0x36f   :  { %v1499_v6 = vpop.f32.mrb[14].mxu1 }
 0x370   :  { %1555 = vrot.lane.b32.xlu0 %v1499_v6, %s2001_s17  ;;  %v1738_v48 = vpop.f32.mrb[15].mxu1 }
 0x37f   :  { %v1506_v29 = vpop.permute.xlu1 %1505 }
 0x380   :  { %v1560_v44 = vsel %vm1559_vm6, %v2758_v34, %v1506_v29 }
 0x381   :  { %v1508_v63 = vpop.permute.xlu0 %1507 }
 0x382   :  { %v1561_v11 = vsel %vm1559_vm6, %v2760_v39, %v1508_v63 }
 0x383   :  { %v1514_v54 = vpop.permute.xlu1 %1513 }
 0x384   :  { %v1563_v46 = vsel %vm1562_vm14, %v1560_v44, %v1514_v54 }
 0x385   :  { %v1516_v50 = vpop.permute.xlu0 %1515 }
 0x386   :  { %v1564_v55 = vsel %vm1562_vm14, %v1561_v11, %v1516_v50 }
 0x387   :  { %v1522_v49 = vpop.permute.xlu1 %1521 }
 0x388   :  { %v1565_v4 = vsel %vm157_vm11, %v1563_v46, %v1522_v49 }
 0x389   :  { %v1524_v47 = vpop.permute.xlu0 %1523 }
 0x38a   :  { %v1566_v57 = vsel %vm157_vm11, %v1564_v55, %v1524_v47 }
 0x3a8   :  { %v1530_v21 = vpop.permute.xlu1 %1529 }
 0x3a9   :  { %v1568_v9 = vsel %vm1567_vm15, %v1565_v4, %v1530_v21 }
 0x3aa   :  { %v1532_v27 = vpop.permute.xlu0 %1531 }
 0x3ab   :  { %v1569_v19 = vsel %vm1567_vm15, %v1566_v57, %v1532_v27 }
 0x3ac   :  { %v1538_v10 = vpop.permute.xlu1 %1537 }
 0x3ad   :  { %v1571_v30 = vsel %vm1570_vm7, %v1568_v9, %v1538_v10 }
 0x3ae   :  { %v1540_v22 = vpop.permute.xlu0 %1539 }
 0x3af   :  { %v1572_v26 = vsel %vm1570_vm7, %v1569_v19, %v1540_v22 }
 0x3d7   :  { %v1546_v59 = vpop.permute.xlu1 %1545 }
 0x3d8   :  { %v1574_v18 = vsel %vm1573_vm8, %v1571_v30, %v1546_v59 }
 0x3d9   :  { %v1548_v62 = vpop.permute.xlu0 %1547 }
 0x3da   :  { %v1575_v5 = vsel %vm1573_vm8, %v1572_v26, %v1548_v62 }
 0x3e0   :  { %v1554_v17 = vpop.permute.xlu1 %1553 }
 0x3e1   :  { %v1577_v14 = vsel %vm1576_vm9, %v1574_v18, %v1554_v17 }
 0x3e2   :  { %v1586_v24 = vadd.f32 %v1674_v15, %v1577_v14  ;;  %v1556_v38 = vpop.permute.xlu0 %1555 }
 0x3e3   :  { %v1578_v8 = vsel %vm1576_vm9, %v1575_v5, %v1556_v38 }
 0x3e4   :  { %v1587_v41 = vadd.f32 %v1674_v15, %v1578_v8  ;;  %v1589_v42 = vsel %vm1588_vm10, %v1586_v24, -inf }
 0x3e5   :  { %1590 = vmax.xlane.f32.xlu1 %v1589_v42 }
 0x3e6   :  { %v1593_v34 = vsel %vm1592_vm12, %v1587_v41, -inf }
 0x3e7   :  { %1594 = vmax.xlane.f32.xlu0 %v1593_v34 }
 0x472   :  { %v1591_v52 = vpop.xlane.xlu1 %1590 }
 0x473   :  { %v1596_v39 = vsub.f32 %v1586_v24, %v1591_v52 }
 0x474   :  { %v1595_v25 = vpop.xlane.xlu0 %1594 }
 0x475   :  { %v1598_v31 = vmul.f32 1.442695, %v1596_v39  ;;  %v1597_v60 = vsub.f32 %v1587_v41, %v1595_v25 }
 0x477   :  { %1907 = vpow2.f32 %v1598_v31  ;;  %v1600_v61 = vmul.f32 1.442695, %v1597_v60 }
 0x479   :  { %1909 = vpow2.f32 %v1600_v61 }
 0x481   :  { %v1908_v40 = vpop.eup %1907 }
 0x482   :  { %v1602_v13 = vsel %vm1588_vm10, %v1908_v40, 0.0 }
 0x483   :  { %v1910_v7 = vpop.eup %1909  ;;  %1603 = vadd.xlane.f32.xlu0 %v1602_v13 }
 0x484   :  { %v1605_v28 = vsel %vm1592_vm12, %v1910_v7, 0.0 }
 0x485   :  { %1606 = vadd.xlane.f32.xlu1 %v1605_v28 }
 0x510   :  { %v1604_v36 = vpop.xlane.xlu0 %1603 }
 0x511   :  { %1911 = vlog2.f32 %v1604_v36 }
 0x512   :  { %v1607_v37 = vpop.xlane.xlu1 %1606 }
 0x513   :  { %1913 = vlog2.f32 %v1607_v37 }
 0x51b   :  { %v1912_v35 = vpop.eup %1911 }
 0x51c   :  { %v1609_v32 = vmul.f32 0.6931472, %v1912_v35 }
 0x51d   :  { %v1914_v45 = vpop.eup %1913 }
 0x51e   :  { %v1612_v58 = vadd.f32 %v1609_v32, %v1591_v52  ;;  %v1611_v53 = vmul.f32 0.6931472, %v1914_v45 }
 0x520   :  { %v1614_v2 = vsub.f32 %v1586_v24, %v1612_v58  ;;  %v1613_v33 = vadd.f32 %v1611_v53, %v1595_v25 }
 0x522   :  { %1616 = vst.msk [vmem:[#allocation5] sm:$0xff] %vm1588_vm10, %v1614_v2  ;;  %v1615_v1 = vsub.f32 %v1587_v41, %v1613_v33 }
 0x524   :  { %1617 = vst.msk [vmem:[#allocation5 + $0x8] sm:$0xf] %vm1592_vm12, %v1615_v1 }
 0x525   :  { %1938 = shalt.err (!%p1935_p9)
}
 0x526   :  { %s1939_s23 = scalar_lea.hbm %s2796_s6, 256 }
 0x527   :  { %p1940_p10 = scmp.ne.s32.totalorder %s2796_s6, %s1939_s23  ;;  %p1943_p11 = scmp.lt.u32.totalorder %s1939_s23, %s2796_s6 }
 0x529   :  { %p1945_p12 = pnand %p1943_p11, %p1940_p10 }
 0x52b   :  { %1948 = shalt.err (!%p1945_p12)
}
 0x52c   :  { %s2003_s27 = smov 128  }
 0x52d   :  { %1629 = dma.vmem_to_hbm [thread:$0]  %s1624_s4, 256, %s2796_s6, [#allocation3], %s2003_s27, %s2003_s27, %s1996_s12  }
 0x52e   :  { %1951 = dma.done.wait [#allocation3], 256  }
 0x52f   :  { %1952 = vsyncadd [#allocation3], 4294967040 }
 0x530   :  { %1633 = vsyncpa [#allocation3], 1 }
 0x531   :  { %1634 = vsyncpa [#allocation4], 1 }

</bundles_post_ra>
